<compile_context>
chip_gen: v7x
topology: tpu7x:2x2x1
jax: 0.10.0
libtpu: 0.0.40
codegen_flags: <defaults>
</compile_context>

<pallas_src>
import functools

import jax
import jax.numpy as jnp
from jax import lax
from jax.experimental import pallas as pl
from jax.experimental.pallas import tpu as pltpu

NUM_CLASSES = 10
FC2_PAD = 128  # lane-dense fc2 output width (sliced back to NUM_CLASSES outside)


# ----------------------------------------------------------------------------
# Fused conv3x3(stride1,pad1) + bias + ReLU + 2x2 max-pool (one image per step)
# ----------------------------------------------------------------------------
def _conv3x3_relu_pool_kernel(xe_ref, xo_ref, w_ref, b_ref, o_ref,
                              *, H, Wo, Cin, Cout):
    """xe_ref/xo_ref: (1, H+2, Wo+1, Cin) bf16 -- even/odd columns of padded input.
    w_ref: (9, Cin, Cout) bf16, taps ordered 3*ky+kx.   b_ref: (1, Cout) f32.
    o_ref: (1, H//2, Wo, Cout) bf16 -- pooled NHWC output."""
    Ho = H // 2
    xe = xe_ref[0]                                   # (H+2, Wo+1, Cin)
    xo = xo_ref[0]

    acc_e = jnp.zeros((H * Wo, Cout), jnp.float32)   # conv out at even columns
    acc_o = jnp.zeros((H * Wo, Cout), jnp.float32)   # conv out at odd columns
    for ky in range(3):
        xe_k = xe[ky:ky + H]                         # (H, Wo+1, Cin)
        xo_k = xo[ky:ky + H]
        for kx in range(3):
            w_tap = w_ref[3 * ky + kx]               # (Cin, Cout)
            if kx == 0:    # even out col 2wo+0 -> xe[wo];  odd out col 2wo+1 -> xo[wo]
                pe, po = xe_k[:, 0:Wo, :], xo_k[:, 0:Wo, :]
            elif kx == 1:  # even -> col 2wo+1 -> xo[wo];   odd -> col 2wo+2 -> xe[wo+1]
                pe, po = xo_k[:, 0:Wo, :], xe_k[:, 1:Wo + 1, :]
            else:          # even -> col 2wo+2 -> xe[wo+1]; odd -> col 2wo+3 -> xo[wo+1]
                pe, po = xe_k[:, 1:Wo + 1, :], xo_k[:, 1:Wo + 1, :]
            acc_e += jnp.dot(pe.reshape(H * Wo, Cin), w_tap,
                             preferred_element_type=jnp.float32)
            acc_o += jnp.dot(po.reshape(H * Wo, Cin), w_tap,
                             preferred_element_type=jnp.float32)

    # 2x2 max-pool.  Bias-add and ReLU are monotone & identical per channel, so
    # pool(ReLU(conv+b)) == ReLU(max_pool(conv) + b).
    m = jnp.maximum(acc_e, acc_o)                    # horizontal pool, rows (h, wo)
    m = m.reshape(Ho, 2 * Wo, Cout)                  # tile-aligned sublane split
    pooled = jnp.maximum(m[:, :Wo, :], m[:, Wo:, :])  # vertical pool -> (Ho, Wo, Cout)
    out = jnp.maximum(pooled + b_ref[...], 0.0)
    o_ref[0] = out.astype(o_ref.dtype)


def conv3x3_relu_pool(x_nhwc, w9, b):
    """x_nhwc: (B, H, W, Cin) bf16 -> pooled (B, H//2, W//2, Cout) bf16 (NHWC)."""
    B, H, W, Cin = x_nhwc.shape
    Cout = w9.shape[-1]
    Ho, Wo = H // 2, W // 2
    Hp, We = H + 2, Wo + 1

    xp = jnp.pad(x_nhwc, ((0, 0), (1, 1), (1, 1), (0, 0)))
    x_ev = xp[:, :, 0::2, :]                         # (B, H+2, Wo+1, Cin)
    x_od = xp[:, :, 1::2, :]                         # (B, H+2, Wo+1, Cin)

    kernel = functools.partial(_conv3x3_relu_pool_kernel,
                               H=H, Wo=Wo, Cin=Cin, Cout=Cout)
    return pl.pallas_call(
        kernel,
        out_shape=jax.ShapeDtypeStruct((B, Ho, Wo, Cout), jnp.bfloat16),
        grid=(B,),
        in_specs=[
            pl.BlockSpec((1, Hp, We, Cin), lambda i: (i, 0, 0, 0)),
            pl.BlockSpec((1, Hp, We, Cin), lambda i: (i, 0, 0, 0)),
            pl.BlockSpec((9, Cin, Cout), lambda i: (0, 0, 0)),
            pl.BlockSpec((1, Cout), lambda i: (0, 0)),
        ],
        out_specs=pl.BlockSpec((1, Ho, Wo, Cout), lambda i: (i, 0, 0, 0)),
        compiler_params=pltpu.CompilerParams(dimension_semantics=("parallel",)),
    )(x_ev, x_od, w9, b.reshape(1, Cout))


# ----------------------------------------------------------------------------
# Fused fc1 + ReLU + fc2 (lane-dense 128-wide output, sliced to 10 outside)
# ----------------------------------------------------------------------------
def _fc_fused_kernel(x_ref, w1_ref, b1_ref, w2_ref, b2_ref, o_ref):
    h = jnp.dot(x_ref[...], w1_ref[...], preferred_element_type=jnp.float32)
    h = jnp.maximum(h + b1_ref[...], 0.0)
    out = jnp.dot(h.astype(jnp.bfloat16), w2_ref[...],
                  preferred_element_type=jnp.float32)
    o_ref[...] = out + b2_ref[...]


def fc1_relu_fc2(flat, w1, b1, w2p, b2p):
    """flat: (B, 4096) bf16; w1: (4096,128) bf16; w2p: (128,128) bf16 (zero-padded).
    Returns (B, 128) f32; the first NUM_CLASSES columns are the logits."""
    B = flat.shape[0]
    N = w2p.shape[1]
    vmem = lambda: pl.BlockSpec(memory_space=pltpu.MemorySpace.VMEM)
    return pl.pallas_call(
        _fc_fused_kernel,
        out_shape=jax.ShapeDtypeStruct((B, N), jnp.float32),
        in_specs=[vmem() for _ in range(5)],
        out_specs=vmem(),
    )(flat, w1, b1.reshape(1, -1), w2p, b2p.reshape(1, -1))


# ----------------------------------------------------------------------------
# Forward pass (matches the PyTorch CNN)
# ----------------------------------------------------------------------------
def cnn_forward(x_nchw, params):
    x = jnp.transpose(x_nchw, (0, 2, 3, 1)).astype(jnp.bfloat16)   # NCHW -> NHWC
    B = x.shape[0]

    y = conv3x3_relu_pool(x, params["w1"], params["b1"])   # (B, 16, 16, 32)
    y = conv3x3_relu_pool(y, params["w2"], params["b2"])   # (B,  8,  8, 64)

    # NHWC flatten; wfc1 rows were pre-permuted to this order (no transpose).
    flat = y.reshape(B, 8 * 8 * 64)
    logits128 = fc1_relu_fc2(flat, params["wfc1"], params["bfc1"],
                             params["wfc2"], params["bfc2"])        # (B, 128)
    return logits128[:, :NUM_CLASSES]


# ----------------------------------------------------------------------------
# Parameters (PyTorch-style init shapes, synthetic values)
# ----------------------------------------------------------------------------
def make_params(key):
    ks = jax.random.split(key, 8)

    def uniform(k, shape, fan_in):
        bound = 1.0 / jnp.sqrt(float(fan_in))
        return jax.random.uniform(k, shape, jnp.float32, -bound, bound)

    w1_pt = uniform(ks[0], (32, 3, 3, 3), 3 * 9)             # conv1 (OIHW)
    b1 = uniform(ks[1], (32,), 3 * 9)
    w2_pt = uniform(ks[2], (64, 32, 3, 3), 32 * 9)           # conv2 (OIHW)
    b2 = uniform(ks[3], (64,), 32 * 9)
    wfc1_pt = uniform(ks[4], (128, 64 * 8 * 8), 64 * 8 * 8)  # fc1 [out, in]
    bfc1 = uniform(ks[5], (128,), 64 * 8 * 8)
    wfc2_pt = uniform(ks[6], (NUM_CLASSES, 128), 128)        # fc2 [out, in]
    bfc2 = uniform(ks[7], (NUM_CLASSES,), 128)

    def conv_w(w_pt):  # (Cout, Cin, 3, 3) -> (9, Cin, Cout), taps ordered 3*ky+kx
        Cout, Cin = w_pt.shape[:2]
        return jnp.transpose(w_pt, (2, 3, 1, 0)).reshape(9, Cin, Cout).astype(jnp.bfloat16)

    # fc1: permute input dim from PyTorch (c, h, w) flatten order to NHWC (h, w, c).
    wfc1_nhwc = (wfc1_pt.reshape(128, 64, 8, 8)
                 .transpose(2, 3, 1, 0)
                 .reshape(64 * 8 * 8, 128)).astype(jnp.bfloat16)

    # fc2: pad output dim 10 -> 128 for a lane-dense store.
    wfc2_pad = jnp.zeros((128, FC2_PAD), jnp.float32).at[:, :NUM_CLASSES].set(wfc2_pt.T)
    bfc2_pad = jnp.zeros((FC2_PAD,), jnp.float32).at[:NUM_CLASSES].set(bfc2)

    return {
        "w1": conv_w(w1_pt), "b1": b1,
        "w2": conv_w(w2_pt), "b2": b2,
        "wfc1": wfc1_nhwc, "bfc1": bfc1,
        "wfc2": wfc2_pad.astype(jnp.bfloat16), "bfc2": bfc2_pad,
        # PyTorch-layout copies for the pure-f32 reference check
        "_w1_pt": w1_pt, "_w2_pt": w2_pt,
        "_wfc1_pt": wfc1_pt, "_wfc2_pt": wfc2_pt, "_bfc2_pt": bfc2,
    }


# Pure-JAX float32 reference (correctness sanity check for the Pallas path)
def reference_forward(x_nchw, p):
    def conv(x, w, b):
        y = lax.conv_general_dilated(
            x, w, window_strides=(1, 1), padding=((1, 1), (1, 1)),
            dimension_numbers=("NCHW", "OIHW", "NCHW"))
        return y + b.reshape(1, -1, 1, 1)

    def pool(x):
        return lax.reduce_window(x, -jnp.inf, lax.max,
                                 (1, 1, 2, 2), (1, 1, 2, 2), "VALID")

    x = pool(jax.nn.relu(conv(x_nchw, p["_w1_pt"], p["b1"])))
    x = pool(jax.nn.relu(conv(x, p["_w2_pt"], p["b2"])))
    x = x.reshape(x.shape[0], 64 * 8 * 8)
    x = jax.nn.relu(x @ p["_wfc1_pt"].T + p["bfc1"])
    return x @ p["_wfc2_pt"].T + p["_bfc2_pt"]


if __name__ == "__main__":
    key = jax.random.PRNGKey(0)
    k_x, k_p = jax.random.split(key)

    x = jax.random.normal(k_x, (2, 3, 32, 32), jnp.float32)   # NCHW, like PyTorch
    params = make_params(k_p)

    fwd = jax.jit(cnn_forward)
    out = jax.block_until_ready(fwd(x, params))
    assert out.shape == (2, NUM_CLASSES) and out.dtype == jnp.float32

    ref = jax.block_until_ready(reference_forward(x, params))
    # bf16 operands (f32 accumulation) vs. a pure-f32 reference -> ~1e-2 tolerance.
    max_err = float(jnp.max(jnp.abs(out - ref)))
    assert jnp.allclose(out, ref, rtol=3e-2, atol=3e-2), f"mismatch, max|diff|={max_err}"

    print("KERNEL_OK")
</pallas_src>

<mosaic_0001>
module attributes {stable_mosaic.version = 11 : i64} {
  func.func @_conv3x3_relu_pool_kernel(%arg0: i32, %arg1: memref<1x34x17x3xbf16, #tpu.memory_space<vmem>>, %arg2: memref<1x34x17x3xbf16, #tpu.memory_space<vmem>>, %arg3: memref<9x3x32xbf16, #tpu.memory_space<vmem>>, %arg4: memref<1x32xf32, #tpu.memory_space<vmem>>, %arg5: memref<1x16x16x32xbf16, #tpu.memory_space<vmem>>) attributes {dimension_semantics = [#tpu.dimension_semantics<parallel>], iteration_bounds = array<i64: 2>, scalar_prefetch = 0 : i64, scratch_operands = 0 : i64, tpu.core_type = #tpu.core_type<tc>, window_params = [{transform_indices = @transform_0, window_bounds = array<i64: 1, 34, 17, 3>}, {transform_indices = @transform_1, window_bounds = array<i64: 1, 34, 17, 3>}, {pipeline_mode = #tpu.pipeline_mode<synchronous>, transform_indices = @transform_2, window_bounds = array<i64: 9, 3, 32>}, {pipeline_mode = #tpu.pipeline_mode<synchronous>, transform_indices = @transform_3, window_bounds = array<i64: 1, 32>}, {transform_indices = @transform_4, window_bounds = array<i64: 1, 16, 16, 32>}]} {
    %c0 = arith.constant 0 : index
    %c0_0 = arith.constant 0 : index
    %c0_1 = arith.constant 0 : index
    %c0_2 = arith.constant 0 : index
    %0 = vector.load %arg1[%c0, %c0_0, %c0_1, %c0_2] : memref<1x34x17x3xbf16, #tpu.memory_space<vmem>>, vector<1x34x17x3xbf16>
    %1 = vector.shape_cast %0 : vector<1x34x17x3xbf16> to vector<34x17x3xbf16>
    %c0_3 = arith.constant 0 : index
    %c0_4 = arith.constant 0 : index
    %c0_5 = arith.constant 0 : index
    %c0_6 = arith.constant 0 : index
    %2 = vector.load %arg2[%c0_3, %c0_4, %c0_5, %c0_6] : memref<1x34x17x3xbf16, #tpu.memory_space<vmem>>, vector<1x34x17x3xbf16>
    %3 = vector.shape_cast %2 : vector<1x34x17x3xbf16> to vector<34x17x3xbf16>
    %cst = arith.constant 0.000000e+00 : f32
    %4 = vector.broadcast %cst : f32 to vector<512x32xf32>
    %cst_7 = arith.constant 0.000000e+00 : f32
    %5 = vector.broadcast %cst_7 : f32 to vector<512x32xf32>
    %6 = vector.extract_strided_slice %1 {offsets = [0, 0, 0], sizes = [32, 17, 3], strides = [1, 1, 1]} : vector<34x17x3xbf16> to vector<32x17x3xbf16>
    %7 = vector.extract_strided_slice %3 {offsets = [0, 0, 0], sizes = [32, 17, 3], strides = [1, 1, 1]} : vector<34x17x3xbf16> to vector<32x17x3xbf16>
    %c0_8 = arith.constant 0 : index
    %c0_9 = arith.constant 0 : index
    %c0_10 = arith.constant 0 : index
    %8 = vector.load %arg3[%c0_8, %c0_9, %c0_10] : memref<9x3x32xbf16, #tpu.memory_space<vmem>>, vector<1x3x32xbf16>
    %9 = vector.shape_cast %8 : vector<1x3x32xbf16> to vector<3x32xbf16>
    %10 = vector.extract_strided_slice %6 {offsets = [0, 0, 0], sizes = [32, 16, 3], strides = [1, 1, 1]} : vector<32x17x3xbf16> to vector<32x16x3xbf16>
    %11 = vector.extract_strided_slice %7 {offsets = [0, 0, 0], sizes = [32, 16, 3], strides = [1, 1, 1]} : vector<32x17x3xbf16> to vector<32x16x3xbf16>
    %12 = vector.shape_cast %10 : vector<32x16x3xbf16> to vector<512x3xbf16>
    %cst_11 = arith.constant dense<0.000000e+00> : vector<512x32xf32>
    %13 = tpu.matmul %12, %9, %cst_11 {dimension_numbers = #tpu.dot_dimension_numbers<[1], [0], [0], [1], [0, 0, 1, 1], [], []>} : vector<512x3xbf16>, vector<3x32xbf16>, vector<512x32xf32> -> vector<512x32xf32>
    %14 = arith.addf %4, %13 : vector<512x32xf32>
    %15 = vector.shape_cast %11 : vector<32x16x3xbf16> to vector<512x3xbf16>
    %cst_12 = arith.constant dense<0.000000e+00> : vector<512x32xf32>
    %16 = tpu.matmul %15, %9, %cst_12 {dimension_numbers = #tpu.dot_dimension_numbers<[1], [0], [0], [1], [0, 0, 1, 1], [], []>} : vector<512x3xbf16>, vector<3x32xbf16>, vector<512x32xf32> -> vector<512x32xf32>
    %17 = arith.addf %5, %16 : vector<512x32xf32>
    %c1 = arith.constant 1 : index
    %c0_13 = arith.constant 0 : index
    %c0_14 = arith.constant 0 : index
    %18 = vector.load %arg3[%c1, %c0_13, %c0_14] : memref<9x3x32xbf16, #tpu.memory_space<vmem>>, vector<1x3x32xbf16>
    %19 = vector.shape_cast %18 : vector<1x3x32xbf16> to vector<3x32xbf16>
    %20 = vector.extract_strided_slice %7 {offsets = [0, 0, 0], sizes = [32, 16, 3], strides = [1, 1, 1]} : vector<32x17x3xbf16> to vector<32x16x3xbf16>
    %21 = vector.extract_strided_slice %6 {offsets = [0, 1, 0], sizes = [32, 16, 3], strides = [1, 1, 1]} : vector<32x17x3xbf16> to vector<32x16x3xbf16>
    %22 = vector.shape_cast %20 : vector<32x16x3xbf16> to vector<512x3xbf16>
    %cst_15 = arith.constant dense<0.000000e+00> : vector<512x32xf32>
    %23 = tpu.matmul %22, %19, %cst_15 {dimension_numbers = #tpu.dot_dimension_numbers<[1], [0], [0], [1], [0, 0, 1, 1], [], []>} : vector<512x3xbf16>, vector<3x32xbf16>, vector<512x32xf32> -> vector<512x32xf32>
    %24 = arith.addf %14, %23 : vector<512x32xf32>
    %25 = vector.shape_cast %21 : vector<32x16x3xbf16> to vector<512x3xbf16>
    %cst_16 = arith.constant dense<0.000000e+00> : vector<512x32xf32>
    %26 = tpu.matmul %25, %19, %cst_16 {dimension_numbers = #tpu.dot_dimension_numbers<[1], [0], [0], [1], [0, 0, 1, 1], [], []>} : vector<512x3xbf16>, vector<3x32xbf16>, vector<512x32xf32> -> vector<512x32xf32>
    %27 = arith.addf %17, %26 : vector<512x32xf32>
    %c2 = arith.constant 2 : index
    %c0_17 = arith.constant 0 : index
    %c0_18 = arith.constant 0 : index
    %28 = vector.load %arg3[%c2, %c0_17, %c0_18] : memref<9x3x32xbf16, #tpu.memory_space<vmem>>, vector<1x3x32xbf16>
    %29 = vector.shape_cast %28 : vector<1x3x32xbf16> to vector<3x32xbf16>
    %30 = vector.extract_strided_slice %6 {offsets = [0, 1, 0], sizes = [32, 16, 3], strides = [1, 1, 1]} : vector<32x17x3xbf16> to vector<32x16x3xbf16>
    %31 = vector.extract_strided_slice %7 {offsets = [0, 1, 0], sizes = [32, 16, 3], strides = [1, 1, 1]} : vector<32x17x3xbf16> to vector<32x16x3xbf16>
    %32 = vector.shape_cast %30 : vector<32x16x3xbf16> to vector<512x3xbf16>
    %cst_19 = arith.constant dense<0.000000e+00> : vector<512x32xf32>
    %33 = tpu.matmul %32, %29, %cst_19 {dimension_numbers = #tpu.dot_dimension_numbers<[1], [0], [0], [1], [0, 0, 1, 1], [], []>} : vector<512x3xbf16>, vector<3x32xbf16>, vector<512x32xf32> -> vector<512x32xf32>
    %34 = arith.addf %24, %33 : vector<512x32xf32>
    %35 = vector.shape_cast %31 : vector<32x16x3xbf16> to vector<512x3xbf16>
    %cst_20 = arith.constant dense<0.000000e+00> : vector<512x32xf32>
    %36 = tpu.matmul %35, %29, %cst_20 {dimension_numbers = #tpu.dot_dimension_numbers<[1], [0], [0], [1], [0, 0, 1, 1], [], []>} : vector<512x3xbf16>, vector<3x32xbf16>, vector<512x32xf32> -> vector<512x32xf32>
    %37 = arith.addf %27, %36 : vector<512x32xf32>
    %38 = vector.extract_strided_slice %1 {offsets = [1, 0, 0], sizes = [32, 17, 3], strides = [1, 1, 1]} : vector<34x17x3xbf16> to vector<32x17x3xbf16>
    %39 = vector.extract_strided_slice %3 {offsets = [1, 0, 0], sizes = [32, 17, 3], strides = [1, 1, 1]} : vector<34x17x3xbf16> to vector<32x17x3xbf16>
    %c3 = arith.constant 3 : index
    %c0_21 = arith.constant 0 : index
    %c0_22 = arith.constant 0 : index
    %40 = vector.load %arg3[%c3, %c0_21, %c0_22] : memref<9x3x32xbf16, #tpu.memory_space<vmem>>, vector<1x3x32xbf16>
    %41 = vector.shape_cast %40 : vector<1x3x32xbf16> to vector<3x32xbf16>
    %42 = vector.extract_strided_slice %38 {offsets = [0, 0, 0], sizes = [32, 16, 3], strides = [1, 1, 1]} : vector<32x17x3xbf16> to vector<32x16x3xbf16>
    %43 = vector.extract_strided_slice %39 {offsets = [0, 0, 0], sizes = [32, 16, 3], strides = [1, 1, 1]} : vector<32x17x3xbf16> to vector<32x16x3xbf16>
    %44 = vector.shape_cast %42 : vector<32x16x3xbf16> to vector<512x3xbf16>
    %cst_23 = arith.constant dense<0.000000e+00> : vector<512x32xf32>
    %45 = tpu.matmul %44, %41, %cst_23 {dimension_numbers = #tpu.dot_dimension_numbers<[1], [0], [0], [1], [0, 0, 1, 1], [], []>} : vector<512x3xbf16>, vector<3x32xbf16>, vector<512x32xf32> -> vector<512x32xf32>
    %46 = arith.addf %34, %45 : vector<512x32xf32>
    %47 = vector.shape_cast %43 : vector<32x16x3xbf16> to vector<512x3xbf16>
    %cst_24 = arith.constant dense<0.000000e+00> : vector<512x32xf32>
    %48 = tpu.matmul %47, %41, %cst_24 {dimension_numbers = #tpu.dot_dimension_numbers<[1], [0], [0], [1], [0, 0, 1, 1], [], []>} : vector<512x3xbf16>, vector<3x32xbf16>, vector<512x32xf32> -> vector<512x32xf32>
    %49 = arith.addf %37, %48 : vector<512x32xf32>
    %c4 = arith.constant 4 : index
    %c0_25 = arith.constant 0 : index
    %c0_26 = arith.constant 0 : index
    %50 = vector.load %arg3[%c4, %c0_25, %c0_26] : memref<9x3x32xbf16, #tpu.memory_space<vmem>>, vector<1x3x32xbf16>
    %51 = vector.shape_cast %50 : vector<1x3x32xbf16> to vector<3x32xbf16>
    %52 = vector.extract_strided_slice %39 {offsets = [0, 0, 0], sizes = [32, 16, 3], strides = [1, 1, 1]} : vector<32x17x3xbf16> to vector<32x16x3xbf16>
    %53 = vector.extract_strided_slice %38 {offsets = [0, 1, 0], sizes = [32, 16, 3], strides = [1, 1, 1]} : vector<32x17x3xbf16> to vector<32x16x3xbf16>
    %54 = vector.shape_cast %52 : vector<32x16x3xbf16> to vector<512x3xbf16>
    %cst_27 = arith.constant dense<0.000000e+00> : vector<512x32xf32>
    %55 = tpu.matmul %54, %51, %cst_27 {dimension_numbers = #tpu.dot_dimension_numbers<[1], [0], [0], [1], [0, 0, 1, 1], [], []>} : vector<512x3xbf16>, vector<3x32xbf16>, vector<512x32xf32> -> vector<512x32xf32>
    %56 = arith.addf %46, %55 : vector<512x32xf32>
    %57 = vector.shape_cast %53 : vector<32x16x3xbf16> to vector<512x3xbf16>
    %cst_28 = arith.constant dense<0.000000e+00> : vector<512x32xf32>
    %58 = tpu.matmul %57, %51, %cst_28 {dimension_numbers = #tpu.dot_dimension_numbers<[1], [0], [0], [1], [0, 0, 1, 1], [], []>} : vector<512x3xbf16>, vector<3x32xbf16>, vector<512x32xf32> -> vector<512x32xf32>
    %59 = arith.addf %49, %58 : vector<512x32xf32>
    %c5 = arith.constant 5 : index
    %c0_29 = arith.constant 0 : index
    %c0_30 = arith.constant 0 : index
    %60 = vector.load %arg3[%c5, %c0_29, %c0_30] : memref<9x3x32xbf16, #tpu.memory_space<vmem>>, vector<1x3x32xbf16>
    %61 = vector.shape_cast %60 : vector<1x3x32xbf16> to vector<3x32xbf16>
    %62 = vector.extract_strided_slice %38 {offsets = [0, 1, 0], sizes = [32, 16, 3], strides = [1, 1, 1]} : vector<32x17x3xbf16> to vector<32x16x3xbf16>
    %63 = vector.extract_strided_slice %39 {offsets = [0, 1, 0], sizes = [32, 16, 3], strides = [1, 1, 1]} : vector<32x17x3xbf16> to vector<32x16x3xbf16>
    %64 = vector.shape_cast %62 : vector<32x16x3xbf16> to vector<512x3xbf16>
    %cst_31 = arith.constant dense<0.000000e+00> : vector<512x32xf32>
    %65 = tpu.matmul %64, %61, %cst_31 {dimension_numbers = #tpu.dot_dimension_numbers<[1], [0], [0], [1], [0, 0, 1, 1], [], []>} : vector<512x3xbf16>, vector<3x32xbf16>, vector<512x32xf32> -> vector<512x32xf32>
    %66 = arith.addf %56, %65 : vector<512x32xf32>
    %67 = vector.shape_cast %63 : vector<32x16x3xbf16> to vector<512x3xbf16>
    %cst_32 = arith.constant dense<0.000000e+00> : vector<512x32xf32>
    %68 = tpu.matmul %67, %61, %cst_32 {dimension_numbers = #tpu.dot_dimension_numbers<[1], [0], [0], [1], [0, 0, 1, 1], [], []>} : vector<512x3xbf16>, vector<3x32xbf16>, vector<512x32xf32> -> vector<512x32xf32>
    %69 = arith.addf %59, %68 : vector<512x32xf32>
    %70 = vector.extract_strided_slice %1 {offsets = [2, 0, 0], sizes = [32, 17, 3], strides = [1, 1, 1]} : vector<34x17x3xbf16> to vector<32x17x3xbf16>
    %71 = vector.extract_strided_slice %3 {offsets = [2, 0, 0], sizes = [32, 17, 3], strides = [1, 1, 1]} : vector<34x17x3xbf16> to vector<32x17x3xbf16>
    %c6 = arith.constant 6 : index
    %c0_33 = arith.constant 0 : index
    %c0_34 = arith.constant 0 : index
    %72 = vector.load %arg3[%c6, %c0_33, %c0_34] : memref<9x3x32xbf16, #tpu.memory_space<vmem>>, vector<1x3x32xbf16>
    %73 = vector.shape_cast %72 : vector<1x3x32xbf16> to vector<3x32xbf16>
    %74 = vector.extract_strided_slice %70 {offsets = [0, 0, 0], sizes = [32, 16, 3], strides = [1, 1, 1]} : vector<32x17x3xbf16> to vector<32x16x3xbf16>
    %75 = vector.extract_strided_slice %71 {offsets = [0, 0, 0], sizes = [32, 16, 3], strides = [1, 1, 1]} : vector<32x17x3xbf16> to vector<32x16x3xbf16>
    %76 = vector.shape_cast %74 : vector<32x16x3xbf16> to vector<512x3xbf16>
    %cst_35 = arith.constant dense<0.000000e+00> : vector<512x32xf32>
    %77 = tpu.matmul %76, %73, %cst_35 {dimension_numbers = #tpu.dot_dimension_numbers<[1], [0], [0], [1], [0, 0, 1, 1], [], []>} : vector<512x3xbf16>, vector<3x32xbf16>, vector<512x32xf32> -> vector<512x32xf32>
    %78 = arith.addf %66, %77 : vector<512x32xf32>
    %79 = vector.shape_cast %75 : vector<32x16x3xbf16> to vector<512x3xbf16>
    %cst_36 = arith.constant dense<0.000000e+00> : vector<512x32xf32>
    %80 = tpu.matmul %79, %73, %cst_36 {dimension_numbers = #tpu.dot_dimension_numbers<[1], [0], [0], [1], [0, 0, 1, 1], [], []>} : vector<512x3xbf16>, vector<3x32xbf16>, vector<512x32xf32> -> vector<512x32xf32>
    %81 = arith.addf %69, %80 : vector<512x32xf32>
    %c7 = arith.constant 7 : index
    %c0_37 = arith.constant 0 : index
    %c0_38 = arith.constant 0 : index
    %82 = vector.load %arg3[%c7, %c0_37, %c0_38] : memref<9x3x32xbf16, #tpu.memory_space<vmem>>, vector<1x3x32xbf16>
    %83 = vector.shape_cast %82 : vector<1x3x32xbf16> to vector<3x32xbf16>
    %84 = vector.extract_strided_slice %71 {offsets = [0, 0, 0], sizes = [32, 16, 3], strides = [1, 1, 1]} : vector<32x17x3xbf16> to vector<32x16x3xbf16>
    %85 = vector.extract_strided_slice %70 {offsets = [0, 1, 0], sizes = [32, 16, 3], strides = [1, 1, 1]} : vector<32x17x3xbf16> to vector<32x16x3xbf16>
    %86 = vector.shape_cast %84 : vector<32x16x3xbf16> to vector<512x3xbf16>
    %cst_39 = arith.constant dense<0.000000e+00> : vector<512x32xf32>
    %87 = tpu.matmul %86, %83, %cst_39 {dimension_numbers = #tpu.dot_dimension_numbers<[1], [0], [0], [1], [0, 0, 1, 1], [], []>} : vector<512x3xbf16>, vector<3x32xbf16>, vector<512x32xf32> -> vector<512x32xf32>
    %88 = arith.addf %78, %87 : vector<512x32xf32>
    %89 = vector.shape_cast %85 : vector<32x16x3xbf16> to vector<512x3xbf16>
    %cst_40 = arith.constant dense<0.000000e+00> : vector<512x32xf32>
    %90 = tpu.matmul %89, %83, %cst_40 {dimension_numbers = #tpu.dot_dimension_numbers<[1], [0], [0], [1], [0, 0, 1, 1], [], []>} : vector<512x3xbf16>, vector<3x32xbf16>, vector<512x32xf32> -> vector<512x32xf32>
    %91 = arith.addf %81, %90 : vector<512x32xf32>
    %c8 = arith.constant 8 : index
    %c0_41 = arith.constant 0 : index
    %c0_42 = arith.constant 0 : index
    %92 = vector.load %arg3[%c8, %c0_41, %c0_42] : memref<9x3x32xbf16, #tpu.memory_space<vmem>>, vector<1x3x32xbf16>
    %93 = vector.shape_cast %92 : vector<1x3x32xbf16> to vector<3x32xbf16>
    %94 = vector.extract_strided_slice %70 {offsets = [0, 1, 0], sizes = [32, 16, 3], strides = [1, 1, 1]} : vector<32x17x3xbf16> to vector<32x16x3xbf16>
    %95 = vector.extract_strided_slice %71 {offsets = [0, 1, 0], sizes = [32, 16, 3], strides = [1, 1, 1]} : vector<32x17x3xbf16> to vector<32x16x3xbf16>
    %96 = vector.shape_cast %94 : vector<32x16x3xbf16> to vector<512x3xbf16>
    %cst_43 = arith.constant dense<0.000000e+00> : vector<512x32xf32>
    %97 = tpu.matmul %96, %93, %cst_43 {dimension_numbers = #tpu.dot_dimension_numbers<[1], [0], [0], [1], [0, 0, 1, 1], [], []>} : vector<512x3xbf16>, vector<3x32xbf16>, vector<512x32xf32> -> vector<512x32xf32>
    %98 = arith.addf %88, %97 : vector<512x32xf32>
    %99 = vector.shape_cast %95 : vector<32x16x3xbf16> to vector<512x3xbf16>
    %cst_44 = arith.constant dense<0.000000e+00> : vector<512x32xf32>
    %100 = tpu.matmul %99, %93, %cst_44 {dimension_numbers = #tpu.dot_dimension_numbers<[1], [0], [0], [1], [0, 0, 1, 1], [], []>} : vector<512x3xbf16>, vector<3x32xbf16>, vector<512x32xf32> -> vector<512x32xf32>
    %101 = arith.addf %91, %100 : vector<512x32xf32>
    %102 = arith.maximumf %98, %101 : vector<512x32xf32>
    %103 = vector.shape_cast %102 : vector<512x32xf32> to vector<16x32x32xf32>
    %104 = vector.extract_strided_slice %103 {offsets = [0, 0, 0], sizes = [16, 16, 32], strides = [1, 1, 1]} : vector<16x32x32xf32> to vector<16x16x32xf32>
    %105 = vector.extract_strided_slice %103 {offsets = [0, 16, 0], sizes = [16, 16, 32], strides = [1, 1, 1]} : vector<16x32x32xf32> to vector<16x16x32xf32>
    %106 = arith.maximumf %104, %105 : vector<16x16x32xf32>
    %c0_45 = arith.constant 0 : index
    %c0_46 = arith.constant 0 : index
    %107 = vector.load %arg4[%c0_45, %c0_46] : memref<1x32xf32, #tpu.memory_space<vmem>>, vector<1x32xf32>
    %108 = vector.shape_cast %107 : vector<1x32xf32> to vector<1x1x32xf32>
    %109 = vector.broadcast %108 : vector<1x1x32xf32> to vector<16x16x32xf32>
    %110 = arith.addf %106, %109 : vector<16x16x32xf32>
    %cst_47 = arith.constant 0.000000e+00 : f32
    %111 = vector.broadcast %cst_47 : f32 to vector<16x16x32xf32>
    %112 = arith.maximumf %110, %111 : vector<16x16x32xf32>
    %113 = arith.truncf %112 : vector<16x16x32xf32> to vector<16x16x32xbf16>
    %c0_48 = arith.constant 0 : index
    %c0_49 = arith.constant 0 : index
    %c0_50 = arith.constant 0 : index
    %c0_51 = arith.constant 0 : index
    %114 = vector.load %arg5[%c0_48, %c0_49, %c0_50, %c0_51] : memref<1x16x16x32xbf16, #tpu.memory_space<vmem>>, vector<1x16x16x32xbf16>
    %115 = vector.shape_cast %114 : vector<1x16x16x32xbf16> to vector<16x16x32xbf16>
    %116 = vector.shape_cast %113 : vector<16x16x32xbf16> to vector<1x16x16x32xbf16>
    tpu.vector_store %arg5[%c0_48, %c0_49, %c0_50, %c0_51], %116 {strides = array<i32>} : memref<1x16x16x32xbf16, #tpu.memory_space<vmem>>, vector<1x16x16x32xbf16>,
    return
  }
  func.func @transform_0(%arg0: i32) -> (i32, i32, i32, i32) {
    %c0_i32 = arith.constant 0 : i32
    %c0_i32_0 = arith.constant 0 : i32
    %c0_i32_1 = arith.constant 0 : i32
    %c0_i32_2 = arith.constant 0 : i32
    return %arg0, %c0_i32, %c0_i32_0, %c0_i32_1 : i32, i32, i32, i32
  }
  func.func @transform_1(%arg0: i32) -> (i32, i32, i32, i32) {
    %c0_i32 = arith.constant 0 : i32
    %c0_i32_0 = arith.constant 0 : i32
    %c0_i32_1 = arith.constant 0 : i32
    %c0_i32_2 = arith.constant 0 : i32
    return %arg0, %c0_i32, %c0_i32_0, %c0_i32_1 : i32, i32, i32, i32
  }
  func.func @transform_2(%arg0: i32) -> (i32, i32, i32) {
    %c0_i32 = arith.constant 0 : i32
    %c0_i32_0 = arith.constant 0 : i32
    %c0_i32_1 = arith.constant 0 : i32
    %c0_i32_2 = arith.constant 0 : i32
    return %c0_i32, %c0_i32_0, %c0_i32_1 : i32, i32, i32
  }
  func.func @transform_3(%arg0: i32) -> (i32, i32) {
    %c0_i32 = arith.constant 0 : i32
    %c0_i32_0 = arith.constant 0 : i32
    %c0_i32_1 = arith.constant 0 : i32
    return %c0_i32, %c0_i32_0 : i32, i32
  }
  func.func @transform_4(%arg0: i32) -> (i32, i32, i32, i32) {
    %c0_i32 = arith.constant 0 : i32
    %c0_i32_0 = arith.constant 0 : i32
    %c0_i32_1 = arith.constant 0 : i32
    %c0_i32_2 = arith.constant 0 : i32
    return %arg0, %c0_i32, %c0_i32_0, %c0_i32_1 : i32, i32, i32, i32
  }
}

module attributes {stable_mosaic.version = 11 : i64} {
  func.func @_conv3x3_relu_pool_kernel(%arg0: i32, %arg1: memref<1x18x9x32xbf16, #tpu.memory_space<vmem>>, %arg2: memref<1x18x9x32xbf16, #tpu.memory_space<vmem>>, %arg3: memref<9x32x64xbf16, #tpu.memory_space<vmem>>, %arg4: memref<1x64xf32, #tpu.memory_space<vmem>>, %arg5: memref<1x8x8x64xbf16, #tpu.memory_space<vmem>>) attributes {dimension_semantics = [#tpu.dimension_semantics<parallel>], iteration_bounds = array<i64: 2>, scalar_prefetch = 0 : i64, scratch_operands = 0 : i64, tpu.core_type = #tpu.core_type<tc>, window_params = [{transform_indices = @transform_0, window_bounds = array<i64: 1, 18, 9, 32>}, {transform_indices = @transform_1, window_bounds = array<i64: 1, 18, 9, 32>}, {pipeline_mode = #tpu.pipeline_mode<synchronous>, transform_indices = @transform_2, window_bounds = array<i64: 9, 32, 64>}, {pipeline_mode = #tpu.pipeline_mode<synchronous>, transform_indices = @transform_3, window_bounds = array<i64: 1, 64>}, {transform_indices = @transform_4, window_bounds = array<i64: 1, 8, 8, 64>}]} {
    %c0 = arith.constant 0 : index
    %c0_0 = arith.constant 0 : index
    %c0_1 = arith.constant 0 : index
    %c0_2 = arith.constant 0 : index
    %0 = vector.load %arg1[%c0, %c0_0, %c0_1, %c0_2] : memref<1x18x9x32xbf16, #tpu.memory_space<vmem>>, vector<1x18x9x32xbf16>
    %1 = vector.shape_cast %0 : vector<1x18x9x32xbf16> to vector<18x9x32xbf16>
    %c0_3 = arith.constant 0 : index
    %c0_4 = arith.constant 0 : index
    %c0_5 = arith.constant 0 : index
    %c0_6 = arith.constant 0 : index
    %2 = vector.load %arg2[%c0_3, %c0_4, %c0_5, %c0_6] : memref<1x18x9x32xbf16, #tpu.memory_space<vmem>>, vector<1x18x9x32xbf16>
    %3 = vector.shape_cast %2 : vector<1x18x9x32xbf16> to vector<18x9x32xbf16>
    %cst = arith.constant 0.000000e+00 : f32
    %4 = vector.broadcast %cst : f32 to vector<128x64xf32>
    %cst_7 = arith.constant 0.000000e+00 : f32
    %5 = vector.broadcast %cst_7 : f32 to vector<128x64xf32>
    %6 = vector.extract_strided_slice %1 {offsets = [0, 0, 0], sizes = [16, 9, 32], strides = [1, 1, 1]} : vector<18x9x32xbf16> to vector<16x9x32xbf16>
    %7 = vector.extract_strided_slice %3 {offsets = [0, 0, 0], sizes = [16, 9, 32], strides = [1, 1, 1]} : vector<18x9x32xbf16> to vector<16x9x32xbf16>
    %c0_8 = arith.constant 0 : index
    %c0_9 = arith.constant 0 : index
    %c0_10 = arith.constant 0 : index
    %8 = vector.load %arg3[%c0_8, %c0_9, %c0_10] : memref<9x32x64xbf16, #tpu.memory_space<vmem>>, vector<1x32x64xbf16>
    %9 = vector.shape_cast %8 : vector<1x32x64xbf16> to vector<32x64xbf16>
    %10 = vector.extract_strided_slice %6 {offsets = [0, 0, 0], sizes = [16, 8, 32], strides = [1, 1, 1]} : vector<16x9x32xbf16> to vector<16x8x32xbf16>
    %11 = vector.extract_strided_slice %7 {offsets = [0, 0, 0], sizes = [16, 8, 32], strides = [1, 1, 1]} : vector<16x9x32xbf16> to vector<16x8x32xbf16>
    %12 = vector.shape_cast %10 : vector<16x8x32xbf16> to vector<128x32xbf16>
    %cst_11 = arith.constant dense<0.000000e+00> : vector<128x64xf32>
    %13 = tpu.matmul %12, %9, %cst_11 {dimension_numbers = #tpu.dot_dimension_numbers<[1], [0], [0], [1], [0, 0, 1, 1], [], []>} : vector<128x32xbf16>, vector<32x64xbf16>, vector<128x64xf32> -> vector<128x64xf32>
    %14 = arith.addf %4, %13 : vector<128x64xf32>
    %15 = vector.shape_cast %11 : vector<16x8x32xbf16> to vector<128x32xbf16>
    %cst_12 = arith.constant dense<0.000000e+00> : vector<128x64xf32>
    %16 = tpu.matmul %15, %9, %cst_12 {dimension_numbers = #tpu.dot_dimension_numbers<[1], [0], [0], [1], [0, 0, 1, 1], [], []>} : vector<128x32xbf16>, vector<32x64xbf16>, vector<128x64xf32> -> vector<128x64xf32>
    %17 = arith.addf %5, %16 : vector<128x64xf32>
    %c1 = arith.constant 1 : index
    %c0_13 = arith.constant 0 : index
    %c0_14 = arith.constant 0 : index
    %18 = vector.load %arg3[%c1, %c0_13, %c0_14] : memref<9x32x64xbf16, #tpu.memory_space<vmem>>, vector<1x32x64xbf16>
    %19 = vector.shape_cast %18 : vector<1x32x64xbf16> to vector<32x64xbf16>
    %20 = vector.extract_strided_slice %7 {offsets = [0, 0, 0], sizes = [16, 8, 32], strides = [1, 1, 1]} : vector<16x9x32xbf16> to vector<16x8x32xbf16>
    %21 = vector.extract_strided_slice %6 {offsets = [0, 1, 0], sizes = [16, 8, 32], strides = [1, 1, 1]} : vector<16x9x32xbf16> to vector<16x8x32xbf16>
    %22 = vector.shape_cast %20 : vector<16x8x32xbf16> to vector<128x32xbf16>
    %cst_15 = arith.constant dense<0.000000e+00> : vector<128x64xf32>
    %23 = tpu.matmul %22, %19, %cst_15 {dimension_numbers = #tpu.dot_dimension_numbers<[1], [0], [0], [1], [0, 0, 1, 1], [], []>} : vector<128x32xbf16>, vector<32x64xbf16>, vector<128x64xf32> -> vector<128x64xf32>
    %24 = arith.addf %14, %23 : vector<128x64xf32>
    %25 = vector.shape_cast %21 : vector<16x8x32xbf16> to vector<128x32xbf16>
    %cst_16 = arith.constant dense<0.000000e+00> : vector<128x64xf32>
    %26 = tpu.matmul %25, %19, %cst_16 {dimension_numbers = #tpu.dot_dimension_numbers<[1], [0], [0], [1], [0, 0, 1, 1], [], []>} : vector<128x32xbf16>, vector<32x64xbf16>, vector<128x64xf32> -> vector<128x64xf32>
    %27 = arith.addf %17, %26 : vector<128x64xf32>
    %c2 = arith.constant 2 : index
    %c0_17 = arith.constant 0 : index
    %c0_18 = arith.constant 0 : index
    %28 = vector.load %arg3[%c2, %c0_17, %c0_18] : memref<9x32x64xbf16, #tpu.memory_space<vmem>>, vector<1x32x64xbf16>
    %29 = vector.shape_cast %28 : vector<1x32x64xbf16> to vector<32x64xbf16>
    %30 = vector.extract_strided_slice %6 {offsets = [0, 1, 0], sizes = [16, 8, 32], strides = [1, 1, 1]} : vector<16x9x32xbf16> to vector<16x8x32xbf16>
    %31 = vector.extract_strided_slice %7 {offsets = [0, 1, 0], sizes = [16, 8, 32], strides = [1, 1, 1]} : vector<16x9x32xbf16> to vector<16x8x32xbf16>
    %32 = vector.shape_cast %30 : vector<16x8x32xbf16> to vector<128x32xbf16>
    %cst_19 = arith.constant dense<0.000000e+00> : vector<128x64xf32>
    %33 = tpu.matmul %32, %29, %cst_19 {dimension_numbers = #tpu.dot_dimension_numbers<[1], [0], [0], [1], [0, 0, 1, 1], [], []>} : vector<128x32xbf16>, vector<32x64xbf16>, vector<128x64xf32> -> vector<128x64xf32>
    %34 = arith.addf %24, %33 : vector<128x64xf32>
    %35 = vector.shape_cast %31 : vector<16x8x32xbf16> to vector<128x32xbf16>
    %cst_20 = arith.constant dense<0.000000e+00> : vector<128x64xf32>
    %36 = tpu.matmul %35, %29, %cst_20 {dimension_numbers = #tpu.dot_dimension_numbers<[1], [0], [0], [1], [0, 0, 1, 1], [], []>} : vector<128x32xbf16>, vector<32x64xbf16>, vector<128x64xf32> -> vector<128x64xf32>
    %37 = arith.addf %27, %36 : vector<128x64xf32>
    %38 = vector.extract_strided_slice %1 {offsets = [1, 0, 0], sizes = [16, 9, 32], strides = [1, 1, 1]} : vector<18x9x32xbf16> to vector<16x9x32xbf16>
    %39 = vector.extract_strided_slice %3 {offsets = [1, 0, 0], sizes = [16, 9, 32], strides = [1, 1, 1]} : vector<18x9x32xbf16> to vector<16x9x32xbf16>
    %c3 = arith.constant 3 : index
    %c0_21 = arith.constant 0 : index
    %c0_22 = arith.constant 0 : index
    %40 = vector.load %arg3[%c3, %c0_21, %c0_22] : memref<9x32x64xbf16, #tpu.memory_space<vmem>>, vector<1x32x64xbf16>
    %41 = vector.shape_cast %40 : vector<1x32x64xbf16> to vector<32x64xbf16>
    %42 = vector.extract_strided_slice %38 {offsets = [0, 0, 0], sizes = [16, 8, 32], strides = [1, 1, 1]} : vector<16x9x32xbf16> to vector<16x8x32xbf16>
    %43 = vector.extract_strided_slice %39 {offsets = [0, 0, 0], sizes = [16, 8, 32], strides = [1, 1, 1]} : vector<16x9x32xbf16> to vector<16x8x32xbf16>
    %44 = vector.shape_cast %42 : vector<16x8x32xbf16> to vector<128x32xbf16>
    %cst_23 = arith.constant dense<0.000000e+00> : vector<128x64xf32>
    %45 = tpu.matmul %44, %41, %cst_23 {dimension_numbers = #tpu.dot_dimension_numbers<[1], [0], [0], [1], [0, 0, 1, 1], [], []>} : vector<128x32xbf16>, vector<32x64xbf16>, vector<128x64xf32> -> vector<128x64xf32>
    %46 = arith.addf %34, %45 : vector<128x64xf32>
    %47 = vector.shape_cast %43 : vector<16x8x32xbf16> to vector<128x32xbf16>
    %cst_24 = arith.constant dense<0.000000e+00> : vector<128x64xf32>
    %48 = tpu.matmul %47, %41, %cst_24 {dimension_numbers = #tpu.dot_dimension_numbers<[1], [0], [0], [1], [0, 0, 1, 1], [], []>} : vector<128x32xbf16>, vector<32x64xbf16>, vector<128x64xf32> -> vector<128x64xf32>
    %49 = arith.addf %37, %48 : vector<128x64xf32>
    %c4 = arith.constant 4 : index
    %c0_25 = arith.constant 0 : index
    %c0_26 = arith.constant 0 : index
    %50 = vector.load %arg3[%c4, %c0_25, %c0_26] : memref<9x32x64xbf16, #tpu.memory_space<vmem>>, vector<1x32x64xbf16>
    %51 = vector.shape_cast %50 : vector<1x32x64xbf16> to vector<32x64xbf16>
    %52 = vector.extract_strided_slice %39 {offsets = [0, 0, 0], sizes = [16, 8, 32], strides = [1, 1, 1]} : vector<16x9x32xbf16> to vector<16x8x32xbf16>
    %53 = vector.extract_strided_slice %38 {offsets = [0, 1, 0], sizes = [16, 8, 32], strides = [1, 1, 1]} : vector<16x9x32xbf16> to vector<16x8x32xbf16>
    %54 = vector.shape_cast %52 : vector<16x8x32xbf16> to vector<128x32xbf16>
    %cst_27 = arith.constant dense<0.000000e+00> : vector<128x64xf32>
    %55 = tpu.matmul %54, %51, %cst_27 {dimension_numbers = #tpu.dot_dimension_numbers<[1], [0], [0], [1], [0, 0, 1, 1], [], []>} : vector<128x32xbf16>, vector<32x64xbf16>, vector<128x64xf32> -> vector<128x64xf32>
    %56 = arith.addf %46, %55 : vector<128x64xf32>
    %57 = vector.shape_cast %53 : vector<16x8x32xbf16> to vector<128x32xbf16>
    %cst_28 = arith.constant dense<0.000000e+00> : vector<128x64xf32>
    %58 = tpu.matmul %57, %51, %cst_28 {dimension_numbers = #tpu.dot_dimension_numbers<[1], [0], [0], [1], [0, 0, 1, 1], [], []>} : vector<128x32xbf16>, vector<32x64xbf16>, vector<128x64xf32> -> vector<128x64xf32>
    %59 = arith.addf %49, %58 : vector<128x64xf32>
    %c5 = arith.constant 5 : index
    %c0_29 = arith.constant 0 : index
    %c0_30 = arith.constant 0 : index
    %60 = vector.load %arg3[%c5, %c0_29, %c0_30] : memref<9x32x64xbf16, #tpu.memory_space<vmem>>, vector<1x32x64xbf16>
    %61 = vector.shape_cast %60 : vector<1x32x64xbf16> to vector<32x64xbf16>
    %62 = vector.extract_strided_slice %38 {offsets = [0, 1, 0], sizes = [16, 8, 32], strides = [1, 1, 1]} : vector<16x9x32xbf16> to vector<16x8x32xbf16>
    %63 = vector.extract_strided_slice %39 {offsets = [0, 1, 0], sizes = [16, 8, 32], strides = [1, 1, 1]} : vector<16x9x32xbf16> to vector<16x8x32xbf16>
    %64 = vector.shape_cast %62 : vector<16x8x32xbf16> to vector<128x32xbf16>
    %cst_31 = arith.constant dense<0.000000e+00> : vector<128x64xf32>
    %65 = tpu.matmul %64, %61, %cst_31 {dimension_numbers = #tpu.dot_dimension_numbers<[1], [0], [0], [1], [0, 0, 1, 1], [], []>} : vector<128x32xbf16>, vector<32x64xbf16>, vector<128x64xf32> -> vector<128x64xf32>
    %66 = arith.addf %56, %65 : vector<128x64xf32>
    %67 = vector.shape_cast %63 : vector<16x8x32xbf16> to vector<128x32xbf16>
    %cst_32 = arith.constant dense<0.000000e+00> : vector<128x64xf32>
    %68 = tpu.matmul %67, %61, %cst_32 {dimension_numbers = #tpu.dot_dimension_numbers<[1], [0], [0], [1], [0, 0, 1, 1], [], []>} : vector<128x32xbf16>, vector<32x64xbf16>, vector<128x64xf32> -> vector<128x64xf32>
    %69 = arith.addf %59, %68 : vector<128x64xf32>
    %70 = vector.extract_strided_slice %1 {offsets = [2, 0, 0], sizes = [16, 9, 32], strides = [1, 1, 1]} : vector<18x9x32xbf16> to vector<16x9x32xbf16>
    %71 = vector.extract_strided_slice %3 {offsets = [2, 0, 0], sizes = [16, 9, 32], strides = [1, 1, 1]} : vector<18x9x32xbf16> to vector<16x9x32xbf16>
    %c6 = arith.constant 6 : index
    %c0_33 = arith.constant 0 : index
    %c0_34 = arith.constant 0 : index
    %72 = vector.load %arg3[%c6, %c0_33, %c0_34] : memref<9x32x64xbf16, #tpu.memory_space<vmem>>, vector<1x32x64xbf16>
    %73 = vector.shape_cast %72 : vector<1x32x64xbf16> to vector<32x64xbf16>
    %74 = vector.extract_strided_slice %70 {offsets = [0, 0, 0], sizes = [16, 8, 32], strides = [1, 1, 1]} : vector<16x9x32xbf16> to vector<16x8x32xbf16>
    %75 = vector.extract_strided_slice %71 {offsets = [0, 0, 0], sizes = [16, 8, 32], strides = [1, 1, 1]} : vector<16x9x32xbf16> to vector<16x8x32xbf16>
    %76 = vector.shape_cast %74 : vector<16x8x32xbf16> to vector<128x32xbf16>
    %cst_35 = arith.constant dense<0.000000e+00> : vector<128x64xf32>
    %77 = tpu.matmul %76, %73, %cst_35 {dimension_numbers = #tpu.dot_dimension_numbers<[1], [0], [0], [1], [0, 0, 1, 1], [], []>} : vector<128x32xbf16>, vector<32x64xbf16>, vector<128x64xf32> -> vector<128x64xf32>
    %78 = arith.addf %66, %77 : vector<128x64xf32>
    %79 = vector.shape_cast %75 : vector<16x8x32xbf16> to vector<128x32xbf16>
    %cst_36 = arith.constant dense<0.000000e+00> : vector<128x64xf32>
    %80 = tpu.matmul %79, %73, %cst_36 {dimension_numbers = #tpu.dot_dimension_numbers<[1], [0], [0], [1], [0, 0, 1, 1], [], []>} : vector<128x32xbf16>, vector<32x64xbf16>, vector<128x64xf32> -> vector<128x64xf32>
    %81 = arith.addf %69, %80 : vector<128x64xf32>
    %c7 = arith.constant 7 : index
    %c0_37 = arith.constant 0 : index
    %c0_38 = arith.constant 0 : index
    %82 = vector.load %arg3[%c7, %c0_37, %c0_38] : memref<9x32x64xbf16, #tpu.memory_space<vmem>>, vector<1x32x64xbf16>
    %83 = vector.shape_cast %82 : vector<1x32x64xbf16> to vector<32x64xbf16>
    %84 = vector.extract_strided_slice %71 {offsets = [0, 0, 0], sizes = [16, 8, 32], strides = [1, 1, 1]} : vector<16x9x32xbf16> to vector<16x8x32xbf16>
    %85 = vector.extract_strided_slice %70 {offsets = [0, 1, 0], sizes = [16, 8, 32], strides = [1, 1, 1]} : vector<16x9x32xbf16> to vector<16x8x32xbf16>
    %86 = vector.shape_cast %84 : vector<16x8x32xbf16> to vector<128x32xbf16>
    %cst_39 = arith.constant dense<0.000000e+00> : vector<128x64xf32>
    %87 = tpu.matmul %86, %83, %cst_39 {dimension_numbers = #tpu.dot_dimension_numbers<[1], [0], [0], [1], [0, 0, 1, 1], [], []>} : vector<128x32xbf16>, vector<32x64xbf16>, vector<128x64xf32> -> vector<128x64xf32>
    %88 = arith.addf %78, %87 : vector<128x64xf32>
    %89 = vector.shape_cast %85 : vector<16x8x32xbf16> to vector<128x32xbf16>
    %cst_40 = arith.constant dense<0.000000e+00> : vector<128x64xf32>
    %90 = tpu.matmul %89, %83, %cst_40 {dimension_numbers = #tpu.dot_dimension_numbers<[1], [0], [0], [1], [0, 0, 1, 1], [], []>} : vector<128x32xbf16>, vector<32x64xbf16>, vector<128x64xf32> -> vector<128x64xf32>
    %91 = arith.addf %81, %90 : vector<128x64xf32>
    %c8 = arith.constant 8 : index
    %c0_41 = arith.constant 0 : index
    %c0_42 = arith.constant 0 : index
    %92 = vector.load %arg3[%c8, %c0_41, %c0_42] : memref<9x32x64xbf16, #tpu.memory_space<vmem>>, vector<1x32x64xbf16>
    %93 = vector.shape_cast %92 : vector<1x32x64xbf16> to vector<32x64xbf16>
    %94 = vector.extract_strided_slice %70 {offsets = [0, 1, 0], sizes = [16, 8, 32], strides = [1, 1, 1]} : vector<16x9x32xbf16> to vector<16x8x32xbf16>
    %95 = vector.extract_strided_slice %71 {offsets = [0, 1, 0], sizes = [16, 8, 32], strides = [1, 1, 1]} : vector<16x9x32xbf16> to vector<16x8x32xbf16>
    %96 = vector.shape_cast %94 : vector<16x8x32xbf16> to vector<128x32xbf16>
    %cst_43 = arith.constant dense<0.000000e+00> : vector<128x64xf32>
    %97 = tpu.matmul %96, %93, %cst_43 {dimension_numbers = #tpu.dot_dimension_numbers<[1], [0], [0], [1], [0, 0, 1, 1], [], []>} : vector<128x32xbf16>, vector<32x64xbf16>, vector<128x64xf32> -> vector<128x64xf32>
    %98 = arith.addf %88, %97 : vector<128x64xf32>
    %99 = vector.shape_cast %95 : vector<16x8x32xbf16> to vector<128x32xbf16>
    %cst_44 = arith.constant dense<0.000000e+00> : vector<128x64xf32>
    %100 = tpu.matmul %99, %93, %cst_44 {dimension_numbers = #tpu.dot_dimension_numbers<[1], [0], [0], [1], [0, 0, 1, 1], [], []>} : vector<128x32xbf16>, vector<32x64xbf16>, vector<128x64xf32> -> vector<128x64xf32>
    %101 = arith.addf %91, %100 : vector<128x64xf32>
    %102 = arith.maximumf %98, %101 : vector<128x64xf32>
    %103 = vector.shape_cast %102 : vector<128x64xf32> to vector<8x16x64xf32>
    %104 = vector.extract_strided_slice %103 {offsets = [0, 0, 0], sizes = [8, 8, 64], strides = [1, 1, 1]} : vector<8x16x64xf32> to vector<8x8x64xf32>
    %105 = vector.extract_strided_slice %103 {offsets = [0, 8, 0], sizes = [8, 8, 64], strides = [1, 1, 1]} : vector<8x16x64xf32> to vector<8x8x64xf32>
    %106 = arith.maximumf %104, %105 : vector<8x8x64xf32>
    %c0_45 = arith.constant 0 : index
    %c0_46 = arith.constant 0 : index
    %107 = vector.load %arg4[%c0_45, %c0_46] : memref<1x64xf32, #tpu.memory_space<vmem>>, vector<1x64xf32>
    %108 = vector.shape_cast %107 : vector<1x64xf32> to vector<1x1x64xf32>
    %109 = vector.broadcast %108 : vector<1x1x64xf32> to vector<8x8x64xf32>
    %110 = arith.addf %106, %109 : vector<8x8x64xf32>
    %cst_47 = arith.constant 0.000000e+00 : f32
    %111 = vector.broadcast %cst_47 : f32 to vector<8x8x64xf32>
    %112 = arith.maximumf %110, %111 : vector<8x8x64xf32>
    %113 = arith.truncf %112 : vector<8x8x64xf32> to vector<8x8x64xbf16>
    %c0_48 = arith.constant 0 : index
    %c0_49 = arith.constant 0 : index
    %c0_50 = arith.constant 0 : index
    %c0_51 = arith.constant 0 : index
    %114 = vector.load %arg5[%c0_48, %c0_49, %c0_50, %c0_51] : memref<1x8x8x64xbf16, #tpu.memory_space<vmem>>, vector<1x8x8x64xbf16>
    %115 = vector.shape_cast %114 : vector<1x8x8x64xbf16> to vector<8x8x64xbf16>
    %116 = vector.shape_cast %113 : vector<8x8x64xbf16> to vector<1x8x8x64xbf16>
    tpu.vector_store %arg5[%c0_48, %c0_49, %c0_50, %c0_51], %116 {strides = array<i32>} : memref<1x8x8x64xbf16, #tpu.memory_space<vmem>>, vector<1x8x8x64xbf16>,
    return
  }
  func.func @transform_0(%arg0: i32) -> (i32, i32, i32, i32) {
    %c0_i32 = arith.constant 0 : i32
    %c0_i32_0 = arith.constant 0 : i32
    %c0_i32_1 = arith.constant 0 : i32
    %c0_i32_2 = arith.constant 0 : i32
    return %arg0, %c0_i32, %c0_i32_0, %c0_i32_1 : i32, i32, i32, i32
  }
  func.func @transform_1(%arg0: i32) -> (i32, i32, i32, i32) {
    %c0_i32 = arith.constant 0 : i32
    %c0_i32_0 = arith.constant 0 : i32
    %c0_i32_1 = arith.constant 0 : i32
    %c0_i32_2 = arith.constant 0 : i32
    return %arg0, %c0_i32, %c0_i32_0, %c0_i32_1 : i32, i32, i32, i32
  }
  func.func @transform_2(%arg0: i32) -> (i32, i32, i32) {
    %c0_i32 = arith.constant 0 : i32
    %c0_i32_0 = arith.constant 0 : i32
    %c0_i32_1 = arith.constant 0 : i32
    %c0_i32_2 = arith.constant 0 : i32
    return %c0_i32, %c0_i32_0, %c0_i32_1 : i32, i32, i32
  }
  func.func @transform_3(%arg0: i32) -> (i32, i32) {
    %c0_i32 = arith.constant 0 : i32
    %c0_i32_0 = arith.constant 0 : i32
    %c0_i32_1 = arith.constant 0 : i32
    return %c0_i32, %c0_i32_0 : i32, i32
  }
  func.func @transform_4(%arg0: i32) -> (i32, i32, i32, i32) {
    %c0_i32 = arith.constant 0 : i32
    %c0_i32_0 = arith.constant 0 : i32
    %c0_i32_1 = arith.constant 0 : i32
    %c0_i32_2 = arith.constant 0 : i32
    return %arg0, %c0_i32, %c0_i32_0, %c0_i32_1 : i32, i32, i32, i32
  }
}

module attributes {stable_mosaic.version = 11 : i64} {
  func.func @_fc_fused_kernel(%arg0: memref<2x4096xbf16, #tpu.memory_space<vmem>>, %arg1: memref<4096x128xbf16, #tpu.memory_space<vmem>>, %arg2: memref<1x128xf32, #tpu.memory_space<vmem>>, %arg3: memref<128x128xbf16, #tpu.memory_space<vmem>>, %arg4: memref<1x128xf32, #tpu.memory_space<vmem>>, %arg5: memref<2x128xf32, #tpu.memory_space<vmem>>) attributes {dimension_semantics = [], scalar_prefetch = 0 : i64, scratch_operands = 0 : i64, tpu.core_type = #tpu.core_type<tc>} {
    %c0 = arith.constant 0 : index
    %c0_0 = arith.constant 0 : index
    %0 = vector.load %arg0[%c0, %c0_0] : memref<2x4096xbf16, #tpu.memory_space<vmem>>, vector<2x4096xbf16>
    %c0_1 = arith.constant 0 : index
    %c0_2 = arith.constant 0 : index
    %1 = vector.load %arg1[%c0_1, %c0_2] : memref<4096x128xbf16, #tpu.memory_space<vmem>>, vector<4096x128xbf16>
    %cst = arith.constant dense<0.000000e+00> : vector<2x128xf32>
    %2 = tpu.matmul %0, %1, %cst {dimension_numbers = #tpu.dot_dimension_numbers<[1], [0], [0], [1], [0, 0, 1, 1], [], []>} : vector<2x4096xbf16>, vector<4096x128xbf16>, vector<2x128xf32> -> vector<2x128xf32>
    %c0_3 = arith.constant 0 : index
    %c0_4 = arith.constant 0 : index
    %3 = vector.load %arg2[%c0_3, %c0_4] : memref<1x128xf32, #tpu.memory_space<vmem>>, vector<1x128xf32>
    %4 = vector.broadcast %3 : vector<1x128xf32> to vector<2x128xf32>
    %5 = arith.addf %2, %4 : vector<2x128xf32>
    %cst_5 = arith.constant 0.000000e+00 : f32
    %6 = vector.broadcast %cst_5 : f32 to vector<2x128xf32>
    %7 = arith.maximumf %5, %6 : vector<2x128xf32>
    %8 = arith.truncf %7 : vector<2x128xf32> to vector<2x128xbf16>
    %c0_6 = arith.constant 0 : index
    %c0_7 = arith.constant 0 : index
    %9 = vector.load %arg3[%c0_6, %c0_7] : memref<128x128xbf16, #tpu.memory_space<vmem>>, vector<128x128xbf16>
    %cst_8 = arith.constant dense<0.000000e+00> : vector<2x128xf32>
    %10 = tpu.matmul %8, %9, %cst_8 {dimension_numbers = #tpu.dot_dimension_numbers<[1], [0], [0], [1], [0, 0, 1, 1], [], []>} : vector<2x128xbf16>, vector<128x128xbf16>, vector<2x128xf32> -> vector<2x128xf32>
    %c0_9 = arith.constant 0 : index
    %c0_10 = arith.constant 0 : index
    %11 = vector.load %arg4[%c0_9, %c0_10] : memref<1x128xf32, #tpu.memory_space<vmem>>, vector<1x128xf32>
    %12 = vector.broadcast %11 : vector<1x128xf32> to vector<2x128xf32>
    %13 = arith.addf %10, %12 : vector<2x128xf32>
    %c0_11 = arith.constant 0 : index
    %c0_12 = arith.constant 0 : index
    %14 = vector.load %arg5[%c0_11, %c0_12] : memref<2x128xf32, #tpu.memory_space<vmem>>, vector<2x128xf32>
    tpu.vector_store %arg5[%c0_11, %c0_12], %13 {strides = array<i32>} : memref<2x128xf32, #tpu.memory_space<vmem>>, vector<2x128xf32>,
    return
  }
}

</mosaic_0001>

<bundles_post_ra>
// kernel: cnn_forward.4
= control target key start
LH: loop header
LB: loop body
LE: loop exit
PB: predicated region body
PF: predicated region fallthrough
CT: control target
= control target key end

     0   :  { %s4600_s15 = smov 0   ;;  %s5698_s0 = inlined_call_operand.vmem [shape: bf16[2,18,9,32], index: 0, kind: input, shape index: {}]   ;;  %s5699_s1 = inlined_call_operand.vmem [shape: bf16[2,18,9,32], index: 1, kind: input, shape index: {}]   ;;  %s5700_s2 = inlined_call_operand.vmem [shape: bf16[9,32,64], index: 2, kind: input, shape index: {}]   ;;  %s5701_s3 = inlined_call_operand.vmem [shape: f32[1,64], index: 3, kind: input, shape index: {}]   ;;  %s5702_s4 = inlined_call_operand.vmem [shape: bf16[2,8,8,64], index: 4, kind: output, shape index: {}]  }
   0x1 LB: > { %s3432_s16 = sadd.s32 4294967295, %s4573_s15   ;;  %p3436_p0 = scmp.ge.s32.totalorder %s4573_s15, 1  ;;  %s4573_s15 = sphi %s4600_s15, %s14_s15  }
   0x2   : > { %p172_p1 = scmp.lt.s32.totalorder %s4573_s15, 3 }
   0x4   : > { %p173_p2 = pnand %p3436_p0, %p172_p1 }
   0x6   : > { %176 = sbr.rel (%p173_p2) target bundleno = 559 (0x22f), region = 36 }
   0xd   : > { %v4512_v0 = vld [vmem:[%s5700_s2 + $0x10] sm:$0xff]   ;;  %p203_p3 = scmp.lt.s32.totalorder %s3432_s16, 1  ;;  %v4513_v1 = vld [vmem:[%s5700_s2 + $0x18] sm:$0xff]   ;;  %v4620_v2 = vld [vmem:[%s5700_s2] sm:$0xff]   ;;  %vm352_vm0 = vcmask 261120   ;;  %vm3356_vm4 = vcmask 519168  }
   0xe   : > { %3887 = vmatprep.subr.bf16.mxu0 %v4512_v0  ;;  %3927 = vmatprep.subr.bf16.mxu1 %v4512_v0  ;;  %v4645_v16 = vld [vmem:[%s5700_s2 + $0x8] sm:$0xff]   ;;  %vm647_vm1 = vsmask.f32 3328  ;;  %vm648_vm2 = vsmask.f32 7440  ;;  %v4680_v34 = vld [vmem:[%s5700_s2 + $0x20] sm:$0xff]  }
   0xf   : > { %s5870_s16 = smov (!%p203_p3, %s3432_s16), 1  ;;  %3888 = vmatpush3.bf16.msra.mxu0 %v4512_v0  ;;  %3928 = vmatpush3.bf16.msra.mxu1 %v4512_v0  ;;  %vm4739_vm3 = vmor %vm647_vm1, %vm648_vm2 }
  0x10   : > { %3889 = vmatprep.subr.bf16.mxu0 %v4513_v1  ;;  %s4503_s21 = smul.u32 144, %s5870_s16  ;;  %3929 = vmatprep.subr.bf16.mxu1 %v4513_v1  ;;  %s3706_s12 = sshll.u32 %s5870_s16, 5 }
  0x11   : > { %s5669_s17 = scalar_lea.vmem %s5702_s4, %s3706_s12 }
  0x12   : > { %s4627_s26 = scalar_lea.vmem %s5699_s1, %s4503_s21  ;;  %s4659_s5 = scalar_lea.vmem %s5698_s0, %s4503_s21 }
  0x13   : > { %3890 = vmatpush3.bf16.msra.mxu0 %v4513_v1  ;;  %v255_v3 = vld [vmem:[%s4627_s26] sm:$0xf]  ;;  %v257_v4 = vld [vmem:[%s4627_s26 + $0x8] sm:$0xf]  ;;  %v259_v5 = vld [vmem:[%s4627_s26 + $0x10] sm:$0xf]  ;;  %3930 = vmatpush3.bf16.msra.mxu1 %v4513_v1 }
  0x14   : > { %v4632_v6 = vcombine.low %v255_v3, %v257_v4  ;;  %v1247_v7 = vshrl.u32 %v255_v3, 16  ;;  %v1250_v8 = vshll.u32 %v255_v3, 16  ;;  %v1261_v9 = vshrl.u32 %v257_v4, 16  ;;  %v261_v10 = vld [vmem:[%s4627_s26 + $0x18] sm:$0xf]  ;;  %3907 = vmatprep.subr.bf16.mxu0 %v4620_v2  ;;  %3947 = vmatprep.subr.bf16.mxu1 %v4620_v2 }
  0x15   : > { %v1264_v11 = vshll.u32 %v257_v4, 16  ;;  %v4637_v12 = vcombine.low %v259_v5, %v261_v10  ;;  %v1275_v13 = vshrl.u32 %v259_v5, 16  ;;  %v1278_v14 = vshll.u32 %v259_v5, 16  ;;  %v4640_v15 = vld [vmem:[%s4627_s26 + $0x20] sm:$0xf] }
  0x16   : > { %3891 = vmatprep.mubr.msk.bf16.mxu0 %vm352_vm0, %v4632_v6  ;;  %v1249_v17 = vrot.slane %v1247_v7, 4  ;;  %v1252_v18 = vrot.slane %v1250_v8, 5  ;;  %v1263_v19 = vrot.slane %v1261_v9, 4  ;;  %v1289_v20 = vshrl.u32 %v261_v10, 16  ;;  %v4650_v21 = vld [vmem:[%s4627_s26 + $0x28] sm:$0xf] }
  0x17   : > { %5751 = vst [vmem:[#allocation2_spill] sm:$0xff] %v4637_v12  ;;  %v1266_v22 = vrot.slane %v1264_v11, 5  ;;  %3892 = vmatmul.mubr.msk.bf16.vlgmr.msra.gmra.mrb[0].mxu0 %vm352_vm0, %v4637_v12  ;;  %v1277_v23 = vrot.slane %v1275_v13, 4  ;;  %v1280_v24 = vrot.slane %v1278_v14, 5  ;;  %v1292_v25 = vshll.u32 %v261_v10, 16 }
  0x18   : > { %v1253_v26 = vor.u32 %v1252_v18, %v1249_v17  ;;  %v4663_v27 = vcombine.low %v4640_v15, %v4650_v21  ;;  %v4666_v28 = vld [vmem:[%s4627_s26 + $0x30] sm:$0xf]  ;;  %v4669_v29 = vld [vmem:[%s4627_s26 + $0x38] sm:$0xf]  ;;  %3908 = vmatpush3.bf16.msra.mxu0 %v4620_v2  ;;  %v4672_v32 = vrot.slane %v1289_v20, 4  ;;  %v4687_v37 = vcombine.low %v261_v10, %v4640_v15 }
  0x19   : > { %5753 = vst [vmem:[#allocation4_spill] sm:$0xff] %v4666_v28  ;;  %5754 = vst [vmem:[#allocation5_spill] sm:$0xff] %v4669_v29  ;;  %v1267_v30 = vor.u32 %v1266_v22, %v1263_v19  ;;  %v1281_v31 = vor.u32 %v1280_v24, %v1277_v23  ;;  %v4674_v33 = vrot.slane %v1292_v25, 5  ;;  %3909 = vmatprep.subr.bf16.mxu0 %v4645_v16  ;;  %v4690_v38 = vld [vmem:[%s4659_s5] sm:$0xf] }
  0x1a   : > { %5752 = vst [vmem:[#allocation3_spill] sm:$0xff] %v4663_v27  ;;  %3895 = vmatprep.mubr.msk.bf16.mxu0 %vm352_vm0, %v4663_v27  ;;  %5755 = vst [vmem:[#allocation6_spill] sm:$0xff] %v4687_v37  ;;  %v220_v39 = vld [vmem:[%s4659_s5 + $0x4] sm:$0x1]  ;;  %v4693_v40 = vrot.slane %v1253_v26, 4  ;;  %v4699_v43 = vcombine.low %v4666_v28, %v4669_v29  ;;  %v651_v53 = vshrl.u32 %v4690_v38, 16 }
  0x1b   : > { %v4702_v44 = vld [vmem:[%s4659_s5 + $0x8] sm:$0xf]  ;;  %v4704_v45 = vrot.slane %v1267_v30, 4  ;;  %v4706_v46 = vrot.slane %v1281_v31, 4  ;;  %v222_v47 = vld [vmem:[%s4659_s5 + $0xc] sm:$0x1]  ;;  %v1295_v49 = vor.u32 %v4674_v33, %v4672_v32 }
  0x1c   : > { %5756 = vst [vmem:[#allocation7_spill] sm:$0xff] %v4693_v40  ;;  %v4710_v48 = vld [vmem:[%s4659_s5 + $0x10] sm:$0xf]  ;;  %3910 = vmatpush3.bf16.msra.mxu0 %v4645_v16  ;;  %v224_v52 = vld [vmem:[%s4659_s5 + $0x14] sm:$0x1]  ;;  %v654_v55 = vshll.u32 %v4690_v38, 16 }
  0x1d   : > { %5757 = vst [vmem:[#allocation8_spill] sm:$0xff] %v4704_v45  ;;  %5758 = vst [vmem:[#allocation9_spill] sm:$0xff] %v4706_v46  ;;  %3967 = vmatprep.subr.bf16.mxu0 %v4680_v34  ;;  %v4721_v54 = vld [vmem:[%s4659_s5 + $0x18] sm:$0xf]  ;;  %v660_v56 = vshll.u32 %v220_v39, 16  ;;  %v665_v57 = vshrl.u32 %v4702_v44, 16 }
  0x1e   : > { %5759 = vst [vmem:[#allocation10_spill] sm:$0xff] %v4721_v54  ;;  %v668_v58 = vshll.u32 %v4702_v44, 16  ;;  %v226_v59 = vld [vmem:[%s4659_s5 + $0x1c] sm:$0x1]  ;;  %v653_v60 = vrot.slane %v651_v53, 4  ;;  %v674_v61 = vshll.u32 %v222_v47, 16 }
  0x1f   : > { %3896 = vmatmul.mubr.msk.bf16.gmra.mrb[4].mxu0 %vm352_vm0, %v4699_v43  ;;  %v679_v62 = vshrl.u32 %v4710_v48, 16  ;;  %v682_v63 = vshll.u32 %v4710_v48, 16  ;;  %v4732_v0 = vld [vmem:[%s4659_s5 + $0x20] sm:$0xf]  ;;  %v656_v1 = vrot.slane %v654_v55, 5  ;;  %v662_v3 = vrot.slane %v660_v56, 5 }
  0x20   : > { %5760 = vst [vmem:[#allocation11_spill] sm:$0xff] %v4732_v0  ;;  %v667_v4 = vrot.slane %v665_v57, 4  ;;  %v670_v5 = vrot.slane %v668_v58, 5  ;;  %v676_v7 = vrot.slane %v674_v61, 5  ;;  %v688_v10 = vshll.u32 %v224_v52, 16 }
  0x21   : > { %v681_v8 = vrot.slane %v679_v62, 4  ;;  %v684_v9 = vrot.slane %v682_v63, 5  ;;  %v228_v11 = vld [vmem:[%s4659_s5 + $0x24] sm:$0x1]  ;;  %v657_v13 = vor.u32 %v656_v1, %v653_v60  ;;  %v693_v17 = vshrl.u32 %v4721_v54, 16 }
  0x22   : > { %v671_v14 = vor.u32 %v670_v5, %v667_v4  ;;  %v696_v18 = vshll.u32 %v4721_v54, 16  ;;  %v690_v22 = vrot.slane %v688_v10, 5  ;;  %v702_v23 = vshll.u32 %v226_v59, 16  ;;  %v4745_v25 = vld [vmem:[%s4627_s26 + $0x40] sm:$0xf] }
  0x23   : > { %v685_v20 = vor.u32 %v684_v9, %v681_v8  ;;  %v707_v24 = vshrl.u32 %v4732_v0, 16  ;;  %5763 = vst [vmem:[#allocation12_spill] sm:$0xff] %v4745_v25  ;;  %v658_v26 = vrot.slane %v657_v13, 4  ;;  %v695_v31 = vrot.slane %v693_v17, 4  ;;  %v4748_v33 = vld [vmem:[%s4627_s26 + $0x48] sm:$0xf] }
  0x24   : > { %v672_v30 = vrot.slane %v671_v14, 4  ;;  %v698_v32 = vrot.slane %v696_v18, 5  ;;  %v704_v47 = vrot.slane %v702_v23, 5  ;;  %v710_v53 = vshll.u32 %v4732_v0, 16  ;;  %v4764_v63 = vld [vmem:[%s4627_s26 + $0x50] sm:$0xf] }
  0x25   : > { %v686_v39 = vrot.slane %v685_v20, 4  ;;  %v709_v52 = vrot.slane %v707_v24, 4  ;;  %v663_v55 = vsel %vm4739_vm3, %v658_v26, %v662_v3  ;;  %v716_v58 = vshll.u32 %v228_v11, 16  ;;  %v4767_v1 = vld [vmem:[%s4627_s26 + $0x58] sm:$0xf] }
  0x26   : > { %v677_v56 = vsel %vm4739_vm3, %v672_v30, %v676_v7  ;;  %v699_v57 = vor.u32 %v698_v32, %v695_v31  ;;  %v712_v60 = vrot.slane %v710_v53, 5  ;;  %v4761_v62 = vcombine.low %v4745_v25, %v4748_v33  ;;  %v4774_v8 = vld [vmem:[%s4659_s5 + $0x28] sm:$0xf]  ;;  %v230_v13 = vld [vmem:[%s4659_s5 + $0x2c] sm:$0x1] }
  0x27   : > { %v691_v59 = vsel %vm4739_vm3, %v686_v39, %v690_v22  ;;  %v4757_v61 = vcombine.low %v663_v55, %v677_v56  ;;  %v4776_v9 = vrot.slane %v1295_v49, 4  ;;  %v718_v11 = vrot.slane %v716_v58, 5  ;;  %v4784_v14 = vld [vmem:[%s4659_s5 + $0x30] sm:$0xf]  ;;  %v232_v22 = vld [vmem:[%s4659_s5 + $0x34] sm:$0x1] }
  0x28   : > { %v700_v5 = vrot.slane %v699_v57, 4  ;;  %v4771_v7 = vcombine.low %v677_v56, %v691_v59  ;;  %v713_v10 = vor.u32 %v712_v60, %v709_v52  ;;  %3899 = vmatprep.mubr.msk.bf16.mxu0 %vm352_vm0, %v4761_v62  ;;  %v3463_v17 = vcombine.low %v4690_v38, %v4702_v44  ;;  %v4797_v23 = vld [vmem:[%s4659_s5 + $0x38] sm:$0xf]  ;;  %v234_v39 = vld [vmem:[%s4659_s5 + $0x3c] sm:$0x1] }
  0x29   : > { %3931 = vmatprep.mubr.msk.bf16.mxu1 %vm352_vm0, %v4757_v61  ;;  %v4793_v20 = vcombine.low %v4764_v63, %v4767_v1  ;;  %v4801_v24 = vcombine.low %v4710_v48, %v4721_v54  ;;  %v724_v52 = vshll.u32 %v4774_v8, 16  ;;  %v730_v53 = vshll.u32 %v230_v13, 16  ;;  %v4814_v56 = vld [vmem:[%s4627_s26 + $0x60] sm:$0xf]  ;;  %v236_v49 = vld [vmem:[%s4659_s5 + $0x44] sm:$0x1] }
  0x2a   : > { %5764 = vst [vmem:[#allocation13_spill] sm:$0xff] %v4771_v7  ;;  %v705_v18 = vsel %vm4739_vm3, %v700_v5, %v704_v47  ;;  %v714_v26 = vrot.slane %v713_v10, 4  ;;  %v721_v47 = vshrl.u32 %v4774_v8, 16  ;;  %v735_v55 = vshrl.u32 %v4784_v14, 16  ;;  %v4823_v5 = vld [vmem:[%s4627_s26 + $0x68] sm:$0xf] }
  0x2b   : > { %5765 = vst [vmem:[#allocation14_spill] sm:$0xff] %v4801_v24  ;;  %v4803_v30 = vcombine.low %v691_v59, %v705_v18  ;;  %3900 = vmatmul.mubr.msk.bf16.gmra.mrb[8].mxu0 %vm352_vm0, %v4793_v20  ;;  %v738_v58 = vshll.u32 %v4784_v14, 16  ;;  %v744_v59 = vshll.u32 %v232_v22, 16  ;;  %v749_v60 = vshrl.u32 %v4797_v23, 16  ;;  %v242_v41 = vld [vmem:[%s4659_s5 + $0x5c] sm:$0x1] }
  0x2c   : > { %v719_v57 = vsel %vm4739_vm3, %v714_v26, %v718_v11  ;;  %v723_v4 = vrot.slane %v721_v47, 4  ;;  %v726_v11 = vrot.slane %v724_v52, 5  ;;  %v732_v26 = vrot.slane %v730_v53, 5  ;;  %v4839_v47 = vld [vmem:[%s4627_s26 + $0x78] sm:$0xf] }
  0x2d   : > { %3932 = vmatmul.mubr.msk.bf16.vlgmr.msra.gmra.mrb[0].mxu1 %vm352_vm0, %v4803_v30  ;;  %v4825_v10 = vcombine.low %v705_v18, %v719_v57  ;;  %v737_v3 = vrot.slane %v735_v55, 4  ;;  %v740_v32 = vrot.slane %v738_v58, 5  ;;  %v751_v31 = vrot.slane %v749_v60, 4  ;;  %v278_v40 = vld [vmem:[%s4627_s26 + $0x5c] sm:$0x1] }
  0x2e   : > { %3948 = vmatpush3.bf16.msra.mxu1 %v4620_v2  ;;  %v727_v22 = vor.u32 %v726_v11, %v723_v4  ;;  %v752_v51 = vshll.u32 %v4797_v23, 16  ;;  %v758_v50 = vshll.u32 %v234_v39, 16  ;;  %v4833_v18 = vcombine.low %v4814_v56, %v4823_v5  ;;  %v4836_v2 = vld [vmem:[%s4627_s26 + $0x70] sm:$0xf]  ;;  %v4844_v4 = vld [vmem:[%s4659_s5 + $0x40] sm:$0xf] }
  0x2f   : > { %5766 = vst [vmem:[#allocation15_spill] sm:$0xff] %v4825_v10  ;;  %3949 = vmatprep.subr.bf16.mxu1 %v4645_v16  ;;  %v741_v55 = vor.u32 %v740_v32, %v737_v3  ;;  %v746_v58 = vrot.slane %v744_v59, 5  ;;  %v4856_v59 = vcombine.low %v4836_v2, %v4839_v47  ;;  %v238_v39 = vld [vmem:[%s4659_s5 + $0x4c] sm:$0x1]  ;;  %v4869_v32 = vld [vmem:[%s4659_s5 + $0x50] sm:$0xf] }
  0x30   : > { %5767 = vst [vmem:[#allocation16_spill] sm:$0xff] %v4833_v18  ;;  %v728_v11 = vrot.slane %v727_v22, 4  ;;  %v754_v13 = vrot.slane %v752_v51, 5  ;;  %3903 = vmatprep.mubr.msk.bf16.mxu0 %vm352_vm0, %v4833_v18  ;;  %v4859_v22 = vld [vmem:[%s4659_s5 + $0x48] sm:$0xf]  ;;  %v772_v3 = vshll.u32 %v236_v49, 16 }
  0x31   : > { %v742_v52 = vrot.slane %v741_v55, 4  ;;  %5768 = vst [vmem:[#allocation17_spill] sm:$0xff] %v4856_v59  ;;  %v760_v55 = vrot.slane %v758_v50, 5  ;;  %v766_v50 = vshll.u32 %v4844_v4, 16  ;;  %v780_v42 = vshll.u32 %v4859_v22, 16 }
  0x32   : > { %3950 = vmatpush3.bf16.msra.mxu1 %v4645_v16  ;;  %v4864_v51 = vsel %vm4739_vm3, %v728_v11, %v732_v26  ;;  %v755_v16 = vor.u32 %v754_v13, %v751_v31  ;;  %v763_v31 = vshrl.u32 %v4844_v4, 16  ;;  %v240_v13 = vld [vmem:[%s4659_s5 + $0x54] sm:$0x1]  ;;  %v4884_v26 = vld [vmem:[%s4659_s5 + $0x58] sm:$0xf]  ;;  %v786_v36 = vshll.u32 %v238_v39, 16 }
  0x33   : > { %3987 = vmatprep.subr.bf16.mxu1 %v4680_v34  ;;  %5769 = vst [vmem:[#allocation18_spill] sm:$0xff] %v4864_v51  ;;  %v4872_v60 = vcombine.low %v719_v57, %v4864_v51  ;;  %v4876_v53 = vsel %vm4739_vm3, %v742_v52, %v746_v58  ;;  %3904 = vmatmul.mubr.msk.bf16.gmra.mrb[12].mxu0 %vm352_vm0, %v4856_v59  ;;  %v777_v57 = vshrl.u32 %v4859_v22, 16  ;;  %v768_v58 = vrot.slane %v766_v50, 5 }
  0x34   : > { %5770 = vst [vmem:[#allocation19_spill] sm:$0xff] %v4876_v53  ;;  %v756_v11 = vrot.slane %v755_v16, 4  ;;  %3911 = vmatprep.mubr.msk.bf16.mxu0 %vm352_vm0, %v3463_v17  ;;  %v765_v52 = vrot.slane %v763_v31, 4  ;;  %v791_v35 = vshrl.u32 %v4869_v32, 16  ;;  %v4897_v16 = vld [vmem:[%s4659_s5 + $0x60] sm:$0xf] }
  0x35   : > { %3935 = vmatprep.mubr.msk.bf16.mxu1 %vm352_vm0, %v4872_v60  ;;  %v774_v10 = vrot.slane %v772_v3, 5  ;;  %v779_v7 = vrot.slane %v777_v57, 4  ;;  %v782_v38 = vrot.slane %v780_v42, 5  ;;  %v788_v31 = vrot.slane %v786_v36, 5  ;;  %v4912_v3 = vld [vmem:[%s5700_s2 + $0x28] sm:$0xff]  }
  0x36   : > { %v4901_v49 = vsel %vm4739_vm3, %v756_v11, %v760_v55  ;;  %v769_v37 = vor.u32 %v768_v58, %v765_v52  ;;  %v793_v50 = vrot.slane %v791_v35, 4  ;;  %v794_v54 = vshll.u32 %v4869_v32, 16  ;;  %v244_v55 = vld [vmem:[%s4659_s5 + $0x64] sm:$0x1]  ;;  %v4920_v58 = vld [vmem:[%s4659_s5 + $0x68] sm:$0xf] }
  0x37   : > { %5771 = vst [vmem:[#allocation20_spill] sm:$0xff] %v4901_v49  ;;  %v4905_v17 = vcombine.low %v4876_v53, %v4901_v49  ;;  %v783_v39 = vor.u32 %v782_v38, %v779_v7  ;;  %v800_v59 = vshll.u32 %v240_v13, 16  ;;  %v805_v51 = vshrl.u32 %v4884_v26, 16  ;;  %v4935_v53 = vld [vmem:[%s4659_s5 + $0x70] sm:$0xf] }
  0x38   : > { %v770_v42 = vrot.slane %v769_v37, 4  ;;  %v808_v36 = vshll.u32 %v4884_v26, 16  ;;  %v814_v35 = vshll.u32 %v242_v41, 16  ;;  %v819_v7 = vshrl.u32 %v4897_v16, 16  ;;  %v246_v41 = vld [vmem:[%s4659_s5 + $0x6c] sm:$0x1] }
  0x39   : > { %5772 = vst [vmem:[#allocation21_spill] sm:$0xff] %v4905_v17  ;;  %3936 = vmatmul.mubr.msk.bf16.gmra.mrb[4].mxu1 %vm352_vm0, %v4905_v17  ;;  %v784_v13 = vrot.slane %v783_v39, 4  ;;  %v796_v11 = vrot.slane %v794_v54, 5  ;;  %v802_v57 = vrot.slane %v800_v59, 5  ;;  %v807_v52 = vrot.slane %v805_v51, 4 }
  0x3a   : > { %v4924_v38 = vsel %vm4739_vm3, %v770_v42, %v774_v10  ;;  %v810_v49 = vrot.slane %v808_v36, 5  ;;  %v816_v37 = vrot.slane %v814_v35, 5  ;;  %v821_v17 = vrot.slane %v819_v7, 4  ;;  %v4941_v10 = vld [vmem:[%s5700_s2 + $0x30] sm:$0xff]  }
  0x3b   : > { %5773 = vst [vmem:[#allocation22_spill] sm:$0xff] %v4924_v38  ;;  %3912 = vmatmul.mubr.msk.bf16.vlgmr.msra.gmra.mrb[0].mxu0 %vm352_vm0, %v4801_v24  ;;  %v4931_v39 = vsel %vm4739_vm3, %v784_v13, %v788_v31  ;;  %v797_v54 = vor.u32 %v796_v11, %v793_v50  ;;  %v822_v59 = vshll.u32 %v4897_v16, 16  ;;  %v828_v51 = vshll.u32 %v244_v55, 16  ;;  %v248_v35 = vld [vmem:[%s4659_s5 + $0x74] sm:$0x1] }
  0x3c   : > { %5774 = vst [vmem:[#allocation23_spill] sm:$0xff] %v4931_v39  ;;  %3968 = vmatpush3.bf16.msra.mxu0 %v4680_v34  ;;  %v4945_v42 = vcombine.low %v4924_v38, %v4931_v39  ;;  %v811_v31 = vor.u32 %v810_v49, %v807_v52  ;;  %v833_v50 = vshrl.u32 %v4920_v58, 16  ;;  %v836_v36 = vshll.u32 %v4920_v58, 16  ;;  %v4954_v38 = vld [vmem:[%s4659_s5 + $0x78] sm:$0xf] }
  0x3d   : > { %3969 = vmatprep.subr.bf16.mxu0 %v4912_v3  ;;  %v798_v55 = vrot.slane %v797_v54, 4  ;;  %v824_v7 = vrot.slane %v822_v59, 5  ;;  %v830_v13 = vrot.slane %v828_v51, 5  ;;  %v842_v11 = vshll.u32 %v246_v41, 16  ;;  %5776 = vst [vmem:[#allocation25_spill] sm:$0xff] %v4954_v38 }
  0x3e   : > { %5775 = vst [vmem:[#allocation24_spill] sm:$0xff] %v4945_v42  ;;  %3939 = vmatprep.mubr.msk.bf16.mxu1 %vm352_vm0, %v4945_v42  ;;  %v812_v24 = vrot.slane %v811_v31, 4  ;;  %v835_v46 = vrot.slane %v833_v50, 4  ;;  %v838_v39 = vrot.slane %v836_v36, 5  ;;  %v847_v49 = vshrl.u32 %v4935_v53, 16 }
  0x3f   : > { %v4959_v52 = vsel %vm4739_vm3, %v798_v55, %v802_v57  ;;  %v825_v45 = vor.u32 %v824_v7, %v821_v17  ;;  %v844_v18 = vrot.slane %v842_v11, 5  ;;  %v250_v54 = vld [vmem:[%s4659_s5 + $0x7c] sm:$0x1]  ;;  %v850_v59 = vshll.u32 %v4935_v53, 16 }
  0x40   : > { %3970 = vmatpush3.bf16.msra.mxu0 %v4912_v3  ;;  %v4966_v41 = vsel %vm4739_vm3, %v812_v24, %v816_v37  ;;  %v839_v51 = vor.u32 %v838_v39, %v835_v46  ;;  %v849_v31 = vrot.slane %v847_v49, 4  ;;  %v856_v50 = vshll.u32 %v248_v35, 16  ;;  %v262_v49 = vld [vmem:[%s4627_s26 + $0x1c] sm:$0x1] }
  0x41   : > { %4007 = vmatprep.subr.bf16.mxu0 %v4941_v10  ;;  %v4971_v57 = vcombine.low %v4959_v52, %v4966_v41  ;;  %v826_v17 = vrot.slane %v825_v45, 4  ;;  %v852_v36 = vrot.slane %v850_v59, 5  ;;  %v861_v55 = vshrl.u32 %v4954_v38, 16 }
  0x42   : > { %v840_v24 = vrot.slane %v839_v51, 4  ;;  %v864_v46 = vshll.u32 %v4954_v38, 16  ;;  %v870_v37 = vshll.u32 %v250_v54, 16  ;;  %v4984_v11 = vcombine.low %v4732_v0, %v4774_v8 }
  0x43   : > { %5777 = vst [vmem:[#allocation26_spill] sm:$0xff] %v4971_v57  ;;  %3940 = vmatmul.mubr.msk.bf16.gmra.mrb[8].mxu1 %vm352_vm0, %v4971_v57  ;;  %v4980_v39 = vsel %vm4739_vm3, %v826_v17, %v830_v13  ;;  %v853_v45 = vor.u32 %v852_v36, %v849_v31  ;;  %v863_v35 = vrot.slane %v861_v55, 4  ;;  %v858_v54 = vrot.slane %v856_v50, 5  ;;  %v256_v13 = vld [vmem:[%s4627_s26 + $0x4] sm:$0x1] }
  0x44   : > { %5778 = vst [vmem:[#allocation27_spill] sm:$0xff] %v4984_v11  ;;  %v4989_v59 = vsel %vm4739_vm3, %v840_v24, %v844_v18  ;;  %v866_v51 = vrot.slane %v864_v46, 5  ;;  %v4993_v7 = vcombine.low %v4784_v14, %v4797_v23  ;;  %v258_v17 = vld [vmem:[%s4627_s26 + $0xc] sm:$0x1]  ;;  %3915 = vmatprep.mubr.msk.bf16.mxu0 %vm352_vm0, %v4984_v11  ;;  %v5006_v18 = vcombine.low %v4844_v4, %v4859_v22  ;;  %v264_v50 = vld [vmem:[%s4627_s26 + $0x24] sm:$0x1] }
  0x45   : > { %5779 = vst [vmem:[#allocation28_spill] sm:$0xff] %v4989_v59  ;;  %v5000_v36 = vcombine.low %v4980_v39, %v4989_v59  ;;  %v854_v55 = vrot.slane %v853_v45, 4  ;;  %v872_v0 = vrot.slane %v870_v37, 5  ;;  %v260_v45 = vld [vmem:[%s4627_s26 + $0x14] sm:$0x1]  ;;  %v1298_v11 = vshll.u32 %v262_v49, 16 }
  0x46   : > { %5780 = vst [vmem:[#allocation29_spill] sm:$0xff] %v4993_v7  ;;  %5782 = vst [vmem:[#allocation31_spill] sm:$0xff] %v5006_v18  ;;  %v867_v46 = vor.u32 %v866_v51, %v863_v35  ;;  %3916 = vmatmul.mubr.msk.bf16.gmra.mrb[4].mxu0 %vm352_vm0, %v4993_v7  ;;  %v5783_v37 = vshrl.u32 %v4640_v15, 16  ;;  %v5784_v51 = vshll.u32 %v4640_v15, 16  ;;  %v5028_v7 = vcombine.low %v4869_v32, %v4884_v26  ;;  %v276_v59 = vld [vmem:[%s4627_s26 + $0x54] sm:$0x1] }
  0x47   : > { %5781 = vst [vmem:[#allocation30_spill] sm:$0xff] %v5000_v36  ;;  %3943 = vmatprep.mubr.msk.bf16.mxu1 %vm352_vm0, %v5000_v36  ;;  %3919 = vmatprep.mubr.msk.bf16.mxu0 %vm352_vm0, %v5006_v18  ;;  %v5020_v57 = vsel %vm4739_vm3, %v854_v55, %v858_v54  ;;  %v1256_v18 = vshll.u32 %v256_v13, 16  ;;  %v1270_v36 = vshll.u32 %v258_v17, 16  ;;  %v1312_v49 = vshll.u32 %v264_v50, 16  ;;  %v266_v17 = vld [vmem:[%s4627_s26 + $0x2c] sm:$0x1] }
  0x48   : > { %v868_v24 = vrot.slane %v867_v46, 4  ;;  %v1305_v35 = vrot.slane %v5783_v37, 4  ;;  %v1308_v31 = vrot.slane %v5784_v51, 5  ;;  %5785 = vst [vmem:[#allocation32_spill] sm:$0xff] %v5028_v7  ;;  %v1284_v55 = vshll.u32 %v260_v45, 16 }
  0x49   : > { %v1300_v46 = vrot.slane %v1298_v11, 5  ;;  %v5040_v37 = vcombine.low %v4897_v16, %v4920_v58  ;;  %v1314_v13 = vrot.slane %v1312_v49, 5  ;;  %v5053_v11 = vrot.slane %v1256_v18, 5 }
  0x4a   : > { %v5032_v54 = vsel %vm4739_vm3, %v868_v24, %v872_v0  ;;  %v1309_v42 = vor.u32 %v1308_v31, %v1305_v35  ;;  %v5046_v0 = vld [vmem:[%s4627_s26 + $0x34] sm:$0x1]  ;;  %v272_v24 = vld [vmem:[%s4627_s26 + $0x44] sm:$0x1]  ;;  %v5071_v45 = vrot.slane %v1270_v36, 5  ;;  %v5073_v18 = vrot.slane %v1284_v55, 5 }
  0x4b   : > { %5786 = vst [vmem:[#allocation33_spill] sm:$0xff] %v5032_v54  ;;  %v5036_v15 = vcombine.low %v5020_v57, %v5032_v54  ;;  %5788 = vst [vmem:[#allocation35_spill] sm:$0xff] %v5040_v37  ;;  %v5793_v35 = vshrl.u32 %v4650_v21, 16  ;;  %v5795_v50 = vshrl.u32 %v4745_v25, 16  ;;  %v5796_v36 = vshrl.u32 %v4666_v28, 16 }
  0x4c   : > { %v1310_v51 = vrot.slane %v1309_v42, 4  ;;  %5789 = vst [vmem:[#allocation36_spill] sm:$0xff] %v5053_v11  ;;  %v5058_v42 = vsel %vm4739_vm3, %v4776_v9, %v1300_v46  ;;  %v5794_v46 = vshll.u32 %v4650_v21, 16  ;;  %v274_v54 = vld [vmem:[%s4627_s26 + $0x4c] sm:$0x1] }
  0x4d   : > { %5787 = vst [vmem:[#allocation34_spill] sm:$0xff] %v5036_v15  ;;  %3944 = vmatmul.mubr.msk.bf16.gmra.mrb[12].mxu1 %vm352_vm0, %v5036_v15  ;;  %5790 = vst [vmem:[#allocation37_spill] sm:$0xff] %v5058_v42  ;;  %v5079_v49 = vrot.slane %v5793_v35, 4  ;;  %v5089_v55 = vrot.slane %v5796_v36, 4  ;;  %v5798_v35 = vshll.u32 %v4745_v25, 16  ;;  %v5799_v36 = vshrl.u32 %v4748_v33, 16 }
  0x4e   : > { %3951 = vmatprep.mubr.msk.bf16.mxu1 %vm352_vm0, %v4632_v6  ;;  %3920 = vmatmul.mubr.msk.bf16.gmra.mrb[8].mxu0 %vm352_vm0, %v5028_v7  ;;  %v5062_v31 = vsel %vm4739_vm3, %v1310_v51, %v1314_v13  ;;  %v5069_v6 = vcombine.low %v4935_v53, %v4954_v38  ;;  %v5083_v51 = vrot.slane %v5794_v46, 5  ;;  %v1326_v13 = vshll.u32 %v266_v17, 16 }
  0x4f   : > { %5791 = vst [vmem:[#allocation38_spill] sm:$0xff] %v5062_v31  ;;  %3923 = vmatprep.mubr.msk.bf16.mxu0 %vm352_vm0, %v5040_v37  ;;  %v1361_v37 = vrot.slane %v5795_v50, 4  ;;  %v5797_v7 = vshll.u32 %v4666_v28, 16  ;;  %v1364_v21 = vrot.slane %v5798_v35, 5  ;;  %v1368_v46 = vshll.u32 %v272_v24, 16 }
  0x50   : > { %5792 = vst [vmem:[#allocation39_spill] sm:$0xff] %v5069_v6  ;;  %v1375_v38 = vrot.slane %v5799_v36, 4  ;;  %v5800_v28 = vshll.u32 %v4748_v33, 16  ;;  %v5801_v15 = vshrl.u32 %v4669_v29, 16  ;;  %v5802_v35 = vshll.u32 %v4669_v29, 16 }
  0x51   : > { %v5093_v9 = vrot.slane %v5797_v7, 5  ;;  %v1365_v25 = vor.u32 %v1364_v21, %v1361_v37  ;;  %v1370_v42 = vrot.slane %v1368_v46, 5  ;;  %v5118_v50 = vrot.slane %v1326_v13, 5  ;;  %v286_v29 = vld [vmem:[%s4627_s26 + $0x7c] sm:$0x1] }
  0x52   : > { %v1378_v7 = vrot.slane %v5800_v28, 5  ;;  %v5109_v31 = vrot.slane %v5801_v15, 4  ;;  %v5113_v24 = vrot.slane %v5802_v35, 5  ;;  %v1382_v11 = vshll.u32 %v274_v54, 16 }
  0x53   : > { %v1366_v15 = vrot.slane %v1365_v25, 4  ;;  %v5803_v37 = vshrl.u32 %v4764_v63, 16  ;;  %v5804_v46 = vshll.u32 %v4764_v63, 16  ;;  %v1396_v13 = vshll.u32 %v276_v59, 16 }
  0x54   : > { %v1379_v36 = vor.u32 %v1378_v7, %v1375_v38  ;;  %v1384_v54 = vrot.slane %v1382_v11, 5  ;;  %v5805_v7 = vshrl.u32 %v4767_v1, 16  ;;  %v1410_v17 = vshll.u32 %v278_v40, 16 }
  0x55   : > { %3952 = vmatmul.mubr.msk.bf16.vlgmr.msra.gmra.mrb[0].mxu1 %vm352_vm0, %v4637_v12  ;;  %v1389_v21 = vrot.slane %v5803_v37, 4  ;;  %v1392_v35 = vrot.slane %v5804_v46, 5  ;;  %v5139_v25 = vsel %vm4739_vm3, %v1366_v15, %v1370_v42  ;;  %v5806_v37 = vshll.u32 %v4767_v1, 16  ;;  %v282_v42 = vld [vmem:[%s4627_s26 + $0x6c] sm:$0x1] }
  0x56   : > { %3988 = vmatpush3.bf16.msra.mxu1 %v4680_v34  ;;  %3955 = vmatprep.mubr.msk.bf16.mxu1 %vm352_vm0, %v4663_v27  ;;  %v1380_v38 = vrot.slane %v1379_v36, 4  ;;  %v1403_v28 = vrot.slane %v5805_v7, 4  ;;  %v280_v36 = vld [vmem:[%s4627_s26 + $0x64] sm:$0x1]  ;;  %v1398_v11 = vrot.slane %v1396_v13, 5  ;;  %v5807_v15 = vshrl.u32 %v4814_v56, 16 }
  0x57   : > { %3924 = vmatmul.mubr.msk.bf16.gmra.mrb[12].mxu0 %vm352_vm0, %v5069_v6  ;;  %3989 = vmatprep.subr.bf16.mxu1 %v4912_v3  ;;  %v1393_v34 = vor.u32 %v1392_v35, %v1389_v21  ;;  %v1406_v46 = vrot.slane %v5806_v37, 5  ;;  %v1424_v13 = vshll.u32 %v280_v36, 16  ;;  %v5810_v7 = vshrl.u32 %v4823_v5, 16  ;;  %v284_v12 = vld [vmem:[%s4627_s26 + $0x74] sm:$0x1] }
  0x58   : > { %3971 = vmatprep.mubr.msk.bf16.mxu0 %vm352_vm0, %v4757_v61  ;;  %v5148_v59 = vsel %vm4739_vm3, %v1380_v38, %v1384_v54  ;;  %v1417_v21 = vrot.slane %v5807_v15, 4  ;;  %v1412_v61 = vrot.slane %v1410_v17, 5  ;;  %v5809_v38 = vshll.u32 %v4814_v56, 16 }
  0x59   : > { %v5157_v40 = vcombine.low %v5139_v25, %v5148_v59  ;;  %v1394_v35 = vrot.slane %v1393_v34, 4  ;;  %v1407_v37 = vor.u32 %v1406_v46, %v1403_v28  ;;  %v1431_v27 = vrot.slane %v5810_v7, 4 }
  0x5a   : > { %3990 = vmatpush3.bf16.msra.mxu1 %v4912_v3  ;;  %v1420_v54 = vrot.slane %v5809_v38, 5  ;;  %v5811_v15 = vshll.u32 %v4823_v5, 16  ;;  %v1351_v28 = vor.u32 %v5113_v24, %v5109_v31  ;;  %v1438_v34 = vshll.u32 %v282_v42, 16  ;;  %v5183_v31 = vld [vmem:[%s5700_s2 + $0x38] sm:$0xff]  }
  0x5b   : > { %5808 = vst [vmem:[#allocation40_spill] sm:$0xff] %v5157_v40  ;;  %4027 = vmatprep.subr.bf16.mxu1 %v4941_v10  ;;  %v5172_v3 = vsel %vm4739_vm3, %v1394_v35, %v1398_v11  ;;  %v1408_v17 = vrot.slane %v1407_v37, 4  ;;  %v1426_v36 = vrot.slane %v1424_v13, 5  ;;  %v5812_v7 = vshrl.u32 %v4836_v2, 16 }
  0x5c   : > { %v1434_v6 = vrot.slane %v5811_v15, 5  ;;  %v1421_v46 = vor.u32 %v1420_v54, %v1417_v21  ;;  %v270_v15 = vld [vmem:[%s4627_s26 + $0x3c] sm:$0x1]  ;;  %v1440_v11 = vrot.slane %v1438_v34, 5  ;;  %v1452_v42 = vshll.u32 %v284_v12, 16 }
  0x5d   : > { %v1445_v40 = vrot.slane %v5812_v7, 4  ;;  %3956 = vmatmul.mubr.msk.bf16.gmra.mrb[4].mxu1 %vm352_vm0, %v4699_v43  ;;  %v5187_v24 = vsel %vm4739_vm3, %v1408_v17, %v1412_v61  ;;  %v5814_v54 = vshrl.u32 %v4839_v47, 16  ;;  %v5815_v34 = vshll.u32 %v4839_v47, 16 }
  0x5e   : > { %v1435_v38 = vor.u32 %v1434_v6, %v1431_v27  ;;  %v5813_v27 = vshll.u32 %v4836_v2, 16  ;;  %3959 = vmatprep.mubr.msk.bf16.mxu1 %vm352_vm0, %v4761_v62  ;;  %v5195_v21 = vcombine.low %v5172_v3, %v5187_v24  ;;  %v1422_v35 = vrot.slane %v1421_v46, 4 }
  0x5f   : > { %v1459_v13 = vrot.slane %v5814_v54, 4  ;;  %3972 = vmatmul.mubr.msk.bf16.vlgmr.msra.gmra.mrb[0].mxu0 %vm352_vm0, %v4803_v30  ;;  %v1454_v17 = vrot.slane %v1452_v42, 5  ;;  %v1462_v12 = vrot.slane %v5815_v34, 5  ;;  %v1466_v7 = vshll.u32 %v286_v29, 16 }
  0x60   : > { %v1448_v6 = vrot.slane %v5813_v27, 5  ;;  %v1436_v37 = vrot.slane %v1435_v38, 4  ;;  %3975 = vmatprep.mubr.msk.bf16.mxu0 %vm352_vm0, %v4872_v60  ;;  %4008 = vmatpush3.bf16.msra.mxu0 %v4941_v10  ;;  %v1354_v27 = vshll.u32 %v270_v15, 16  ;;  %v5208_v46 = vsel %vm4739_vm3, %v1422_v35, %v1426_v36  ;;  %v5224_v36 = vld [vmem:[%s5700_s2 + $0x40] sm:$0xff]  }
  0x61   : > { %4009 = vmatprep.subr.bf16.mxu0 %v5183_v31  ;;  %v1463_v42 = vor.u32 %v1462_v12, %v1459_v13  ;;  %v1468_v15 = vrot.slane %v1466_v7, 5  ;;  %v3543_v54 = vcombine.low %v4859_v22, %v4869_v32  ;;  %v5817_v13 = vor.u32 %v5083_v51, %v5079_v49  ;;  %v5846_v32 = vld [vmem:[#allocation4_spill] sm:$0xff] }
  0x62   : > { %v1449_v61 = vor.u32 %v1448_v6, %v1445_v40  ;;  %v5212_v38 = vsel %vm4739_vm3, %v1436_v37, %v1440_v11  ;;  %v5816_v11 = vshll.u32 %v5046_v0, 16  ;;  %v5818_v12 = vor.u32 %v5093_v9, %v5089_v55 }
  0x63   : > { %v5219_v29 = vcombine.low %v5208_v46, %v5212_v38  ;;  %v1352_v37 = vrot.slane %v1351_v28, 4  ;;  %v1356_v40 = vrot.slane %v1354_v27, 5  ;;  %v3545_v34 = vcombine.low %v4920_v58, %v4935_v53  ;;  %v5819_v28 = vld [vmem:[#allocation16_spill] sm:$0xff]  ;;  %v4555_v58 = vld [vmem:[%s5700_s2 + $0x58] sm:$0xff]  }
  0x64   : > { %v1450_v6 = vrot.slane %v1449_v61, 4  ;;  %v1342_v35 = vrot.slane %v5816_v11, 5  ;;  %v1324_v61 = vrot.slane %v5817_v13, 4  ;;  %v1338_v7 = vrot.slane %v5818_v12, 4  ;;  %4010 = vmatpush3.bf16.msra.mxu0 %v5183_v31  ;;  %v5827_v13 = vld [vmem:[#allocation23_spill] sm:$0xff]  ;;  %v5849_v53 = vld [vmem:[#allocation12_spill] sm:$0xff] }
  0x65   : > { %v1464_v11 = vrot.slane %v1463_v42, 4  ;;  %v5249_v49 = vcombine.low %v4748_v33, %v4764_v63  ;;  %3960 = vmatmul.mubr.msk.bf16.gmra.mrb[8].mxu1 %vm352_vm0, %v4793_v20  ;;  %4047 = vmatprep.subr.bf16.mxu0 %v5224_v36  ;;  %v5260_v51 = vcombine.low %v4767_v1, %v4814_v56  ;;  %v5264_v55 = vcombine.low %v4823_v5, %v4836_v2  ;;  %v5820_v33 = vld [vmem:[#allocation8_spill] sm:$0xff]  ;;  %v5822_v56 = vld [vmem:[#allocation19_spill] sm:$0xff]  ;;  %v5823_v5 = vld [vmem:[#allocation18_spill] sm:$0xff] }
  0x66   : > { %v5242_v0 = vsel %vm4739_vm3, %v1450_v6, %v1454_v17  ;;  %3963 = vmatprep.mubr.msk.bf16.mxu1 %vm352_vm0, %v5819_v28  ;;  %v5272_v63 = vsel %vm4739_vm3, %v5820_v33, %v5071_v45  ;;  %v5821_v17 = vld [vmem:[#allocation9_spill] sm:$0xff]  ;;  %v5286_v2 = vcombine.low %v5823_v5, %v5822_v56  ;;  %v5825_v42 = vld [vmem:[#allocation22_spill] sm:$0xff]  ;;  %v5826_v45 = vld [vmem:[#allocation20_spill] sm:$0xff]  ;;  %v5296_v12 = vcombine.low %v5827_v13, %v4959_v52 }
  0x67   : > { %v5255_v9 = vsel %vm4739_vm3, %v1464_v11, %v1468_v15  ;;  %v5278_v27 = vsel %vm4739_vm3, %v5821_v17, %v5073_v18  ;;  %v5824_v6 = vld [vmem:[#allocation21_spill] sm:$0xff]  ;;  %v5292_v15 = vcombine.low %v5826_v45, %v5825_v42  ;;  %v5300_v18 = vcombine.low %v4966_v41, %v4980_v39  ;;  %v5828_v11 = vld [vmem:[#allocation28_spill] sm:$0xff]  ;;  %v5834_v13 = vld [vmem:[#allocation26_spill] sm:$0xff] }
  0x68   : > { %v5282_v1 = vcombine.low %v5242_v0, %v5255_v9  ;;  %3976 = vmatmul.mubr.msk.bf16.gmra.mrb[4].mxu0 %vm352_vm0, %v5824_v6  ;;  %v5304_v33 = vcombine.low %v5828_v11, %v5020_v57  ;;  %v5829_v17 = vld [vmem:[#allocation24_spill] sm:$0xff]  ;;  %v5311_v56 = vsel %vm4739_vm3, %v1324_v61, %v5118_v50  ;;  %v5315_v52 = vsel %vm4739_vm3, %v1338_v7, %v1342_v35  ;;  %v5833_v45 = vld [vmem:[#allocation17_spill] sm:$0xff]  ;;  %v5835_v11 = vld [vmem:[#allocation30_spill] sm:$0xff] }
  0x69   : > { %3979 = vmatprep.mubr.msk.bf16.mxu0 %vm352_vm0, %v5829_v17  ;;  %v5319_v41 = vsel %vm4739_vm3, %v1352_v37, %v1356_v40  ;;  %v3617_v57 = vcombine.low %v5272_v63, %v5278_v27  ;;  %v5830_v40 = vld [vmem:[#allocation7_spill] sm:$0xff]  ;;  %v5831_v37 = vld [vmem:[#allocation36_spill] sm:$0xff]  ;;  %v5836_v35 = vld [vmem:[#allocation37_spill] sm:$0xff] }
  0x6a   : > { %v5832_v61 = vsel %vm4739_vm3, %v5830_v40, %v5831_v37  ;;  %v5348_v50 = vcombine.low %v5278_v27, %v5836_v35  ;;  %v5837_v40 = vld [vmem:[#allocation38_spill] sm:$0xff]  ;;  %v5368_v42 = vcombine.low %v5315_v52, %v5319_v41 }
  0x6b   : > { %v3519_v7 = vcombine.low %v5832_v61, %v5272_v63  ;;  %v5352_v37 = vcombine.low %v5837_v40, %v5311_v56  ;;  %v5838_v61 = vld [vmem:[#allocation34_spill] sm:$0xff]  ;;  %v5855_v63 = vcombine.low %v5311_v56, %v5315_v52  ;;  %v4560_v56 = vld [vmem:[%s5700_s2 + $0x78] sm:$0xff]   ;;  %v5858_v52 = vcombine.low %v5148_v59, %v5172_v3 }
  0x6c   : > { %v5841_v5 = vld [vmem:[#allocation10_spill] sm:$0xff]  ;;  %v5861_v59 = vcombine.low %v5187_v24, %v5208_v46  ;;  %v5862_v3 = vcombine.low %v5212_v38, %v5242_v0  ;;  %v5866_v38 = vld [vmem:[#allocation35_spill] sm:$0xff] }
  0x6d   : > { %3964 = vmatmul.mubr.msk.bf16.gmra.mrb[12].mxu1 %vm352_vm0, %v5833_v45  ;;  %v5856_v27 = vld [vmem:[#allocation14_spill] sm:$0xff]  ;;  %v5867_v0 = vld [vmem:[#allocation39_spill] sm:$0xff] }
  0x6e   : > { %3991 = vmatprep.mubr.msk.bf16.mxu1 %vm352_vm0, %v3519_v7  ;;  %v5839_v7 = vcombine.low %v4702_v44, %v4710_v48  ;;  %v4550_v44 = vld [vmem:[%s5700_s2 + $0x48] sm:$0xff]   ;;  %v5842_v48 = vld [vmem:[#allocation40_spill] sm:$0xff]  ;;  %v5865_v46 = vld [vmem:[#allocation2_spill] sm:$0xff] }
  0x70   : > { %3980 = vmatmul.mubr.msk.bf16.gmra.mrb[8].mxu0 %vm352_vm0, %v5834_v13 }
  0x71   : > { %3983 = vmatprep.mubr.msk.bf16.mxu0 %vm352_vm0, %v5835_v11 }
  0x75   : > { %3992 = vmatmul.mubr.msk.bf16.vlgmr.msra.gmra.mrb[0].mxu1 %vm352_vm0, %v5348_v50 }
  0x76   : > { %4028 = vmatpush3.bf16.msra.mxu1 %v4941_v10  ;;  %3995 = vmatprep.mubr.msk.bf16.mxu1 %vm352_vm0, %v5352_v37  ;;  %v5840_v10 = vld [vmem:[#allocation11_spill] sm:$0xff] }
  0x77   : > { %4029 = vmatprep.subr.bf16.mxu1 %v5183_v31  ;;  %v3540_v39 = vcombine.low %v5841_v5, %v5840_v10  ;;  %v4554_v5 = vld [vmem:[%s5700_s2 + $0x50] sm:$0xff]   ;;  %v5845_v10 = vcombine.low %v4884_v26, %v4897_v16  ;;  %v5850_v26 = vld [vmem:[#allocation5_spill] sm:$0xff] }
  0x78   : > { %3984 = vmatmul.mubr.msk.bf16.gmra.mrb[12].mxu0 %vm352_vm0, %v5838_v61  ;;  %v3560_v16 = vcombine.low %v5850_v26, %v5849_v53 }
  0x79   : > { %4011 = vmatprep.mubr.msk.bf16.mxu0 %vm352_vm0, %v5839_v7 }
  0x7a   : > { %4030 = vmatpush3.bf16.msra.mxu1 %v5183_v31  ;;  %v5843_v31 = vcombine.low %v4774_v8, %v4784_v14  ;;  %v5844_v8 = vcombine.low %v4797_v23, %v4844_v4  ;;  %v4564_v14 = vld [vmem:[%s4627_s26 + $0x8] sm:$0xf]  ;;  %v5416_v23 = vld [vmem:[%s4659_s5 + $0x80] sm:$0xf] }
  0x7b   : > { %4067 = vmatprep.subr.bf16.mxu1 %v5224_v36  ;;  %v4566_v4 = vld [vmem:[%s4627_s26 + $0x28] sm:$0xf] }
  0x7c   : > { %v3559_v22 = vcombine.low %v4566_v4, %v5846_v32  ;;  %v4558_v32 = vld [vmem:[%s5700_s2 + $0x70] sm:$0xff]  }
  0x7d   : > { %3996 = vmatmul.mubr.msk.bf16.gmra.mrb[4].mxu1 %vm352_vm0, %v5368_v42 }
  0x7e   : > { %3999 = vmatprep.mubr.msk.bf16.mxu1 %vm352_vm0, %v5842_v48 }
  0x80   : > { %4012 = vmatmul.mubr.msk.bf16.vlgmr.msra.gmra.mrb[0].mxu0 %vm352_vm0, %v3540_v39  ;;  %v4565_v39 = vld [vmem:[%s4627_s26 + $0x10] sm:$0xf] }
  0x81   : > { %4015 = vmatprep.mubr.msk.bf16.mxu0 %vm352_vm0, %v5843_v31  ;;  %4048 = vmatpush3.bf16.msra.mxu0 %v5224_v36  ;;  %v3557_v7 = vcombine.low %v4564_v14, %v4565_v39  ;;  %v5851_v14 = vld [vmem:[#allocation13_spill] sm:$0xff]  ;;  %v5852_v39 = vld [vmem:[#allocation15_spill] sm:$0xff] }
  0x82   : > { %4049 = vmatprep.subr.bf16.mxu0 %v4550_v44 }
  0x85   : > { %4050 = vmatpush3.bf16.msra.mxu0 %v4550_v44  ;;  %4000 = vmatmul.mubr.msk.bf16.gmra.mrb[8].mxu1 %vm352_vm0, %v5195_v21 }
  0x86   : > { %4087 = vmatprep.subr.bf16.mxu0 %v4554_v5  ;;  %4003 = vmatprep.mubr.msk.bf16.mxu1 %vm352_vm0, %v5219_v29 }
  0x88   : > { %4016 = vmatmul.mubr.msk.bf16.gmra.mrb[4].mxu0 %vm352_vm0, %v5844_v8  ;;  %v5848_v8 = vld [vmem:[#allocation6_spill] sm:$0xff] }
  0x89   : > { %4019 = vmatprep.mubr.msk.bf16.mxu0 %vm352_vm0, %v3543_v54  ;;  %v5847_v54 = vld [vmem:[#allocation25_spill] sm:$0xff] }
  0x8a   : > { %v3546_v31 = vcombine.low %v5847_v54, %v5416_v23 }
  0x8d   : > { %4004 = vmatmul.mubr.msk.bf16.gmra.mrb[12].mxu1 %vm352_vm0, %v5282_v1 }
  0x8e   : > { %4031 = vmatprep.mubr.msk.bf16.mxu1 %vm352_vm0, %v3557_v7 }
  0x90   : > { %4020 = vmatmul.mubr.msk.bf16.gmra.mrb[8].mxu0 %vm352_vm0, %v5845_v10 }
  0x91   : > { %4023 = vmatprep.mubr.msk.bf16.mxu0 %vm352_vm0, %v3545_v34  ;;  %v5447_v34 = vld [vmem:[%s4627_s26 + $0x80] sm:$0xf] }
  0x92   : > { %v2366_v53 = vshll.u32 %v5447_v34, 16 }
  0x95   : > { %4032 = vmatmul.mubr.msk.bf16.vlgmr.msra.gmra.mrb[0].mxu1 %vm352_vm0, %v5848_v8 }
  0x96   : > { %4068 = vmatpush3.bf16.msra.mxu1 %v5224_v36  ;;  %4035 = vmatprep.mubr.msk.bf16.mxu1 %vm352_vm0, %v3559_v22  ;;  %v4556_v36 = vld [vmem:[%s5700_s2 + $0x60] sm:$0xff]  }
  0x97   : > { %4069 = vmatprep.subr.bf16.mxu1 %v4550_v44 }
  0x98   : > { %4024 = vmatmul.mubr.msk.bf16.gmra.mrb[12].mxu0 %vm352_vm0, %v3546_v31 }
  0x99   : > { %4051 = vmatprep.mubr.msk.bf16.mxu0 %vm352_vm0, %v3557_v7  ;;  %v2076_v7 = vshll.u32 %v5416_v23, 16 }
  0x9a   : > { %4070 = vmatpush3.bf16.msra.mxu1 %v4550_v44  ;;  %v3564_v44 = vcombine.low %v4839_v47, %v5447_v34 }
  0x9b   : > { %4107 = vmatprep.subr.bf16.mxu1 %v4554_v5 }
  0x9d   : > { %4036 = vmatmul.mubr.msk.bf16.gmra.mrb[4].mxu1 %vm352_vm0, %v3560_v16 }
  0x9e   : > { %4039 = vmatprep.mubr.msk.bf16.mxu1 %vm352_vm0, %v5249_v49 }
  0xa0   : > { %4052 = vmatmul.mubr.msk.bf16.vlgmr.msra.gmra.mrb[0].mxu0 %vm352_vm0, %v5848_v8 }
  0xa1   : > { %4055 = vmatprep.mubr.msk.bf16.mxu0 %vm352_vm0, %v3559_v22  ;;  %4088 = vmatpush3.bf16.msra.mxu0 %v4554_v5 }
  0xa2   : > { %4089 = vmatprep.subr.bf16.mxu0 %v4555_v58 }
  0xa5   : > { %4090 = vmatpush3.bf16.msra.mxu0 %v4555_v58  ;;  %4040 = vmatmul.mubr.msk.bf16.gmra.mrb[8].mxu1 %vm352_vm0, %v5260_v51 }
  0xa6   : > { %4127 = vmatprep.subr.bf16.mxu0 %v4556_v36  ;;  %4043 = vmatprep.mubr.msk.bf16.mxu1 %vm352_vm0, %v5264_v55 }
  0xa8   : > { %4056 = vmatmul.mubr.msk.bf16.gmra.mrb[4].mxu0 %vm352_vm0, %v3560_v16  ;;  %v5859_v16 = vld [vmem:[#allocation27_spill] sm:$0xff] }
  0xa9   : > { %4059 = vmatprep.mubr.msk.bf16.mxu0 %vm352_vm0, %v5249_v49  ;;  %v2073_v49 = vshrl.u32 %v5416_v23, 16 }
  0xab   : > { %v2075_v47 = vrot.slane %v2073_v49, 4  ;;  %v253_v49 = vld [vmem:[%s4659_s5 + $0x88] sm:$0xf] }
  0xad   : > { %4044 = vmatmul.mubr.msk.bf16.gmra.mrb[12].mxu1 %vm352_vm0, %v3564_v44 }
  0xae   : > { %4071 = vmatprep.mubr.msk.bf16.mxu1 %vm352_vm0, %v5851_v14 }
  0xb0   : > { %4060 = vmatmul.mubr.msk.bf16.gmra.mrb[8].mxu0 %vm352_vm0, %v5260_v51  ;;  %v2078_v51 = vrot.slane %v2076_v7, 5  ;;  %v3637_v7 = vcombine.low %v5416_v23, %v253_v49  ;;  %v289_v23 = vld [vmem:[%s4627_s26 + $0x88] sm:$0xf] }
  0xb1   : > { %4063 = vmatprep.mubr.msk.bf16.mxu0 %vm352_vm0, %v5264_v55  ;;  %v252_v55 = vld [vmem:[%s4659_s5 + $0x84] sm:$0x1] }
  0xb2   : > { %v2079_v10 = vor.u32 %v2078_v51, %v2075_v47  ;;  %v2082_v4 = vshll.u32 %v252_v55, 16  ;;  %v5868_v47 = vld [vmem:[#allocation3_spill] sm:$0xff]  ;;  %v3648_v51 = vcombine.low %v5447_v34, %v289_v23 }
  0xb4   : > { %v2080_v22 = vrot.slane %v2079_v10, 4  ;;  %v2084_v54 = vrot.slane %v2082_v4, 5 }
  0xb5   : > { %4072 = vmatmul.mubr.msk.bf16.vlgmr.msra.gmra.mrb[0].mxu1 %vm352_vm0, %v5852_v39 }
  0xb6   : > { %4108 = vmatpush3.bf16.msra.mxu1 %v4554_v5  ;;  %4075 = vmatprep.mubr.msk.bf16.mxu1 %vm352_vm0, %v5286_v2  ;;  %v4557_v5 = vld [vmem:[%s5700_s2 + $0x68] sm:$0xff]   ;;  %v5491_v31 = vsel %vm4739_vm3, %v2080_v22, %v2084_v54 }
  0xb7   : > { %4109 = vmatprep.subr.bf16.mxu1 %v4555_v58 }
  0xb8   : > { %4064 = vmatmul.mubr.msk.bf16.gmra.mrb[12].mxu0 %vm352_vm0, %v3564_v44 }
  0xb9   : > { %4091 = vmatprep.mubr.msk.bf16.mxu0 %vm352_vm0, %v5851_v14  ;;  %v5863_v14 = vld [vmem:[#allocation31_spill] sm:$0xff] }
  0xba   : > { %4110 = vmatpush3.bf16.msra.mxu1 %v4555_v58  ;;  %v5860_v58 = vld [vmem:[#allocation29_spill] sm:$0xff] }
  0xbb   : > { %4147 = vmatprep.subr.bf16.mxu1 %v4556_v36 }
  0xbd   : > { %4076 = vmatmul.mubr.msk.bf16.gmra.mrb[4].mxu1 %vm352_vm0, %v5292_v15 }
  0xbe   : > { %4079 = vmatprep.mubr.msk.bf16.mxu1 %vm352_vm0, %v5296_v12 }
  0xc0   : > { %4092 = vmatmul.mubr.msk.bf16.vlgmr.msra.gmra.mrb[0].mxu0 %vm352_vm0, %v5852_v39  ;;  %v5864_v39 = vld [vmem:[#allocation32_spill] sm:$0xff] }
  0xc1   : > { %4095 = vmatprep.mubr.msk.bf16.mxu0 %vm352_vm0, %v5286_v2  ;;  %4128 = vmatpush3.bf16.msra.mxu0 %v4556_v36  ;;  %v5853_v2 = vld [vmem:[#allocation33_spill] sm:$0xff] }
  0xc2   : > { %4129 = vmatprep.subr.bf16.mxu0 %v4557_v5  ;;  %v3594_v8 = vcombine.low %v5853_v2, %v5491_v31 }
  0xc5   : > { %4130 = vmatpush3.bf16.msra.mxu0 %v4557_v5  ;;  %4080 = vmatmul.mubr.msk.bf16.gmra.mrb[8].mxu1 %vm352_vm0, %v5300_v18 }
  0xc6   : > { %4167 = vmatprep.subr.bf16.mxu0 %v4558_v32  ;;  %4083 = vmatprep.mubr.msk.bf16.mxu1 %vm352_vm0, %v5304_v33 }
  0xc8   : > { %4096 = vmatmul.mubr.msk.bf16.gmra.mrb[4].mxu0 %vm352_vm0, %v5292_v15  ;;  %v5854_v15 = vcombine.low %v5836_v35, %v5837_v40  ;;  %v5857_v35 = vcombine.low %v5319_v41, %v5139_v25  ;;  %v4562_v25 = vld [vmem:[%s5700_s2 + $0x80] sm:$0xff]  }
  0xc9   : > { %4099 = vmatprep.mubr.msk.bf16.mxu0 %vm352_vm0, %v5296_v12  ;;  %v2363_v12 = vshrl.u32 %v5447_v34, 16  ;;  %v254_v34 = vld [vmem:[%s4659_s5 + $0x8c] sm:$0x1] }
  0xca   : > { %v2917_v55 = vshll.u32 %v254_v34, 16 }
  0xcd   : > { %4084 = vmatmul.mubr.msk.bf16.gmra.mrb[12].mxu1 %vm352_vm0, %v3594_v8 }
  0xce   : > { %4111 = vmatprep.mubr.msk.bf16.mxu1 %vm352_vm0, %v3617_v57  ;;  %v288_v57 = vld [vmem:[%s4627_s26 + $0x84] sm:$0x1] }
  0xcf   : > { %v2372_v26 = vshll.u32 %v288_v57, 16 }
  0xd0   : > { %4100 = vmatmul.mubr.msk.bf16.gmra.mrb[8].mxu0 %vm352_vm0, %v5300_v18  ;;  %v2365_v18 = vrot.slane %v2363_v12, 4 }
  0xd1   : > { %4103 = vmatprep.mubr.msk.bf16.mxu0 %vm352_vm0, %v5304_v33  ;;  %v2368_v33 = vrot.slane %v2366_v53, 5 }
  0xd3   : > { %v2369_v40 = vor.u32 %v2368_v33, %v2365_v18 }
  0xd5   : > { %4112 = vmatmul.mubr.msk.bf16.vlgmr.msra.gmra.mrb[0].mxu1 %vm352_vm0, %v5854_v15  ;;  %v2370_v41 = vrot.slane %v2369_v40, 4 }
  0xd6   : > { %4148 = vmatpush3.bf16.msra.mxu1 %v4556_v36  ;;  %4115 = vmatprep.mubr.msk.bf16.mxu1 %vm352_vm0, %v5855_v63  ;;  %v2374_v36 = vrot.slane %v2372_v26, 5  ;;  %v5661_v26 = vld [vmem:[%s5701_s3] ss:$0 sm:$0xff] }
  0xd7   : > { %4149 = vmatprep.subr.bf16.mxu1 %v4557_v5 }
  0xd8   : > { %4104 = vmatmul.mubr.msk.bf16.gmra.mrb[12].mxu0 %vm352_vm0, %v3594_v8  ;;  %v5550_v44 = vsel %vm4739_vm3, %v2370_v41, %v2374_v36 }
  0xd9   : > { %4131 = vmatprep.mubr.msk.bf16.mxu0 %vm352_vm0, %v5856_v27  ;;  %v3624_v24 = vcombine.low %v5255_v9, %v5550_v44  ;;  %v4563_v9 = vld [vmem:[%s5700_s2 + $0x88] sm:$0xff]  }
  0xda   : > { %4150 = vmatpush3.bf16.msra.mxu1 %v4557_v5 }
  0xdb   : > { %4187 = vmatprep.subr.bf16.mxu1 %v4558_v32 }
  0xdd   : > { %4116 = vmatmul.mubr.msk.bf16.gmra.mrb[4].mxu1 %vm352_vm0, %v5857_v35 }
  0xde   : > { %4119 = vmatprep.mubr.msk.bf16.mxu1 %vm352_vm0, %v5858_v52 }
  0xe0   : > { %4132 = vmatmul.mubr.msk.bf16.vlgmr.msra.gmra.mrb[0].mxu0 %vm352_vm0, %v5859_v16 }
  0xe1   : > { %4135 = vmatprep.mubr.msk.bf16.mxu0 %vm352_vm0, %v5860_v58  ;;  %4168 = vmatpush3.bf16.msra.mxu0 %v4558_v32 }
  0xe2   : > { %4169 = vmatprep.subr.bf16.mxu0 %v4560_v56 }
  0xe5   : > { %4170 = vmatpush3.bf16.msra.mxu0 %v4560_v56  ;;  %4120 = vmatmul.mubr.msk.bf16.gmra.mrb[8].mxu1 %vm352_vm0, %v5861_v59 }
  0xe6   : > { %4207 = vmatprep.subr.bf16.mxu0 %v4562_v25  ;;  %4123 = vmatprep.mubr.msk.bf16.mxu1 %vm352_vm0, %v5862_v3 }
  0xe8   : > { %4136 = vmatmul.mubr.msk.bf16.gmra.mrb[4].mxu0 %vm352_vm0, %v5863_v14 }
  0xe9   : > { %4139 = vmatprep.mubr.msk.bf16.mxu0 %vm352_vm0, %v5864_v39 }
  0xed   : > { %4124 = vmatmul.mubr.msk.bf16.gmra.mrb[12].mxu1 %vm352_vm0, %v3624_v24 }
  0xee   : > { %4151 = vmatprep.mubr.msk.bf16.mxu1 %vm352_vm0, %v5865_v46 }
  0xf0   : > { %4140 = vmatmul.mubr.msk.bf16.gmra.mrb[8].mxu0 %vm352_vm0, %v5866_v38 }
  0xf1   : > { %4143 = vmatprep.mubr.msk.bf16.mxu0 %vm352_vm0, %v5867_v0 }
  0xf5   : > { %4152 = vmatmul.mubr.msk.bf16.vlgmr.msra.gmra.mrb[0].mxu1 %vm352_vm0, %v5868_v47 }
  0xf6   : > { %4188 = vmatpush3.bf16.msra.mxu1 %v4558_v32  ;;  %4155 = vmatprep.mubr.msk.bf16.mxu1 %vm352_vm0, %v4699_v43  ;;  %v290_v32 = vld [vmem:[%s4627_s26 + $0x8c] sm:$0x1] }
  0xf7   : > { %4189 = vmatprep.subr.bf16.mxu1 %v4560_v56 }
  0xf8   : > { %4144 = vmatmul.mubr.msk.bf16.gmra.mrb[12].mxu0 %vm352_vm0, %v3637_v7 }
  0xf9   : > { %4171 = vmatprep.mubr.msk.bf16.mxu0 %vm352_vm0, %v5865_v46 }
  0xfa   : > { %4190 = vmatpush3.bf16.msra.mxu1 %v4560_v56 }
  0xfb   : > { %4227 = vmatprep.subr.bf16.mxu1 %v4562_v25 }
  0xfd   : > { %4156 = vmatmul.mubr.msk.bf16.gmra.mrb[4].mxu1 %vm352_vm0, %v4761_v62 }
  0xfe   : > { %4159 = vmatprep.mubr.msk.bf16.mxu1 %vm352_vm0, %v4793_v20 }
 0x100   : > { %4172 = vmatmul.mubr.msk.bf16.vlgmr.msra.gmra.mrb[0].mxu0 %vm352_vm0, %v5868_v47 }
 0x101   : > { %4175 = vmatprep.mubr.msk.bf16.mxu0 %vm352_vm0, %v4699_v43  ;;  %4208 = vmatpush3.bf16.msra.mxu0 %v4562_v25  ;;  %v2908_v43 = vshrl.u32 %v253_v49, 16 }
 0x102   : > { %4209 = vmatprep.subr.bf16.mxu0 %v4563_v9 }
 0x105   : > { %4210 = vmatpush3.bf16.msra.mxu0 %v4563_v9  ;;  %4160 = vmatmul.mubr.msk.bf16.gmra.mrb[8].mxu1 %vm352_vm0, %v5819_v28 }
 0x106   : > { %4163 = vmatprep.mubr.msk.bf16.mxu1 %vm352_vm0, %v5833_v45 }
 0x108   : > { %4176 = vmatmul.mubr.msk.bf16.gmra.mrb[4].mxu0 %vm352_vm0, %v4761_v62  ;;  %v2911_v62 = vshll.u32 %v253_v49, 16 }
 0x109   : > { %4179 = vmatprep.mubr.msk.bf16.mxu0 %vm352_vm0, %v4793_v20  ;;  %v2910_v20 = vrot.slane %v2908_v43, 4 }
 0x10d   : > { %4164 = vmatmul.mubr.msk.bf16.gmra.mrb[12].mxu1 %vm352_vm0, %v3648_v51 }
 0x10e   : > { %4191 = vmatprep.mubr.msk.bf16.mxu1 %vm352_vm0, %v4803_v30 }
 0x110   : > { %4180 = vmatmul.mubr.msk.bf16.gmra.mrb[8].mxu0 %vm352_vm0, %v5819_v28  ;;  %v2913_v28 = vrot.slane %v2911_v62, 5 }
 0x111   : > { %4183 = vmatprep.mubr.msk.bf16.mxu0 %vm352_vm0, %v5833_v45 }
 0x112   : > { %v2914_v45 = vor.u32 %v2913_v28, %v2910_v20 }
 0x114   : > { %v2915_v5 = vrot.slane %v2914_v45, 4 }
 0x115   : > { %4192 = vmatmul.mubr.msk.bf16.vlgmr.msra.gmra.mrb[0].mxu1 %vm352_vm0, %v4872_v60 }
 0x116   : > { %4228 = vmatpush3.bf16.msra.mxu1 %v4562_v25  ;;  %4195 = vmatprep.mubr.msk.bf16.mxu1 %vm352_vm0, %v5824_v6 }
 0x117   : > { %4229 = vmatprep.subr.bf16.mxu1 %v4563_v9 }
 0x118   : > { %4184 = vmatmul.mubr.msk.bf16.gmra.mrb[12].mxu0 %vm352_vm0, %v3648_v51 }
 0x119   : > { %4211 = vmatprep.mubr.msk.bf16.mxu0 %vm352_vm0, %v4803_v30  ;;  %v2919_v30 = vrot.slane %v2917_v55, 5 }
 0x11a   : > { %4230 = vmatpush3.bf16.msra.mxu1 %v4563_v9 }
 0x11b   : > { %v2920_v10 = vsel %vm4739_vm3, %v2915_v5, %v2919_v30 }
 0x11d   : > { %4196 = vmatmul.mubr.msk.bf16.gmra.mrb[4].mxu1 %vm352_vm0, %v5829_v17 }
 0x11e   : > { %4199 = vmatprep.mubr.msk.bf16.mxu1 %vm352_vm0, %v5834_v13 }
 0x120   : > { %4212 = vmatmul.mubr.msk.bf16.vlgmr.msra.gmra.mrb[0].mxu0 %vm352_vm0, %v4872_v60  ;;  %v3671_v60 = vcombine.low %v5491_v31, %v2920_v10 }
 0x121   : > { %4215 = vmatprep.mubr.msk.bf16.mxu0 %vm352_vm0, %v5824_v6  ;;  %v3170_v6 = vshrl.u32 %v289_v23, 16 }
 0x125   : > { %4200 = vmatmul.mubr.msk.bf16.gmra.mrb[8].mxu1 %vm352_vm0, %v5835_v11 }
 0x126   : > { %4203 = vmatprep.mubr.msk.bf16.mxu1 %vm352_vm0, %v5838_v61 }
 0x128   : > { %4216 = vmatmul.mubr.msk.bf16.gmra.mrb[4].mxu0 %vm352_vm0, %v5829_v17  ;;  %v3173_v17 = vshll.u32 %v289_v23, 16 }
 0x129   : > { %4219 = vmatprep.mubr.msk.bf16.mxu0 %vm352_vm0, %v5834_v13  ;;  %v3172_v13 = vrot.slane %v3170_v6, 4 }
 0x12a   : > { %v3175_v4 = vrot.slane %v3173_v17, 5 }
 0x12d   : > { %4204 = vmatmul.mubr.msk.bf16.gmra.mrb[12].mxu1 %vm352_vm0, %v3671_v60 }
 0x12e   : > { %4231 = vmatprep.mubr.msk.bf16.mxu1 %vm352_vm0, %v5348_v50  ;;  %v3176_v50 = vor.u32 %v3175_v4, %v3172_v13 }
 0x130   : > { %4220 = vmatmul.mubr.msk.bf16.gmra.mrb[8].mxu0 %vm352_vm0, %v5835_v11  ;;  %v3179_v11 = vshll.u32 %v290_v32, 16 }
 0x131   : > { %4223 = vmatprep.mubr.msk.bf16.mxu0 %vm352_vm0, %v5838_v61  ;;  %v3177_v61 = vrot.slane %v3176_v50, 4 }
 0x135   : > { %4232 = vmatmul.mubr.msk.bf16.vlgmr.msra.gmra.mrb[0].mxu1 %vm352_vm0, %v5352_v37  ;;  %v3181_v37 = vrot.slane %v3179_v11, 5 }
 0x136   : > { %4235 = vmatprep.mubr.msk.bf16.mxu1 %vm352_vm0, %v5368_v42 }
 0x137   : > { %v3182_v42 = vsel %vm4739_vm3, %v3177_v61, %v3181_v37 }
 0x138   : > { %4224 = vmatmul.mubr.msk.bf16.gmra.mrb[12].mxu0 %vm352_vm0, %v3671_v60  ;;  %v3694_v22 = vcombine.low %v5550_v44, %v3182_v42 }
 0x13d   : > { %4236 = vmatmul.mubr.msk.bf16.gmra.mrb[4].mxu1 %vm352_vm0, %v5842_v48 }
 0x13e   : > { %4239 = vmatprep.mubr.msk.bf16.mxu1 %vm352_vm0, %v5195_v21 }
 0x145   : > { %4240 = vmatmul.mubr.msk.bf16.gmra.mrb[8].mxu1 %vm352_vm0, %v5219_v29 }
 0x146   : > { %4243 = vmatprep.mubr.msk.bf16.mxu1 %vm352_vm0, %v5282_v1 }
 0x14d   : > { %4244 = vmatmul.mubr.msk.bf16.gmra.mrb[12].mxu1 %vm352_vm0, %v3694_v22 }
 0x1f3   : > { %v4213_v48 = vpop.f32.mrb[0].mxu0 }
 0x1f4   : > { %v3090_v54 = vpop.f32.mrb[1].mxu0 }
 0x1f5   : > { %v4214_v21 = vpop.f32.mrb[2].mxu0 }
 0x1f6   : > { %v3093_v31 = vpop.f32.mrb[3].mxu0 }
 0x1fb   : > { %v4217_v2 = vpop.f32.mrb[4].mxu0 }
 0x1fc   : > { %v3106_v8 = vpop.f32.mrb[5].mxu0 }
 0x1fd   : > { %v4218_v15 = vpop.f32.mrb[6].mxu0 }
 0x1fe   : > { %v3109_v12 = vpop.f32.mrb[7].mxu0 }
 0x203   : > { %v4221_v53 = vpop.f32.mrb[8].mxu0 }
 0x204   : > { %v3122_v29 = vpop.f32.mrb[9].mxu0 }
 0x205   : > { %v4222_v63 = vpop.f32.mrb[10].mxu0 }
 0x206   : > { %v3125_v27 = vpop.f32.mrb[11].mxu0 }
 0x208   : > { %v4233_v1 = vpop.f32.mrb[0].mxu1 }
 0x209   : > { %v3303_v19 = vmax.f32 %v4213_v48, %v4233_v1  ;;  %v3222_v18 = vpop.f32.mrb[1].mxu1 }
 0x20a   : > { %v3301_v33 = vmax.f32 %v3090_v54, %v3222_v18  ;;  %v4234_v57 = vpop.f32.mrb[2].mxu1 }
 0x20b   : > { %v5654_v35 = vpop.f32.mrb[12].mxu0  ;;  %v3304_v56 = vmax.f32 %v4214_v21, %v4234_v57  ;;  %v3225_v52 = vpop.f32.mrb[3].mxu1 }
 0x20c   : > { %v5656_v40 = vpop.f32.mrb[13].mxu0  ;;  %v3302_v16 = vmax.f32 %v3093_v31, %v3225_v52 }
 0x20d   : > { %v4226_v58 = vpop.f32.mrb[14].mxu0  ;;  %v3318_v25 = vmax.f32 %v3303_v19, %v3304_v56 }
 0x20e   : > { %v3141_v41 = vpop.f32.mrb[15].mxu0  ;;  %v3317_v36 = vmax.f32 %v3301_v33, %v3302_v16 }
 0x20f   : > { %v3333_v59 = vadd.f32 %v5661_v26, %v3318_v25 }
 0x210   : > { %v3332_v3 = vadd.f32 %v5661_v26, %v3317_v36  ;;  %v4237_v44 = vpop.f32.mrb[4].mxu1 }
 0x211   : > { %v3341_v14 = vmax.f32 %v3333_v59, 0.0  ;;  %v3307_v39 = vmax.f32 %v4217_v2, %v4237_v44  ;;  %v3238_v24 = vpop.f32.mrb[5].mxu1 }
 0x212   : > { %v3340_v46 = vmax.f32 %v3332_v3, 0.0  ;;  %v3305_v38 = vmax.f32 %v3106_v8, %v3238_v24  ;;  %v4238_v0 = vpop.f32.mrb[6].mxu1 }
 0x213   : > { %v3349_v49 = vpack.c.bf16 %v3341_v14, %v3341_v14  ;;  %v3308_v7 = vmax.f32 %v4218_v15, %v4238_v0  ;;  %v3241_v47 = vpop.f32.mrb[7].mxu1 }
 0x214   : > { %v3348_v9 = vpack.c.bf16 %v3340_v46, %v3340_v46  ;;  %v3306_v23 = vmax.f32 %v3109_v12, %v3241_v47 }
 0x215   : > { %3358 = vst.msk [vmem:[%s5669_s17 + $0x4] sm:$0xf] %vm3356_vm4, %v3349_v49  ;;  %v3320_v51 = vmax.f32 %v3307_v39, %v3308_v7 }
 0x216   : > { %3357 = vst.msk [vmem:[%s5669_s17] sm:$0xf] %vm3356_vm4, %v3348_v9  ;;  %v3319_v43 = vmax.f32 %v3305_v38, %v3306_v23 }
 0x217   : > { %v3335_v62 = vadd.f32 %v5661_v26, %v3320_v51 }
 0x218   : > { %v3334_v20 = vadd.f32 %v5661_v26, %v3319_v43  ;;  %v4241_v28 = vpop.f32.mrb[8].mxu1 }
 0x219   : > { %v3343_v34 = vmax.f32 %v3335_v62, 0.0  ;;  %v3311_v45 = vmax.f32 %v4221_v53, %v4241_v28  ;;  %v3254_v55 = vpop.f32.mrb[9].mxu1 }
 0x21a   : > { %v3342_v5 = vmax.f32 %v3334_v20, 0.0  ;;  %v3309_v30 = vmax.f32 %v3122_v29, %v3254_v55  ;;  %v4242_v10 = vpop.f32.mrb[10].mxu1 }
 0x21b   : > { %v3351_v60 = vpack.c.bf16 %v3343_v34, %v3343_v34  ;;  %v3312_v6 = vmax.f32 %v4222_v63, %v4242_v10  ;;  %v3257_v17 = vpop.f32.mrb[11].mxu1 }
 0x21c   : > { %v3350_v13 = vpack.c.bf16 %v3342_v5, %v3342_v5  ;;  %v3310_v4 = vmax.f32 %v3125_v27, %v3257_v17 }
 0x21d   : > { %3360 = vst.msk [vmem:[%s5669_s17 + $0xc] sm:$0xf] %vm3356_vm4, %v3351_v60  ;;  %v3322_v32 = vmax.f32 %v3311_v45, %v3312_v6 }
 0x21e   : > { %3359 = vst.msk [vmem:[%s5669_s17 + $0x8] sm:$0xf] %vm3356_vm4, %v3350_v13  ;;  %v3321_v50 = vmax.f32 %v3309_v30, %v3310_v4 }
 0x21f   : > { %v3337_v11 = vadd.f32 %v5661_v26, %v3322_v32 }
 0x220   : > { %v3336_v61 = vadd.f32 %v5661_v26, %v3321_v50  ;;  %v4245_v37 = vpop.f32.mrb[12].mxu1 }
 0x221   : > { %v3345_v42 = vmax.f32 %v3337_v11, 0.0  ;;  %v3315_v22 = vmax.f32 %v5654_v35, %v4245_v37  ;;  %v3270_v48 = vpop.f32.mrb[13].mxu1 }
 0x222   : > { %v3344_v54 = vmax.f32 %v3336_v61, 0.0  ;;  %v3313_v21 = vmax.f32 %v5656_v40, %v3270_v48  ;;  %v4246_v31 = vpop.f32.mrb[14].mxu1 }
 0x223   : > { %v3353_v2 = vpack.c.bf16 %v3345_v42, %v3345_v42  ;;  %v3316_v8 = vmax.f32 %v4226_v58, %v4246_v31  ;;  %v3273_v15 = vpop.f32.mrb[15].mxu1 }
 0x224   : > { %v3352_v12 = vpack.c.bf16 %v3344_v54, %v3344_v54  ;;  %v3314_v53 = vmax.f32 %v3141_v41, %v3273_v15 }
 0x225   : > { %3362 = vst.msk [vmem:[%s5669_s17 + $0x14] sm:$0xf] %vm3356_vm4, %v3353_v2  ;;  %v3324_v29 = vmax.f32 %v3315_v22, %v3316_v8 }
 0x226   : > { %3361 = vst.msk [vmem:[%s5669_s17 + $0x10] sm:$0xf] %vm3356_vm4, %v3352_v12  ;;  %v3323_v63 = vmax.f32 %v3313_v21, %v3314_v53 }
 0x227   : > { %v3339_v27 = vadd.f32 %v5661_v26, %v3324_v29 }
 0x228   : > { %v3338_v1 = vadd.f32 %v5661_v26, %v3323_v63 }
 0x229   : > { %v3347_v19 = vmax.f32 %v3339_v27, 0.0 }
 0x22a   : > { %v3346_v18 = vmax.f32 %v3338_v1, 0.0 }
 0x22b   : > { %v3355_v33 = vpack.c.bf16 %v3347_v19, %v3347_v19 }
 0x22c   : > { %v3354_v57 = vpack.c.bf16 %v3346_v18, %v3346_v18 }
 0x22d   : > { %3364 = vst.msk [vmem:[%s5669_s17 + $0x1c] sm:$0xf] %vm3356_vm4, %v3355_v33 }
 0x22e   : > { %3363 = vst.msk [vmem:[%s5669_s17 + $0x18] sm:$0xf] %vm3356_vm4, %v3354_v57 }
 0x22f PF: > { %s14_s15 = sadd.s32 1, %s4573_s15  }
 0x230   : > { %p11_p4 = scmp.ge.s32.totalorder %s14_s15, 4  }
 0x232   :  { %13 = sbr.rel (!%p11_p4) target bundleno = 1 (0x1), region = 77 }

// kernel: cnn_forward.5
= control target key start
LH: loop header
LB: loop body
LE: loop exit
PB: predicated region body
PF: predicated region fallthrough
CT: control target
= control target key end

     0   :  { %v553_v28 = vlaneseq  ;;  %v4024_v36 = vmov 1966171168   ;;  %s4926_s0 = inlined_call_operand.vmem [shape: bf16[2,4096], index: 0, kind: input, shape index: {}]   ;;  %s4927_s1 = inlined_call_operand.vmem [shape: bf16[4096,128], index: 1, kind: input, shape index: {}]   ;;  %s4928_s2 = inlined_call_operand.vmem [shape: f32[1,128], index: 2, kind: input, shape index: {}]   ;;  %s4929_s3 = inlined_call_operand.vmem [shape: bf16[128,128], index: 3, kind: input, shape index: {}]   ;;  %s4930_s4 = inlined_call_operand.vmem [shape: f32[1,128], index: 4, kind: input, shape index: {}]   ;;  %s4931_s5 = inlined_call_operand.hbm [shape: f32[2,128], index: 5, kind: output, shape index: {}]  }
   0x1   :  { %v3732_v0 = vld [vmem:[%s4927_s1 + $0x40] sm:$0xff]   ;;  %v3736_v4 = vld [vmem:[%s4927_s1 + $0x48] sm:$0xff]   ;;  %v3740_v8 = vld [vmem:[%s4927_s1 + $0x50] sm:$0xff]   ;;  %v551_v37 = vunpack.c.l.s4 %v4024_v36 }
   0x2   :  { %v3733_v1 = vld [vmem:[%s4927_s1 + $0xc0] sm:$0xff]   ;;  %3347 = vmatprep.subr.bf16.mxu0 %v3732_v0  ;;  %v3737_v5 = vld [vmem:[%s4927_s1 + $0xc8] sm:$0xff]   ;;  %v3741_v9 = vld [vmem:[%s4927_s1 + $0xd0] sm:$0xff]   ;;  %v554_v33 = vshrl.u32 %v553_v28, 7 }
   0x3   :  { %v3734_v2 = vld [vmem:[%s4927_s1] sm:$0xff]   ;;  %3369 = vmatprep.subr.bf16.mxu1 %v3733_v1  ;;  %v3738_v6 = vld [vmem:[%s4927_s1 + $0x8] sm:$0xff]   ;;  %v3742_v10 = vld [vmem:[%s4927_s1 + $0x10] sm:$0xff]   ;;  %v552_v40 = vunpack.c.0.s8 %v551_v37 }
   0x4   :  { %v3735_v3 = vld [vmem:[%s4927_s1 + $0x80] sm:$0xff]   ;;  %3348 = vmatpush3.bf16.msra.mxu0 %v3734_v2  ;;  %v3739_v7 = vld [vmem:[%s4927_s1 + $0x88] sm:$0xff]   ;;  %v3743_v11 = vld [vmem:[%s4927_s1 + $0x90] sm:$0xff]  }
   0x5   :  { %3370 = vmatpush3.bf16.msra.mxu1 %v3735_v3  ;;  %3349 = vmatprep.subr.bf16.mxu0 %v3736_v4  ;;  %v3744_v12 = vld [vmem:[%s4927_s1 + $0x58] sm:$0xff]   ;;  %v3748_v16 = vld [vmem:[%s4927_s1 + $0x60] sm:$0xff]   ;;  %v3752_v20 = vld [vmem:[%s4927_s1 + $0x68] sm:$0xff]   ;;  %v4163_v41 = vsub.s32 %v552_v40, %v554_v33 }
   0x6   :  { %3371 = vmatprep.subr.bf16.mxu1 %v3737_v5  ;;  %v3745_v13 = vld [vmem:[%s4927_s1 + $0xd8] sm:$0xff]   ;;  %v3749_v17 = vld [vmem:[%s4927_s1 + $0xe0] sm:$0xff]   ;;  %v3753_v21 = vld [vmem:[%s4927_s1 + $0xe8] sm:$0xff]  }
   0x7   :  { %v3746_v14 = vld [vmem:[%s4927_s1 + $0x18] sm:$0xff]   ;;  %v3750_v18 = vld [vmem:[%s4927_s1 + $0x20] sm:$0xff]   ;;  %v3754_v22 = vld [vmem:[%s4927_s1 + $0x28] sm:$0xff]  }
   0x8   :  { %3350 = vmatpush3.bf16.msra.mxu0 %v3738_v6  ;;  %v3747_v15 = vld [vmem:[%s4927_s1 + $0x98] sm:$0xff]   ;;  %v3751_v19 = vld [vmem:[%s4927_s1 + $0xa0] sm:$0xff]   ;;  %v3755_v23 = vld [vmem:[%s4927_s1 + $0xa8] sm:$0xff]  }
   0x9   :  { %3372 = vmatpush3.bf16.msra.mxu1 %v3739_v7  ;;  %3351 = vmatprep.subr.bf16.mxu0 %v3740_v8  ;;  %v3756_v24 = vld [vmem:[%s4927_s1 + $0x70] sm:$0xff]   ;;  %v3760_v29 = vld [vmem:[%s4927_s1 + $0x78] sm:$0xff]   ;;  %v22_v34 = vld [vmem:[%s4926_s0] sm:$0xff] }
   0xa   :  { %3373 = vmatprep.subr.bf16.mxu1 %v3741_v9  ;;  %v3757_v25 = vld [vmem:[%s4927_s1 + $0xf0] sm:$0xff]   ;;  %v3761_v30 = vld [vmem:[%s4927_s1 + $0xf8] sm:$0xff]   ;;  %v3765_v35 = vld [vmem:[%s4927_s1 + $0x140] sm:$0xff]   ;;  %v549_v39 = vcombine.high %v22_v34, %v22_v34  ;;  %v556_v42 = vrot.slane %v22_v34, %v4163_v41 }
   0xb   :  { %v3758_v26 = vld [vmem:[%s4927_s1 + $0x30] sm:$0xff]   ;;  %v3762_v31 = vld [vmem:[%s4927_s1 + $0x38] sm:$0xff]   ;;  %v3766_v38 = vld [vmem:[%s4927_s1 + $0x1c0] sm:$0xff]  }
   0xc   :  { %3352 = vmatpush3.bf16.msra.mxu0 %v3742_v10  ;;  %v3759_v27 = vld [vmem:[%s4927_s1 + $0xb0] sm:$0xff]   ;;  %v3763_v32 = vld [vmem:[%s4927_s1 + $0xb8] sm:$0xff]   ;;  %v4167_v43 = vrot.slane %v549_v39, %v4163_v41  ;;  %v564_v44 = vcombine.high %v556_v42, %v556_v42  ;;  %v572_v45 = vrot.slane %v556_v42, %v4163_v41  ;;  %v3767_v47 = vld [vmem:[%s4927_s1 + $0x100] sm:$0xff]  }
   0xd   :  { %3374 = vmatpush3.bf16.msra.mxu1 %v3743_v11  ;;  %3353 = vmatprep.subr.bf16.mxu0 %v3744_v12  ;;  %v3768_v49 = vld [vmem:[%s4927_s1 + $0x180] sm:$0xff]   ;;  %v3769_v52 = vld [vmem:[%s4927_s1 + $0x148] sm:$0xff]   ;;  %v3773_v58 = vld [vmem:[%s4927_s1 + $0x150] sm:$0xff]  }
   0xe   :  { %3375 = vmatprep.subr.bf16.mxu1 %v3745_v13  ;;  %v565_v46 = vcombine.high %v4167_v43, %v4167_v43  ;;  %v586_v48 = vrot.slane %v564_v44, %v4163_v41  ;;  %v594_v51 = vcombine.high %v572_v45, %v572_v45  ;;  %v3770_v54 = vld [vmem:[%s4927_s1 + $0x1c8] sm:$0xff]   ;;  %v3774_v59 = vld [vmem:[%s4927_s1 + $0x1d0] sm:$0xff]   ;;  %v3777_v62 = vld [vmem:[%s4927_s1 + $0x158] sm:$0xff]  }
   0xf   :  { %v3771_v55 = vld [vmem:[%s4927_s1 + $0x108] sm:$0xff]   ;;  %v3775_v60 = vld [vmem:[%s4927_s1 + $0x110] sm:$0xff]   ;;  %v3778_v63 = vld [vmem:[%s4927_s1 + $0x1d8] sm:$0xff]  }
  0x10   :  { %3354 = vmatpush3.bf16.msra.mxu0 %v3746_v14  ;;  %v593_v50 = vrot.slane %v565_v46, %v4163_v41  ;;  %2345 = vmatprep.mubr.bf16.mxu0 %v586_v48  ;;  %v596_v53 = vcombine.high %v586_v48, %v586_v48  ;;  %v3772_v57 = vld [vmem:[%s4927_s1 + $0x188] sm:$0xff]   ;;  %v3776_v61 = vld [vmem:[%s4927_s1 + $0x190] sm:$0xff]   ;;  %v3779_v0 = vld [vmem:[%s4927_s1 + $0x118] sm:$0xff]  }
  0x11   :  { %3376 = vmatpush3.bf16.msra.mxu1 %v3747_v15  ;;  %3355 = vmatprep.subr.bf16.mxu0 %v3748_v16  ;;  %v3780_v1 = vld [vmem:[%s4927_s1 + $0x198] sm:$0xff]   ;;  %v3781_v2 = vld [vmem:[%s4927_s1 + $0x160] sm:$0xff]   ;;  %v3785_v6 = vld [vmem:[%s4927_s1 + $0x168] sm:$0xff]  }
  0x12   :  { %3377 = vmatprep.subr.bf16.mxu1 %v3749_v17  ;;  %v597_v56 = vcombine.high %v593_v50, %v593_v50  ;;  %2385 = vmatprep.mubr.bf16.mxu1 %v596_v53  ;;  %v3782_v3 = vld [vmem:[%s4927_s1 + $0x1e0] sm:$0xff]   ;;  %v3786_v7 = vld [vmem:[%s4927_s1 + $0x1e8] sm:$0xff]   ;;  %v3789_v10 = vld [vmem:[%s4927_s1 + $0x170] sm:$0xff]  }
  0x13   :  { %v3783_v4 = vld [vmem:[%s4927_s1 + $0x120] sm:$0xff]   ;;  %v3787_v8 = vld [vmem:[%s4927_s1 + $0x128] sm:$0xff]   ;;  %v3790_v11 = vld [vmem:[%s4927_s1 + $0x1f0] sm:$0xff]  }
  0x14   :  { %3356 = vmatpush3.bf16.msra.mxu0 %v3750_v18  ;;  %v3784_v5 = vld [vmem:[%s4927_s1 + $0x1a0] sm:$0xff]   ;;  %v3788_v9 = vld [vmem:[%s4927_s1 + $0x1a8] sm:$0xff]   ;;  %v3791_v12 = vld [vmem:[%s4927_s1 + $0x130] sm:$0xff]   ;;  %v579_v18 = vrot.slane %v4167_v43, %v4163_v41 }
  0x15   :  { %3378 = vmatpush3.bf16.msra.mxu1 %v3751_v19  ;;  %3357 = vmatprep.subr.bf16.mxu0 %v3752_v20  ;;  %v3792_v13 = vld [vmem:[%s4927_s1 + $0x1b0] sm:$0xff]   ;;  %v3793_v14 = vld [vmem:[%s4927_s1 + $0x178] sm:$0xff]   ;;  %v3797_v19 = vld [vmem:[%s4927_s1 + $0x240] sm:$0xff]  }
  0x16   :  { %3379 = vmatprep.subr.bf16.mxu1 %v3753_v21  ;;  %v3794_v15 = vld [vmem:[%s4927_s1 + $0x1f8] sm:$0xff]   ;;  %v3798_v20 = vld [vmem:[%s4927_s1 + $0x2c0] sm:$0xff]   ;;  %v3805_v28 = vld [vmem:[%s4927_s1 + $0x250] sm:$0xff]  }
  0x17   :  { %v3795_v16 = vld [vmem:[%s4927_s1 + $0x138] sm:$0xff]   ;;  %v3799_v21 = vld [vmem:[%s4927_s1 + $0x200] sm:$0xff]   ;;  %v3817_v40 = vld [vmem:[%s4927_s1 + $0x268] sm:$0xff]  }
  0x18   :  { %3358 = vmatpush3.bf16.msra.mxu0 %v3754_v22  ;;  %v3796_v17 = vld [vmem:[%s4927_s1 + $0x1b8] sm:$0xff]   ;;  %v3800_v22 = vld [vmem:[%s4927_s1 + $0x280] sm:$0xff]   ;;  %v3818_v42 = vld [vmem:[%s4927_s1 + $0x2e8] sm:$0xff]  }
  0x19   :  { %3380 = vmatpush3.bf16.msra.mxu1 %v3755_v23  ;;  %3359 = vmatprep.subr.bf16.mxu0 %v3756_v24  ;;  %v595_v23 = vcombine.high %v579_v18, %v579_v18  ;;  %v3801_v24 = vld [vmem:[%s4927_s1 + $0x248] sm:$0xff]   ;;  %v3810_v33 = vld [vmem:[%s4927_s1 + $0x2d8] sm:$0xff]   ;;  %v3813_v36 = vld [vmem:[%s4927_s1 + $0x260] sm:$0xff]  }
  0x1a   :  { %3381 = vmatprep.subr.bf16.mxu1 %v3757_v25  ;;  %v3802_v25 = vld [vmem:[%s4927_s1 + $0x2c8] sm:$0xff]   ;;  %v3811_v34 = vld [vmem:[%s4927_s1 + $0x218] sm:$0xff]   ;;  %v3814_v37 = vld [vmem:[%s4927_s1 + $0x2e0] sm:$0xff]  }
  0x1b   :  { %v3816_v39 = vld [vmem:[%s4927_s1 + $0x2a0] sm:$0xff]   ;;  %v3819_v43 = vld [vmem:[%s4927_s1 + $0x228] sm:$0xff]  }
  0x1c   :  { %3360 = vmatpush3.bf16.msra.mxu0 %v3758_v26  ;;  %v3803_v26 = vld [vmem:[%s4927_s1 + $0x208] sm:$0xff]  }
  0x1d   :  { %3382 = vmatpush3.bf16.msra.mxu1 %v3759_v27  ;;  %3361 = vmatprep.subr.bf16.mxu0 %v3760_v29  ;;  %v3804_v27 = vld [vmem:[%s4927_s1 + $0x288] sm:$0xff]   ;;  %v3806_v29 = vld [vmem:[%s4927_s1 + $0x2d0] sm:$0xff]  }
  0x1e   :  { %3383 = vmatprep.subr.bf16.mxu1 %v3761_v30  ;;  %v3807_v30 = vld [vmem:[%s4927_s1 + $0x210] sm:$0xff]   ;;  %v3820_v44 = vld [vmem:[%s4927_s1 + $0x2a8] sm:$0xff]  }
  0x1f   :  { %v23_v46 = vld [vmem:[%s4926_s0 + $0x8] sm:$0xff] }
  0x20   :  { %3362 = vmatpush3.bf16.msra.mxu0 %v3762_v31  ;;  %v3808_v31 = vld [vmem:[%s4927_s1 + $0x290] sm:$0xff]   ;;  %v605_v48 = vrot.slane %v23_v46, %v4163_v41 }
  0x21   :  { %3384 = vmatpush3.bf16.msra.mxu1 %v3763_v32  ;;  %3391 = vmatprep.subr.bf16.mxu0 %v3765_v35  ;;  %v3809_v32 = vld [vmem:[%s4927_s1 + $0x258] sm:$0xff]  }
  0x22   :  { %3413 = vmatprep.subr.bf16.mxu1 %v3766_v38  ;;  %v3812_v35 = vld [vmem:[%s4927_s1 + $0x298] sm:$0xff]   ;;  %v3815_v38 = vld [vmem:[%s4927_s1 + $0x220] sm:$0xff]  }
  0x23   :  { %2346 = vmatmul.mubr.bf16.vlgmr.msra.gmra.mrb[0].mxu0 %v572_v45  ;;  %v3821_v45 = vld [vmem:[%s4927_s1 + $0x270] sm:$0xff]  }
  0x24   :  { %3392 = vmatpush3.bf16.msra.mxu0 %v3767_v47  ;;  %2386 = vmatmul.mubr.bf16.vlgmr.msra.gmra.mrb[0].mxu1 %v594_v51  ;;  %v3822_v47 = vld [vmem:[%s4927_s1 + $0x2f0] sm:$0xff]  }
  0x25   :  { %3393 = vmatprep.subr.bf16.mxu0 %v3769_v52  ;;  %3414 = vmatpush3.bf16.msra.mxu1 %v3768_v49  ;;  %v598_v49 = vcombine.high %v23_v46, %v23_v46  ;;  %v3824_v51 = vld [vmem:[%s4927_s1 + $0x2b0] sm:$0xff]   ;;  %v613_v52 = vcombine.high %v605_v48, %v605_v48 }
  0x26   :  { %2425 = vmatprep.mubr.bf16.mxu0 %v593_v50  ;;  %3415 = vmatprep.subr.bf16.mxu1 %v3770_v54  ;;  %v3823_v50 = vld [vmem:[%s4927_s1 + $0x230] sm:$0xff]   ;;  %v3825_v54 = vld [vmem:[%s4927_s1 + $0x278] sm:$0xff]  }
  0x27   :  { %2465 = vmatprep.mubr.bf16.mxu1 %v597_v56  ;;  %v4355_v53 = vrot.slane %v598_v49, %v4163_v41  ;;  %v635_v56 = vrot.slane %v613_v52, %v4163_v41  ;;  %v3872_v46 = vld [vmem:[%s4927_s1 + $0x410] sm:$0xff]   ;;  %v3875_v49 = vld [vmem:[%s4927_s1 + $0x4d8] sm:$0xff]   ;;  %v3878_v52 = vld [vmem:[%s4927_s1 + $0x460] sm:$0xff]  }
  0x28   :  { %3394 = vmatpush3.bf16.msra.mxu0 %v3771_v55  ;;  %v3826_v55 = vld [vmem:[%s4927_s1 + $0x2f8] sm:$0xff]  }
  0x29   :  { %3395 = vmatprep.subr.bf16.mxu0 %v3773_v58  ;;  %3416 = vmatpush3.bf16.msra.mxu1 %v3772_v57  ;;  %v614_v57 = vcombine.high %v4355_v53, %v4355_v53  ;;  %v3827_v58 = vld [vmem:[%s4927_s1 + $0x238] sm:$0xff]  }
  0x2a   :  { %3417 = vmatprep.subr.bf16.mxu1 %v3774_v59  ;;  %v3828_v59 = vld [vmem:[%s4927_s1 + $0x2b8] sm:$0xff]  }
  0x2c   :  { %3396 = vmatpush3.bf16.msra.mxu0 %v3775_v60  ;;  %v645_v60 = vcombine.high %v635_v56, %v635_v56 }
  0x2d   :  { %3397 = vmatprep.subr.bf16.mxu0 %v3777_v62  ;;  %3418 = vmatpush3.bf16.msra.mxu1 %v3776_v61  ;;  %v621_v61 = vrot.slane %v605_v48, %v4163_v41  ;;  %v3829_v62 = vld [vmem:[%s4927_s1 + $0x340] sm:$0xff]   ;;  %v3874_v48 = vld [vmem:[%s4927_s1 + $0x458] sm:$0xff]  }
  0x2e   :  { %3419 = vmatprep.subr.bf16.mxu1 %v3778_v63  ;;  %v3830_v63 = vld [vmem:[%s4927_s1 + $0x3c0] sm:$0xff]  }
  0x30   :  { %3398 = vmatpush3.bf16.msra.mxu0 %v3779_v0  ;;  %v642_v0 = vrot.slane %v614_v57, %v4163_v41  ;;  %v3883_v57 = vld [vmem:[%s4927_s1 + $0x4e8] sm:$0xff]  }
  0x31   :  { %3399 = vmatprep.subr.bf16.mxu0 %v3781_v2  ;;  %3420 = vmatpush3.bf16.msra.mxu1 %v3780_v1  ;;  %v3831_v1 = vld [vmem:[%s4927_s1 + $0x300] sm:$0xff]  }
  0x32   :  { %3421 = vmatprep.subr.bf16.mxu1 %v3782_v3  ;;  %v3832_v2 = vld [vmem:[%s4927_s1 + $0x380] sm:$0xff]   ;;  %v643_v3 = vcombine.high %v621_v61, %v621_v61 }
  0x34   :  { %3400 = vmatpush3.bf16.msra.mxu0 %v3783_v4  ;;  %v3833_v4 = vld [vmem:[%s4927_s1 + $0x348] sm:$0xff]  }
  0x35   :  { %3401 = vmatprep.subr.bf16.mxu0 %v3785_v6  ;;  %3422 = vmatpush3.bf16.msra.mxu1 %v3784_v5  ;;  %v3834_v5 = vld [vmem:[%s4927_s1 + $0x3c8] sm:$0xff]   ;;  %v646_v6 = vcombine.high %v642_v0, %v642_v0 }
  0x36   :  { %3423 = vmatprep.subr.bf16.mxu1 %v3786_v7  ;;  %v3835_v7 = vld [vmem:[%s4927_s1 + $0x308] sm:$0xff]  }
  0x38   :  { %3402 = vmatpush3.bf16.msra.mxu0 %v3787_v8  ;;  %v3836_v8 = vld [vmem:[%s4927_s1 + $0x388] sm:$0xff]  }
  0x39   :  { %3403 = vmatprep.subr.bf16.mxu0 %v3789_v10  ;;  %3424 = vmatpush3.bf16.msra.mxu1 %v3788_v9  ;;  %v3837_v9 = vld [vmem:[%s4927_s1 + $0x350] sm:$0xff]  }
  0x3a   :  { %3425 = vmatprep.subr.bf16.mxu1 %v3790_v11  ;;  %v3838_v10 = vld [vmem:[%s4927_s1 + $0x3d0] sm:$0xff]  }
  0x3b   :  { %v3839_v11 = vld [vmem:[%s4927_s1 + $0x310] sm:$0xff]  }
  0x3c   :  { %3404 = vmatpush3.bf16.msra.mxu0 %v3791_v12  ;;  %v3840_v12 = vld [vmem:[%s4927_s1 + $0x390] sm:$0xff]  }
  0x3d   :  { %3405 = vmatprep.subr.bf16.mxu0 %v3793_v14  ;;  %3426 = vmatpush3.bf16.msra.mxu1 %v3792_v13  ;;  %v3841_v13 = vld [vmem:[%s4927_s1 + $0x358] sm:$0xff]  }
  0x3e   :  { %3427 = vmatprep.subr.bf16.mxu1 %v3794_v15  ;;  %v3842_v14 = vld [vmem:[%s4927_s1 + $0x3d8] sm:$0xff]  }
  0x3f   :  { %v3843_v15 = vld [vmem:[%s4927_s1 + $0x318] sm:$0xff]  }
  0x40   :  { %3406 = vmatpush3.bf16.msra.mxu0 %v3795_v16  ;;  %v3844_v16 = vld [vmem:[%s4927_s1 + $0x398] sm:$0xff]  }
  0x41   :  { %3435 = vmatprep.subr.bf16.mxu0 %v3797_v19  ;;  %3428 = vmatpush3.bf16.msra.mxu1 %v3796_v17  ;;  %v3845_v17 = vld [vmem:[%s4927_s1 + $0x360] sm:$0xff]  }
  0x42   :  { %3457 = vmatprep.subr.bf16.mxu1 %v3798_v20  ;;  %v3847_v19 = vld [vmem:[%s4927_s1 + $0x320] sm:$0xff]  }
  0x43   :  { %2426 = vmatmul.mubr.bf16.vlgmr.msra.gmra.mrb[4].mxu0 %v579_v18  ;;  %v3846_v18 = vld [vmem:[%s4927_s1 + $0x3e0] sm:$0xff]  }
  0x44   :  { %3436 = vmatpush3.bf16.msra.mxu0 %v3799_v21  ;;  %2466 = vmatmul.mubr.bf16.vlgmr.msra.gmra.mrb[4].mxu1 %v595_v23  ;;  %v3848_v20 = vld [vmem:[%s4927_s1 + $0x3a0] sm:$0xff]   ;;  %v3849_v21 = vld [vmem:[%s4927_s1 + $0x368] sm:$0xff]  }
  0x45   :  { %3437 = vmatprep.subr.bf16.mxu0 %v3801_v24  ;;  %3458 = vmatpush3.bf16.msra.mxu1 %v3800_v22  ;;  %v3850_v22 = vld [vmem:[%s4927_s1 + $0x3e8] sm:$0xff]  }
  0x46   :  { %3459 = vmatprep.subr.bf16.mxu1 %v3802_v25  ;;  %2505 = vmatprep.mubr.bf16.mxu0 %v635_v56  ;;  %v3851_v23 = vld [vmem:[%s4927_s1 + $0x328] sm:$0xff]   ;;  %v3853_v25 = vld [vmem:[%s4927_s1 + $0x370] sm:$0xff]  }
  0x47   :  { %2545 = vmatprep.mubr.bf16.mxu1 %v645_v60  ;;  %v3852_v24 = vld [vmem:[%s4927_s1 + $0x3a8] sm:$0xff]   ;;  %v3886_v60 = vld [vmem:[%s4927_s1 + $0x470] sm:$0xff]  }
  0x48   :  { %3438 = vmatpush3.bf16.msra.mxu0 %v3803_v26  ;;  %v3854_v26 = vld [vmem:[%s4927_s1 + $0x3f0] sm:$0xff]   ;;  %v3882_v56 = vld [vmem:[%s4927_s1 + $0x468] sm:$0xff]  }
  0x49   :  { %3439 = vmatprep.subr.bf16.mxu0 %v3805_v28  ;;  %3460 = vmatpush3.bf16.msra.mxu1 %v3804_v27  ;;  %v3855_v27 = vld [vmem:[%s4927_s1 + $0x330] sm:$0xff]  }
  0x4a   :  { %3461 = vmatprep.subr.bf16.mxu1 %v3806_v29  ;;  %v3856_v28 = vld [vmem:[%s4927_s1 + $0x3b0] sm:$0xff]   ;;  %v3857_v29 = vld [vmem:[%s4927_s1 + $0x378] sm:$0xff]  }
  0x4c   :  { %3440 = vmatpush3.bf16.msra.mxu0 %v3807_v30  ;;  %v3858_v30 = vld [vmem:[%s4927_s1 + $0x3f8] sm:$0xff]  }
  0x4d   :  { %3441 = vmatprep.subr.bf16.mxu0 %v3809_v32  ;;  %3462 = vmatpush3.bf16.msra.mxu1 %v3808_v31  ;;  %v3859_v31 = vld [vmem:[%s4927_s1 + $0x338] sm:$0xff]  }
  0x4e   :  { %3463 = vmatprep.subr.bf16.mxu1 %v3810_v33  ;;  %v3860_v32 = vld [vmem:[%s4927_s1 + $0x3b8] sm:$0xff]   ;;  %v628_v33 = vrot.slane %v4355_v53, %v4163_v41  ;;  %v3879_v53 = vld [vmem:[%s4927_s1 + $0x4e0] sm:$0xff]  }
  0x50   :  { %3442 = vmatpush3.bf16.msra.mxu0 %v3811_v34  ;;  %v3862_v34 = vld [vmem:[%s4927_s1 + $0x440] sm:$0xff]  }
  0x51   :  { %3443 = vmatprep.subr.bf16.mxu0 %v3813_v36  ;;  %3464 = vmatpush3.bf16.msra.mxu1 %v3812_v35  ;;  %v3863_v35 = vld [vmem:[%s4927_s1 + $0x4c0] sm:$0xff]  }
  0x52   :  { %3465 = vmatprep.subr.bf16.mxu1 %v3814_v37  ;;  %v3864_v36 = vld [vmem:[%s4927_s1 + $0x400] sm:$0xff]  }
  0x53   :  { %v3865_v37 = vld [vmem:[%s4927_s1 + $0x480] sm:$0xff]  }
  0x54   :  { %3444 = vmatpush3.bf16.msra.mxu0 %v3815_v38  ;;  %v644_v38 = vcombine.high %v628_v33, %v628_v33 }
  0x55   :  { %3445 = vmatprep.subr.bf16.mxu0 %v3817_v40  ;;  %3466 = vmatpush3.bf16.msra.mxu1 %v3816_v39  ;;  %v3866_v39 = vld [vmem:[%s4927_s1 + $0x448] sm:$0xff]  }
  0x56   :  { %3467 = vmatprep.subr.bf16.mxu1 %v3818_v42  ;;  %v3867_v40 = vld [vmem:[%s4927_s1 + $0x4c8] sm:$0xff]  }
  0x57   :  { %v3868_v42 = vld [vmem:[%s4927_s1 + $0x408] sm:$0xff]  }
  0x58   :  { %3446 = vmatpush3.bf16.msra.mxu0 %v3819_v43  ;;  %v3869_v43 = vld [vmem:[%s4927_s1 + $0x488] sm:$0xff]  }
  0x59   :  { %3447 = vmatprep.subr.bf16.mxu0 %v3821_v45  ;;  %3468 = vmatpush3.bf16.msra.mxu1 %v3820_v44  ;;  %v3870_v44 = vld [vmem:[%s4927_s1 + $0x450] sm:$0xff]  }
  0x5a   :  { %3469 = vmatprep.subr.bf16.mxu1 %v3822_v47  ;;  %v3871_v45 = vld [vmem:[%s4927_s1 + $0x4d0] sm:$0xff]  }
  0x5b   :  { %v3873_v47 = vld [vmem:[%s4927_s1 + $0x490] sm:$0xff]  }
  0x5c   :  { %3448 = vmatpush3.bf16.msra.mxu0 %v3823_v50  ;;  %v3876_v50 = vld [vmem:[%s4927_s1 + $0x418] sm:$0xff]  }
  0x5d   :  { %3449 = vmatprep.subr.bf16.mxu0 %v3825_v54  ;;  %3470 = vmatpush3.bf16.msra.mxu1 %v3824_v51  ;;  %v3877_v51 = vld [vmem:[%s4927_s1 + $0x498] sm:$0xff]   ;;  %v3880_v54 = vld [vmem:[%s4927_s1 + $0x420] sm:$0xff]  }
  0x5e   :  { %3471 = vmatprep.subr.bf16.mxu1 %v3826_v55  ;;  %v3881_v55 = vld [vmem:[%s4927_s1 + $0x4a0] sm:$0xff]  }
  0x60   :  { %3450 = vmatpush3.bf16.msra.mxu0 %v3827_v58  ;;  %v3884_v58 = vld [vmem:[%s4927_s1 + $0x428] sm:$0xff]  }
  0x61   :  { %3479 = vmatprep.subr.bf16.mxu0 %v3829_v62  ;;  %3472 = vmatpush3.bf16.msra.mxu1 %v3828_v59  ;;  %v3885_v59 = vld [vmem:[%s4927_s1 + $0x4a8] sm:$0xff]   ;;  %v3887_v62 = vld [vmem:[%s4927_s1 + $0x4f0] sm:$0xff]  }
  0x62   :  { %3501 = vmatprep.subr.bf16.mxu1 %v3830_v63 }
  0x63   :  { %2506 = vmatmul.mubr.bf16.vlgmr.msra.gmra.mrb[8].mxu0 %v621_v61  ;;  %v24_v61 = vld [vmem:[%s4926_s0 + $0x10] sm:$0xff] }
  0x64   :  { %3480 = vmatpush3.bf16.msra.mxu0 %v3831_v1  ;;  %2585 = vmatprep.mubr.bf16.mxu0 %v642_v0  ;;  %v654_v63 = vrot.slane %v24_v61, %v4163_v41  ;;  %v647_v0 = vcombine.high %v24_v61, %v24_v61  ;;  %v3888_v1 = vld [vmem:[%s4927_s1 + $0x430] sm:$0xff]  }
  0x65   :  { %2546 = vmatmul.mubr.bf16.vlgmr.msra.gmra.mrb[8].mxu1 %v643_v3  ;;  %3481 = vmatprep.subr.bf16.mxu0 %v3833_v4  ;;  %v3937_v61 = vld [vmem:[%s4927_s1 + $0x610] sm:$0xff]  }
  0x66   :  { %3502 = vmatpush3.bf16.msra.mxu1 %v3832_v2  ;;  %2625 = vmatprep.mubr.bf16.mxu1 %v646_v6  ;;  %v3889_v2 = vld [vmem:[%s4927_s1 + $0x4b0] sm:$0xff]   ;;  %v662_v3 = vcombine.high %v654_v63, %v654_v63  ;;  %v4561_v4 = vrot.slane %v647_v0, %v4163_v41  ;;  %v3891_v6 = vld [vmem:[%s4927_s1 + $0x4f8] sm:$0xff]  }
  0x67   :  { %3503 = vmatprep.subr.bf16.mxu1 %v3834_v5  ;;  %v3890_v5 = vld [vmem:[%s4927_s1 + $0x478] sm:$0xff]  }
  0x68   :  { %3482 = vmatpush3.bf16.msra.mxu0 %v3835_v7  ;;  %v684_v7 = vrot.slane %v662_v3, %v4163_v41  ;;  %v3940_v0 = vld [vmem:[%s4927_s1 + $0x6d8] sm:$0xff]   ;;  %v3943_v3 = vld [vmem:[%s4927_s1 + $0x660] sm:$0xff]  }
  0x69   :  { %3483 = vmatprep.subr.bf16.mxu0 %v3837_v9  ;;  %v3892_v9 = vld [vmem:[%s4927_s1 + $0x438] sm:$0xff]  }
  0x6a   :  { %3504 = vmatpush3.bf16.msra.mxu1 %v3836_v8  ;;  %v663_v8 = vcombine.high %v4561_v4, %v4561_v4 }
  0x6b   :  { %3505 = vmatprep.subr.bf16.mxu1 %v3838_v10  ;;  %v3893_v10 = vld [vmem:[%s4927_s1 + $0x4b8] sm:$0xff]  }
  0x6c   :  { %3484 = vmatpush3.bf16.msra.mxu0 %v3839_v11  ;;  %v694_v11 = vcombine.high %v684_v7, %v684_v7 }
  0x6d   :  { %3485 = vmatprep.subr.bf16.mxu0 %v3841_v13  ;;  %v3894_v13 = vld [vmem:[%s4927_s1 + $0x540] sm:$0xff]  }
  0x6e   :  { %3506 = vmatpush3.bf16.msra.mxu1 %v3840_v12  ;;  %v670_v12 = vrot.slane %v654_v63, %v4163_v41  ;;  %v3939_v63 = vld [vmem:[%s4927_s1 + $0x658] sm:$0xff]  }
  0x6f   :  { %3507 = vmatprep.subr.bf16.mxu1 %v3842_v14  ;;  %v3895_v14 = vld [vmem:[%s4927_s1 + $0x5c0] sm:$0xff]  }
  0x70   :  { %3486 = vmatpush3.bf16.msra.mxu0 %v3843_v15  ;;  %v691_v15 = vrot.slane %v663_v8, %v4163_v41  ;;  %v3948_v8 = vld [vmem:[%s4927_s1 + $0x6e8] sm:$0xff]  }
  0x71   :  { %3487 = vmatprep.subr.bf16.mxu0 %v3845_v17  ;;  %v3897_v17 = vld [vmem:[%s4927_s1 + $0x580] sm:$0xff]  }
  0x72   :  { %3508 = vmatpush3.bf16.msra.mxu1 %v3844_v16  ;;  %v3896_v16 = vld [vmem:[%s4927_s1 + $0x500] sm:$0xff]  }
  0x73   :  { %3509 = vmatprep.subr.bf16.mxu1 %v3846_v18  ;;  %v692_v18 = vcombine.high %v670_v12, %v670_v12 }
  0x74   :  { %3488 = vmatpush3.bf16.msra.mxu0 %v3847_v19  ;;  %v3898_v19 = vld [vmem:[%s4927_s1 + $0x548] sm:$0xff]  }
  0x75   :  { %3489 = vmatprep.subr.bf16.mxu0 %v3849_v21  ;;  %v695_v21 = vcombine.high %v691_v15, %v691_v15 }
  0x76   :  { %3510 = vmatpush3.bf16.msra.mxu1 %v3848_v20  ;;  %v3899_v20 = vld [vmem:[%s4927_s1 + $0x5c8] sm:$0xff]  }
  0x77   :  { %3511 = vmatprep.subr.bf16.mxu1 %v3850_v22  ;;  %v3900_v22 = vld [vmem:[%s4927_s1 + $0x508] sm:$0xff]  }
  0x78   :  { %3490 = vmatpush3.bf16.msra.mxu0 %v3851_v23  ;;  %v3901_v23 = vld [vmem:[%s4927_s1 + $0x588] sm:$0xff]  }
  0x79   :  { %3491 = vmatprep.subr.bf16.mxu0 %v3853_v25  ;;  %v3903_v25 = vld [vmem:[%s4927_s1 + $0x5d0] sm:$0xff]  }
  0x7a   :  { %3512 = vmatpush3.bf16.msra.mxu1 %v3852_v24  ;;  %v3902_v24 = vld [vmem:[%s4927_s1 + $0x550] sm:$0xff]  }
  0x7b   :  { %3513 = vmatprep.subr.bf16.mxu1 %v3854_v26  ;;  %v3904_v26 = vld [vmem:[%s4927_s1 + $0x510] sm:$0xff]  }
  0x7c   :  { %3492 = vmatpush3.bf16.msra.mxu0 %v3855_v27  ;;  %v3905_v27 = vld [vmem:[%s4927_s1 + $0x590] sm:$0xff]  }
  0x7d   :  { %3493 = vmatprep.subr.bf16.mxu0 %v3857_v29  ;;  %v3907_v29 = vld [vmem:[%s4927_s1 + $0x5d8] sm:$0xff]  }
  0x7e   :  { %3514 = vmatpush3.bf16.msra.mxu1 %v3856_v28  ;;  %v3906_v28 = vld [vmem:[%s4927_s1 + $0x558] sm:$0xff]  }
  0x7f   :  { %3515 = vmatprep.subr.bf16.mxu1 %v3858_v30  ;;  %v3908_v30 = vld [vmem:[%s4927_s1 + $0x518] sm:$0xff]  }
  0x80   :  { %3494 = vmatpush3.bf16.msra.mxu0 %v3859_v31  ;;  %v3909_v31 = vld [vmem:[%s4927_s1 + $0x598] sm:$0xff]  }
  0x81   :  { %3523 = vmatprep.subr.bf16.mxu0 %v3862_v34  ;;  %v3912_v34 = vld [vmem:[%s4927_s1 + $0x520] sm:$0xff]  }
  0x82   :  { %3516 = vmatpush3.bf16.msra.mxu1 %v3860_v32  ;;  %v3910_v32 = vld [vmem:[%s4927_s1 + $0x560] sm:$0xff]  }
  0x83   :  { %2586 = vmatmul.mubr.bf16.vlgmr.msra.gmra.mrb[12].mxu0 %v628_v33  ;;  %3545 = vmatprep.subr.bf16.mxu1 %v3863_v35  ;;  %v3911_v33 = vld [vmem:[%s4927_s1 + $0x5e0] sm:$0xff]  }
  0x84   :  { %3524 = vmatpush3.bf16.msra.mxu0 %v3864_v36  ;;  %2665 = vmatprep.mubr.bf16.mxu0 %v684_v7  ;;  %v3913_v35 = vld [vmem:[%s4927_s1 + $0x5a0] sm:$0xff]   ;;  %v3914_v36 = vld [vmem:[%s4927_s1 + $0x568] sm:$0xff]  }
  0x85   :  { %2626 = vmatmul.mubr.bf16.vlgmr.msra.gmra.mrb[12].mxu1 %v644_v38  ;;  %3525 = vmatprep.subr.bf16.mxu0 %v3866_v39  ;;  %v3916_v38 = vld [vmem:[%s4927_s1 + $0x528] sm:$0xff]  }
  0x86   :  { %3546 = vmatpush3.bf16.msra.mxu1 %v3865_v37  ;;  %2705 = vmatprep.mubr.bf16.mxu1 %v694_v11  ;;  %v3915_v37 = vld [vmem:[%s4927_s1 + $0x5e8] sm:$0xff]   ;;  %v3951_v11 = vld [vmem:[%s4927_s1 + $0x670] sm:$0xff]  }
  0x87   :  { %3547 = vmatprep.subr.bf16.mxu1 %v3867_v40  ;;  %v3917_v39 = vld [vmem:[%s4927_s1 + $0x5a8] sm:$0xff]   ;;  %v3918_v40 = vld [vmem:[%s4927_s1 + $0x570] sm:$0xff]  }
  0x88   :  { %3526 = vmatpush3.bf16.msra.mxu0 %v3868_v42  ;;  %v3919_v42 = vld [vmem:[%s4927_s1 + $0x5f0] sm:$0xff]   ;;  %v3947_v7 = vld [vmem:[%s4927_s1 + $0x668] sm:$0xff]  }
  0x89   :  { %3527 = vmatprep.subr.bf16.mxu0 %v3870_v44  ;;  %v3921_v44 = vld [vmem:[%s4927_s1 + $0x5b0] sm:$0xff]  }
  0x8a   :  { %3548 = vmatpush3.bf16.msra.mxu1 %v3869_v43  ;;  %v3920_v43 = vld [vmem:[%s4927_s1 + $0x530] sm:$0xff]  }
  0x8b   :  { %3549 = vmatprep.subr.bf16.mxu1 %v3871_v45  ;;  %v3922_v45 = vld [vmem:[%s4927_s1 + $0x578] sm:$0xff]  }
  0x8c   :  { %3528 = vmatpush3.bf16.msra.mxu0 %v3872_v46  ;;  %v3923_v46 = vld [vmem:[%s4927_s1 + $0x5f8] sm:$0xff]  }
  0x8d   :  { %3529 = vmatprep.subr.bf16.mxu0 %v3874_v48  ;;  %v3925_v48 = vld [vmem:[%s4927_s1 + $0x5b8] sm:$0xff]  }
  0x8e   :  { %3550 = vmatpush3.bf16.msra.mxu1 %v3873_v47  ;;  %v3924_v47 = vld [vmem:[%s4927_s1 + $0x538] sm:$0xff]  }
  0x8f   :  { %3551 = vmatprep.subr.bf16.mxu1 %v3875_v49  ;;  %v677_v49 = vrot.slane %v4561_v4, %v4163_v41  ;;  %v3944_v4 = vld [vmem:[%s4927_s1 + $0x6e0] sm:$0xff]  }
  0x90   :  { %3530 = vmatpush3.bf16.msra.mxu0 %v3876_v50  ;;  %v3927_v50 = vld [vmem:[%s4927_s1 + $0x640] sm:$0xff]  }
  0x91   :  { %3531 = vmatprep.subr.bf16.mxu0 %v3878_v52  ;;  %v3929_v52 = vld [vmem:[%s4927_s1 + $0x600] sm:$0xff]  }
  0x92   :  { %3552 = vmatpush3.bf16.msra.mxu1 %v3877_v51  ;;  %v3928_v51 = vld [vmem:[%s4927_s1 + $0x6c0] sm:$0xff]  }
  0x93   :  { %3553 = vmatprep.subr.bf16.mxu1 %v3879_v53  ;;  %v3930_v53 = vld [vmem:[%s4927_s1 + $0x680] sm:$0xff]  }
  0x94   :  { %3532 = vmatpush3.bf16.msra.mxu0 %v3880_v54  ;;  %v693_v54 = vcombine.high %v677_v49, %v677_v49 }
  0x95   :  { %3533 = vmatprep.subr.bf16.mxu0 %v3882_v56  ;;  %v3932_v56 = vld [vmem:[%s4927_s1 + $0x6c8] sm:$0xff]  }
  0x96   :  { %3554 = vmatpush3.bf16.msra.mxu1 %v3881_v55  ;;  %v3931_v55 = vld [vmem:[%s4927_s1 + $0x648] sm:$0xff]  }
  0x97   :  { %3555 = vmatprep.subr.bf16.mxu1 %v3883_v57  ;;  %v3933_v57 = vld [vmem:[%s4927_s1 + $0x608] sm:$0xff]  }
  0x98   :  { %3534 = vmatpush3.bf16.msra.mxu0 %v3884_v58  ;;  %v3934_v58 = vld [vmem:[%s4927_s1 + $0x688] sm:$0xff]  }
  0x99   :  { %3535 = vmatprep.subr.bf16.mxu0 %v3886_v60  ;;  %v3936_v60 = vld [vmem:[%s4927_s1 + $0x6d0] sm:$0xff]  }
  0x9a   :  { %3556 = vmatpush3.bf16.msra.mxu1 %v3885_v59  ;;  %v3935_v59 = vld [vmem:[%s4927_s1 + $0x650] sm:$0xff]  }
  0x9b   :  { %3557 = vmatprep.subr.bf16.mxu1 %v3887_v62  ;;  %v3938_v62 = vld [vmem:[%s4927_s1 + $0x690] sm:$0xff]  }
  0x9c   :  { %3536 = vmatpush3.bf16.msra.mxu0 %v3888_v1  ;;  %v3941_v1 = vld [vmem:[%s4927_s1 + $0x618] sm:$0xff]  }
  0x9d   :  { %3537 = vmatprep.subr.bf16.mxu0 %v3890_v5  ;;  %v3945_v5 = vld [vmem:[%s4927_s1 + $0x620] sm:$0xff]  }
  0x9e   :  { %3558 = vmatpush3.bf16.msra.mxu1 %v3889_v2  ;;  %v3942_v2 = vld [vmem:[%s4927_s1 + $0x698] sm:$0xff]  }
  0x9f   :  { %3559 = vmatprep.subr.bf16.mxu1 %v3891_v6  ;;  %v3946_v6 = vld [vmem:[%s4927_s1 + $0x6a0] sm:$0xff]  }
  0xa0   :  { %3538 = vmatpush3.bf16.msra.mxu0 %v3892_v9  ;;  %v3949_v9 = vld [vmem:[%s4927_s1 + $0x628] sm:$0xff]  }
  0xa1   :  { %3567 = vmatprep.subr.bf16.mxu0 %v3894_v13  ;;  %v3952_v13 = vld [vmem:[%s4927_s1 + $0x6f0] sm:$0xff]  }
  0xa2   :  { %3560 = vmatpush3.bf16.msra.mxu1 %v3893_v10  ;;  %v3950_v10 = vld [vmem:[%s4927_s1 + $0x6a8] sm:$0xff]  }
  0xa3   :  { %2666 = vmatmul.mubr.bf16.vlgmr.msra.gmra.mrb[16].mxu0 %v670_v12  ;;  %3589 = vmatprep.subr.bf16.mxu1 %v3895_v14  ;;  %v25_v12 = vld [vmem:[%s4926_s0 + $0x18] sm:$0xff] }
  0xa4   :  { %3568 = vmatpush3.bf16.msra.mxu0 %v3896_v16  ;;  %2745 = vmatprep.mubr.bf16.mxu0 %v691_v15  ;;  %v703_v14 = vrot.slane %v25_v12, %v4163_v41  ;;  %v696_v15 = vcombine.high %v25_v12, %v25_v12  ;;  %v3953_v16 = vld [vmem:[%s4927_s1 + $0x630] sm:$0xff]  }
  0xa5   :  { %2706 = vmatmul.mubr.bf16.vlgmr.msra.gmra.mrb[16].mxu1 %v692_v18  ;;  %3569 = vmatprep.subr.bf16.mxu0 %v3898_v19 }
  0xa6   :  { %3590 = vmatpush3.bf16.msra.mxu1 %v3897_v17  ;;  %2785 = vmatprep.mubr.bf16.mxu1 %v695_v21  ;;  %v3955_v17 = vld [vmem:[%s4927_s1 + $0x678] sm:$0xff]   ;;  %v711_v18 = vcombine.high %v703_v14, %v703_v14  ;;  %v4767_v19 = vrot.slane %v696_v15, %v4163_v41 }
  0xa7   :  { %3591 = vmatprep.subr.bf16.mxu1 %v3899_v20  ;;  %v3954_v20 = vld [vmem:[%s4927_s1 + $0x6b0] sm:$0xff]   ;;  %v3956_v21 = vld [vmem:[%s4927_s1 + $0x6f8] sm:$0xff]  }
  0xa8   :  { %3570 = vmatpush3.bf16.msra.mxu0 %v3900_v22  ;;  %v733_v22 = vrot.slane %v711_v18, %v4163_v41  ;;  %v726_v12 = vrot.slane %v4767_v19, %v4163_v41 }
  0xa9   :  { %3571 = vmatprep.subr.bf16.mxu0 %v3902_v24  ;;  %v3957_v24 = vld [vmem:[%s4927_s1 + $0x638] sm:$0xff]  }
  0xaa   :  { %3592 = vmatpush3.bf16.msra.mxu1 %v3901_v23  ;;  %v712_v23 = vcombine.high %v4767_v19, %v4767_v19 }
  0xab   :  { %3593 = vmatprep.subr.bf16.mxu1 %v3903_v25  ;;  %v743_v25 = vcombine.high %v733_v22, %v733_v22 }
  0xac   :  { %3572 = vmatpush3.bf16.msra.mxu0 %v3904_v26  ;;  %v719_v26 = vrot.slane %v703_v14, %v4163_v41 }
  0xad   :  { %3573 = vmatprep.subr.bf16.mxu0 %v3906_v28  ;;  %v3958_v28 = vld [vmem:[%s4927_s1 + $0x6b8] sm:$0xff]  }
  0xae   :  { %3594 = vmatpush3.bf16.msra.mxu1 %v3905_v27  ;;  %v3959_v27 = vld [vmem:[%s4927_s1 + $0x740] sm:$0xff]  }
  0xaf   :  { %3595 = vmatprep.subr.bf16.mxu1 %v3907_v29  ;;  %v740_v29 = vrot.slane %v712_v23, %v4163_v41 }
  0xb0   :  { %3574 = vmatpush3.bf16.msra.mxu0 %v3908_v30  ;;  %v3960_v30 = vld [vmem:[%s4927_s1 + $0x7c0] sm:$0xff]  }
  0xb1   :  { %3575 = vmatprep.subr.bf16.mxu0 %v3910_v32  ;;  %v741_v32 = vcombine.high %v719_v26, %v719_v26 }
  0xb2   :  { %3596 = vmatpush3.bf16.msra.mxu1 %v3909_v31  ;;  %v3961_v31 = vld [vmem:[%s4927_s1 + $0x700] sm:$0xff]  }
  0xb3   :  { %3597 = vmatprep.subr.bf16.mxu1 %v3911_v33  ;;  %v3963_v33 = vld [vmem:[%s4927_s1 + $0x748] sm:$0xff]  }
  0xb4   :  { %3576 = vmatpush3.bf16.msra.mxu0 %v3912_v34  ;;  %v3962_v34 = vld [vmem:[%s4927_s1 + $0x780] sm:$0xff]  }
  0xb5   :  { %3577 = vmatprep.subr.bf16.mxu0 %v3914_v36  ;;  %v3964_v36 = vld [vmem:[%s4927_s1 + $0x7c8] sm:$0xff]  }
  0xb6   :  { %3598 = vmatpush3.bf16.msra.mxu1 %v3913_v35  ;;  %v744_v35 = vcombine.high %v740_v29, %v740_v29 }
  0xb7   :  { %3599 = vmatprep.subr.bf16.mxu1 %v3915_v37  ;;  %v3965_v37 = vld [vmem:[%s4927_s1 + $0x708] sm:$0xff]  }
  0xb8   :  { %3578 = vmatpush3.bf16.msra.mxu0 %v3916_v38  ;;  %v3967_v38 = vld [vmem:[%s4927_s1 + $0x750] sm:$0xff]  }
  0xb9   :  { %3579 = vmatprep.subr.bf16.mxu0 %v3918_v40  ;;  %v3968_v40 = vld [vmem:[%s4927_s1 + $0x7d0] sm:$0xff]  }
  0xba   :  { %3600 = vmatpush3.bf16.msra.mxu1 %v3917_v39  ;;  %v3966_v39 = vld [vmem:[%s4927_s1 + $0x788] sm:$0xff]  }
  0xbb   :  { %3601 = vmatprep.subr.bf16.mxu1 %v3919_v42  ;;  %v3969_v42 = vld [vmem:[%s4927_s1 + $0x710] sm:$0xff]  }
  0xbc   :  { %3580 = vmatpush3.bf16.msra.mxu0 %v3920_v43  ;;  %v3971_v43 = vld [vmem:[%s4927_s1 + $0x758] sm:$0xff]  }
  0xbd   :  { %3581 = vmatprep.subr.bf16.mxu0 %v3922_v45  ;;  %v3972_v45 = vld [vmem:[%s4927_s1 + $0x7d8] sm:$0xff]  }
  0xbe   :  { %3602 = vmatpush3.bf16.msra.mxu1 %v3921_v44  ;;  %v3970_v44 = vld [vmem:[%s4927_s1 + $0x790] sm:$0xff]  }
  0xbf   :  { %3603 = vmatprep.subr.bf16.mxu1 %v3923_v46  ;;  %v3973_v46 = vld [vmem:[%s4927_s1 + $0x718] sm:$0xff]  }
  0xc0   :  { %3582 = vmatpush3.bf16.msra.mxu0 %v3924_v47  ;;  %v3974_v47 = vld [vmem:[%s4927_s1 + $0x798] sm:$0xff]  }
  0xc1   :  { %3611 = vmatprep.subr.bf16.mxu0 %v3927_v50  ;;  %v3977_v50 = vld [vmem:[%s4927_s1 + $0x720] sm:$0xff]  }
  0xc2   :  { %3604 = vmatpush3.bf16.msra.mxu1 %v3925_v48  ;;  %v3975_v48 = vld [vmem:[%s4927_s1 + $0x760] sm:$0xff]  }
  0xc3   :  { %2746 = vmatmul.mubr.bf16.vlgmr.msra.gmra.mrb[20].mxu0 %v677_v49  ;;  %3633 = vmatprep.subr.bf16.mxu1 %v3928_v51  ;;  %v3976_v49 = vld [vmem:[%s4927_s1 + $0x7e0] sm:$0xff]  }
  0xc4   :  { %3612 = vmatpush3.bf16.msra.mxu0 %v3929_v52  ;;  %2825 = vmatprep.mubr.bf16.mxu0 %v733_v22  ;;  %v3978_v51 = vld [vmem:[%s4927_s1 + $0x7a0] sm:$0xff]   ;;  %v3979_v52 = vld [vmem:[%s4927_s1 + $0x768] sm:$0xff]  }
  0xc5   :  { %2786 = vmatmul.mubr.bf16.vlgmr.msra.gmra.mrb[20].mxu1 %v693_v54  ;;  %3613 = vmatprep.subr.bf16.mxu0 %v3931_v55  ;;  %v3981_v54 = vld [vmem:[%s4927_s1 + $0x728] sm:$0xff]  }
  0xc6   :  { %3634 = vmatpush3.bf16.msra.mxu1 %v3930_v53  ;;  %2865 = vmatprep.mubr.bf16.mxu1 %v743_v25  ;;  %v3980_v53 = vld [vmem:[%s4927_s1 + $0x7e8] sm:$0xff]  }
  0xc7   :  { %3635 = vmatprep.subr.bf16.mxu1 %v3932_v56  ;;  %v3982_v55 = vld [vmem:[%s4927_s1 + $0x7a8] sm:$0xff]   ;;  %v3983_v56 = vld [vmem:[%s4927_s1 + $0x770] sm:$0xff]  }
  0xc8   :  { %3614 = vmatpush3.bf16.msra.mxu0 %v3933_v57  ;;  %v3081_v57 = vld [vmem:[%s4928_s2] ss:$0 sm:$0xff] }
  0xc9   :  { %3615 = vmatprep.subr.bf16.mxu0 %v3935_v59 }
  0xca   :  { %3636 = vmatpush3.bf16.msra.mxu1 %v3934_v58  ;;  %v3984_v58 = vld [vmem:[%s4927_s1 + $0x7f0] sm:$0xff]  }
  0xcb   :  { %3637 = vmatprep.subr.bf16.mxu1 %v3936_v60  ;;  %v3985_v60 = vld [vmem:[%s4927_s1 + $0x730] sm:$0xff]  }
  0xcc   :  { %3616 = vmatpush3.bf16.msra.mxu0 %v3937_v61 }
  0xcd   :  { %3617 = vmatprep.subr.bf16.mxu0 %v3939_v63 }
  0xce   :  { %3638 = vmatpush3.bf16.msra.mxu1 %v3938_v62  ;;  %v3987_v62 = vld [vmem:[%s4927_s1 + $0x778] sm:$0xff]  }
  0xcf   :  { %3639 = vmatprep.subr.bf16.mxu1 %v3940_v0 }
  0xd0   :  { %3618 = vmatpush3.bf16.msra.mxu0 %v3941_v1 }
  0xd1   :  { %3619 = vmatprep.subr.bf16.mxu0 %v3943_v3 }
  0xd2   :  { %3640 = vmatpush3.bf16.msra.mxu1 %v3942_v2  ;;  %v3986_v2 = vld [vmem:[%s4927_s1 + $0x7b0] sm:$0xff]  }
  0xd3   :  { %3641 = vmatprep.subr.bf16.mxu1 %v3944_v4 }
  0xd4   :  { %3620 = vmatpush3.bf16.msra.mxu0 %v3945_v5 }
  0xd5   :  { %3621 = vmatprep.subr.bf16.mxu0 %v3947_v7 }
  0xd6   :  { %3642 = vmatpush3.bf16.msra.mxu1 %v3946_v6 }
  0xd7   :  { %3643 = vmatprep.subr.bf16.mxu1 %v3948_v8  ;;  %v3988_v8 = vld [vmem:[%s4927_s1 + $0x7f8] sm:$0xff]  }
  0xd8   :  { %3622 = vmatpush3.bf16.msra.mxu0 %v3949_v9 }
  0xd9   :  { %3623 = vmatprep.subr.bf16.mxu0 %v3951_v11 }
  0xda   :  { %3644 = vmatpush3.bf16.msra.mxu1 %v3950_v10  ;;  %v3989_v10 = vld [vmem:[%s4927_s1 + $0x738] sm:$0xff]  }
  0xdb   :  { %3645 = vmatprep.subr.bf16.mxu1 %v3952_v13 }
  0xdc   :  { %3624 = vmatpush3.bf16.msra.mxu0 %v3953_v16 }
  0xdd   :  { %3625 = vmatprep.subr.bf16.mxu0 %v3955_v17 }
  0xde   :  { %3646 = vmatpush3.bf16.msra.mxu1 %v3954_v20 }
  0xdf   :  { %3647 = vmatprep.subr.bf16.mxu1 %v3956_v21 }
  0xe0   :  { %3626 = vmatpush3.bf16.msra.mxu0 %v3957_v24 }
  0xe1   :  { %3655 = vmatprep.subr.bf16.mxu0 %v3959_v27 }
  0xe2   :  { %3648 = vmatpush3.bf16.msra.mxu1 %v3958_v28 }
  0xe3   :  { %2826 = vmatmul.mubr.bf16.vlgmr.msra.gmra.mrb[24].mxu0 %v719_v26  ;;  %3677 = vmatprep.subr.bf16.mxu1 %v3960_v30 }
  0xe4   :  { %3656 = vmatpush3.bf16.msra.mxu0 %v3961_v31  ;;  %2905 = vmatprep.mubr.bf16.mxu0 %v740_v29 }
  0xe5   :  { %2866 = vmatmul.mubr.bf16.vlgmr.msra.gmra.mrb[24].mxu1 %v741_v32  ;;  %3657 = vmatprep.subr.bf16.mxu0 %v3963_v33 }
  0xe6   :  { %3678 = vmatpush3.bf16.msra.mxu1 %v3962_v34  ;;  %2945 = vmatprep.mubr.bf16.mxu1 %v744_v35 }
  0xe7   :  { %3679 = vmatprep.subr.bf16.mxu1 %v3964_v36 }
  0xe8   :  { %3658 = vmatpush3.bf16.msra.mxu0 %v3965_v37 }
  0xe9   :  { %3659 = vmatprep.subr.bf16.mxu0 %v3967_v38 }
  0xea   :  { %3680 = vmatpush3.bf16.msra.mxu1 %v3966_v39 }
  0xeb   :  { %3681 = vmatprep.subr.bf16.mxu1 %v3968_v40 }
  0xec   :  { %3660 = vmatpush3.bf16.msra.mxu0 %v3969_v42 }
  0xed   :  { %3661 = vmatprep.subr.bf16.mxu0 %v3971_v43 }
  0xee   :  { %3682 = vmatpush3.bf16.msra.mxu1 %v3970_v44 }
  0xef   :  { %3683 = vmatprep.subr.bf16.mxu1 %v3972_v45 }
  0xf0   :  { %3662 = vmatpush3.bf16.msra.mxu0 %v3973_v46 }
  0xf1   :  { %3663 = vmatprep.subr.bf16.mxu0 %v3975_v48 }
  0xf2   :  { %3684 = vmatpush3.bf16.msra.mxu1 %v3974_v47 }
  0xf3   :  { %3685 = vmatprep.subr.bf16.mxu1 %v3976_v49 }
  0xf4   :  { %3664 = vmatpush3.bf16.msra.mxu0 %v3977_v50 }
  0xf5   :  { %3665 = vmatprep.subr.bf16.mxu0 %v3979_v52 }
  0xf6   :  { %3686 = vmatpush3.bf16.msra.mxu1 %v3978_v51  ;;  %v3363_v59 = vpop.f32.mrb[0].mxu0 }
  0xf7   :  { %v3364_v61 = vpop.f32.mrb[1].mxu0  ;;  %3687 = vmatprep.subr.bf16.mxu1 %v3980_v53  ;;  %v3385_v63 = vpop.f32.mrb[0].mxu1 }
  0xf8   :  { %v3365_v0 = vadd.f32 %v3364_v61, %v3363_v59  ;;  %v3366_v1 = vpop.f32.mrb[2].mxu0  ;;  %3666 = vmatpush3.bf16.msra.mxu0 %v3981_v54  ;;  %v3386_v3 = vpop.f32.mrb[1].mxu1 }
  0xf9   :  { %v3367_v4 = vpop.f32.mrb[3].mxu0  ;;  %3667 = vmatprep.subr.bf16.mxu0 %v3983_v56  ;;  %v3387_v6 = vadd.f32 %v3386_v3, %v3385_v63  ;;  %v3388_v7 = vpop.f32.mrb[2].mxu1 }
  0xfa   :  { %v2348_v5 = vadd.f32 %v3365_v0, %v3081_v57  ;;  %3688 = vmatpush3.bf16.msra.mxu1 %v3982_v55  ;;  %v3389_v9 = vpop.f32.mrb[3].mxu1 }
  0xfb   :  { %3689 = vmatprep.subr.bf16.mxu1 %v3984_v58 }
  0xfc   :  { %v2388_v11 = vadd.f32 %v3387_v6, %v2348_v5  ;;  %3668 = vmatpush3.bf16.msra.mxu0 %v3985_v60 }
  0xfd   :  { %3669 = vmatprep.subr.bf16.mxu0 %v3987_v62 }
  0xfe   :  { %10 = vsyncpa [#allocation3], 0  ;;  %3690 = vmatpush3.bf16.msra.mxu1 %v3986_v2  ;;  %v3990_v13 = vld [vmem:[%s4927_s1 + $0x7b8] sm:$0xff]   ;;  %v742_v14 = vcombine.high %v726_v12, %v726_v12  ;;  %v3992_v38 = vld [vmem:[%s4929_s3] sm:$0xff]   ;;  %v4025_v39 = vmov 0.0   ;;  %vm4026_vm0 = vmmov 0  }
  0xff   :  { %3691 = vmatprep.subr.bf16.mxu1 %v3988_v8  ;;  %v3993_v40 = vld [vmem:[%s4929_s3 + $0x8] sm:$0xff]   ;;  %v3994_v42 = vld [vmem:[%s4929_s3 + $0x10] sm:$0xff]   ;;  %v3995_v43 = vld [vmem:[%s4929_s3 + $0x18] sm:$0xff]   ;;  %s4027_s26 = smov [#allocation2]  }
 0x100   :  { %3670 = vmatpush3.bf16.msra.mxu0 %v3989_v10  ;;  %v3996_v44 = vld [vmem:[%s4929_s3 + $0x20] sm:$0xff]   ;;  %v3997_v47 = vld [vmem:[%s4929_s3 + $0x28] sm:$0xff]   ;;  %v3998_v57 = vld [vmem:[%s4929_s3 + $0x30] sm:$0xff]   ;;  %s3073_s27 = sshll.u32 %s4027_s26, 4  ;;  %s3074_s27 = int_to_ptr.vmem [resolvable:$true] %s3073_s27 }
 0x101   :  { %3708 = vmatprep.subr.bf16.mxu0 %v4025_v39  ;;  %v3999_v59 = vld [vmem:[%s4929_s3 + $0x38] sm:$0xff]   ;;  %s4000_s28 = scalar_lea.vmem %s3074_s27, 32  ;;  %p4005_p1 = scmp.lt.s32.totalorder %s3074_s27, %s3074_s27 }
 0x102   :  { %3692 = vmatpush3.bf16.msra.mxu1 %v3990_v13  ;;  %p4001_p0 = scmp.ne.s32.totalorder %s3074_s27, %s4000_s28  ;;  %p4006_p2 = scmp.lt.s32.totalorder %s4000_s28, %s4000_s28 }
 0x103   :  { %2906 = vmatmul.mubr.bf16.vlgmr.msra.gmra.mrb[28].mxu0 %v726_v12 }
 0x104   :  { %3709 = vmatpush3.bf16.msra.mxu0 %v3992_v38  ;;  %3724 = vmatprep.mubr.msk.bf16.mxu0 %vm4026_vm0, %v4025_v39  ;;  %p4007_p3 = por %p4006_p2, %p4005_p1 }
 0x105   :  { %2946 = vmatmul.mubr.bf16.vlgmr.msra.gmra.mrb[28].mxu1 %v742_v14  ;;  %3710 = vmatprep.subr.bf16.mxu0 %v4025_v39 }
 0x106   :  { %p4008_p4 = pnand %p4007_p3, %p4001_p0 }
 0x108   :  { %3711 = vmatpush3.bf16.msra.mxu0 %v3993_v40 }
 0x109   :  { %3712 = vmatprep.subr.bf16.mxu0 %v4025_v39 }
 0x10c   :  { %3713 = vmatpush3.bf16.msra.mxu0 %v3994_v42 }
 0x10d   :  { %3714 = vmatprep.subr.bf16.mxu0 %v4025_v39 }
 0x110   :  { %3715 = vmatpush3.bf16.msra.mxu0 %v3995_v43 }
 0x111   :  { %3716 = vmatprep.subr.bf16.mxu0 %v4025_v39 }
 0x114   :  { %3717 = vmatpush3.bf16.msra.mxu0 %v3996_v44 }
 0x115   :  { %3718 = vmatprep.subr.bf16.mxu0 %v4025_v39 }
 0x116   :  { %v3407_v15 = vpop.f32.mrb[4].mxu0 }
 0x117   :  { %v3408_v16 = vpop.f32.mrb[5].mxu0  ;;  %v3429_v17 = vpop.f32.mrb[4].mxu1 }
 0x118   :  { %v3409_v18 = vadd.f32 %v3408_v16, %v3407_v15  ;;  %v3410_v20 = vpop.f32.mrb[6].mxu0  ;;  %v3430_v21 = vpop.f32.mrb[5].mxu1  ;;  %3719 = vmatpush3.bf16.msra.mxu0 %v3997_v47 }
 0x119   :  { %v3411_v22 = vpop.f32.mrb[7].mxu0  ;;  %v3431_v19 = vadd.f32 %v3430_v21, %v3429_v17  ;;  %v3432_v23 = vpop.f32.mrb[6].mxu1  ;;  %3720 = vmatprep.subr.bf16.mxu0 %v4025_v39 }
 0x11a   :  { %v2428_v41 = vadd.f32 %v3409_v18, %v2388_v11  ;;  %v3433_v24 = vpop.f32.mrb[7].mxu1 }
 0x11c   :  { %v2468_v25 = vadd.f32 %v3431_v19, %v2428_v41  ;;  %3721 = vmatpush3.bf16.msra.mxu0 %v3998_v57 }
 0x11d   :  { %3722 = vmatprep.subr.bf16.mxu0 %v4025_v39 }
 0x120   :  { %3723 = vmatpush3.bf16.msra.mxu0 %v3999_v59 }
 0x136   :  { %v3451_v26 = vpop.f32.mrb[8].mxu0 }
 0x137   :  { %v3452_v27 = vpop.f32.mrb[9].mxu0 }
 0x138   :  { %v3473_v28 = vpop.f32.mrb[8].mxu1  ;;  %v3453_v29 = vadd.f32 %v3452_v27, %v3451_v26  ;;  %v3454_v30 = vpop.f32.mrb[10].mxu0 }
 0x139   :  { %v3474_v31 = vpop.f32.mrb[9].mxu1  ;;  %v3455_v32 = vpop.f32.mrb[11].mxu0 }
 0x13a   :  { %v2508_v33 = vadd.f32 %v3453_v29, %v2468_v25  ;;  %v3475_v34 = vadd.f32 %v3474_v31, %v3473_v28  ;;  %v3476_v35 = vpop.f32.mrb[10].mxu1 }
 0x13b   :  { %v3477_v36 = vpop.f32.mrb[11].mxu1 }
 0x13c   :  { %v2548_v37 = vadd.f32 %v3475_v34, %v2508_v33 }
 0x156   :  { %v3495_v45 = vpop.f32.mrb[12].mxu0 }
 0x157   :  { %v3496_v46 = vpop.f32.mrb[13].mxu0 }
 0x158   :  { %v3517_v48 = vpop.f32.mrb[12].mxu1  ;;  %v3497_v49 = vadd.f32 %v3496_v46, %v3495_v45  ;;  %v3498_v50 = vpop.f32.mrb[14].mxu0  ;;  %v3338_v46 = vld [vmem:[%s4930_s4] ss:$0 sm:$0xff] }
 0x159   :  { %v3518_v51 = vpop.f32.mrb[13].mxu1  ;;  %v3499_v52 = vpop.f32.mrb[15].mxu0 }
 0x15a   :  { %v2588_v53 = vadd.f32 %v3497_v49, %v2548_v37  ;;  %v3519_v54 = vadd.f32 %v3518_v51, %v3517_v48  ;;  %v3520_v55 = vpop.f32.mrb[14].mxu1 }
 0x15b   :  { %v3521_v56 = vpop.f32.mrb[15].mxu1 }
 0x15c   :  { %v2628_v58 = vadd.f32 %v3519_v54, %v2588_v53 }
 0x176   :  { %v3539_v60 = vpop.f32.mrb[16].mxu0 }
 0x177   :  { %v3540_v61 = vpop.f32.mrb[17].mxu0 }
 0x178   :  { %v3561_v62 = vpop.f32.mrb[16].mxu1  ;;  %v3541_v63 = vadd.f32 %v3540_v61, %v3539_v60  ;;  %v3542_v0 = vpop.f32.mrb[18].mxu0 }
 0x179   :  { %v3562_v1 = vpop.f32.mrb[17].mxu1  ;;  %v3543_v2 = vpop.f32.mrb[19].mxu0 }
 0x17a   :  { %v2668_v3 = vadd.f32 %v3541_v63, %v2628_v58  ;;  %v3563_v4 = vadd.f32 %v3562_v1, %v3561_v62  ;;  %v3564_v5 = vpop.f32.mrb[18].mxu1 }
 0x17b   :  { %v3565_v6 = vpop.f32.mrb[19].mxu1 }
 0x17c   :  { %v2708_v7 = vadd.f32 %v3563_v4, %v2668_v3 }
 0x196   :  { %v3583_v8 = vpop.f32.mrb[20].mxu0 }
 0x197   :  { %v3584_v9 = vpop.f32.mrb[21].mxu0 }
 0x198   :  { %v3605_v10 = vpop.f32.mrb[20].mxu1  ;;  %v3585_v11 = vadd.f32 %v3584_v9, %v3583_v8  ;;  %v3586_v12 = vpop.f32.mrb[22].mxu0 }
 0x199   :  { %v3606_v13 = vpop.f32.mrb[21].mxu1  ;;  %v3587_v14 = vpop.f32.mrb[23].mxu0 }
 0x19a   :  { %v2748_v15 = vadd.f32 %v3585_v11, %v2708_v7  ;;  %v3607_v16 = vadd.f32 %v3606_v13, %v3605_v10  ;;  %v3608_v17 = vpop.f32.mrb[22].mxu1 }
 0x19b   :  { %v3609_v18 = vpop.f32.mrb[23].mxu1 }
 0x19c   :  { %v2788_v20 = vadd.f32 %v3607_v16, %v2748_v15 }
 0x1b6   :  { %v3627_v21 = vpop.f32.mrb[24].mxu0 }
 0x1b7   :  { %v3628_v22 = vpop.f32.mrb[25].mxu0 }
 0x1b8   :  { %v3649_v41 = vpop.f32.mrb[24].mxu1  ;;  %v3629_v19 = vadd.f32 %v3628_v22, %v3627_v21  ;;  %v3630_v23 = vpop.f32.mrb[26].mxu0 }
 0x1b9   :  { %v3650_v24 = vpop.f32.mrb[25].mxu1  ;;  %v3631_v25 = vpop.f32.mrb[27].mxu0 }
 0x1ba   :  { %v2828_v26 = vadd.f32 %v3629_v19, %v2788_v20  ;;  %v3651_v27 = vadd.f32 %v3650_v24, %v3649_v41  ;;  %v3652_v28 = vpop.f32.mrb[26].mxu1 }
 0x1bb   :  { %v3653_v29 = vpop.f32.mrb[27].mxu1 }
 0x1bc   :  { %v2868_v30 = vadd.f32 %v3651_v27, %v2828_v26 }
 0x1d6   :  { %v3671_v31 = vpop.f32.mrb[28].mxu0 }
 0x1d7   :  { %v3672_v32 = vpop.f32.mrb[29].mxu0 }
 0x1d8   :  { %v3693_v33 = vpop.f32.mrb[28].mxu1  ;;  %v3673_v34 = vadd.f32 %v3672_v32, %v3671_v31  ;;  %v3674_v35 = vpop.f32.mrb[30].mxu0 }
 0x1d9   :  { %v3694_v36 = vpop.f32.mrb[29].mxu1  ;;  %v3675_v37 = vpop.f32.mrb[31].mxu0 }
 0x1da   :  { %v2908_v38 = vadd.f32 %v3673_v34, %v2868_v30  ;;  %v3695_v39 = vadd.f32 %v3694_v36, %v3693_v33  ;;  %v3696_v40 = vpop.f32.mrb[30].mxu1 }
 0x1db   :  { %v3697_v42 = vpop.f32.mrb[31].mxu1 }
 0x1dc   :  { %v2948_v43 = vadd.f32 %v3695_v39, %v2908_v38 }
 0x1de   :  { %v2953_v44 = vmax.f32 %v2948_v43, 0.0 }
 0x1e0   :  { %v2954_v45 = vpack.c.bf16 %v2953_v44, %v2953_v44 }
 0x1e2   :  { %3725 = vmatmul.mubr.bf16.vlgmr.msra.gmra.mrb[32].mxu0 %v2954_v45 }
 0x2b5   :  { %v3060_v47 = vpop.f32.mrb[32].mxu0 }
 0x2b6   :  { %v3061_v48 = vadd.f32 %v3338_v46, %v3060_v47  ;;  %v3726_v49 = vpop.f32.mrb[33].mxu0 }
 0x2b7   :  { %v3063_v50 = vpop.f32.mrb[34].mxu0 }
 0x2b8   :  { %3066 = vst [vmem:[#allocation2] sm:$0x3] %v3061_v48  ;;  %v3727_v51 = vpop.f32.mrb[35].mxu0 }
 0x2b9   :  { %4011 = shalt.err (!%p4008_p4)
}
 0x2ba   :  { %s4012_s4 = scalar_lea.hbm %s4931_s5, 32 }
 0x2bb   :  { %p4013_p5 = scmp.ne.s32.totalorder %s4931_s5, %s4012_s4  ;;  %p4016_p6 = scmp.lt.u32.totalorder %s4012_s4, %s4931_s5 }
 0x2bd   :  { %p4018_p7 = pnand %p4016_p6, %p4013_p5 }
 0x2bf   :  { %4021 = shalt.err (!%p4018_p7)
}
 0x2c0   :  { %3076 = dma.vmem_to_hbm [thread:$0]  %s3074_s27, 32, %s4931_s5, [#allocation3]  }
 0x2c1   :  { %4022 = dma.done.wait [#allocation3], 32  }
 0x2c2   :  { %4023 = vsyncadd [#allocation3], 4294967264 }
 0x2c3   :  { %3080 = vsyncpa [#allocation3], 1 }

// kernel: cnn_forward.3
= control target key start
LH: loop header
LB: loop body
LE: loop exit
PB: predicated region body
PF: predicated region fallthrough
CT: control target
= control target key end

     0   :  { %s13359_s15 = smov 0   ;;  %s16063_s0 = inlined_call_operand.vmem [shape: bf16[2,34,17,3], index: 0, kind: input, shape index: {}]   ;;  %s16064_s1 = inlined_call_operand.vmem [shape: bf16[2,34,17,3], index: 1, kind: input, shape index: {}]   ;;  %s16065_s2 = inlined_call_operand.vmem [shape: bf16[9,3,32], index: 2, kind: input, shape index: {}]   ;;  %s16066_s3 = inlined_call_operand.vmem [shape: f32[1,32], index: 3, kind: input, shape index: {}]   ;;  %s16067_s4 = inlined_call_operand.vmem [shape: bf16[2,16,16,32], index: 4, kind: output, shape index: {}]  }
   0x1 LB: > { %s9552_s16 = sadd.s32 4294967295, %s13331_s15   ;;  %p9556_p0 = scmp.ge.s32.totalorder %s13331_s15, 1  ;;  %s13331_s15 = sphi %s13359_s15, %s14_s15  }
   0x2   : > { %p172_p1 = scmp.lt.s32.totalorder %s13331_s15, 3 }
   0x4   : > { %p173_p2 = pnand %p9556_p0, %p172_p1 }
   0x6   : > { %176 = sbr.rel (%p173_p2) target bundleno = 1426 (0x592), region = 36 }
   0xd   : > { %v9561_v0 = vld [vmem:[%s16065_s2 + $0x2] sm:$0x3]  ;;  %vm683_vm0 = vcmask 1040384   ;;  %vm684_vm1 = vcmask 1041408   ;;  %p203_p3 = scmp.lt.s32.totalorder %s9552_s16, 1  ;;  %v13333_v1 = vmov 65535  }
   0xe   : > { %v685_v2 = vsel %vm683_vm0, 4294967295, %v13333_v1  ;;  %v423_v4 = vld [vmem:[%s16065_s2] sm:$0x3]  ;;  %vm586_vm2 = vcmask 23552   ;;  %vm1527_vm3 = vsmask.f32 3328 }
   0xf   : > { %v13370_v3 = vsel %vm684_vm1, %v685_v2, 0  ;;  %s16699_s16 = smov (!%p203_p3, %s9552_s16), 1  ;;  %vm1528_vm4 = vsmask.f32 7440  ;;  %vm9452_vm6 = vcmask 257024  }
  0x10   : > { %v688_v5 = vand.u32 %v9561_v0, %v13370_v3  ;;  %v13379_v6 = vand.u32 %v13370_v3, %v423_v4  ;;  %s13155_s21 = smul.u32 408, %s16699_s16  ;;  %vm13436_vm5 = vmor %vm1527_vm3, %vm1528_vm4  ;;  %s10316_s20 = sshll.u32 %s16699_s16, 7 }
  0x11   : > { %s15826_s23 = scalar_lea.vmem %s16067_s4, %s10316_s20 }
  0x12   : > { %10943 = vmatprep.subr.bf16.mxu0 %v688_v5  ;;  %11075 = vmatprep.subr.bf16.mxu1 %v688_v5  ;;  %s13385_s24 = scalar_lea.vmem %s16064_s1, %s13155_s21  ;;  %s13401_s27 = scalar_lea.vmem %s16063_s0, %s13155_s21 }
  0x13   : > { %10944 = vmatpush3.bf16.msra.mxu0 %v688_v5  ;;  %11076 = vmatpush3.bf16.msra.mxu1 %v688_v5  ;;  %v321_v7 = vld [vmem:[%s13385_s24] sm:$0xf]  ;;  %v322_v8 = vld [vmem:[%s13385_s24 + $0x4] sm:$0xf]  ;;  %v324_v9 = vld [vmem:[%s13385_s24 + $0xc] sm:$0xf] }
  0x14   : > { %11009 = vmatprep.subr.bf16.mxu0 %v13379_v6  ;;  %11141 = vmatprep.subr.bf16.mxu1 %v13379_v6  ;;  %v13392_v10 = vcombine.low %v321_v7, %v322_v8  ;;  %v3427_v11 = vshrl.u32 %v321_v7, 16  ;;  %v3430_v12 = vshll.u32 %v321_v7, 16  ;;  %v325_v13 = vld [vmem:[%s13385_s24 + $0x10] sm:$0xf]  ;;  %v3436_v14 = vshll.u32 %v322_v8, 16 }
  0x15   : > { %v13395_v15 = vcombine.low %v324_v9, %v325_v13  ;;  %v3451_v16 = vshrl.u32 %v324_v9, 16  ;;  %v3454_v17 = vshll.u32 %v324_v9, 16  ;;  %v327_v18 = vld [vmem:[%s13385_s24 + $0x18] sm:$0xf]  ;;  %v3440_v20 = vshrl.u32 %v322_v8, 16 }
  0x16   : > { %10945 = vmatprep.mubr.msk.bf16.mxu0 %vm586_vm2, %v13392_v10  ;;  %v13405_v19 = vrot.slane %v3427_v11, 4  ;;  %v328_v21 = vld [vmem:[%s13385_s24 + $0x1c] sm:$0xf]  ;;  %v13408_v22 = vrot.slane %v3430_v12, 5  ;;  %v3460_v25 = vshll.u32 %v325_v13, 16  ;;  %v13418_v30 = vrot.slane %v3436_v14, 5 }
  0x17   : > { %10946 = vmatmul.mubr.msk.bf16.vlgmr.msra.gmra.mrb[0].mxu0 %vm586_vm2, %v13395_v15  ;;  %v3453_v23 = vrot.slane %v3451_v16, 4  ;;  %v3456_v24 = vrot.slane %v3454_v17, 5  ;;  %v13412_v26 = vcombine.low %v327_v18, %v328_v21  ;;  %v330_v27 = vld [vmem:[%s13385_s24 + $0x24] sm:$0xf]  ;;  %v331_v28 = vld [vmem:[%s13385_s24 + $0x28] sm:$0xf] }
  0x18   : > { %v219_v29 = vld [vmem:[%s13401_s27] sm:$0xf]  ;;  %11010 = vmatpush3.bf16.msra.mxu0 %v13379_v6  ;;  %v3464_v32 = vshrl.u32 %v325_v13, 16  ;;  %v220_v33 = vld [vmem:[%s13401_s27 + $0x4] sm:$0xf]  ;;  %v13422_v35 = vrot.slane %v3440_v20, 4  ;;  %v13431_v42 = vcombine.low %v330_v27, %v331_v28 }
  0x19   : > { %16323 = vst [vmem:[#allocation2_spill] sm:$0xff] %v13412_v26  ;;  %v3457_v31 = vor.u32 %v3456_v24, %v3453_v23  ;;  %v221_v34 = vld [vmem:[%s13401_s27 + $0x8] sm:$0x1]  ;;  %10949 = vmatprep.mubr.msk.bf16.mxu0 %vm586_vm2, %v13412_v26  ;;  %v1531_v36 = vshrl.u32 %v219_v29, 16  ;;  %v1534_v37 = vshll.u32 %v219_v29, 16  ;;  %v1540_v38 = vshll.u32 %v220_v33, 16 }
  0x1a   : > { %v222_v39 = vld [vmem:[%s13401_s27 + $0xc] sm:$0xf]  ;;  %v13429_v41 = vrot.slane %v3460_v25, 5  ;;  %16324 = vst [vmem:[#allocation3_spill] sm:$0xff] %v13431_v42  ;;  %v1544_v43 = vshrl.u32 %v220_v33, 16  ;;  %v1550_v49 = vshll.u32 %v221_v34, 16 }
  0x1b   : > { %v13427_v40 = vrot.slane %v3457_v31, 4  ;;  %v223_v44 = vld [vmem:[%s13401_s27 + $0x10] sm:$0xf]  ;;  %v1533_v46 = vrot.slane %v1531_v36, 4  ;;  %v1536_v47 = vrot.slane %v1534_v37, 5  ;;  %v1542_v48 = vrot.slane %v1540_v38, 5 }
  0x1c   : > { %v224_v50 = vld [vmem:[%s13401_s27 + $0x14] sm:$0x1]  ;;  %v13445_v52 = vrot.slane %v3464_v32, 4  ;;  %v1546_v53 = vrot.slane %v1544_v43, 4  ;;  %v1555_v54 = vshrl.u32 %v222_v39, 16  ;;  %v1552_v57 = vrot.slane %v1550_v49, 5 }
  0x1d   : > { %v333_v55 = vld [vmem:[%s13385_s24 + $0x30] sm:$0xf]  ;;  %v1537_v56 = vor.u32 %v1536_v47, %v1533_v46  ;;  %v1558_v58 = vshll.u32 %v222_v39, 16  ;;  %v1564_v59 = vshll.u32 %v223_v44, 16  ;;  %v334_v60 = vld [vmem:[%s13385_s24 + $0x34] sm:$0xf] }
  0x1e   : > { %v1547_v61 = vor.u32 %v1546_v53, %v1542_v48  ;;  %v1557_v62 = vrot.slane %v1555_v54, 4  ;;  %v1568_v63 = vshrl.u32 %v223_v44, 16  ;;  %v1574_v0 = vshll.u32 %v224_v50, 16  ;;  %v336_v1 = vld [vmem:[%s13385_s24 + $0x3c] sm:$0xf] }
  0x1f   : > { %10950 = vmatmul.mubr.msk.bf16.gmra.mrb[4].mxu0 %vm586_vm2, %v13431_v42  ;;  %v1538_v2 = vrot.slane %v1537_v56, 4  ;;  %v1560_v4 = vrot.slane %v1558_v58, 5  ;;  %v1566_v5 = vrot.slane %v1564_v59, 5  ;;  %v13452_v7 = vcombine.low %v333_v55, %v334_v60  ;;  %v337_v8 = vld [vmem:[%s13385_s24 + $0x40] sm:$0xf] }
  0x20   : > { %v1548_v9 = vrot.slane %v1547_v61, 4  ;;  %v1570_v11 = vrot.slane %v1568_v63, 4  ;;  %v1576_v12 = vrot.slane %v1574_v0, 5  ;;  %v13455_v13 = vcombine.low %v336_v1, %v337_v8  ;;  %v225_v14 = vld [vmem:[%s13401_s27 + $0x18] sm:$0xf] }
  0x21   : > { %v1543_v16 = vsel %vm13436_vm5, %v1538_v2, %v1542_v48  ;;  %v1561_v17 = vor.u32 %v1560_v4, %v1557_v62  ;;  %10953 = vmatprep.mubr.msk.bf16.mxu0 %vm586_vm2, %v13452_v7  ;;  %v226_v18 = vld [vmem:[%s13401_s27 + $0x1c] sm:$0xf]  ;;  %v227_v20 = vld [vmem:[%s13401_s27 + $0x20] sm:$0x1]  ;;  %v1579_v21 = vshrl.u32 %v225_v14, 16  ;;  %v1582_v23 = vshll.u32 %v225_v14, 16 }
  0x22   : > { %v1553_v24 = vsel %vm13436_vm5, %v1548_v9, %v1552_v57  ;;  %v1571_v25 = vor.u32 %v1570_v11, %v1566_v5  ;;  %v1588_v27 = vshll.u32 %v226_v18, 16  ;;  %v1592_v28 = vshrl.u32 %v226_v18, 16  ;;  %v228_v29 = vld [vmem:[%s13401_s27 + $0x24] sm:$0xf]  ;;  %v229_v36 = vld [vmem:[%s13401_s27 + $0x28] sm:$0xf] }
  0x23   : > { %v13467_v31 = vcombine.low %v1543_v16, %v1553_v24  ;;  %v1562_v32 = vrot.slane %v1561_v17, 4  ;;  %v1581_v33 = vrot.slane %v1579_v21, 4  ;;  %v1584_v34 = vrot.slane %v1582_v23, 5  ;;  %v230_v44 = vld [vmem:[%s13401_s27 + $0x2c] sm:$0x1] }
  0x24   : > { %v1572_v37 = vrot.slane %v1571_v25, 4  ;;  %v1590_v38 = vrot.slane %v1588_v27, 5  ;;  %v1594_v39 = vrot.slane %v1592_v28, 4  ;;  %v1598_v43 = vshll.u32 %v227_v20, 16  ;;  %v339_v50 = vld [vmem:[%s13385_s24 + $0x48] sm:$0xf] }
  0x25   : > { %16327 = vst [vmem:[#allocation4_spill] sm:$0xff] %v13467_v31  ;;  %11077 = vmatprep.mubr.msk.bf16.mxu1 %vm586_vm2, %v13467_v31  ;;  %v1567_v46 = vsel %vm13436_vm5, %v1562_v32, %v1566_v5  ;;  %v1585_v47 = vor.u32 %v1584_v34, %v1581_v33  ;;  %v1603_v48 = vshrl.u32 %v228_v29, 16  ;;  %v1606_v49 = vshll.u32 %v228_v29, 16  ;;  %v340_v53 = vld [vmem:[%s13385_s24 + $0x4c] sm:$0xf] }
  0x26   : > { %v1577_v54 = vsel %vm13436_vm5, %v1572_v37, %v1576_v12  ;;  %v1595_v55 = vor.u32 %v1594_v39, %v1590_v38  ;;  %v1600_v56 = vrot.slane %v1598_v43, 5  ;;  %v1612_v57 = vshll.u32 %v229_v36, 16  ;;  %v342_v58 = vld [vmem:[%s13385_s24 + $0x54] sm:$0xf]  ;;  %v343_v59 = vld [vmem:[%s13385_s24 + $0x58] sm:$0xf] }
  0x27   : > { %10954 = vmatmul.mubr.msk.bf16.gmra.mrb[8].mxu0 %vm586_vm2, %v13455_v13  ;;  %v13483_v60 = vcombine.low %v1567_v46, %v1577_v54  ;;  %v1586_v61 = vrot.slane %v1585_v47, 4  ;;  %v1605_v62 = vrot.slane %v1603_v48, 4  ;;  %v1608_v63 = vrot.slane %v1606_v49, 5  ;;  %v231_v0 = vld [vmem:[%s13401_s27 + $0x30] sm:$0xf] }
  0x28   : > { %v1596_v1 = vrot.slane %v1595_v55, 4  ;;  %v1614_v2 = vrot.slane %v1612_v57, 5  ;;  %v1616_v4 = vshrl.u32 %v229_v36, 16  ;;  %v1622_v5 = vshll.u32 %v230_v44, 16  ;;  %v232_v8 = vld [vmem:[%s13401_s27 + $0x34] sm:$0xf] }
  0x29   : > { %16328 = vst [vmem:[#allocation5_spill] sm:$0xff] %v13483_v60  ;;  %11078 = vmatmul.mubr.msk.bf16.vlgmr.msra.gmra.mrb[0].mxu1 %vm586_vm2, %v13483_v60  ;;  %v1591_v9 = vsel %vm13436_vm5, %v1586_v61, %v1590_v38  ;;  %v1609_v11 = vor.u32 %v1608_v63, %v1605_v62  ;;  %v13491_v12 = vcombine.low %v339_v50, %v340_v53  ;;  %v233_v16 = vld [vmem:[%s13401_s27 + $0x38] sm:$0x1]  ;;  %v1627_v21 = vshrl.u32 %v231_v0, 16  ;;  %v234_v23 = vld [vmem:[%s13401_s27 + $0x3c] sm:$0xf] }
  0x2a   : > { %v13493_v14 = vcombine.low %v342_v58, %v343_v59  ;;  %11142 = vmatpush3.bf16.msra.mxu1 %v13379_v6  ;;  %v1601_v17 = vsel %vm13436_vm5, %v1596_v1, %v1600_v56  ;;  %v1618_v18 = vrot.slane %v1616_v4, 4  ;;  %v1624_v20 = vrot.slane %v1622_v5, 5  ;;  %v235_v29 = vld [vmem:[%s13401_s27 + $0x40] sm:$0xf]  ;;  %v236_v36 = vld [vmem:[%s13401_s27 + $0x44] sm:$0x1] }
  0x2b   : > { %v13500_v24 = vcombine.low %v1591_v9, %v1601_v17  ;;  %v1610_v25 = vrot.slane %v1609_v11, 4  ;;  %10957 = vmatprep.mubr.msk.bf16.mxu0 %vm586_vm2, %v13491_v12  ;;  %v1630_v27 = vshll.u32 %v231_v0, 16  ;;  %v1636_v28 = vshll.u32 %v232_v8, 16  ;;  %v345_v44 = vld [vmem:[%s13385_s24 + $0x60] sm:$0xf] }
  0x2c   : > { %v1619_v32 = vor.u32 %v1618_v18, %v1614_v2  ;;  %v1629_v6 = vrot.slane %v1627_v21, 4  ;;  %v1640_v33 = vshrl.u32 %v232_v8, 16  ;;  %v1646_v34 = vshll.u32 %v233_v16, 16  ;;  %v346_v50 = vld [vmem:[%s13385_s24 + $0x64] sm:$0xf] }
  0x2d   : > { %16329 = vst [vmem:[#allocation6_spill] sm:$0xff] %v13500_v24  ;;  %11081 = vmatprep.mubr.msk.bf16.mxu1 %vm586_vm2, %v13500_v24  ;;  %v1615_v37 = vsel %vm13436_vm5, %v1610_v25, %v1614_v2  ;;  %v1632_v38 = vrot.slane %v1630_v27, 5  ;;  %v1638_v39 = vrot.slane %v1636_v28, 5  ;;  %v1651_v43 = vshrl.u32 %v234_v23, 16  ;;  %v348_v57 = vld [vmem:[%s13385_s24 + $0x6c] sm:$0xf] }
  0x2e   : > { %v1620_v46 = vrot.slane %v1619_v32, 4  ;;  %v1642_v47 = vrot.slane %v1640_v33, 4  ;;  %v1648_v48 = vrot.slane %v1646_v34, 5  ;;  %v1654_v49 = vshll.u32 %v234_v23, 16  ;;  %v349_v63 = vld [vmem:[%s13385_s24 + $0x70] sm:$0xf] }
  0x2f   : > { %10958 = vmatmul.mubr.msk.bf16.gmra.mrb[12].mxu0 %vm586_vm2, %v13493_v14  ;;  %v1633_v53 = vor.u32 %v1632_v38, %v1629_v6  ;;  %v1653_v54 = vrot.slane %v1651_v43, 4  ;;  %v1660_v55 = vshll.u32 %v235_v29, 16  ;;  %v1664_v56 = vshrl.u32 %v235_v29, 16  ;;  %v237_v0 = vld [vmem:[%s13401_s27 + $0x48] sm:$0xf] }
  0x30   : > { %v1625_v58 = vsel %vm13436_vm5, %v1620_v46, %v1624_v20  ;;  %v1643_v59 = vor.u32 %v1642_v47, %v1638_v39  ;;  %v1656_v61 = vrot.slane %v1654_v49, 5  ;;  %v1670_v62 = vshll.u32 %v236_v36, 16  ;;  %v238_v8 = vld [vmem:[%s13401_s27 + $0x4c] sm:$0xf]  ;;  %v239_v23 = vld [vmem:[%s13401_s27 + $0x50] sm:$0x1] }
  0x31   : > { %v13519_v1 = vcombine.low %v1615_v37, %v1625_v58  ;;  %v1634_v2 = vrot.slane %v1633_v53, 4  ;;  %v1662_v4 = vrot.slane %v1660_v55, 5  ;;  %v1666_v5 = vrot.slane %v1664_v56, 4  ;;  %v240_v27 = vld [vmem:[%s13401_s27 + $0x54] sm:$0xf] }
  0x32   : > { %v1644_v9 = vrot.slane %v1643_v59, 4  ;;  %v1657_v11 = vor.u32 %v1656_v61, %v1653_v54  ;;  %v1672_v16 = vrot.slane %v1670_v62, 5  ;;  %v13522_v17 = vcombine.low %v345_v44, %v346_v50  ;;  %v241_v33 = vld [vmem:[%s13401_s27 + $0x58] sm:$0xf]  ;;  %v352_v55 = vld [vmem:[%s13385_s24 + $0x7c] sm:$0xf] }
  0x33   : > { %16330 = vst [vmem:[#allocation7_spill] sm:$0xff] %v13519_v1  ;;  %11082 = vmatmul.mubr.msk.bf16.gmra.mrb[4].mxu1 %vm586_vm2, %v13519_v1  ;;  %v1639_v18 = vsel %vm13436_vm5, %v1634_v2, %v1638_v39  ;;  %v1667_v20 = vor.u32 %v1666_v5, %v1662_v4  ;;  %v13528_v21 = vcombine.low %v348_v57, %v349_v63  ;;  %v1675_v25 = vshrl.u32 %v237_v0, 16  ;;  %v242_v39 = vld [vmem:[%s13401_s27 + $0x5c] sm:$0x1]  ;;  %v354_v61 = vld [vmem:[%s13385_s24 + $0x84] sm:$0xf] }
  0x34   : > { %16331 = vst [vmem:[#allocation8_spill] sm:$0xff] %v13522_v17  ;;  %v1649_v28 = vsel %vm13436_vm5, %v1644_v9, %v1648_v48  ;;  %v1658_v29 = vrot.slane %v1657_v11, 4  ;;  %10961 = vmatprep.mubr.msk.bf16.mxu0 %vm586_vm2, %v13522_v17  ;;  %v1678_v32 = vshll.u32 %v237_v0, 16  ;;  %v1684_v6 = vshll.u32 %v238_v8, 16  ;;  %v351_v48 = vld [vmem:[%s13385_s24 + $0x78] sm:$0xf] }
  0x35   : > { %16332 = vst [vmem:[#allocation9_spill] sm:$0xff] %v13528_v21  ;;  %v13537_v34 = vcombine.low %v1639_v18, %v1649_v28  ;;  %v1668_v36 = vrot.slane %v1667_v20, 4  ;;  %v1677_v37 = vrot.slane %v1675_v25, 4  ;;  %v1688_v38 = vshrl.u32 %v238_v8, 16  ;;  %v355_v62 = vld [vmem:[%s13385_s24 + $0x88] sm:$0xf] }
  0x36   : > { %v1663_v43 = vsel %vm13436_vm5, %v1658_v29, %v1662_v4  ;;  %v1680_v44 = vrot.slane %v1678_v32, 5  ;;  %v1686_v46 = vrot.slane %v1684_v6, 5  ;;  %v1694_v47 = vshll.u32 %v239_v23, 16  ;;  %v243_v5 = vld [vmem:[%s13401_s27 + $0x60] sm:$0xf] }
  0x37   : > { %16333 = vst [vmem:[#allocation10_spill] sm:$0xff] %v13537_v34  ;;  %10962 = vmatmul.mubr.msk.bf16.gmra.mrb[16].mxu0 %vm586_vm2, %v13528_v21  ;;  %11085 = vmatprep.mubr.msk.bf16.mxu1 %vm586_vm2, %v13537_v34  ;;  %v1673_v49 = vsel %vm13436_vm5, %v1668_v36, %v1672_v16  ;;  %v1690_v50 = vrot.slane %v1688_v38, 4  ;;  %v1699_v53 = vshrl.u32 %v240_v27, 16  ;;  %v1702_v54 = vshll.u32 %v240_v27, 16  ;;  %v244_v18 = vld [vmem:[%s13401_s27 + $0x64] sm:$0xf] }
  0x38   : > { %v13550_v56 = vcombine.low %v1663_v43, %v1673_v49  ;;  %v1681_v57 = vor.u32 %v1680_v44, %v1677_v37  ;;  %v1696_v58 = vrot.slane %v1694_v47, 5  ;;  %v1708_v59 = vshll.u32 %v241_v33, 16  ;;  %v245_v32 = vld [vmem:[%s13401_s27 + $0x68] sm:$0x1]  ;;  %v246_v43 = vld [vmem:[%s13401_s27 + $0x6c] sm:$0xf] }
  0x39   : > { %v1691_v63 = vor.u32 %v1690_v50, %v1686_v46  ;;  %v1701_v0 = vrot.slane %v1699_v53, 4  ;;  %v1704_v2 = vrot.slane %v1702_v54, 5  ;;  %v1712_v4 = vshrl.u32 %v241_v33, 16  ;;  %v247_v44 = vld [vmem:[%s13401_s27 + $0x70] sm:$0xf] }
  0x3a   : > { %16334 = vst [vmem:[#allocation11_spill] sm:$0xff] %v13550_v56  ;;  %v1682_v8 = vrot.slane %v1681_v57, 4  ;;  %v1710_v9 = vrot.slane %v1708_v59, 5  ;;  %v1718_v11 = vshll.u32 %v242_v39, 16  ;;  %v13555_v16 = vcombine.low %v351_v48, %v352_v55  ;;  %v248_v50 = vld [vmem:[%s13401_s27 + $0x74] sm:$0x1] }
  0x3b   : > { %11086 = vmatmul.mubr.msk.bf16.gmra.mrb[8].mxu1 %vm586_vm2, %v13550_v56  ;;  %v1692_v20 = vrot.slane %v1691_v63, 4  ;;  %v1705_v23 = vor.u32 %v1704_v2, %v1701_v0  ;;  %v1714_v25 = vrot.slane %v1712_v4, 4  ;;  %v13560_v27 = vcombine.low %v354_v61, %v355_v62  ;;  %v358_v59 = vld [vmem:[%s13385_s24 + $0x94] sm:$0xf]  ;;  %v360_v2 = vld [vmem:[%s13385_s24 + $0x9c] sm:$0xf] }
  0x3c   : > { %16335 = vst [vmem:[#allocation12_spill] sm:$0xff] %v13555_v16  ;;  %v1687_v28 = vsel %vm13436_vm5, %v1682_v8, %v1686_v46  ;;  %v1720_v29 = vrot.slane %v1718_v11, 5  ;;  %10965 = vmatprep.mubr.msk.bf16.mxu0 %vm586_vm2, %v13555_v16  ;;  %v1723_v6 = vshrl.u32 %v243_v5, 16  ;;  %v1726_v33 = vshll.u32 %v243_v5, 16  ;;  %v361_v11 = vld [vmem:[%s13385_s24 + $0xa0] sm:$0xf] }
  0x3d   : > { %16336 = vst [vmem:[#allocation13_spill] sm:$0xff] %v13560_v27  ;;  %v1697_v36 = vsel %vm13436_vm5, %v1692_v20, %v1696_v58  ;;  %v1706_v37 = vrot.slane %v1705_v23, 4  ;;  %v1715_v38 = vor.u32 %v1714_v25, %v1710_v9  ;;  %v1732_v39 = vshll.u32 %v244_v18, 16  ;;  %v357_v58 = vld [vmem:[%s13385_s24 + $0x90] sm:$0xf] }
  0x3e   : > { %v13571_v47 = vcombine.low %v1687_v28, %v1697_v36  ;;  %v1725_v46 = vrot.slane %v1723_v6, 4  ;;  %v1728_v48 = vrot.slane %v1726_v33, 5  ;;  %v1736_v49 = vshrl.u32 %v244_v18, 16  ;;  %v249_v28 = vld [vmem:[%s13401_s27 + $0x78] sm:$0xf] }
  0x3f   : > { %10966 = vmatmul.mubr.msk.bf16.gmra.mrb[20].mxu0 %vm586_vm2, %v13560_v27  ;;  %v1711_v53 = vsel %vm13436_vm5, %v1706_v37, %v1710_v9  ;;  %v1716_v54 = vrot.slane %v1715_v38, 4  ;;  %v1734_v55 = vrot.slane %v1732_v39, 5  ;;  %v1742_v57 = vshll.u32 %v245_v32, 16  ;;  %v250_v37 = vld [vmem:[%s13401_s27 + $0x7c] sm:$0xf] }
  0x40   : > { %16337 = vst [vmem:[#allocation14_spill] sm:$0xff] %v13571_v47  ;;  %11089 = vmatprep.mubr.msk.bf16.mxu1 %vm586_vm2, %v13571_v47  ;;  %v1729_v61 = vor.u32 %v1728_v48, %v1725_v46  ;;  %v1738_v62 = vrot.slane %v1736_v49, 4  ;;  %v1747_v63 = vshrl.u32 %v246_v43, 16  ;;  %v1750_v0 = vshll.u32 %v246_v43, 16  ;;  %v251_v49 = vld [vmem:[%s13401_s27 + $0x80] sm:$0x1] }
  0x41   : > { %v1721_v4 = vsel %vm13436_vm5, %v1716_v54, %v1720_v29  ;;  %v1744_v5 = vrot.slane %v1742_v57, 5  ;;  %v1756_v8 = vshll.u32 %v247_v44, 16  ;;  %v1760_v9 = vshrl.u32 %v247_v44, 16  ;;  %v373_v51 = vld [vmem:[%s13385_s24 + $0xd0] sm:$0xf] }
  0x42   : > { %v13586_v18 = vcombine.low %v1711_v53, %v1721_v4  ;;  %v1730_v20 = vrot.slane %v1729_v61, 4  ;;  %v1739_v23 = vor.u32 %v1738_v62, %v1734_v55  ;;  %v1749_v25 = vrot.slane %v1747_v63, 4  ;;  %v275_v47 = vld [vmem:[%s13401_s27 + $0xe0] sm:$0x1]  ;;  %v388_v34 = vld [vmem:[%s13385_s24 + $0x10c] sm:$0xf] }
  0x43   : > { %v1752_v32 = vrot.slane %v1750_v0, 5  ;;  %v1758_v6 = vrot.slane %v1756_v8, 5  ;;  %v1762_v33 = vrot.slane %v1760_v9, 4  ;;  %v1766_v36 = vshll.u32 %v248_v50, 16  ;;  %v253_v0 = vld [vmem:[%s13401_s27 + $0x88] sm:$0xf] }
  0x44   : > { %16338 = vst [vmem:[#allocation15_spill] sm:$0xff] %v13586_v18  ;;  %11090 = vmatmul.mubr.msk.bf16.gmra.mrb[12].mxu1 %vm586_vm2, %v13586_v18  ;;  %v1735_v29 = vsel %vm13436_vm5, %v1730_v20, %v1734_v55  ;;  %v1740_v38 = vrot.slane %v1739_v23, 4  ;;  %v13594_v39 = vcombine.low %v357_v58, %v358_v59  ;;  %v13596_v43 = vcombine.low %v360_v2, %v361_v11  ;;  %v252_v58 = vld [vmem:[%s13401_s27 + $0x84] sm:$0xf]  ;;  %v254_v9 = vld [vmem:[%s13401_s27 + $0x8c] sm:$0x1] }
  0x45   : > { %v1753_v44 = vor.u32 %v1752_v32, %v1749_v25  ;;  %v1763_v46 = vor.u32 %v1762_v33, %v1758_v6  ;;  %v1768_v48 = vrot.slane %v1766_v36, 5  ;;  %v1771_v53 = vshrl.u32 %v249_v28, 16  ;;  %v364_v32 = vld [vmem:[%s13385_s24 + $0xac] sm:$0xf]  ;;  %v13750_v18 = vld [vmem:[%s13401_s27 + $0xdc] sm:$0xf] }
  0x46   : > { %16339 = vst [vmem:[#allocation16_spill] sm:$0xff] %v13594_v39  ;;  %16340 = vst [vmem:[#allocation17_spill] sm:$0xff] %v13596_v43  ;;  %v1745_v50 = vsel %vm13436_vm5, %v1740_v38, %v1744_v5  ;;  %10969 = vmatprep.mubr.msk.bf16.mxu0 %vm586_vm2, %v13594_v39  ;;  %v1774_v54 = vshll.u32 %v249_v28, 16  ;;  %v1780_v55 = vshll.u32 %v250_v37, 16  ;;  %v1784_v57 = vshrl.u32 %v250_v37, 16 }
  0x47   : > { %v13604_v59 = vcombine.low %v1735_v29, %v1745_v50  ;;  %v1754_v61 = vrot.slane %v1753_v44, 4  ;;  %v1764_v62 = vrot.slane %v1763_v46, 4  ;;  %10970 = vmatmul.mubr.msk.bf16.gmra.mrb[24].mxu0 %vm586_vm2, %v13596_v43  ;;  %v1773_v63 = vrot.slane %v1771_v53, 4  ;;  %v363_v28 = vld [vmem:[%s13385_s24 + $0xa8] sm:$0xf]  ;;  %16362 = vst [vmem:[#allocation39_spill] sm:$0xff] %v13750_v18 }
  0x48   : > { %v1776_v2 = vrot.slane %v1774_v54, 5  ;;  %v1782_v4 = vrot.slane %v1780_v55, 5  ;;  %v1786_v5 = vrot.slane %v1784_v57, 4  ;;  %v1790_v8 = vshll.u32 %v251_v49, 16  ;;  %v366_v38 = vld [vmem:[%s13385_s24 + $0xb4] sm:$0xf] }
  0x49   : > { %16341 = vst [vmem:[#allocation18_spill] sm:$0xff] %v13604_v59  ;;  %11093 = vmatprep.mubr.msk.bf16.mxu1 %vm586_vm2, %v13604_v59  ;;  %v1759_v11 = vsel %vm13436_vm5, %v1754_v61, %v1758_v6  ;;  %v1769_v20 = vsel %vm13436_vm5, %v1764_v62, %v1768_v48  ;;  %v1795_v23 = vshrl.u32 %v252_v58, 16  ;;  %v1798_v25 = vshll.u32 %v252_v58, 16  ;;  %v367_v44 = vld [vmem:[%s13385_s24 + $0xb8] sm:$0xf] }
  0x4a   : > { %v13618_v33 = vcombine.low %v1759_v11, %v1769_v20  ;;  %v1777_v36 = vor.u32 %v1776_v2, %v1773_v63  ;;  %v1787_v37 = vor.u32 %v1786_v5, %v1782_v4  ;;  %v1792_v29 = vrot.slane %v1790_v8, 5  ;;  %v255_v50 = vld [vmem:[%s13401_s27 + $0x90] sm:$0xf]  ;;  %v256_v2 = vld [vmem:[%s13401_s27 + $0x94] sm:$0xf] }
  0x4b   : > { %v1797_v46 = vrot.slane %v1795_v23, 4  ;;  %v1800_v49 = vrot.slane %v1798_v25, 5  ;;  %v1804_v6 = vshll.u32 %v253_v0, 16  ;;  %v1808_v53 = vshrl.u32 %v253_v0, 16  ;;  %v257_v5 = vld [vmem:[%s13401_s27 + $0x98] sm:$0x1] }
  0x4c   : > { %16342 = vst [vmem:[#allocation19_spill] sm:$0xff] %v13618_v33  ;;  %11094 = vmatmul.mubr.msk.bf16.gmra.mrb[16].mxu1 %vm586_vm2, %v13618_v33  ;;  %v1778_v48 = vrot.slane %v1777_v36, 4  ;;  %v1788_v54 = vrot.slane %v1787_v37, 4  ;;  %v1814_v55 = vshll.u32 %v254_v9, 16  ;;  %v13625_v57 = vcombine.low %v363_v28, %v364_v32  ;;  %v258_v20 = vld [vmem:[%s13401_s27 + $0x9c] sm:$0xf] }
  0x4d   : > { %v1801_v58 = vor.u32 %v1800_v49, %v1797_v46  ;;  %v1806_v61 = vrot.slane %v1804_v6, 5  ;;  %v1810_v62 = vrot.slane %v1808_v53, 4  ;;  %v13627_v63 = vcombine.low %v366_v38, %v367_v44  ;;  %v260_v44 = vld [vmem:[%s13401_s27 + $0xa4] sm:$0x1]  ;;  %v262_v33 = vld [vmem:[%s13401_s27 + $0xac] sm:$0xf] }
  0x4e   : > { %16343 = vst [vmem:[#allocation20_spill] sm:$0xff] %v13625_v57  ;;  %v1783_v0 = vsel %vm13436_vm5, %v1778_v48, %v1782_v4  ;;  %v1793_v8 = vsel %vm13436_vm5, %v1788_v54, %v1792_v29  ;;  %v1816_v11 = vrot.slane %v1814_v55, 5  ;;  %10973 = vmatprep.mubr.msk.bf16.mxu0 %vm586_vm2, %v13625_v57  ;;  %v1819_v9 = vshrl.u32 %v255_v50, 16  ;;  %v259_v4 = vld [vmem:[%s13401_s27 + $0xa0] sm:$0xf] }
  0x4f   : > { %16344 = vst [vmem:[#allocation21_spill] sm:$0xff] %v13627_v63  ;;  %v13638_v23 = vcombine.low %v1783_v0, %v1793_v8  ;;  %v1802_v25 = vrot.slane %v1801_v58, 4  ;;  %v1811_v28 = vor.u32 %v1810_v62, %v1806_v61  ;;  %10974 = vmatmul.mubr.msk.bf16.gmra.mrb[28].mxu0 %vm586_vm2, %v13627_v63  ;;  %v1822_v32 = vshll.u32 %v255_v50, 16  ;;  %v369_v48 = vld [vmem:[%s13385_s24 + $0xc0] sm:$0xf] }
  0x50   : > { %v1821_v36 = vrot.slane %v1819_v9, 4  ;;  %v1828_v37 = vshll.u32 %v256_v2, 16  ;;  %v1832_v29 = vshrl.u32 %v256_v2, 16  ;;  %v1838_v38 = vshll.u32 %v257_v5, 16  ;;  %v370_v62 = vld [vmem:[%s13385_s24 + $0xc4] sm:$0xf] }
  0x51   : > { %16345 = vst [vmem:[#allocation22_spill] sm:$0xff] %v13638_v23  ;;  %11097 = vmatprep.mubr.msk.bf16.mxu1 %vm586_vm2, %v13638_v23  ;;  %v1807_v46 = vsel %vm13436_vm5, %v1802_v25, %v1806_v61  ;;  %v1812_v49 = vrot.slane %v1811_v28, 4  ;;  %v1824_v6 = vrot.slane %v1822_v32, 5  ;;  %v1843_v53 = vshrl.u32 %v258_v20, 16  ;;  %v372_v9 = vld [vmem:[%s13385_s24 + $0xcc] sm:$0xf] }
  0x52   : > { %v1830_v50 = vrot.slane %v1828_v37, 5  ;;  %v1834_v54 = vrot.slane %v1832_v29, 4  ;;  %v1840_v55 = vrot.slane %v1838_v38, 5  ;;  %v1846_v58 = vshll.u32 %v258_v20, 16  ;;  %v261_v37 = vld [vmem:[%s13401_s27 + $0xa8] sm:$0xf] }
  0x53   : > { %v1817_v2 = vsel %vm13436_vm5, %v1812_v49, %v1816_v11  ;;  %v1825_v5 = vor.u32 %v1824_v6, %v1821_v36  ;;  %v1845_v0 = vrot.slane %v1843_v53, 4  ;;  %v1852_v8 = vshll.u32 %v259_v4, 16  ;;  %v13694_v59 = vld [vmem:[%s13401_s27 + $0xc4] sm:$0xf]  ;;  %v13844_v63 = vld [vmem:[%s13401_s27 + $0x10c] sm:$0xf] }
  0x54   : > { %v13654_v61 = vcombine.low %v1807_v46, %v1817_v2  ;;  %v1835_v25 = vor.u32 %v1834_v54, %v1830_v50  ;;  %v1848_v28 = vrot.slane %v1846_v58, 5  ;;  %v1856_v32 = vshrl.u32 %v259_v4, 16  ;;  %v265_v2 = vld [vmem:[%s13401_s27 + $0xb8] sm:$0xf]  ;;  %16352 = vst [vmem:[#allocation29_spill] sm:$0xff] %v13694_v59 }
  0x55   : > { %v1826_v29 = vrot.slane %v1825_v5, 4  ;;  %v1854_v38 = vrot.slane %v1852_v8, 5  ;;  %v1862_v20 = vshll.u32 %v260_v44, 16  ;;  %v13657_v23 = vcombine.low %v369_v48, %v370_v62  ;;  %v263_v44 = vld [vmem:[%s13401_s27 + $0xb0] sm:$0x1] }
  0x56   : > { %16346 = vst [vmem:[#allocation23_spill] sm:$0xff] %v13654_v61  ;;  %11098 = vmatmul.mubr.msk.bf16.gmra.mrb[20].mxu1 %vm586_vm2, %v13654_v61  ;;  %v1836_v11 = vrot.slane %v1835_v25, 4  ;;  %v1849_v36 = vor.u32 %v1848_v28, %v1845_v0  ;;  %v1858_v46 = vrot.slane %v1856_v32, 4  ;;  %v13662_v49 = vcombine.low %v372_v9, %v373_v51  ;;  %v266_v25 = vld [vmem:[%s13401_s27 + $0xbc] sm:$0x1] }
  0x57   : > { %16347 = vst [vmem:[#allocation24_spill] sm:$0xff] %v13657_v23  ;;  %v1831_v4 = vsel %vm13436_vm5, %v1826_v29, %v1830_v50  ;;  %v1864_v6 = vrot.slane %v1862_v20, 5  ;;  %10977 = vmatprep.mubr.msk.bf16.mxu0 %vm586_vm2, %v13657_v23  ;;  %v1867_v53 = vshrl.u32 %v261_v37, 16  ;;  %v1870_v48 = vshll.u32 %v261_v37, 16  ;;  %v264_v50 = vld [vmem:[%s13401_s27 + $0xb4] sm:$0xf] }
  0x58   : > { %16348 = vst [vmem:[#allocation25_spill] sm:$0xff] %v13662_v49  ;;  %v1841_v54 = vsel %vm13436_vm5, %v1836_v11, %v1840_v55  ;;  %v1850_v58 = vrot.slane %v1849_v36, 4  ;;  %v1859_v62 = vor.u32 %v1858_v46, %v1854_v38  ;;  %10978 = vmatmul.mubr.msk.bf16.gmra.mrb[32].mxu0 %vm586_vm2, %v13662_v49  ;;  %v1876_v51 = vshll.u32 %v262_v33, 16  ;;  %v375_v29 = vld [vmem:[%s13385_s24 + $0xd8] sm:$0xf] }
  0x59   : > { %v13675_v5 = vcombine.low %v1831_v4, %v1841_v54  ;;  %v1869_v0 = vrot.slane %v1867_v53, 4  ;;  %v1872_v8 = vrot.slane %v1870_v48, 5  ;;  %v1880_v9 = vshrl.u32 %v262_v33, 16  ;;  %v376_v20 = vld [vmem:[%s13385_s24 + $0xdc] sm:$0xf] }
  0x5a   : > { %v1855_v55 = vsel %vm13436_vm5, %v1850_v58, %v1854_v38  ;;  %v1860_v28 = vrot.slane %v1859_v62, 4  ;;  %v1878_v32 = vrot.slane %v1876_v51, 5  ;;  %v1886_v37 = vshll.u32 %v263_v44, 16  ;;  %v378_v33 = vld [vmem:[%s13385_s24 + $0xe4] sm:$0xf] }
  0x5b   : > { %16349 = vst [vmem:[#allocation26_spill] sm:$0xff] %v13675_v5  ;;  %11101 = vmatprep.mubr.msk.bf16.mxu1 %vm586_vm2, %v13675_v5  ;;  %v1873_v11 = vor.u32 %v1872_v8, %v1869_v0  ;;  %v1882_v36 = vrot.slane %v1880_v9, 4  ;;  %v1891_v46 = vshrl.u32 %v264_v50, 16  ;;  %v1894_v4 = vshll.u32 %v264_v50, 16  ;;  %v379_v58 = vld [vmem:[%s13385_s24 + $0xe8] sm:$0xf] }
  0x5c   : > { %v1865_v53 = vsel %vm13436_vm5, %v1860_v28, %v1864_v6  ;;  %v1888_v38 = vrot.slane %v1886_v37, 5  ;;  %v1900_v48 = vshll.u32 %v265_v2, 16  ;;  %v1904_v54 = vshrl.u32 %v265_v2, 16  ;;  %v13691_v5 = vld [vmem:[%s13401_s27 + $0xc0] sm:$0xf] }
  0x5d   : > { %v13688_v44 = vcombine.low %v1855_v55, %v1865_v53  ;;  %v1874_v62 = vrot.slane %v1873_v11, 4  ;;  %v1883_v51 = vor.u32 %v1882_v36, %v1878_v32  ;;  %v1893_v61 = vrot.slane %v1891_v46, 4  ;;  %16351 = vst [vmem:[#allocation28_spill] sm:$0xff] %v13691_v5  ;;  %v269_v46 = vld [vmem:[%s13401_s27 + $0xc8] sm:$0x1] }
  0x5e   : > { %v1896_v0 = vrot.slane %v1894_v4, 5  ;;  %v1902_v8 = vrot.slane %v1900_v48, 5  ;;  %v1906_v50 = vrot.slane %v1904_v54, 4  ;;  %v1910_v9 = vshll.u32 %v266_v25, 16  ;;  %v13721_v54 = vld [vmem:[%s13401_s27 + $0xd0] sm:$0xf] }
  0x5f   : > { %16350 = vst [vmem:[#allocation27_spill] sm:$0xff] %v13688_v44  ;;  %11102 = vmatmul.mubr.msk.bf16.gmra.mrb[24].mxu1 %vm586_vm2, %v13688_v44  ;;  %v1879_v6 = vsel %vm13436_vm5, %v1874_v62, %v1878_v32  ;;  %v1884_v2 = vrot.slane %v1883_v51, 4  ;;  %v13700_v55 = vcombine.low %v375_v29, %v376_v20  ;;  %v13702_v28 = vcombine.low %v378_v33, %v379_v58  ;;  %v293_v57 = vld [vmem:[%s13401_s27 + $0x128] sm:$0x1]  ;;  %v13994_v21 = vld [vmem:[%s13401_s27 + $0x154] sm:$0xf] }
  0x60   : > { %v1897_v37 = vor.u32 %v1896_v0, %v1893_v61  ;;  %v1907_v11 = vor.u32 %v1906_v50, %v1902_v8  ;;  %v1912_v36 = vrot.slane %v1910_v9, 5  ;;  %v1915_v25 = vshrl.u32 %v13691_v5, 16  ;;  %v13714_v61 = vld [vmem:[%s13401_s27 + $0xcc] sm:$0xf]  ;;  %16357 = vst [vmem:[#allocation34_spill] sm:$0xff] %v13721_v54 }
  0x61   : > { %16353 = vst [vmem:[#allocation30_spill] sm:$0xff] %v13700_v55  ;;  %16354 = vst [vmem:[#allocation31_spill] sm:$0xff] %v13702_v28  ;;  %v1889_v4 = vsel %vm13436_vm5, %v1884_v2, %v1888_v38  ;;  %10981 = vmatprep.mubr.msk.bf16.mxu0 %vm586_vm2, %v13700_v55  ;;  %v1918_v32 = vshll.u32 %v13691_v5, 16  ;;  %v1924_v29 = vshll.u32 %v13694_v59, 16  ;;  %v1928_v20 = vshrl.u32 %v13694_v59, 16 }
  0x62   : > { %16355 = vst [vmem:[#allocation32_spill] sm:$0xff] %v13714_v61  ;;  %v13716_v33 = vcombine.low %v1879_v6, %v1889_v4  ;;  %v1898_v53 = vrot.slane %v1897_v37, 4  ;;  %v1908_v48 = vrot.slane %v1907_v11, 4  ;;  %10982 = vmatmul.mubr.msk.bf16.gmra.mrb[36].mxu0 %vm586_vm2, %v13702_v28  ;;  %v1917_v38 = vrot.slane %v1915_v25, 4  ;;  %v272_v50 = vld [vmem:[%s13401_s27 + $0xd4] sm:$0x1] }
  0x63   : > { %v1920_v58 = vrot.slane %v1918_v32, 5  ;;  %v1926_v62 = vrot.slane %v1924_v29, 5  ;;  %v1930_v51 = vrot.slane %v1928_v20, 4  ;;  %v1934_v0 = vshll.u32 %v269_v46, 16  ;;  %v381_v11 = vld [vmem:[%s13385_s24 + $0xf0] sm:$0xf] }
  0x64   : > { %16356 = vst [vmem:[#allocation33_spill] sm:$0xff] %v13716_v33  ;;  %11105 = vmatprep.mubr.msk.bf16.mxu1 %vm586_vm2, %v13716_v33  ;;  %v1903_v9 = vsel %vm13436_vm5, %v1898_v53, %v1902_v8  ;;  %v1913_v6 = vsel %vm13436_vm5, %v1908_v48, %v1912_v36  ;;  %v1939_v2 = vshrl.u32 %v13714_v61, 16  ;;  %v1942_v37 = vshll.u32 %v13714_v61, 16  ;;  %v382_v25 = vld [vmem:[%s13385_s24 + $0xf4] sm:$0xf] }
  0x65   : > { %v13734_v4 = vcombine.low %v1903_v9, %v1913_v6  ;;  %v1921_v46 = vor.u32 %v1920_v58, %v1917_v38  ;;  %v1931_v32 = vor.u32 %v1930_v51, %v1926_v62  ;;  %v1936_v29 = vrot.slane %v1934_v0, 5  ;;  %v384_v20 = vld [vmem:[%s13385_s24 + $0xfc] sm:$0xf]  ;;  %v385_v33 = vld [vmem:[%s13385_s24 + $0x100] sm:$0xf] }
  0x66   : > { %v1941_v8 = vrot.slane %v1939_v2, 4  ;;  %v1944_v53 = vrot.slane %v1942_v37, 5  ;;  %v1948_v44 = vshll.u32 %v13721_v54, 16  ;;  %v1952_v36 = vshrl.u32 %v13721_v54, 16  ;;  %v13741_v48 = vld [vmem:[%s13401_s27 + $0xd8] sm:$0xf] }
  0x67   : > { %16358 = vst [vmem:[#allocation35_spill] sm:$0xff] %v13734_v4  ;;  %16359 = vst [vmem:[#allocation36_spill] sm:$0xff] %v13741_v48  ;;  %11106 = vmatmul.mubr.msk.bf16.gmra.mrb[28].mxu1 %vm586_vm2, %v13734_v4  ;;  %v1922_v9 = vrot.slane %v1921_v46, 4  ;;  %v1932_v38 = vrot.slane %v1931_v32, 4  ;;  %v1958_v58 = vshll.u32 %v272_v50, 16  ;;  %v13745_v51 = vcombine.low %v381_v11, %v382_v25 }
  0x68   : > { %v1945_v0 = vor.u32 %v1944_v53, %v1941_v8  ;;  %v1950_v6 = vrot.slane %v1948_v44, 5  ;;  %v1954_v2 = vrot.slane %v1952_v36, 4  ;;  %v13747_v37 = vcombine.low %v384_v20, %v385_v33  ;;  %v13761_v50 = vld [vmem:[%s13401_s27 + $0xe4] sm:$0xf]  ;;  %v13769_v20 = vld [vmem:[%s13401_s27 + $0xe8] sm:$0xf] }
  0x69   : > { %16360 = vst [vmem:[#allocation37_spill] sm:$0xff] %v13745_v51  ;;  %v1927_v56 = vsel %vm13436_vm5, %v1922_v9, %v1926_v62  ;;  %v1937_v46 = vsel %vm13436_vm5, %v1932_v38, %v1936_v29  ;;  %v1960_v32 = vrot.slane %v1958_v58, 5  ;;  %10985 = vmatprep.mubr.msk.bf16.mxu0 %vm586_vm2, %v13745_v51  ;;  %v1963_v44 = vshrl.u32 %v13741_v48, 16  ;;  %16363 = vst [vmem:[#allocation40_spill] sm:$0xff] %v13761_v50  ;;  %v278_v9 = vld [vmem:[%s13401_s27 + $0xec] sm:$0x1] }
  0x6a   : > { %16361 = vst [vmem:[#allocation38_spill] sm:$0xff] %v13747_v37  ;;  %v13763_v33 = vcombine.low %v1927_v56, %v1937_v46  ;;  %v1946_v11 = vrot.slane %v1945_v0, 4  ;;  %v1955_v25 = vor.u32 %v1954_v2, %v1950_v6  ;;  %10986 = vmatmul.mubr.msk.bf16.gmra.mrb[40].mxu0 %vm586_vm2, %v13747_v37  ;;  %v1966_v62 = vshll.u32 %v13741_v48, 16  ;;  %16365 = vst [vmem:[#allocation42_spill] sm:$0xff] %v13769_v20  ;;  %v387_v2 = vld [vmem:[%s13385_s24 + $0x108] sm:$0xf] }
  0x6b   : > { %v1965_v29 = vrot.slane %v1963_v44, 4  ;;  %v1972_v8 = vshll.u32 %v13750_v18, 16  ;;  %v1976_v53 = vshrl.u32 %v13750_v18, 16  ;;  %v1982_v36 = vshll.u32 %v275_v47, 16  ;;  %v311_v5 = vld [vmem:[%s13401_s27 + $0x170] sm:$0x1] }
  0x6c   : > { %16364 = vst [vmem:[#allocation41_spill] sm:$0xff] %v13763_v33  ;;  %11109 = vmatprep.mubr.msk.bf16.mxu1 %vm586_vm2, %v13763_v33  ;;  %v1951_v56 = vsel %vm13436_vm5, %v1946_v11, %v1950_v6  ;;  %v1956_v38 = vrot.slane %v1955_v25, 4  ;;  %v1968_v58 = vrot.slane %v1966_v62, 5  ;;  %v1987_v0 = vshrl.u32 %v13761_v50, 16  ;;  %v390_v11 = vld [vmem:[%s13385_s24 + $0x114] sm:$0xf] }
  0x6d   : > { %v1974_v46 = vrot.slane %v1972_v8, 5  ;;  %v1978_v44 = vrot.slane %v1976_v53, 4  ;;  %v1984_v4 = vrot.slane %v1982_v36, 5  ;;  %v1990_v47 = vshll.u32 %v13761_v50, 16  ;;  %v391_v25 = vld [vmem:[%s13385_s24 + $0x118] sm:$0xf] }
  0x6e   : > { %v1961_v33 = vsel %vm13436_vm5, %v1956_v38, %v1960_v32  ;;  %v1969_v1 = vor.u32 %v1968_v58, %v1965_v29  ;;  %v1989_v24 = vrot.slane %v1987_v0, 4  ;;  %v1996_v6 = vshll.u32 %v13769_v20, 16  ;;  %v13791_v53 = vld [vmem:[%s13401_s27 + $0xf0] sm:$0xf]  ;;  %v13796_v32 = vld [vmem:[%s13401_s27 + $0xf4] sm:$0xf] }
  0x6f   : > { %v13787_v62 = vcombine.low %v1951_v56, %v1961_v33  ;;  %v1979_v60 = vor.u32 %v1978_v44, %v1974_v46  ;;  %v1992_v31 = vrot.slane %v1990_v47, 5  ;;  %v2000_v8 = vshrl.u32 %v13769_v20, 16 }
  0x70   : > { %v1970_v36 = vrot.slane %v1969_v1, 4  ;;  %v1998_v37 = vrot.slane %v1996_v6, 5  ;;  %v2006_v51 = vshll.u32 %v278_v9, 16  ;;  %v13793_v28 = vcombine.low %v387_v2, %v388_v34  ;;  %v281_v34 = vld [vmem:[%s13401_s27 + $0xf8] sm:$0x1] }
  0x71   : > { %16366 = vst [vmem:[#allocation43_spill] sm:$0xff] %v13787_v62  ;;  %11110 = vmatmul.mubr.msk.bf16.gmra.mrb[32].mxu1 %vm586_vm2, %v13787_v62  ;;  %v1980_v33 = vrot.slane %v1979_v60, 4  ;;  %v1993_v29 = vor.u32 %v1992_v31, %v1989_v24  ;;  %v2002_v56 = vrot.slane %v2000_v8, 4  ;;  %v13800_v38 = vcombine.low %v390_v11, %v391_v25  ;;  %v13815_v2 = vld [vmem:[%s13401_s27 + $0xfc] sm:$0xf] }
  0x72   : > { %16367 = vst [vmem:[#allocation44_spill] sm:$0xff] %v13793_v28  ;;  %v1975_v58 = vsel %vm13436_vm5, %v1970_v36, %v1974_v46  ;;  %v2008_v1 = vrot.slane %v2006_v51, 5  ;;  %10989 = vmatprep.mubr.msk.bf16.mxu0 %vm586_vm2, %v13793_v28  ;;  %v2011_v9 = vshrl.u32 %v13791_v53, 16  ;;  %v2014_v0 = vshll.u32 %v13791_v53, 16  ;;  %v13818_v46 = vld [vmem:[%s13401_s27 + $0x100] sm:$0xf] }
  0x73   : > { %16368 = vst [vmem:[#allocation45_spill] sm:$0xff] %v13800_v38  ;;  %v1985_v60 = vsel %vm13436_vm5, %v1980_v33, %v1984_v4  ;;  %v1994_v31 = vrot.slane %v1993_v29, 4  ;;  %v2003_v24 = vor.u32 %v2002_v56, %v1998_v37  ;;  %10990 = vmatmul.mubr.msk.bf16.gmra.mrb[44].mxu0 %vm586_vm2, %v13800_v38  ;;  %v2020_v51 = vshll.u32 %v13796_v32, 16  ;;  %v284_v11 = vld [vmem:[%s13401_s27 + $0x104] sm:$0x1] }
  0x74   : > { %v13820_v44 = vcombine.low %v1975_v58, %v1985_v60  ;;  %v2013_v47 = vrot.slane %v2011_v9, 4  ;;  %v2016_v6 = vrot.slane %v2014_v0, 5  ;;  %v2024_v4 = vshrl.u32 %v13796_v32, 16  ;;  %v393_v29 = vld [vmem:[%s13385_s24 + $0x120] sm:$0xf] }
  0x75   : > { %v1999_v25 = vsel %vm13436_vm5, %v1994_v31, %v1998_v37  ;;  %v2004_v8 = vrot.slane %v2003_v24, 4  ;;  %v2022_v36 = vrot.slane %v2020_v51, 5  ;;  %v2030_v33 = vshll.u32 %v281_v34, 16  ;;  %v394_v56 = vld [vmem:[%s13385_s24 + $0x124] sm:$0xf] }
  0x76   : > { %16369 = vst [vmem:[#allocation46_spill] sm:$0xff] %v13820_v44  ;;  %11113 = vmatprep.mubr.msk.bf16.mxu1 %vm586_vm2, %v13820_v44  ;;  %v2017_v58 = vor.u32 %v2016_v6, %v2013_v47  ;;  %v2026_v60 = vrot.slane %v2024_v4, 4  ;;  %v2035_v9 = vshrl.u32 %v13815_v2, 16  ;;  %v2038_v0 = vshll.u32 %v13815_v2, 16  ;;  %v396_v62 = vld [vmem:[%s13385_s24 + $0x12c] sm:$0xf] }
  0x77   : > { %v2009_v37 = vsel %vm13436_vm5, %v2004_v8, %v2008_v1  ;;  %v2032_v31 = vrot.slane %v2030_v33, 5  ;;  %v2044_v34 = vshll.u32 %v13818_v46, 16  ;;  %v2048_v24 = vshrl.u32 %v13818_v46, 16  ;;  %v397_v51 = vld [vmem:[%s13385_s24 + $0x130] sm:$0xf] }
  0x78   : > { %v13838_v38 = vcombine.low %v1999_v25, %v2009_v37  ;;  %v2018_v44 = vrot.slane %v2017_v58, 4  ;;  %v2027_v47 = vor.u32 %v2026_v60, %v2022_v36  ;;  %v2037_v6 = vrot.slane %v2035_v9, 4  ;;  %v13841_v4 = vld [vmem:[%s13401_s27 + $0x108] sm:$0xf] }
  0x79   : > { %v2040_v28 = vrot.slane %v2038_v0, 5  ;;  %v2046_v55 = vrot.slane %v2044_v34, 5  ;;  %v2050_v49 = vrot.slane %v2048_v24, 4  ;;  %v2054_v23 = vshll.u32 %v284_v11, 16  ;;  %v287_v0 = vld [vmem:[%s13401_s27 + $0x110] sm:$0x1] }
  0x7a   : > { %16370 = vst [vmem:[#allocation47_spill] sm:$0xff] %v13838_v38  ;;  %11114 = vmatmul.mubr.msk.bf16.gmra.mrb[36].mxu1 %vm586_vm2, %v13838_v38  ;;  %v2023_v1 = vsel %vm13436_vm5, %v2018_v44, %v2022_v36  ;;  %v2028_v25 = vrot.slane %v2027_v47, 4  ;;  %v13850_v8 = vcombine.low %v393_v29, %v394_v56  ;;  %v13852_v33 = vcombine.low %v396_v62, %v397_v51  ;;  %v402_v38 = vld [vmem:[%s13385_s24 + $0x144] sm:$0xf] }
  0x7b   : > { %v2041_v58 = vor.u32 %v2040_v28, %v2037_v6  ;;  %v2051_v60 = vor.u32 %v2050_v49, %v2046_v55  ;;  %v2056_v9 = vrot.slane %v2054_v23, 5  ;;  %v2059_v11 = vshrl.u32 %v13841_v4, 16  ;;  %v13864_v28 = vld [vmem:[%s13401_s27 + $0x114] sm:$0xf]  ;;  %v290_v6 = vld [vmem:[%s13401_s27 + $0x11c] sm:$0x1] }
  0x7c   : > { %16371 = vst [vmem:[#allocation48_spill] sm:$0xff] %v13850_v8  ;;  %16372 = vst [vmem:[#allocation49_spill] sm:$0xff] %v13852_v33  ;;  %v2033_v37 = vsel %vm13436_vm5, %v2028_v25, %v2032_v31  ;;  %10993 = vmatprep.mubr.msk.bf16.mxu0 %vm586_vm2, %v13850_v8  ;;  %v2062_v44 = vshll.u32 %v13841_v4, 16  ;;  %v2068_v36 = vshll.u32 %v13844_v63, 16  ;;  %v2072_v62 = vshrl.u32 %v13844_v63, 16 }
  0x7d   : > { %v13866_v49 = vcombine.low %v2023_v1, %v2033_v37  ;;  %v2042_v23 = vrot.slane %v2041_v58, 4  ;;  %v2052_v29 = vrot.slane %v2051_v60, 4  ;;  %10994 = vmatmul.mubr.msk.bf16.gmra.mrb[48].mxu0 %vm586_vm2, %v13852_v33  ;;  %v2061_v56 = vrot.slane %v2059_v11, 4  ;;  %v13871_v31 = vld [vmem:[%s13401_s27 + $0x118] sm:$0xf] }
  0x7e   : > { %v2064_v34 = vrot.slane %v2062_v44, 5  ;;  %v2070_v24 = vrot.slane %v2068_v36, 5  ;;  %v2074_v51 = vrot.slane %v2072_v62, 4  ;;  %v2078_v47 = vshll.u32 %v287_v0, 16  ;;  %v399_v11 = vld [vmem:[%s13385_s24 + $0x138] sm:$0xf] }
  0x7f   : > { %16373 = vst [vmem:[#allocation50_spill] sm:$0xff] %v13866_v49  ;;  %11117 = vmatprep.mubr.msk.bf16.mxu1 %vm586_vm2, %v13866_v49  ;;  %v2047_v1 = vsel %vm13436_vm5, %v2042_v23, %v2046_v55  ;;  %v2057_v25 = vsel %vm13436_vm5, %v2052_v29, %v2056_v9  ;;  %v2083_v58 = vshrl.u32 %v13864_v28, 16  ;;  %v2086_v60 = vshll.u32 %v13864_v28, 16  ;;  %v400_v37 = vld [vmem:[%s13385_s24 + $0x13c] sm:$0xf] }
  0x80   : > { %v13884_v44 = vcombine.low %v2047_v1, %v2057_v25  ;;  %v2065_v0 = vor.u32 %v2064_v34, %v2061_v56  ;;  %v2075_v36 = vor.u32 %v2074_v51, %v2070_v24  ;;  %v2080_v62 = vrot.slane %v2078_v47, 5  ;;  %v403_v49 = vld [vmem:[%s13385_s24 + $0x148] sm:$0xf]  ;;  %v13891_v29 = vld [vmem:[%s13401_s27 + $0x120] sm:$0xf] }
  0x81   : > { %v2085_v55 = vrot.slane %v2083_v58, 4  ;;  %v2088_v23 = vrot.slane %v2086_v60, 5  ;;  %v2092_v33 = vshll.u32 %v13871_v31, 16  ;;  %v2096_v9 = vshrl.u32 %v13871_v31, 16  ;;  %v13900_v8 = vld [vmem:[%s13401_s27 + $0x124] sm:$0xf] }
  0x82   : > { %16374 = vst [vmem:[#allocation51_spill] sm:$0xff] %v13884_v44  ;;  %11118 = vmatmul.mubr.msk.bf16.gmra.mrb[40].mxu1 %vm586_vm2, %v13884_v44  ;;  %v2066_v1 = vrot.slane %v2065_v0, 4  ;;  %v2076_v56 = vrot.slane %v2075_v36, 4  ;;  %v2102_v34 = vshll.u32 %v290_v6, 16  ;;  %v13895_v51 = vcombine.low %v399_v11, %v400_v37  ;;  %v13911_v6 = vld [vmem:[%s13401_s27 + $0x12c] sm:$0xf] }
  0x83   : > { %v2089_v47 = vor.u32 %v2088_v23, %v2085_v55  ;;  %v2094_v25 = vrot.slane %v2092_v33, 5  ;;  %v2098_v58 = vrot.slane %v2096_v9, 4  ;;  %v13897_v60 = vcombine.low %v402_v38, %v403_v49  ;;  %v13919_v37 = vld [vmem:[%s13401_s27 + $0x130] sm:$0xf] }
  0x84   : > { %16375 = vst [vmem:[#allocation52_spill] sm:$0xff] %v13895_v51  ;;  %v2071_v43 = vsel %vm13436_vm5, %v2066_v1, %v2070_v24  ;;  %v2081_v0 = vsel %vm13436_vm5, %v2076_v56, %v2080_v62  ;;  %v2104_v36 = vrot.slane %v2102_v34, 5  ;;  %10997 = vmatprep.mubr.msk.bf16.mxu0 %vm586_vm2, %v13895_v51  ;;  %v2107_v33 = vshrl.u32 %v13891_v29, 16  ;;  %v296_v1 = vld [vmem:[%s13401_s27 + $0x134] sm:$0x1] }
  0x85   : > { %16376 = vst [vmem:[#allocation53_spill] sm:$0xff] %v13897_v60  ;;  %v13913_v38 = vcombine.low %v2071_v43, %v2081_v0  ;;  %v2090_v49 = vrot.slane %v2089_v47, 4  ;;  %v2099_v11 = vor.u32 %v2098_v58, %v2094_v25  ;;  %10998 = vmatmul.mubr.msk.bf16.gmra.mrb[52].mxu0 %vm586_vm2, %v13897_v60  ;;  %v2110_v24 = vshll.u32 %v13891_v29, 16  ;;  %v405_v58 = vld [vmem:[%s13385_s24 + $0x150] sm:$0xf] }
  0x86   : > { %v2109_v62 = vrot.slane %v2107_v33, 4  ;;  %v2116_v55 = vshll.u32 %v13900_v8, 16  ;;  %v2120_v23 = vshrl.u32 %v13900_v8, 16  ;;  %v2126_v9 = vshll.u32 %v293_v57, 16  ;;  %v406_v60 = vld [vmem:[%s13385_s24 + $0x154] sm:$0xf] }
  0x87   : > { %16377 = vst [vmem:[#allocation54_spill] sm:$0xff] %v13913_v38  ;;  %11121 = vmatprep.mubr.msk.bf16.mxu1 %vm586_vm2, %v13913_v38  ;;  %v2095_v43 = vsel %vm13436_vm5, %v2090_v49, %v2094_v25  ;;  %v2100_v56 = vrot.slane %v2099_v11, 4  ;;  %v2112_v34 = vrot.slane %v2110_v24, 5  ;;  %v2131_v47 = vshrl.u32 %v13911_v6, 16  ;;  %v408_v49 = vld [vmem:[%s13385_s24 + $0x15c] sm:$0xf] }
  0x88   : > { %v2118_v0 = vrot.slane %v2116_v55, 5  ;;  %v2122_v33 = vrot.slane %v2120_v23, 4  ;;  %v2128_v44 = vrot.slane %v2126_v9, 5  ;;  %v2134_v57 = vshll.u32 %v13911_v6, 16  ;;  %v409_v11 = vld [vmem:[%s13385_s24 + $0x160] sm:$0xf] }
  0x89   : > { %v2105_v38 = vsel %vm13436_vm5, %v2100_v56, %v2104_v36  ;;  %v2113_v51 = vor.u32 %v2112_v34, %v2109_v62  ;;  %v2133_v50 = vrot.slane %v2131_v47, 4  ;;  %v2140_v25 = vshll.u32 %v13919_v37, 16  ;;  %v13941_v23 = vld [vmem:[%s13401_s27 + $0x138] sm:$0xf]  ;;  %v13946_v36 = vld [vmem:[%s13401_s27 + $0x13c] sm:$0xf] }
  0x8a   : > { %v13937_v24 = vcombine.low %v2095_v43, %v2105_v38  ;;  %v2123_v20 = vor.u32 %v2122_v33, %v2118_v0  ;;  %v2136_v39 = vrot.slane %v2134_v57, 5  ;;  %v2144_v55 = vshrl.u32 %v13919_v37, 16 }
  0x8b   : > { %v2114_v9 = vrot.slane %v2113_v51, 4  ;;  %v2142_v27 = vrot.slane %v2140_v25, 5  ;;  %v2150_v48 = vshll.u32 %v296_v1, 16  ;;  %v13943_v18 = vcombine.low %v405_v58, %v406_v60  ;;  %v299_v60 = vld [vmem:[%s13401_s27 + $0x140] sm:$0x1] }
  0x8c   : > { %16378 = vst [vmem:[#allocation55_spill] sm:$0xff] %v13937_v24  ;;  %11122 = vmatmul.mubr.msk.bf16.gmra.mrb[44].mxu1 %vm586_vm2, %v13937_v24  ;;  %v2124_v38 = vrot.slane %v2123_v20, 4  ;;  %v2137_v62 = vor.u32 %v2136_v39, %v2133_v50  ;;  %v2146_v43 = vrot.slane %v2144_v55, 4  ;;  %v13950_v56 = vcombine.low %v408_v49, %v409_v11  ;;  %v13965_v58 = vld [vmem:[%s13401_s27 + $0x144] sm:$0xf] }
  0x8d   : > { %16379 = vst [vmem:[#allocation56_spill] sm:$0xff] %v13943_v18  ;;  %v2119_v34 = vsel %vm13436_vm5, %v2114_v9, %v2118_v0  ;;  %v2152_v51 = vrot.slane %v2150_v48, 5  ;;  %11001 = vmatprep.mubr.msk.bf16.mxu0 %vm586_vm2, %v13943_v18  ;;  %v2155_v1 = vshrl.u32 %v13941_v23, 16  ;;  %v2158_v47 = vshll.u32 %v13941_v23, 16  ;;  %v13968_v0 = vld [vmem:[%s13401_s27 + $0x148] sm:$0xf] }
  0x8e   : > { %16380 = vst [vmem:[#allocation57_spill] sm:$0xff] %v13950_v56  ;;  %v2129_v20 = vsel %vm13436_vm5, %v2124_v38, %v2128_v44  ;;  %v2138_v39 = vrot.slane %v2137_v62, 4  ;;  %v2147_v50 = vor.u32 %v2146_v43, %v2142_v27  ;;  %11002 = vmatmul.mubr.msk.bf16.gmra.mrb[56].mxu0 %vm586_vm2, %v13950_v56  ;;  %v2164_v48 = vshll.u32 %v13946_v36, 16  ;;  %v302_v49 = vld [vmem:[%s13401_s27 + $0x14c] sm:$0x1] }
  0x8f   : > { %v13970_v33 = vcombine.low %v2119_v34, %v2129_v20  ;;  %v2157_v57 = vrot.slane %v2155_v1, 4  ;;  %v2160_v25 = vrot.slane %v2158_v47, 5  ;;  %v2168_v44 = vshrl.u32 %v13946_v36, 16  ;;  %v411_v62 = vld [vmem:[%s13385_s24 + $0x168] sm:$0xf] }
  0x90   : > { %v2143_v11 = vsel %vm13436_vm5, %v2138_v39, %v2142_v27  ;;  %v2148_v55 = vrot.slane %v2147_v50, 4  ;;  %v2166_v9 = vrot.slane %v2164_v48, 5  ;;  %v2174_v38 = vshll.u32 %v299_v60, 16  ;;  %v412_v43 = vld [vmem:[%s13385_s24 + $0x16c] sm:$0xf] }
  0x91   : > { %16381 = vst [vmem:[#allocation58_spill] sm:$0xff] %v13970_v33  ;;  %11125 = vmatprep.mubr.msk.bf16.mxu1 %vm586_vm2, %v13970_v33  ;;  %v2161_v34 = vor.u32 %v2160_v25, %v2157_v57  ;;  %v2170_v20 = vrot.slane %v2168_v44, 4  ;;  %v2179_v1 = vshrl.u32 %v13965_v58, 16  ;;  %v2182_v47 = vshll.u32 %v13965_v58, 16  ;;  %v414_v24 = vld [vmem:[%s13385_s24 + $0x174] sm:$0xf] }
  0x92   : > { %v2153_v27 = vsel %vm13436_vm5, %v2148_v55, %v2152_v51  ;;  %v2176_v39 = vrot.slane %v2174_v38, 5  ;;  %v2188_v60 = vshll.u32 %v13968_v0, 16  ;;  %v2192_v50 = vshrl.u32 %v13968_v0, 16  ;;  %v415_v48 = vld [vmem:[%s13385_s24 + $0x178] sm:$0xf] }
  0x93   : > { %v13988_v56 = vcombine.low %v2143_v11, %v2153_v27  ;;  %v2162_v33 = vrot.slane %v2161_v34, 4  ;;  %v2171_v57 = vor.u32 %v2170_v20, %v2166_v9  ;;  %v2181_v25 = vrot.slane %v2179_v1, 4  ;;  %v13991_v44 = vld [vmem:[%s13401_s27 + $0x150] sm:$0xf] }
  0x94   : > { %v2184_v18 = vrot.slane %v2182_v47, 5  ;;  %v2190_v61 = vrot.slane %v2188_v60, 5  ;;  %v2194_v54 = vrot.slane %v2192_v50, 4  ;;  %v2198_v16 = vshll.u32 %v302_v49, 16  ;;  %v305_v47 = vld [vmem:[%s13401_s27 + $0x158] sm:$0x1] }
  0x95   : > { %16382 = vst [vmem:[#allocation59_spill] sm:$0xff] %v13988_v56  ;;  %11126 = vmatmul.mubr.msk.bf16.gmra.mrb[48].mxu1 %vm586_vm2, %v13988_v56  ;;  %v2167_v51 = vsel %vm13436_vm5, %v2162_v33, %v2166_v9  ;;  %v2172_v11 = vrot.slane %v2171_v57, 4  ;;  %v14000_v55 = vcombine.low %v411_v62, %v412_v43  ;;  %v14002_v38 = vcombine.low %v414_v24, %v415_v48  ;;  %v14021_v57 = vld [vmem:[%s13401_s27 + $0x160] sm:$0xf]  ;;  %v13236_v56 = vld [vmem:[%s13401_s27 + $0x10] sm:$0xf] }
  0x96   : > { %v2185_v34 = vor.u32 %v2184_v18, %v2181_v25  ;;  %v2195_v20 = vor.u32 %v2194_v54, %v2190_v61  ;;  %v2200_v1 = vrot.slane %v2198_v16, 5  ;;  %v2203_v49 = vshrl.u32 %v13991_v44, 16  ;;  %v14014_v18 = vld [vmem:[%s13401_s27 + $0x15c] sm:$0xf] }
  0x97   : > { %16383 = vst [vmem:[#allocation60_spill] sm:$0xff] %v14000_v55  ;;  %16384 = vst [vmem:[#allocation61_spill] sm:$0xff] %v14002_v38  ;;  %v2177_v27 = vsel %vm13436_vm5, %v2172_v11, %v2176_v39  ;;  %11005 = vmatprep.mubr.msk.bf16.mxu0 %vm586_vm2, %v14000_v55  ;;  %v2206_v33 = vshll.u32 %v13991_v44, 16  ;;  %v2212_v9 = vshll.u32 %v13994_v21, 16  ;;  %v2216_v24 = vshrl.u32 %v13994_v21, 16 }
  0x98   : > { %v14016_v16 = vcombine.low %v2167_v51, %v2177_v27  ;;  %v2186_v54 = vrot.slane %v2185_v34, 4  ;;  %v2196_v62 = vrot.slane %v2195_v20, 4  ;;  %11006 = vmatmul.mubr.msk.bf16.gmra.mrb[60].mxu0 %vm586_vm2, %v14002_v38  ;;  %v2205_v43 = vrot.slane %v2203_v49, 4  ;;  %v308_v11 = vld [vmem:[%s13401_s27 + $0x164] sm:$0x1] }
  0x99   : > { %v2208_v39 = vrot.slane %v2206_v33, 5  ;;  %v2214_v60 = vrot.slane %v2212_v9, 5  ;;  %v2218_v50 = vrot.slane %v2216_v24, 4  ;;  %v2222_v48 = vshll.u32 %v305_v47, 16  ;;  %v14048_v55 = vld [vmem:[%s13401_s27 + $0x16c] sm:$0xf] }
  0x9a   : > { %16385 = vst [vmem:[#allocation62_spill] sm:$0xff] %v14016_v16  ;;  %11129 = vmatprep.mubr.msk.bf16.mxu1 %vm586_vm2, %v14016_v16  ;;  %v2191_v25 = vsel %vm13436_vm5, %v2186_v54, %v2190_v61  ;;  %v2201_v51 = vsel %vm13436_vm5, %v2196_v62, %v2200_v1  ;;  %v2227_v34 = vshrl.u32 %v14014_v18, 16  ;;  %v2230_v20 = vshll.u32 %v14014_v18, 16  ;;  %v14037_v54 = vld [vmem:[%s13401_s27 + $0x168] sm:$0xf] }
  0x9b   : > { %v14032_v47 = vcombine.low %v2191_v25, %v2201_v51  ;;  %v2209_v49 = vor.u32 %v2208_v39, %v2205_v43  ;;  %v2219_v27 = vor.u32 %v2218_v50, %v2214_v60  ;;  %v2224_v33 = vrot.slane %v2222_v48, 5  ;;  %v13233_v39 = vld [vmem:[%s13401_s27] sm:$0xf]  ;;  %v13234_v50 = vld [vmem:[%s13401_s27 + $0x4] sm:$0xf] }
  0x9c   : > { %v2229_v9 = vrot.slane %v2227_v34, 4  ;;  %v2232_v24 = vrot.slane %v2230_v20, 5  ;;  %v2236_v61 = vshll.u32 %v14021_v57, 16  ;;  %v2240_v1 = vshrl.u32 %v14021_v57, 16  ;;  %v13235_v16 = vld [vmem:[%s13401_s27 + $0xc] sm:$0xf] }
  0x9d   : > { %16386 = vst [vmem:[#allocation63_spill] sm:$0xff] %v14032_v47  ;;  %11130 = vmatmul.mubr.msk.bf16.gmra.mrb[52].mxu1 %vm586_vm2, %v14032_v47  ;;  %v2210_v62 = vrot.slane %v2209_v49, 4  ;;  %v2220_v25 = vrot.slane %v2219_v27, 4  ;;  %v2246_v43 = vshll.u32 %v308_v11, 16  ;;  %v9626_v48 = vcombine.low %v13233_v39, %v13234_v50 }
  0x9e   : > { %v2233_v51 = vor.u32 %v2232_v24, %v2229_v9  ;;  %v2238_v34 = vrot.slane %v2236_v61, 5  ;;  %v2242_v20 = vrot.slane %v2240_v1, 4  ;;  %v14045_v38 = vcombine.low %v13235_v16, %v13236_v56  ;;  %v14058_v24 = vld [vmem:[%s13401_s27 + $0x174] sm:$0xf] }
  0x9f   : > { %v2215_v49 = vsel %vm13436_vm5, %v2210_v62, %v2214_v60  ;;  %v2225_v11 = vsel %vm13436_vm5, %v2220_v25, %v2224_v33  ;;  %v2248_v27 = vrot.slane %v2246_v43, 5  ;;  %11011 = vmatprep.mubr.msk.bf16.mxu0 %vm586_vm2, %v9626_v48  ;;  %v2251_v9 = vshrl.u32 %v14037_v54, 16  ;;  %v14068_v43 = vld [vmem:[%s13401_s27 + $0x178] sm:$0xf] }
  0xa0   : > { %16387 = vst [vmem:[#allocation64_spill] sm:$0xff] %v14045_v38  ;;  %v14060_v61 = vcombine.low %v2215_v49, %v2225_v11  ;;  %v2234_v56 = vrot.slane %v2233_v51, 4  ;;  %v2243_v16 = vor.u32 %v2242_v20, %v2238_v34  ;;  %11012 = vmatmul.mubr.msk.bf16.vlgmr.msra.gmra.mrb[0].mxu0 %vm586_vm2, %v14045_v38  ;;  %v2254_v60 = vshll.u32 %v14037_v54, 16 }
  0xa1   : > { %v2253_v1 = vrot.slane %v2251_v9, 4  ;;  %v2260_v33 = vshll.u32 %v14048_v55, 16  ;;  %v2264_v62 = vshrl.u32 %v14048_v55, 16  ;;  %v2270_v25 = vshll.u32 %v311_v5, 16  ;;  %v314_v9 = vld [vmem:[%s13401_s27 + $0x17c] sm:$0x1] }
  0xa2   : > { %16388 = vst [vmem:[#allocation65_spill] sm:$0xff] %v14060_v61  ;;  %11133 = vmatprep.mubr.msk.bf16.mxu1 %vm586_vm2, %v14060_v61  ;;  %v2239_v39 = vsel %vm13436_vm5, %v2234_v56, %v2238_v34  ;;  %v2244_v50 = vrot.slane %v2243_v16, 4  ;;  %v2256_v48 = vrot.slane %v2254_v60, 5  ;;  %v2275_v51 = vshrl.u32 %v14058_v24, 16 }
  0xa3   : > { %v2262_v20 = vrot.slane %v2260_v33, 5  ;;  %v2266_v49 = vrot.slane %v2264_v62, 4  ;;  %v2272_v11 = vrot.slane %v2270_v25, 5  ;;  %v2278_v5 = vshll.u32 %v14058_v24, 16  ;;  %v9786_v33 = vld [vmem:[%s16065_s2 + $0x4] sm:$0x3] }
  0xa4   : > { %v2249_v38 = vsel %vm13436_vm5, %v2244_v50, %v2248_v27  ;;  %v2257_v47 = vor.u32 %v2256_v48, %v2253_v1  ;;  %v2277_v61 = vrot.slane %v2275_v51, 4  ;;  %v2284_v59 = vshll.u32 %v14068_v43, 16  ;;  %v13237_v1 = vld [vmem:[%s13401_s27 + $0x18] sm:$0xf]  ;;  %v13238_v50 = vld [vmem:[%s13401_s27 + $0x1c] sm:$0xf] }
  0xa5   : > { %v14080_v34 = vcombine.low %v2239_v39, %v2249_v38  ;;  %v2267_v56 = vor.u32 %v2266_v49, %v2262_v20  ;;  %v2280_v16 = vrot.slane %v2278_v5, 5  ;;  %v2288_v60 = vshrl.u32 %v14068_v43, 16  ;;  %v13239_v49 = vld [vmem:[%s13401_s27 + $0x24] sm:$0xf]  ;;  %v13240_v5 = vld [vmem:[%s13401_s27 + $0x28] sm:$0xf] }
  0xa6   : > { %v2258_v62 = vrot.slane %v2257_v47, 4  ;;  %v2286_v25 = vrot.slane %v2284_v59, 5  ;;  %v2294_v27 = vshll.u32 %v314_v9, 16  ;;  %v14088_v48 = vcombine.low %v13237_v1, %v13238_v50  ;;  %v13241_v1 = vld [vmem:[%s13401_s27 + $0x30] sm:$0xf] }
  0xa7   : > { %16389 = vst [vmem:[#allocation66_spill] sm:$0xff] %v14080_v34  ;;  %11134 = vmatmul.mubr.msk.bf16.gmra.mrb[56].mxu1 %vm586_vm2, %v14080_v34  ;;  %v2268_v38 = vrot.slane %v2267_v56, 4  ;;  %v2281_v39 = vor.u32 %v2280_v16, %v2277_v61  ;;  %v2290_v51 = vrot.slane %v2288_v60, 4  ;;  %v14094_v17 = vcombine.low %v13239_v49, %v13240_v5  ;;  %v13242_v56 = vld [vmem:[%s13401_s27 + $0x34] sm:$0xf] }
  0xa8   : > { %v3433_v59 = vor.u32 %v13408_v22, %v13405_v19  ;;  %v2263_v47 = vsel %vm13436_vm5, %v2258_v62, %v2262_v20  ;;  %11015 = vmatprep.mubr.msk.bf16.mxu0 %vm586_vm2, %v14088_v48  ;;  %v14103_v9 = vand.u32 %v9786_v33, %v13370_v3  ;;  %v14107_v61 = vcombine.low %v13241_v1, %v13242_v56  ;;  %v13245_v5 = vld [vmem:[%s13401_s27 + $0x48] sm:$0xf] }
  0xa9   : > { %v2273_v16 = vsel %vm13436_vm5, %v2268_v38, %v2272_v11  ;;  %v2282_v60 = vrot.slane %v2281_v39, 4  ;;  %v2291_v50 = vor.u32 %v2290_v51, %v2286_v25  ;;  %v2296_v19 = vrot.slane %v2294_v27, 5  ;;  %11016 = vmatmul.mubr.msk.bf16.gmra.mrb[4].mxu0 %vm586_vm2, %v14094_v17  ;;  %v13243_v27 = vld [vmem:[%s13401_s27 + $0x3c] sm:$0xf]  ;;  %v13244_v38 = vld [vmem:[%s13401_s27 + $0x40] sm:$0xf] }
  0xaa   : > { %v3443_v22 = vor.u32 %v13422_v35, %v13418_v30  ;;  %v3467_v20 = vor.u32 %v13445_v52, %v13429_v41  ;;  %v14117_v33 = vcombine.low %v2263_v47, %v2273_v16  ;;  %11207 = vmatprep.subr.bf16.mxu0 %v14103_v9  ;;  %11273 = vmatprep.subr.bf16.mxu1 %v14103_v9  ;;  %v3434_v35 = vrot.slane %v3433_v59, 4  ;;  %v13246_v47 = vld [vmem:[%s13401_s27 + $0x4c] sm:$0xf] }
  0xab   : > { %v2287_v11 = vsel %vm13436_vm5, %v2282_v60, %v2286_v25  ;;  %v2292_v62 = vrot.slane %v2291_v50, 4  ;;  %11208 = vmatpush3.bf16.msra.mxu0 %v14103_v9  ;;  %11019 = vmatprep.mubr.msk.bf16.mxu0 %vm586_vm2, %v14107_v61  ;;  %v14132_v39 = vcombine.low %v13243_v27, %v13244_v38  ;;  %v14138_v1 = vcombine.low %v13245_v5, %v13246_v47  ;;  %v323_v50 = vld [vmem:[%s13385_s24 + $0x8] sm:$0x1]  ;;  %v13257_v27 = vld [vmem:[%s13401_s27 + $0x90] sm:$0xf] }
  0xac   : > { %16390 = vst [vmem:[#allocation67_spill] sm:$0xff] %v14117_v33  ;;  %11137 = vmatprep.mubr.msk.bf16.mxu1 %vm586_vm2, %v14117_v33  ;;  %v3444_v51 = vrot.slane %v3443_v22, 4  ;;  %v3468_v25 = vrot.slane %v3467_v20, 4  ;;  %v14142_v56 = vcombine.low %v13791_v53, %v13796_v32  ;;  %v14146_v59 = vcombine.low %v13815_v2, %v13818_v46  ;;  %v326_v46 = vld [vmem:[%s13385_s24 + $0x14] sm:$0x1] }
  0xad   : > { %v2297_v52 = vsel %vm13436_vm5, %v2292_v62, %v2296_v19  ;;  %16391 = vst [vmem:[#allocation68_spill] sm:$0xff] %v14132_v39  ;;  %16393 = vst [vmem:[#allocation70_spill] sm:$0xff] %v14138_v1  ;;  %v14150_v16 = vcombine.low %v13841_v4, %v13844_v63  ;;  %v14154_v60 = vcombine.low %v13864_v28, %v13871_v31  ;;  %v3446_v31 = vshll.u32 %v323_v50, 16  ;;  %v13253_v20 = vld [vmem:[%s13401_s27 + $0x78] sm:$0xf] }
  0xae   : > { %v14134_v49 = vcombine.low %v2287_v11, %v2297_v52  ;;  %16394 = vst [vmem:[#allocation71_spill] sm:$0xff] %v14142_v56  ;;  %16395 = vst [vmem:[#allocation72_spill] sm:$0xff] %v14146_v59  ;;  %v14161_v53 = vcombine.low %v13891_v29, %v13900_v8  ;;  %v14165_v32 = vcombine.low %v13911_v6, %v13919_v37  ;;  %v3470_v37 = vshll.u32 %v326_v46, 16  ;;  %v13255_v62 = vld [vmem:[%s13401_s27 + $0x84] sm:$0xf] }
  0xaf   : > { %16396 = vst [vmem:[#allocation73_spill] sm:$0xff] %v14150_v16  ;;  %16397 = vst [vmem:[#allocation74_spill] sm:$0xff] %v14154_v60  ;;  %v14169_v63 = vcombine.low %v13941_v23, %v13946_v36  ;;  %v14173_v2 = vcombine.low %v13965_v58, %v13968_v0  ;;  %v14182_v4 = vcombine.low %v13991_v44, %v13994_v21  ;;  %v3448_v23 = vrot.slane %v3446_v31, 5  ;;  %v13247_v0 = vld [vmem:[%s13401_s27 + $0x54] sm:$0xf] }
  0xb0   : > { %16392 = vst [vmem:[#allocation69_spill] sm:$0xff] %v14134_v49  ;;  %11138 = vmatmul.mubr.msk.bf16.gmra.mrb[60].mxu1 %vm586_vm2, %v14134_v49  ;;  %16398 = vst [vmem:[#allocation75_spill] sm:$0xff] %v14161_v53  ;;  %v14186_v8 = vcombine.low %v14014_v18, %v14021_v57  ;;  %v14190_v28 = vcombine.low %v14037_v54, %v14048_v55  ;;  %v14199_v21 = vcombine.low %v14058_v24, %v14068_v43  ;;  %v13248_v44 = vld [vmem:[%s13401_s27 + $0x58] sm:$0xf]  ;;  %v13249_v57 = vld [vmem:[%s13401_s27 + $0x60] sm:$0xf] }
  0xb1   : > { %16399 = vst [vmem:[#allocation76_spill] sm:$0xff] %v14165_v32  ;;  %16400 = vst [vmem:[#allocation77_spill] sm:$0xff] %v14169_v63  ;;  %11143 = vmatprep.mubr.msk.bf16.mxu1 %vm586_vm2, %v13392_v10  ;;  %11020 = vmatmul.mubr.msk.bf16.gmra.mrb[8].mxu0 %vm586_vm2, %v14132_v39  ;;  %v9883_v10 = vld [vmem:[%s16065_s2 + $0x6] sm:$0x3]  ;;  %v3439_v29 = vsel %vm13436_vm5, %v3434_v35, %v13418_v30  ;;  %v3472_v36 = vrot.slane %v3470_v37, 5  ;;  %v3449_v58 = vsel %vm13436_vm5, %v3444_v51, %v3448_v23 }
  0xb2   : > { %16401 = vst [vmem:[#allocation78_spill] sm:$0xff] %v14173_v2  ;;  %16402 = vst [vmem:[#allocation79_spill] sm:$0xff] %v14182_v4  ;;  %11023 = vmatprep.mubr.msk.bf16.mxu0 %vm586_vm2, %v14138_v1  ;;  %v14205_v6 = vand.u32 %v9883_v10, %v13370_v3  ;;  %v14212_v55 = vcombine.low %v13247_v0, %v13248_v44  ;;  %v14214_v18 = vcombine.low %v3439_v29, %v3449_v58  ;;  %v13250_v54 = vld [vmem:[%s13401_s27 + $0x64] sm:$0xf]  ;;  %v13256_v35 = vld [vmem:[%s13401_s27 + $0x88] sm:$0xf] }
  0xb3   : > { %16403 = vst [vmem:[#allocation80_spill] sm:$0xff] %v14186_v8  ;;  %16404 = vst [vmem:[#allocation81_spill] sm:$0xff] %v14190_v28  ;;  %v3473_v30 = vsel %vm13436_vm5, %v3468_v25, %v3472_v36  ;;  %v14220_v24 = vcombine.low %v13249_v57, %v13250_v54  ;;  %v16408_v43 = vsel %vm13436_vm5, %v13427_v40, %v13429_v41  ;;  %v13251_v40 = vld [vmem:[%s13401_s27 + $0x6c] sm:$0xf]  ;;  %v13252_v41 = vld [vmem:[%s13401_s27 + $0x70] sm:$0xf] }
  0xb4   : > { %16405 = vst [vmem:[#allocation82_spill] sm:$0xff] %v14199_v21  ;;  %11339 = vmatprep.subr.bf16.mxu0 %v14205_v6  ;;  %16406 = vst [vmem:[#allocation83_spill] sm:$0xff] %v14212_v55  ;;  %v14227_v19 = vcombine.low %v16408_v43, %v3473_v30  ;;  %v14241_v22 = vcombine.low %v13251_v40, %v13252_v41  ;;  %v14257_v52 = vcombine.low %v13255_v62, %v13256_v35  ;;  %v13258_v38 = vld [vmem:[%s13401_s27 + $0x94] sm:$0xf]  ;;  %v13259_v25 = vld [vmem:[%s13401_s27 + $0x9c] sm:$0xf] }
  0xb5   : > { %16407 = vst [vmem:[#allocation84_spill] sm:$0xff] %v14220_v24  ;;  %v14261_v51 = vcombine.low %v13257_v27, %v13258_v38  ;;  %v13260_v5 = vld [vmem:[%s13401_s27 + $0xa0] sm:$0xf]  ;;  %v13261_v50 = vld [vmem:[%s13401_s27 + $0xa8] sm:$0xf]  ;;  %v16416_v10 = vld [vmem:[#allocation8_spill] sm:$0xff] }
  0xb6   : > { %16409 = vst [vmem:[#allocation85_spill] sm:$0xff] %v14227_v19  ;;  %16410 = vst [vmem:[#allocation86_spill] sm:$0xff] %v14241_v22  ;;  %v14273_v47 = vcombine.low %v13259_v25, %v13260_v5  ;;  %v13262_v46 = vld [vmem:[%s13401_s27 + $0xac] sm:$0xf]  ;;  %v13263_v29 = vld [vmem:[%s13401_s27 + $0xb4] sm:$0xf] }
  0xb7   : > { %16412 = vst [vmem:[#allocation88_spill] sm:$0xff] %v14257_v52  ;;  %16413 = vst [vmem:[#allocation89_spill] sm:$0xff] %v14261_v51  ;;  %v14277_v31 = vcombine.low %v13261_v50, %v13262_v46  ;;  %v13264_v37 = vld [vmem:[%s13401_s27 + $0xb8] sm:$0xf]  ;;  %v16419_v58 = vld [vmem:[#allocation28_spill] sm:$0xff] }
  0xb8   : > { %11144 = vmatmul.mubr.msk.bf16.vlgmr.msra.gmra.mrb[0].mxu1 %vm586_vm2, %v13395_v15  ;;  %16414 = vst [vmem:[#allocation90_spill] sm:$0xff] %v14273_v47  ;;  %v14289_v23 = vcombine.low %v13263_v29, %v13264_v37  ;;  %v16418_v36 = vld [vmem:[#allocation29_spill] sm:$0xff]  ;;  %v16422_v30 = vld [vmem:[#allocation12_spill] sm:$0xff]  ;;  %v16423_v57 = vld [vmem:[#allocation34_spill] sm:$0xff] }
  0xb9   : > { %11274 = vmatpush3.bf16.msra.mxu1 %v14103_v9  ;;  %11147 = vmatprep.mubr.msk.bf16.mxu1 %vm586_vm2, %v13412_v26  ;;  %v13254_v9 = vld [vmem:[%s13401_s27 + $0x7c] sm:$0xf]  ;;  %16415 = vst [vmem:[#allocation91_spill] sm:$0xff] %v14277_v31  ;;  %v14293_v0 = vcombine.low %v16419_v58, %v16418_v36  ;;  %v16424_v54 = vld [vmem:[#allocation32_spill] sm:$0xff]  ;;  %v16426_v40 = vld [vmem:[#allocation39_spill] sm:$0xff] }
  0xba   : > { %11024 = vmatmul.mubr.msk.bf16.gmra.mrb[12].mxu0 %vm586_vm2, %v14212_v55  ;;  %11405 = vmatprep.subr.bf16.mxu1 %v14205_v6  ;;  %v14245_v11 = vcombine.low %v13253_v20, %v13254_v9  ;;  %16417 = vst [vmem:[#allocation92_spill] sm:$0xff] %v14289_v23  ;;  %v16421_v44 = vld [vmem:[#allocation9_spill] sm:$0xff]  ;;  %v14305_v43 = vcombine.low %v16424_v54, %v16423_v57  ;;  %v16427_v41 = vld [vmem:[#allocation36_spill] sm:$0xff]  ;;  %v16431_v35 = vld [vmem:[#allocation42_spill] sm:$0xff] }
  0xbb   : > { %11027 = vmatprep.mubr.msk.bf16.mxu0 %vm586_vm2, %v14220_v24  ;;  %16420 = vst [vmem:[#allocation29_spill] sm:$0xff] %v14293_v0  ;;  %v14309_v20 = vcombine.low %v16427_v41, %v16426_v40  ;;  %v16429_v9 = vld [vmem:[#allocation13_spill] sm:$0xff]  ;;  %v16430_v62 = vld [vmem:[#allocation16_spill] sm:$0xff]  ;;  %v16439_v37 = vld [vmem:[#allocation30_spill] sm:$0xff] }
  0xbc   : > { %16411 = vst [vmem:[#allocation87_spill] sm:$0xff] %v14245_v11  ;;  %16425 = vst [vmem:[#allocation28_spill] sm:$0xff] %v14305_v43  ;;  %v16432_v27 = vld [vmem:[#allocation40_spill] sm:$0xff]  ;;  %v16434_v25 = vld [vmem:[#allocation17_spill] sm:$0xff] }
  0xbd   : > { %16428 = vst [vmem:[#allocation34_spill] sm:$0xff] %v14309_v20  ;;  %v14321_v38 = vcombine.low %v16432_v27, %v16431_v35  ;;  %v16435_v5 = vld [vmem:[#allocation20_spill] sm:$0xff]  ;;  %v16436_v50 = vld [vmem:[#allocation21_spill] sm:$0xff]  ;;  %v16440_v36 = vld [vmem:[#allocation31_spill] sm:$0xff] }
  0xbe   : > { %v16437_v46 = vld [vmem:[#allocation24_spill] sm:$0xff]  ;;  %v16438_v29 = vld [vmem:[#allocation25_spill] sm:$0xff]  ;;  %v16442_v57 = vld [vmem:[#allocation38_spill] sm:$0xff] }
  0xbf   : > { %16433 = vst [vmem:[#allocation32_spill] sm:$0xff] %v14321_v38  ;;  %v16441_v58 = vld [vmem:[#allocation37_spill] sm:$0xff]  ;;  %v16443_v54 = vld [vmem:[#allocation44_spill] sm:$0xff] }
  0xc0   : > { %11148 = vmatmul.mubr.msk.bf16.gmra.mrb[4].mxu1 %vm586_vm2, %v13431_v42  ;;  %v16444_v40 = vld [vmem:[#allocation45_spill] sm:$0xff]  ;;  %v16445_v41 = vld [vmem:[#allocation48_spill] sm:$0xff] }
  0xc1   : > { %11151 = vmatprep.mubr.msk.bf16.mxu1 %vm586_vm2, %v13452_v7  ;;  %v16446_v35 = vld [vmem:[#allocation49_spill] sm:$0xff]  ;;  %v16447_v27 = vld [vmem:[#allocation52_spill] sm:$0xff] }
  0xc2   : > { %11028 = vmatmul.mubr.msk.bf16.gmra.mrb[16].mxu0 %vm586_vm2, %v14241_v22 }
  0xc3   : > { %11031 = vmatprep.mubr.msk.bf16.mxu0 %vm586_vm2, %v14245_v11 }
  0xc8   : > { %11152 = vmatmul.mubr.msk.bf16.gmra.mrb[8].mxu1 %vm586_vm2, %v13455_v13 }
  0xc9   : > { %11155 = vmatprep.mubr.msk.bf16.mxu1 %vm586_vm2, %v13491_v12 }
  0xca   : > { %11032 = vmatmul.mubr.msk.bf16.gmra.mrb[20].mxu0 %vm586_vm2, %v14257_v52 }
  0xcb   : > { %11035 = vmatprep.mubr.msk.bf16.mxu0 %vm586_vm2, %v14261_v51 }
  0xd0   : > { %11156 = vmatmul.mubr.msk.bf16.gmra.mrb[12].mxu1 %vm586_vm2, %v13493_v14 }
  0xd1   : > { %11159 = vmatprep.mubr.msk.bf16.mxu1 %vm586_vm2, %v16416_v10  ;;  %v365_v10 = vld [vmem:[%s13385_s24 + $0xb0] sm:$0x1] }
  0xd2   : > { %11036 = vmatmul.mubr.msk.bf16.gmra.mrb[24].mxu0 %vm586_vm2, %v14273_v47 }
  0xd3   : > { %11039 = vmatprep.mubr.msk.bf16.mxu0 %vm586_vm2, %v14277_v31 }
  0xd8   : > { %11160 = vmatmul.mubr.msk.bf16.gmra.mrb[16].mxu1 %vm586_vm2, %v16421_v44 }
  0xd9   : > { %11163 = vmatprep.mubr.msk.bf16.mxu1 %vm586_vm2, %v16422_v30 }
  0xda   : > { %11040 = vmatmul.mubr.msk.bf16.gmra.mrb[28].mxu0 %vm586_vm2, %v14289_v23 }
  0xdb   : > { %11043 = vmatprep.mubr.msk.bf16.mxu0 %vm586_vm2, %v14293_v0 }
  0xe0   : > { %11164 = vmatmul.mubr.msk.bf16.gmra.mrb[20].mxu1 %vm586_vm2, %v16429_v9 }
  0xe1   : > { %11167 = vmatprep.mubr.msk.bf16.mxu1 %vm586_vm2, %v16430_v62 }
  0xe2   : > { %11044 = vmatmul.mubr.msk.bf16.gmra.mrb[32].mxu0 %vm586_vm2, %v14305_v43  ;;  %v16453_v43 = vld [vmem:[#allocation57_spill] sm:$0xff] }
  0xe3   : > { %11047 = vmatprep.mubr.msk.bf16.mxu0 %vm586_vm2, %v14309_v20  ;;  %v16449_v20 = vld [vmem:[#allocation53_spill] sm:$0xff] }
  0xe8   : > { %11168 = vmatmul.mubr.msk.bf16.gmra.mrb[24].mxu1 %vm586_vm2, %v16434_v25  ;;  %v13272_v25 = vld [vmem:[%s13385_s24 + $0x40] sm:$0xf] }
  0xe9   : > { %11171 = vmatprep.mubr.msk.bf16.mxu1 %vm586_vm2, %v16435_v5  ;;  %v3560_v62 = vshrl.u32 %v13272_v25, 16 }
  0xea   : > { %11048 = vmatmul.mubr.msk.bf16.gmra.mrb[36].mxu0 %vm586_vm2, %v14321_v38 }
  0xeb   : > { %11051 = vmatprep.mubr.msk.bf16.mxu0 %vm586_vm2, %v14142_v56 }
  0xf0   : > { %11172 = vmatmul.mubr.msk.bf16.gmra.mrb[28].mxu1 %vm586_vm2, %v16436_v50 }
  0xf1   : > { %11175 = vmatprep.mubr.msk.bf16.mxu1 %vm586_vm2, %v16437_v46 }
  0xf2   : > { %11052 = vmatmul.mubr.msk.bf16.gmra.mrb[40].mxu0 %vm586_vm2, %v14146_v59 }
  0xf3   : > { %11055 = vmatprep.mubr.msk.bf16.mxu0 %vm586_vm2, %v14150_v16 }
  0xf8   : > { %11176 = vmatmul.mubr.msk.bf16.gmra.mrb[32].mxu1 %vm586_vm2, %v16438_v29 }
  0xf9   : > { %11179 = vmatprep.mubr.msk.bf16.mxu1 %vm586_vm2, %v16439_v37  ;;  %v13270_v37 = vld [vmem:[%s13385_s24 + $0x34] sm:$0xf] }
  0xfa   : > { %11056 = vmatmul.mubr.msk.bf16.gmra.mrb[44].mxu0 %vm586_vm2, %v14154_v60  ;;  %v3532_v60 = vshll.u32 %v13270_v37, 16  ;;  %v3536_v16 = vshrl.u32 %v13270_v37, 16 }
  0xfb   : > { %11059 = vmatprep.mubr.msk.bf16.mxu0 %vm586_vm2, %v14161_v53  ;;  %v16448_v53 = vld [vmem:[#allocation4_spill] sm:$0xff] }
  0xfc   : > { %v3538_v37 = vrot.slane %v3536_v16, 4 }
 0x100   : > { %11180 = vmatmul.mubr.msk.bf16.gmra.mrb[36].mxu1 %vm586_vm2, %v16440_v36 }
 0x101   : > { %11183 = vmatprep.mubr.msk.bf16.mxu1 %vm586_vm2, %v16441_v58 }
 0x102   : > { %11060 = vmatmul.mubr.msk.bf16.gmra.mrb[48].mxu0 %vm586_vm2, %v14165_v32 }
 0x103   : > { %11063 = vmatprep.mubr.msk.bf16.mxu0 %vm586_vm2, %v14169_v63 }
 0x108   : > { %11184 = vmatmul.mubr.msk.bf16.gmra.mrb[40].mxu1 %vm586_vm2, %v16442_v57 }
 0x109   : > { %11187 = vmatprep.mubr.msk.bf16.mxu1 %vm586_vm2, %v16443_v54 }
 0x10a   : > { %11064 = vmatmul.mubr.msk.bf16.gmra.mrb[52].mxu0 %vm586_vm2, %v14173_v2  ;;  %v13266_v2 = vld [vmem:[%s13385_s24 + $0x1c] sm:$0xf] }
 0x10b   : > { %11067 = vmatprep.mubr.msk.bf16.mxu0 %vm586_vm2, %v14182_v4  ;;  %v13265_v4 = vld [vmem:[%s13385_s24 + $0x18] sm:$0xf]  ;;  %v3484_v63 = vshll.u32 %v13266_v2, 16 }
 0x10c   : > { %v3475_v54 = vshrl.u32 %v13265_v4, 16 }
 0x10e   : > { %v3477_v29 = vrot.slane %v3475_v54, 4  ;;  %v16450_v54 = vld [vmem:[#allocation56_spill] sm:$0xff] }
 0x110   : > { %11188 = vmatmul.mubr.msk.bf16.gmra.mrb[44].mxu1 %vm586_vm2, %v16444_v40  ;;  %v3478_v40 = vshll.u32 %v13265_v4, 16 }
 0x111   : > { %11191 = vmatprep.mubr.msk.bf16.mxu1 %vm586_vm2, %v16445_v41  ;;  %v3488_v41 = vshrl.u32 %v13266_v2, 16  ;;  %v329_v2 = vld [vmem:[%s13385_s24 + $0x20] sm:$0x1] }
 0x112   : > { %11068 = vmatmul.mubr.msk.bf16.gmra.mrb[56].mxu0 %vm586_vm2, %v14186_v8  ;;  %v13267_v8 = vld [vmem:[%s13385_s24 + $0x24] sm:$0xf]  ;;  %v3480_v46 = vrot.slane %v3478_v40, 5 }
 0x113   : > { %11071 = vmatprep.mubr.msk.bf16.mxu0 %vm586_vm2, %v14190_v28  ;;  %v3499_v28 = vshrl.u32 %v13267_v8, 16  ;;  %v3502_v57 = vshll.u32 %v13267_v8, 16  ;;  %v3490_v59 = vrot.slane %v3488_v41, 4  ;;  %v332_v8 = vld [vmem:[%s13385_s24 + $0x2c] sm:$0x1]  ;;  %v3494_v41 = vshll.u32 %v329_v2, 16 }
 0x115   : > { %v3501_v56 = vrot.slane %v3499_v28, 4  ;;  %v3504_v50 = vrot.slane %v3502_v57, 5  ;;  %v3518_v28 = vshll.u32 %v332_v8, 16  ;;  %v16451_v57 = vld [vmem:[#allocation5_spill] sm:$0xff]  ;;  %v3496_v2 = vrot.slane %v3494_v41, 5 }
 0x117   : > { %v3520_v8 = vrot.slane %v3518_v28, 5 }
 0x118   : > { %11192 = vmatmul.mubr.msk.bf16.gmra.mrb[48].mxu1 %vm586_vm2, %v16446_v35  ;;  %v13268_v35 = vld [vmem:[%s13385_s24 + $0x28] sm:$0xf] }
 0x119   : > { %11195 = vmatprep.mubr.msk.bf16.mxu1 %vm586_vm2, %v16447_v27  ;;  %v3508_v58 = vshll.u32 %v13268_v35, 16  ;;  %v3512_v32 = vshrl.u32 %v13268_v35, 16  ;;  %v13269_v27 = vld [vmem:[%s13385_s24 + $0x30] sm:$0xf] }
 0x11a   : > { %11072 = vmatmul.mubr.msk.bf16.gmra.mrb[60].mxu0 %vm586_vm2, %v14199_v21  ;;  %v3523_v36 = vshrl.u32 %v13269_v27, 16  ;;  %v3526_v4 = vshll.u32 %v13269_v27, 16  ;;  %v14386_v21 = vrot.slane %v3484_v63, 5  ;;  %v14393_v27 = vrot.slane %v3532_v60, 5 }
 0x11b   : > { %11209 = vmatprep.mubr.msk.bf16.mxu0 %vm586_vm2, %v16448_v53  ;;  %v14389_v35 = vrot.slane %v3508_v58, 5  ;;  %v3514_v5 = vrot.slane %v3512_v32, 4  ;;  %v3481_v63 = vor.u32 %v3480_v46, %v3477_v29  ;;  %v335_v58 = vld [vmem:[%s13385_s24 + $0x38] sm:$0x1]  ;;  %v3505_v32 = vor.u32 %v3504_v50, %v3501_v56  ;;  %v13271_v50 = vld [vmem:[%s13385_s24 + $0x3c] sm:$0xf] }
 0x11c   : > { %v3525_v53 = vrot.slane %v3523_v36, 4  ;;  %v3528_v38 = vrot.slane %v3526_v4, 5  ;;  %v3491_v40 = vor.u32 %v3490_v59, %v14386_v21  ;;  %v16452_v4 = vld [vmem:[#allocation6_spill] sm:$0xff]  ;;  %v3539_v60 = vor.u32 %v3538_v37, %v14393_v27 }
 0x11d   : > { %v3515_v36 = vor.u32 %v3514_v5, %v14389_v35  ;;  %v3542_v59 = vshll.u32 %v335_v58, 16  ;;  %v3482_v46 = vrot.slane %v3481_v63, 4  ;;  %v3547_v5 = vshrl.u32 %v13271_v50, 16  ;;  %v338_v37 = vld [vmem:[%s13385_s24 + $0x44] sm:$0x1]  ;;  %v16454_v58 = vld [vmem:[#allocation60_spill] sm:$0xff] }
 0x11e   : > { %v3529_v16 = vor.u32 %v3528_v38, %v3525_v53  ;;  %v3492_v29 = vrot.slane %v3491_v40, 4  ;;  %v3540_v38 = vrot.slane %v3539_v60, 4  ;;  %v13273_v63 = vld [vmem:[%s13385_s24 + $0x48] sm:$0xf] }
 0x11f   : > { %v3516_v56 = vrot.slane %v3515_v36, 4  ;;  %v3544_v53 = vrot.slane %v3542_v59, 5  ;;  %v3571_v40 = vshrl.u32 %v13273_v63, 16  ;;  %v3487_v41 = vsel %vm13436_vm5, %v3482_v46, %v14386_v21 }
 0x120   : > { %11196 = vmatmul.mubr.msk.bf16.gmra.mrb[52].mxu1 %vm586_vm2, %v16449_v20  ;;  %v3530_v20 = vrot.slane %v3529_v16, 4  ;;  %v3497_v28 = vsel %vm13436_vm5, %v3492_v29, %v3496_v2  ;;  %v3549_v60 = vrot.slane %v3547_v5, 4  ;;  %v3562_v29 = vrot.slane %v3560_v62, 4  ;;  %v13275_v5 = vld [vmem:[%s13385_s24 + $0x54] sm:$0xf] }
 0x121   : > { %11199 = vmatprep.mubr.msk.bf16.mxu1 %vm586_vm2, %v16450_v54  ;;  %v3550_v54 = vshll.u32 %v13271_v50, 16  ;;  %v3521_v16 = vsel %vm13436_vm5, %v3516_v56, %v3520_v8  ;;  %v16456_v50 = vld [vmem:[#allocation10_spill] sm:$0xff]  ;;  %v3566_v2 = vshll.u32 %v338_v37, 16 }
 0x122   : > { %11210 = vmatmul.mubr.msk.bf16.vlgmr.msra.gmra.mrb[0].mxu0 %vm586_vm2, %v16451_v57  ;;  %v3506_v57 = vrot.slane %v3505_v32, 4  ;;  %v16455_v32 = vld [vmem:[#allocation7_spill] sm:$0xff]  ;;  %v3535_v21 = vsel %vm13436_vm5, %v3530_v20, %v14393_v27  ;;  %v14438_v20 = vcombine.low %v3487_v41, %v3497_v28 }
 0x123   : > { %11213 = vmatprep.mubr.msk.bf16.mxu0 %vm586_vm2, %v16452_v4  ;;  %11340 = vmatpush3.bf16.msra.mxu0 %v14205_v6  ;;  %v3556_v4 = vshll.u32 %v13272_v25, 16  ;;  %v3574_v25 = vshll.u32 %v13273_v63, 16  ;;  %v3552_v59 = vrot.slane %v3550_v54, 5  ;;  %v13274_v63 = vld [vmem:[%s13385_s24 + $0x4c] sm:$0xf]  ;;  %v14447_v37 = vrot.slane %v3566_v2, 5 }
 0x124   : > { %v3511_v36 = vsel %vm13436_vm5, %v3506_v57, %v14389_v35  ;;  %v3545_v35 = vsel %vm13436_vm5, %v3540_v38, %v3544_v53  ;;  %v3573_v57 = vrot.slane %v3571_v40, 4  ;;  %v3580_v8 = vshll.u32 %v13274_v63, 16  ;;  %16457 = vst [vmem:[#allocation39_spill] sm:$0xff] %v14438_v20  ;;  %v16459_v38 = vld [vmem:[#allocation61_spill] sm:$0xff]  ;;  %v341_v40 = vld [vmem:[%s13385_s24 + $0x50] sm:$0x1] }
 0x125   : > { %v14431_v46 = vrot.slane %v3556_v4, 5  ;;  %v3584_v56 = vshrl.u32 %v13274_v63, 16  ;;  %v3576_v54 = vrot.slane %v3574_v25, 5  ;;  %v14440_v27 = vcombine.low %v3511_v36, %v3521_v16  ;;  %v13277_v2 = vld [vmem:[%s13385_s24 + $0x60] sm:$0xf] }
 0x126   : > { %v3553_v62 = vor.u32 %v3552_v59, %v3549_v60  ;;  %v14445_v53 = vcombine.low %v3535_v21, %v3545_v35  ;;  %v14450_v25 = vrot.slane %v3580_v8, 5  ;;  %v9950_v60 = vld [vmem:[%s16065_s2 + $0x8] sm:$0x3]  ;;  %v344_v21 = vld [vmem:[%s13385_s24 + $0x5c] sm:$0x1]  ;;  %v3619_v35 = vshrl.u32 %v13277_v2, 16 }
 0x127   : > { %16458 = vst [vmem:[#allocation36_spill] sm:$0xff] %v14440_v27  ;;  %v3563_v4 = vor.u32 %v3562_v29, %v14431_v46  ;;  %v3577_v41 = vor.u32 %v3576_v54, %v3573_v57  ;;  %v16461_v59 = vld [vmem:[#allocation11_spill] sm:$0xff]  ;;  %v3622_v63 = vshll.u32 %v13277_v2, 16  ;;  %v3614_v30 = vshll.u32 %v344_v21, 16 }
 0x128   : > { %11200 = vmatmul.mubr.msk.bf16.gmra.mrb[56].mxu1 %vm586_vm2, %v16453_v43  ;;  %16460 = vst [vmem:[#allocation42_spill] sm:$0xff] %v14445_v53  ;;  %v13279_v8 = vld [vmem:[%s13385_s24 + $0x6c] sm:$0xf] }
 0x129   : > { %11203 = vmatprep.mubr.msk.bf16.mxu1 %vm586_vm2, %v16454_v58  ;;  %v13276_v58 = vld [vmem:[%s13385_s24 + $0x58] sm:$0xf]  ;;  %v3646_v54 = vshll.u32 %v13279_v8, 16  ;;  %v14475_v2 = vrot.slane %v3563_v4, 4 }
 0x12a   : > { %11214 = vmatmul.mubr.msk.bf16.gmra.mrb[4].mxu0 %vm586_vm2, %v16455_v32  ;;  %v3595_v32 = vshrl.u32 %v13275_v5, 16  ;;  %v3604_v43 = vshll.u32 %v13276_v58, 16  ;;  %v3608_v0 = vshrl.u32 %v13276_v58, 16  ;;  %v3586_v58 = vrot.slane %v3584_v56, 4 }
 0x12b   : > { %11217 = vmatprep.mubr.msk.bf16.mxu0 %vm586_vm2, %v16456_v50  ;;  %v3598_v50 = vshll.u32 %v13275_v5, 16  ;;  %v3643_v56 = vshrl.u32 %v13279_v8, 16  ;;  %v3648_v44 = vrot.slane %v3646_v54, 5  ;;  %v16463_v54 = vld [vmem:[#allocation15_spill] sm:$0xff] }
 0x12c   : > { %v3597_v28 = vrot.slane %v3595_v32, 4  ;;  %v14454_v16 = vrot.slane %v3604_v43, 5  ;;  %v3610_v29 = vrot.slane %v3608_v0, 4  ;;  %v16462_v32 = vld [vmem:[#allocation14_spill] sm:$0xff]  ;;  %v3587_v5 = vor.u32 %v3586_v58, %v14450_v25 }
 0x12d   : > { %v3600_v36 = vrot.slane %v3598_v50, 5  ;;  %v13278_v43 = vld [vmem:[%s13385_s24 + $0x64] sm:$0xf]  ;;  %v3621_v58 = vrot.slane %v3619_v35, 4  ;;  %v3645_v31 = vrot.slane %v3643_v56, 4 }
 0x12e   : > { %v3628_v50 = vshll.u32 %v13278_v43, 16  ;;  %v3632_v57 = vshrl.u32 %v13278_v43, 16  ;;  %v3611_v8 = vor.u32 %v3610_v29, %v14454_v16  ;;  %v13281_v29 = vld [vmem:[%s13385_s24 + $0x78] sm:$0xf] }
 0x12f   : > { %v3601_v43 = vor.u32 %v3600_v36, %v3597_v28  ;;  %v350_v36 = vld [vmem:[%s13385_s24 + $0x74] sm:$0x1]  ;;  %v3667_v35 = vshrl.u32 %v13281_v29, 16 }
 0x130   : > { %11204 = vmatmul.mubr.msk.bf16.gmra.mrb[60].mxu1 %vm586_vm2, %v16459_v38  ;;  %v13280_v38 = vld [vmem:[%s13385_s24 + $0x70] sm:$0xf]  ;;  %v14480_v23 = vrot.slane %v3628_v50, 5  ;;  %v13282_v50 = vld [vmem:[%s13385_s24 + $0x7c] sm:$0xf] }
 0x131   : > { %11275 = vmatprep.mubr.msk.bf16.mxu1 %vm586_vm2, %v14214_v18  ;;  %v14464_v18 = vand.u32 %v9950_v60, %v13370_v3  ;;  %v3652_v0 = vshll.u32 %v13280_v38, 16  ;;  %v3656_v9 = vshrl.u32 %v13280_v38, 16  ;;  %v14473_v60 = vrot.slane %v3553_v62, 4 }
 0x132   : > { %11218 = vmatmul.mubr.msk.bf16.gmra.mrb[8].mxu0 %vm586_vm2, %v16461_v59  ;;  %v3590_v59 = vshll.u32 %v341_v40, 16  ;;  %v3624_v40 = vrot.slane %v3622_v63, 5  ;;  %v3634_v38 = vrot.slane %v3632_v57, 4  ;;  %v3588_v62 = vrot.slane %v3587_v5, 4 }
 0x133   : > { %11221 = vmatprep.mubr.msk.bf16.mxu0 %vm586_vm2, %v16462_v32  ;;  %11471 = vmatprep.subr.bf16.mxu0 %v14464_v18  ;;  %v14477_v32 = vrot.slane %v3577_v41, 4  ;;  %v347_v41 = vld [vmem:[%s13385_s24 + $0x68] sm:$0x1]  ;;  %v14485_v21 = vrot.slane %v3652_v0, 5  ;;  %v3658_v28 = vrot.slane %v3656_v9, 4  ;;  %v3670_v63 = vshll.u32 %v13281_v29, 16 }
 0x134   : > { %v3592_v4 = vrot.slane %v3590_v59, 5  ;;  %v3676_v57 = vshll.u32 %v13282_v50, 16  ;;  %v3680_v56 = vshrl.u32 %v13282_v50, 16  ;;  %v3602_v59 = vrot.slane %v3601_v43, 4 }
 0x135   : > { %v3612_v5 = vrot.slane %v3611_v8, 4  ;;  %v3616_v0 = vrot.slane %v3614_v30, 5  ;;  %v3625_v9 = vor.u32 %v3624_v40, %v3621_v58  ;;  %v3635_v29 = vor.u32 %v3634_v38, %v14480_v23 }
 0x136   : > { %v3638_v50 = vshll.u32 %v347_v41, 16  ;;  %v3569_v30 = vsel %vm13436_vm5, %v14475_v2, %v14447_v37  ;;  %v3583_v43 = vsel %vm13436_vm5, %v14477_v32, %v14450_v25  ;;  %v3659_v8 = vor.u32 %v3658_v28, %v14485_v21 }
 0x137   : > { %v3669_v58 = vrot.slane %v3667_v35, 4  ;;  %v3672_v40 = vrot.slane %v3670_v63, 5  ;;  %v14513_v38 = vrot.slane %v3676_v57, 5  ;;  %v3607_v37 = vsel %vm13436_vm5, %v3602_v59, %v14454_v16  ;;  %v13283_v16 = vld [vmem:[%s13385_s24 + $0x84] sm:$0xf]  ;;  %v16466_v59 = vld [vmem:[#allocation19_spill] sm:$0xff] }
 0x138   : > { %11276 = vmatmul.mubr.msk.bf16.vlgmr.msra.gmra.mrb[0].mxu1 %vm586_vm2, %v14227_v19  ;;  %v3649_v19 = vor.u32 %v3648_v44, %v3645_v31  ;;  %v3682_v31 = vrot.slane %v3680_v56, 4  ;;  %v3593_v44 = vsel %vm13436_vm5, %v3588_v62, %v3592_v4  ;;  %v3617_v25 = vsel %vm13436_vm5, %v3612_v5, %v3616_v0 }
 0x139   : > { %11406 = vmatpush3.bf16.msra.mxu1 %v14205_v6  ;;  %11279 = vmatprep.mubr.msk.bf16.mxu1 %vm586_vm2, %v14438_v20  ;;  %v3559_v6 = vsel %vm13436_vm5, %v14473_v60, %v14431_v46  ;;  %v16464_v20 = vld [vmem:[#allocation18_spill] sm:$0xff]  ;;  %v3662_v46 = vshll.u32 %v350_v36, 16  ;;  %v14522_v32 = vrot.slane %v3625_v9, 4  ;;  %v14524_v2 = vrot.slane %v3635_v29, 4 }
 0x13a   : > { %11222 = vmatmul.mubr.msk.bf16.gmra.mrb[12].mxu0 %vm586_vm2, %v16463_v54  ;;  %11537 = vmatprep.subr.bf16.mxu1 %v14464_v18  ;;  %v353_v60 = vld [vmem:[%s13385_s24 + $0x80] sm:$0x1]  ;;  %v14526_v41 = vrot.slane %v3638_v50, 5  ;;  %v14528_v28 = vrot.slane %v3649_v19, 4  ;;  %v14532_v62 = vrot.slane %v3659_v8, 4  ;;  %v3691_v35 = vshrl.u32 %v13283_v16, 16 }
 0x13b   : > { %11225 = vmatprep.mubr.msk.bf16.mxu0 %vm586_vm2, %v16464_v20  ;;  %v3686_v36 = vshll.u32 %v353_v60, 16  ;;  %v14534_v4 = vrot.slane %v3662_v46, 5  ;;  %v3694_v63 = vshll.u32 %v13283_v16, 16  ;;  %v3673_v57 = vor.u32 %v3672_v40, %v3669_v58  ;;  %v16469_v29 = vld [vmem:[#allocation22_spill] sm:$0xff] }
 0x13c   : > { %v3683_v56 = vor.u32 %v3682_v31, %v14513_v38  ;;  %v14540_v19 = vcombine.low %v3559_v6, %v3569_v30  ;;  %v14544_v5 = vcombine.low %v3583_v43, %v3593_v44  ;;  %v14546_v0 = vcombine.low %v3607_v37, %v3617_v25  ;;  %v13284_v43 = vld [vmem:[%s13385_s24 + $0x88] sm:$0xf]  ;;  %v13285_v44 = vld [vmem:[%s13385_s24 + $0x90] sm:$0xf]  ;;  %v13288_v16 = vld [vmem:[%s13385_s24 + $0xa0] sm:$0xf] }
 0x13d   : > { %v3631_v9 = vsel %vm13436_vm5, %v14522_v32, %v14480_v23  ;;  %v3641_v6 = vsel %vm13436_vm5, %v14524_v2, %v14526_v41  ;;  %v3655_v50 = vsel %vm13436_vm5, %v14528_v28, %v14485_v21  ;;  %v3688_v30 = vrot.slane %v3686_v36, 5  ;;  %v13286_v21 = vld [vmem:[%s13385_s24 + $0x94] sm:$0xf]  ;;  %v13287_v41 = vld [vmem:[%s13385_s24 + $0x9c] sm:$0xf]  ;;  %v16471_v20 = vld [vmem:[#allocation26_spill] sm:$0xff] }
 0x13e   : > { %16465 = vst [vmem:[#allocation40_spill] sm:$0xff] %v14540_v19  ;;  %16467 = vst [vmem:[#allocation4_spill] sm:$0xff] %v14544_v5  ;;  %v3700_v8 = vshll.u32 %v13284_v43, 16  ;;  %v3665_v23 = vsel %vm13436_vm5, %v14532_v62, %v14534_v4  ;;  %v3693_v46 = vrot.slane %v3691_v35, 4  ;;  %v3696_v60 = vrot.slane %v3694_v63, 5 }
 0x13f   : > { %16468 = vst [vmem:[#allocation93_spill] sm:$0xff] %v14546_v0  ;;  %v3704_v58 = vshrl.u32 %v13284_v43, 16  ;;  %v3674_v40 = vrot.slane %v3673_v57, 4  ;;  %v3684_v31 = vrot.slane %v3683_v56, 4  ;;  %v3715_v37 = vshrl.u32 %v13285_v44, 16 }
 0x140   : > { %11280 = vmatmul.mubr.msk.bf16.gmra.mrb[4].mxu1 %vm586_vm2, %v14440_v27  ;;  %v3718_v25 = vshll.u32 %v13285_v44, 16  ;;  %v3724_v32 = vshll.u32 %v13286_v21, 16  ;;  %v3728_v2 = vshrl.u32 %v13286_v21, 16  ;;  %v3739_v28 = vshrl.u32 %v13287_v41, 16  ;;  %v13289_v4 = vld [vmem:[%s13385_s24 + $0xa8] sm:$0xf] }
 0x141   : > { %11283 = vmatprep.mubr.msk.bf16.mxu1 %vm586_vm2, %v14445_v53  ;;  %v3742_v36 = vshll.u32 %v13287_v41, 16  ;;  %v3748_v53 = vshll.u32 %v13288_v16, 16  ;;  %v3752_v62 = vshrl.u32 %v13288_v16, 16  ;;  %v3763_v35 = vshrl.u32 %v13289_v4, 16  ;;  %v13290_v43 = vld [vmem:[%s13385_s24 + $0xac] sm:$0xf] }
 0x142   : > { %11226 = vmatmul.mubr.msk.bf16.gmra.mrb[16].mxu0 %vm586_vm2, %v16466_v59  ;;  %v3766_v63 = vshll.u32 %v13289_v4, 16  ;;  %v14574_v57 = vrot.slane %v3700_v8, 5  ;;  %v3706_v56 = vrot.slane %v3704_v58, 4  ;;  %v3772_v44 = vshll.u32 %v13290_v43, 16  ;;  %v356_v4 = vld [vmem:[%s13385_s24 + $0x8c] sm:$0x1] }
 0x143   : > { %11229 = vmatprep.mubr.msk.bf16.mxu0 %vm586_vm2, %v16469_v29  ;;  %v3776_v21 = vshrl.u32 %v13290_v43, 16  ;;  %v3679_v41 = vsel %vm13436_vm5, %v3674_v40, %v14513_v38  ;;  %v3689_v16 = vsel %vm13436_vm5, %v3684_v31, %v3688_v30  ;;  %v3717_v27 = vrot.slane %v3715_v37, 4  ;;  %v359_v58 = vld [vmem:[%s13385_s24 + $0x98] sm:$0x1]  ;;  %v362_v38 = vld [vmem:[%s13385_s24 + $0xa4] sm:$0x1] }
 0x144   : > { %v3720_v8 = vrot.slane %v3718_v25, 5  ;;  %v14588_v29 = vrot.slane %v3724_v32, 5  ;;  %v3730_v43 = vrot.slane %v3728_v2, 4  ;;  %v3741_v59 = vrot.slane %v3739_v28, 4 }
 0x145   : > { %v14593_v40 = vrot.slane %v3748_v53, 5  ;;  %v3754_v30 = vrot.slane %v3752_v62, 4  ;;  %v3765_v31 = vrot.slane %v3763_v35, 4  ;;  %v3768_v37 = vrot.slane %v3766_v63, 5  ;;  %v16670_v45 = vld [vmem:[#allocation40_spill] sm:$0xff] }
 0x146   : > { %v14595_v54 = vcombine.low %v3631_v9, %v3641_v6  ;;  %v3697_v25 = vor.u32 %v3696_v60, %v3693_v46  ;;  %v3778_v32 = vrot.slane %v3776_v21, 4  ;;  %v14600_v2 = vcombine.low %v3655_v50, %v3665_v23 }
 0x147   : > { %v14602_v28 = vcombine.low %v3679_v41, %v3689_v16  ;;  %v3721_v53 = vor.u32 %v3720_v8, %v3717_v27  ;;  %v3731_v62 = vor.u32 %v3730_v43, %v14588_v29  ;;  %v3734_v35 = vshll.u32 %v359_v58, 16 }
 0x148   : > { %11284 = vmatmul.mubr.msk.bf16.gmra.mrb[8].mxu1 %vm586_vm2, %v14540_v19  ;;  %v16470_v19 = vld [vmem:[#allocation23_spill] sm:$0xff]  ;;  %16472 = vst [vmem:[#allocation94_spill] sm:$0xff] %v14595_v54  ;;  %16473 = vst [vmem:[#allocation95_spill] sm:$0xff] %v14600_v2  ;;  %v3758_v9 = vshll.u32 %v362_v38, 16  ;;  %v3755_v46 = vor.u32 %v3754_v30, %v14593_v40  ;;  %v3769_v60 = vor.u32 %v3768_v37, %v3765_v31  ;;  %v3782_v63 = vshll.u32 %v365_v10, 16  ;;  %v16476_v38 = vld [vmem:[#allocation33_spill] sm:$0xff] }
 0x149   : > { %11287 = vmatprep.mubr.msk.bf16.mxu1 %vm586_vm2, %v14544_v5  ;;  %v3744_v5 = vrot.slane %v3742_v36, 5  ;;  %16474 = vst [vmem:[#allocation96_spill] sm:$0xff] %v14602_v28  ;;  %v3707_v36 = vor.u32 %v3706_v56, %v14574_v57  ;;  %v3698_v50 = vrot.slane %v3697_v25, 4  ;;  %v16475_v10 = vld [vmem:[#allocation27_spill] sm:$0xff]  ;;  %v3732_v8 = vrot.slane %v3731_v62, 4 }
 0x14a   : > { %11230 = vmatmul.mubr.msk.bf16.gmra.mrb[20].mxu0 %vm586_vm2, %v16470_v19  ;;  %v14598_v19 = vrot.slane %v3772_v44, 5  ;;  %v13291_v44 = vld [vmem:[%s13385_s24 + $0xb4] sm:$0xf]  ;;  %v3736_v58 = vrot.slane %v3734_v35, 5  ;;  %v3760_v43 = vrot.slane %v3758_v9, 5  ;;  %v3756_v31 = vrot.slane %v3755_v46, 4 }
 0x14b   : > { %11233 = vmatprep.mubr.msk.bf16.mxu0 %vm586_vm2, %v16471_v20  ;;  %v3710_v20 = vshll.u32 %v356_v4, 16  ;;  %v3745_v6 = vor.u32 %v3744_v5, %v3741_v59  ;;  %v3787_v56 = vshrl.u32 %v13291_v44, 16  ;;  %v3790_v21 = vshll.u32 %v13291_v44, 16  ;;  %v13292_v59 = vld [vmem:[%s13385_s24 + $0xb8] sm:$0xf] }
 0x14c   : > { %v3779_v23 = vor.u32 %v3778_v32, %v14598_v19  ;;  %v3708_v27 = vrot.slane %v3707_v36, 4  ;;  %v3796_v5 = vshll.u32 %v13292_v59, 16  ;;  %v3800_v16 = vshrl.u32 %v13292_v59, 16  ;;  %v368_v32 = vld [vmem:[%s13385_s24 + $0xbc] sm:$0x1] }
 0x14d   : > { %v3712_v41 = vrot.slane %v3710_v20, 5  ;;  %v3722_v4 = vrot.slane %v3721_v53, 4  ;;  %v3746_v30 = vrot.slane %v3745_v6, 4  ;;  %v3770_v37 = vrot.slane %v3769_v60, 4  ;;  %v13293_v59 = vld [vmem:[%s13385_s24 + $0xc0] sm:$0xf] }
 0x14e   : > { %v3784_v25 = vrot.slane %v3782_v63, 5  ;;  %v3780_v20 = vrot.slane %v3779_v23, 4  ;;  %v3789_v36 = vrot.slane %v3787_v56, 4  ;;  %v3792_v44 = vrot.slane %v3790_v21, 5  ;;  %v13294_v60 = vld [vmem:[%s13385_s24 + $0xc4] sm:$0xf] }
 0x14f   : > { %v3703_v53 = vsel %vm13436_vm5, %v3698_v50, %v14574_v57  ;;  %v14623_v62 = vrot.slane %v3796_v5, 5  ;;  %v3802_v35 = vrot.slane %v3800_v16, 4  ;;  %v3814_v9 = vshll.u32 %v13293_v59, 16 }
 0x150   : > { %11288 = vmatmul.mubr.msk.bf16.gmra.mrb[12].mxu1 %vm586_vm2, %v14546_v0  ;;  %v3713_v6 = vsel %vm13436_vm5, %v3708_v27, %v3712_v41  ;;  %v3727_v46 = vsel %vm13436_vm5, %v3722_v4, %v14588_v29  ;;  %v3820_v63 = vshll.u32 %v13294_v60, 16  ;;  %v3824_v23 = vshrl.u32 %v13294_v60, 16  ;;  %v13295_v4 = vld [vmem:[%s13385_s24 + $0xcc] sm:$0xf] }
 0x151   : > { %11291 = vmatprep.mubr.msk.bf16.mxu1 %vm586_vm2, %v14595_v54  ;;  %v3811_v54 = vshrl.u32 %v13293_v59, 16  ;;  %v3737_v56 = vsel %vm13436_vm5, %v3732_v8, %v3736_v58  ;;  %v3751_v57 = vsel %vm13436_vm5, %v3746_v30, %v14593_v40  ;;  %v3761_v50 = vsel %vm13436_vm5, %v3756_v31, %v3760_v43  ;;  %v16477_v43 = vld [vmem:[#allocation35_spill] sm:$0xff] }
 0x152   : > { %11234 = vmatmul.mubr.msk.bf16.gmra.mrb[24].mxu0 %vm586_vm2, %v16475_v10  ;;  %v3806_v21 = vshll.u32 %v368_v32, 16  ;;  %v3775_v29 = vsel %vm13436_vm5, %v3770_v37, %v14598_v19  ;;  %v3785_v27 = vsel %vm13436_vm5, %v3780_v20, %v3784_v25  ;;  %v3793_v41 = vor.u32 %v3792_v44, %v3789_v36  ;;  %v371_v30 = vld [vmem:[%s13385_s24 + $0xc8] sm:$0x1]  ;;  %v13296_v37 = vld [vmem:[%s13385_s24 + $0xd0] sm:$0xf]  ;;  %v16480_v36 = vld [vmem:[#allocation41_spill] sm:$0xff] }
 0x153   : > { %11237 = vmatprep.mubr.msk.bf16.mxu0 %vm586_vm2, %v16476_v38  ;;  %v3813_v5 = vrot.slane %v3811_v54, 4  ;;  %v3803_v40 = vor.u32 %v3802_v35, %v14623_v62  ;;  %v3816_v16 = vrot.slane %v3814_v9, 5  ;;  %v3835_v8 = vshrl.u32 %v13295_v4, 16 }
 0x154   : > { %v3838_v58 = vshll.u32 %v13295_v4, 16  ;;  %v14652_v31 = vrot.slane %v3820_v63, 5  ;;  %v3826_v19 = vrot.slane %v3824_v23, 4  ;;  %v3844_v25 = vshll.u32 %v13296_v37, 16 }
 0x155   : > { %v3848_v20 = vshrl.u32 %v13296_v37, 16  ;;  %v14655_v54 = vcombine.low %v3703_v53, %v3713_v6  ;;  %v14657_v32 = vcombine.low %v3727_v46, %v3737_v56  ;;  %v14661_v44 = vcombine.low %v3751_v57, %v3761_v50  ;;  %v374_v37 = vld [vmem:[%s13385_s24 + $0xd4] sm:$0x1]  ;;  %v13297_v57 = vld [vmem:[%s13385_s24 + $0xd8] sm:$0xf] }
 0x156   : > { %v14663_v59 = vcombine.low %v3775_v29, %v3785_v27  ;;  %v3794_v35 = vrot.slane %v3793_v41, 4  ;;  %v3808_v9 = vrot.slane %v3806_v21, 5  ;;  %v3817_v60 = vor.u32 %v3816_v16, %v3813_v5  ;;  %v13298_v29 = vld [vmem:[%s13385_s24 + $0xdc] sm:$0xf]  ;;  %v13299_v21 = vld [vmem:[%s13385_s24 + $0xe4] sm:$0xf] }
 0x157   : > { %16478 = vst [vmem:[#allocation27_spill] sm:$0xff] %v14655_v54  ;;  %16479 = vst [vmem:[#allocation33_spill] sm:$0xff] %v14657_v32  ;;  %v3830_v63 = vshll.u32 %v371_v30, 16  ;;  %v3837_v23 = vrot.slane %v3835_v8, 4  ;;  %v3840_v4 = vrot.slane %v3838_v58, 5  ;;  %v3804_v53 = vrot.slane %v3803_v40, 4 }
 0x158   : > { %11292 = vmatmul.mubr.msk.bf16.gmra.mrb[16].mxu1 %vm586_vm2, %v14600_v2  ;;  %16481 = vst [vmem:[#allocation35_spill] sm:$0xff] %v14661_v44  ;;  %16482 = vst [vmem:[#allocation97_spill] sm:$0xff] %v14663_v59  ;;  %v3827_v6 = vor.u32 %v3826_v19, %v14652_v31  ;;  %v14666_v46 = vrot.slane %v3844_v25, 5  ;;  %v3850_v56 = vrot.slane %v3848_v20, 4  ;;  %v3859_v50 = vshrl.u32 %v13297_v57, 16 }
 0x159   : > { %11295 = vmatprep.mubr.msk.bf16.mxu1 %vm586_vm2, %v14602_v28  ;;  %v3862_v28 = vshll.u32 %v13297_v57, 16  ;;  %v3868_v27 = vshll.u32 %v13298_v29, 16  ;;  %v3872_v41 = vshrl.u32 %v13298_v29, 16  ;;  %v3883_v5 = vshrl.u32 %v13299_v21, 16  ;;  %v13300_v8 = vld [vmem:[%s13385_s24 + $0xe8] sm:$0xf] }
 0x15a   : > { %11238 = vmatmul.mubr.msk.bf16.gmra.mrb[28].mxu0 %vm586_vm2, %v16477_v43  ;;  %v3886_v16 = vshll.u32 %v13299_v21, 16  ;;  %v3892_v40 = vshll.u32 %v13300_v8, 16  ;;  %v3896_v58 = vshrl.u32 %v13300_v8, 16  ;;  %v3799_v30 = vsel %vm13436_vm5, %v3794_v35, %v14623_v62  ;;  %v16483_v57 = vld [vmem:[#allocation43_spill] sm:$0xff] }
 0x15b   : > { %11241 = vmatprep.mubr.msk.bf16.mxu0 %vm586_vm2, %v16480_v36  ;;  %v3818_v19 = vrot.slane %v3817_v60, 4  ;;  %v3832_v25 = vrot.slane %v3830_v63, 5  ;;  %v3841_v20 = vor.u32 %v3840_v4, %v3837_v23  ;;  %v3809_v29 = vsel %vm13436_vm5, %v3804_v53, %v3808_v9  ;;  %v377_v63 = vld [vmem:[%s13385_s24 + $0xe0] sm:$0x1] }
 0x15c   : > { %v3828_v21 = vrot.slane %v3827_v6, 4  ;;  %v3851_v8 = vor.u32 %v3850_v56, %v14666_v46  ;;  %v3861_v2 = vrot.slane %v3859_v50, 4  ;;  %v3864_v62 = vrot.slane %v3862_v28, 5  ;;  %v380_v56 = vld [vmem:[%s13385_s24 + $0xec] sm:$0x1] }
 0x15d   : > { %v14687_v35 = vrot.slane %v3868_v27, 5  ;;  %v3874_v60 = vrot.slane %v3872_v41, 4  ;;  %v3885_v23 = vrot.slane %v3883_v5, 4  ;;  %v3888_v4 = vrot.slane %v3886_v16, 5  ;;  %v13302_v41 = vld [vmem:[%s13385_s24 + $0xf4] sm:$0xf] }
 0x15e   : > { %v14690_v0 = vrot.slane %v3892_v40, 5  ;;  %v3898_v9 = vrot.slane %v3896_v58, 4  ;;  %v3823_v53 = vsel %vm13436_vm5, %v3818_v19, %v14652_v31  ;;  %v3842_v6 = vrot.slane %v3841_v20, 4 }
 0x15f   : > { %v3833_v28 = vsel %vm13436_vm5, %v3828_v21, %v3832_v25  ;;  %v3916_v5 = vshll.u32 %v13302_v41, 16  ;;  %v3920_v16 = vshrl.u32 %v13302_v41, 16  ;;  %v3852_v40 = vrot.slane %v3851_v8, 4  ;;  %v383_v21 = vld [vmem:[%s13385_s24 + $0xf8] sm:$0x1] }
 0x160   : > { %11296 = vmatmul.mubr.msk.bf16.gmra.mrb[20].mxu1 %vm586_vm2, %v14655_v54  ;;  %v3854_v54 = vshll.u32 %v374_v37, 16  ;;  %v13301_v37 = vld [vmem:[%s13385_s24 + $0xf0] sm:$0xf]  ;;  %v3875_v58 = vor.u32 %v3874_v60, %v14687_v35  ;;  %v3878_v36 = vshll.u32 %v377_v63, 16  ;;  %v14703_v31 = vcombine.low %v3799_v30, %v3809_v29  ;;  %v16487_v60 = vld [vmem:[#allocation47_spill] sm:$0xff] }
 0x161   : > { %11299 = vmatprep.mubr.msk.bf16.mxu1 %vm586_vm2, %v14657_v32  ;;  %v16484_v32 = vld [vmem:[#allocation46_spill] sm:$0xff]  ;;  %v3910_v50 = vshll.u32 %v13301_v37, 16  ;;  %v3889_v19 = vor.u32 %v3888_v4, %v3885_v23  ;;  %v3899_v20 = vor.u32 %v3898_v9, %v14690_v0  ;;  %v3902_v25 = vshll.u32 %v380_v56, 16  ;;  %v13303_v63 = vld [vmem:[%s13385_s24 + $0xfc] sm:$0xf] }
 0x162   : > { %11242 = vmatmul.mubr.msk.bf16.gmra.mrb[32].mxu0 %vm586_vm2, %v16483_v57  ;;  %v3856_v27 = vrot.slane %v3854_v54, 5  ;;  %v3865_v57 = vor.u32 %v3864_v62, %v3861_v2  ;;  %16485 = vst [vmem:[#allocation98_spill] sm:$0xff] %v14703_v31  ;;  %v14708_v54 = vcombine.low %v3823_v53, %v3833_v28  ;;  %v3847_v2 = vsel %vm13436_vm5, %v3842_v6, %v14666_v46  ;;  %v16488_v53 = vld [vmem:[#allocation50_spill] sm:$0xff] }
 0x163   : > { %11245 = vmatprep.mubr.msk.bf16.mxu0 %vm586_vm2, %v16484_v32  ;;  %v3907_v32 = vshrl.u32 %v13301_v37, 16  ;;  %v3912_v62 = vrot.slane %v3910_v50, 5  ;;  %v14716_v30 = vrot.slane %v3916_v5, 5  ;;  %v3922_v29 = vrot.slane %v3920_v16, 4  ;;  %v13304_v41 = vld [vmem:[%s13385_s24 + $0x100] sm:$0xf] }
 0x164   : > { %16486 = vst [vmem:[#allocation99_spill] sm:$0xff] %v14708_v54  ;;  %v3931_v23 = vshrl.u32 %v13303_v63, 16  ;;  %v3934_v4 = vshll.u32 %v13303_v63, 16  ;;  %v3857_v9 = vsel %vm13436_vm5, %v3852_v40, %v3856_v27  ;;  %v3866_v46 = vrot.slane %v3865_v57, 4 }
 0x165   : > { %v3909_v8 = vrot.slane %v3907_v32, 4  ;;  %v3876_v32 = vrot.slane %v3875_v58, 4  ;;  %v3880_v6 = vrot.slane %v3878_v36, 5  ;;  %v3890_v56 = vrot.slane %v3889_v19, 4  ;;  %v386_v58 = vld [vmem:[%s13385_s24 + $0x104] sm:$0x1] }
 0x166   : > { %v3900_v37 = vrot.slane %v3899_v20, 4  ;;  %v3904_v50 = vrot.slane %v3902_v25, 5  ;;  %v3926_v28 = vshll.u32 %v383_v21, 16  ;;  %v3940_v5 = vshll.u32 %v13304_v41, 16  ;;  %v13306_v19 = vld [vmem:[%s13385_s24 + $0x10c] sm:$0xf] }
 0x167   : > { %v3944_v16 = vshrl.u32 %v13304_v41, 16  ;;  %v3923_v27 = vor.u32 %v3922_v29, %v14716_v30  ;;  %v3933_v40 = vrot.slane %v3931_v23, 4  ;;  %v14726_v57 = vcombine.low %v3847_v2, %v3857_v9 }
 0x168   : > { %11300 = vmatmul.mubr.msk.bf16.gmra.mrb[24].mxu1 %vm586_vm2, %v14661_v44  ;;  %v3871_v36 = vsel %vm13436_vm5, %v3866_v46, %v14687_v35  ;;  %v3964_v20 = vshll.u32 %v13306_v19, 16  ;;  %v3968_v25 = vshrl.u32 %v13306_v19, 16  ;;  %v3895_v21 = vsel %vm13436_vm5, %v3890_v56, %v14690_v0 }
 0x169   : > { %11303 = vmatprep.mubr.msk.bf16.mxu1 %vm586_vm2, %v14663_v59  ;;  %v13305_v59 = vld [vmem:[%s13385_s24 + $0x108] sm:$0xf]  ;;  %16489 = vst [vmem:[#allocation100_spill] sm:$0xff] %v14726_v57  ;;  %v3905_v2 = vsel %vm13436_vm5, %v3900_v37, %v3904_v50  ;;  %v14744_v35 = vrot.slane %v3940_v5, 5  ;;  %v3924_v0 = vrot.slane %v3923_v27, 4 }
 0x16a   : > { %11246 = vmatmul.mubr.msk.bf16.gmra.mrb[36].mxu0 %vm586_vm2, %v16487_v60  ;;  %v3955_v63 = vshrl.u32 %v13305_v59, 16  ;;  %v3958_v44 = vshll.u32 %v13305_v59, 16  ;;  %v3913_v60 = vor.u32 %v3912_v62, %v3909_v8  ;;  %v3881_v59 = vsel %vm13436_vm5, %v3876_v32, %v3880_v6  ;;  %v16491_v6 = vld [vmem:[#allocation54_spill] sm:$0xff]  ;;  %v13307_v50 = vld [vmem:[%s13385_s24 + $0x114] sm:$0xf] }
 0x16b   : > { %11249 = vmatprep.mubr.msk.bf16.mxu0 %vm586_vm2, %v16488_v53  ;;  %v3936_v53 = vrot.slane %v3934_v4, 5  ;;  %v3928_v8 = vrot.slane %v3926_v28, 5  ;;  %v3946_v62 = vrot.slane %v3944_v16, 4  ;;  %v16490_v4 = vld [vmem:[#allocation51_spill] sm:$0xff]  ;;  %v3950_v32 = vshll.u32 %v386_v58, 16 }
 0x16c   : > { %v3957_v29 = vrot.slane %v3955_v63, 4  ;;  %v3960_v23 = vrot.slane %v3958_v44, 5  ;;  %v3914_v9 = vrot.slane %v3913_v60, 4  ;;  %v14750_v56 = vrot.slane %v3964_v20, 5  ;;  %v389_v16 = vld [vmem:[%s13385_s24 + $0x110] sm:$0x1] }
 0x16d   : > { %v3937_v46 = vor.u32 %v3936_v53, %v3933_v40  ;;  %v3970_v37 = vrot.slane %v3968_v25, 4  ;;  %v3979_v28 = vshrl.u32 %v13307_v50, 16  ;;  %v3982_v41 = vshll.u32 %v13307_v50, 16  ;;  %v13308_v63 = vld [vmem:[%s13385_s24 + $0x118] sm:$0xf] }
 0x16e   : > { %v14753_v5 = vcombine.low %v3871_v36, %v3881_v59  ;;  %v14755_v44 = vcombine.low %v3895_v21, %v3905_v2  ;;  %v3988_v60 = vshll.u32 %v13308_v63, 16  ;;  %v3992_v53 = vshrl.u32 %v13308_v63, 16  ;;  %v13309_v58 = vld [vmem:[%s13385_s24 + $0x120] sm:$0xf] }
 0x16f   : > { %v3947_v27 = vor.u32 %v3946_v62, %v14744_v35  ;;  %v3961_v40 = vor.u32 %v3960_v23, %v3957_v29  ;;  %v4003_v19 = vshrl.u32 %v13309_v58, 16  ;;  %v4006_v20 = vshll.u32 %v13309_v58, 16  ;;  %v392_v23 = vld [vmem:[%s13385_s24 + $0x11c] sm:$0x1] }
 0x170   : > { %11304 = vmatmul.mubr.msk.bf16.gmra.mrb[28].mxu1 %vm586_vm2, %v14703_v31  ;;  %16492 = vst [vmem:[#allocation101_spill] sm:$0xff] %v14753_v5  ;;  %16493 = vst [vmem:[#allocation102_spill] sm:$0xff] %v14755_v44  ;;  %v3919_v25 = vsel %vm13436_vm5, %v3914_v9, %v14716_v30  ;;  %v3929_v36 = vsel %vm13436_vm5, %v3924_v0, %v3928_v8  ;;  %v14766_v59 = vrot.slane %v3937_v46, 4  ;;  %v14768_v21 = vrot.slane %v3950_v32, 5  ;;  %v13310_v9 = vld [vmem:[%s13385_s24 + $0x124] sm:$0xf] }
 0x171   : > { %11307 = vmatprep.mubr.msk.bf16.mxu1 %vm586_vm2, %v14708_v54  ;;  %v3971_v2 = vor.u32 %v3970_v37, %v14750_v56  ;;  %v3974_v50 = vshll.u32 %v389_v16, 16  ;;  %v3981_v62 = vrot.slane %v3979_v28, 4  ;;  %v3984_v29 = vrot.slane %v3982_v41, 5  ;;  %v16494_v41 = vld [vmem:[#allocation55_spill] sm:$0xff]  ;;  %v16495_v31 = vld [vmem:[#allocation58_spill] sm:$0xff] }
 0x172   : > { %11250 = vmatmul.mubr.msk.bf16.gmra.mrb[40].mxu0 %vm586_vm2, %v16490_v4  ;;  %v14774_v63 = vrot.slane %v3988_v60, 5  ;;  %v3994_v30 = vrot.slane %v3992_v53, 4  ;;  %v4012_v8 = vshll.u32 %v13310_v9, 16  ;;  %v4016_v0 = vshrl.u32 %v13310_v9, 16  ;;  %v13311_v16 = vld [vmem:[%s13385_s24 + $0x12c] sm:$0xf] }
 0x173   : > { %11253 = vmatprep.mubr.msk.bf16.mxu0 %vm586_vm2, %v16491_v6  ;;  %v3948_v46 = vrot.slane %v3947_v27, 4  ;;  %v3962_v32 = vrot.slane %v3961_v40, 4  ;;  %v4005_v37 = vrot.slane %v4003_v19, 4  ;;  %v4008_v28 = vrot.slane %v4006_v20, 5  ;;  %v13312_v60 = vld [vmem:[%s13385_s24 + $0x130] sm:$0xf] }
 0x174   : > { %v4027_v58 = vshrl.u32 %v13311_v16, 16  ;;  %v4036_v54 = vshll.u32 %v13312_v60, 16  ;;  %v4040_v53 = vshrl.u32 %v13312_v60, 16  ;;  %v3972_v9 = vrot.slane %v3971_v2, 4  ;;  %v395_v20 = vld [vmem:[%s13385_s24 + $0x128] sm:$0x1] }
 0x175   : > { %v3976_v6 = vrot.slane %v3974_v50, 5  ;;  %v3998_v27 = vshll.u32 %v392_v23, 16  ;;  %v14785_v40 = vcombine.low %v3919_v25, %v3929_v36  ;;  %v3995_v19 = vor.u32 %v3994_v30, %v14774_v63 }
 0x176   : > { %v4018_v4 = vrot.slane %v4016_v0, 4  ;;  %v3953_v2 = vsel %vm13436_vm5, %v3948_v46, %v14768_v21  ;;  %v3967_v25 = vsel %vm13436_vm5, %v3962_v32, %v14750_v56  ;;  %v4009_v36 = vor.u32 %v4008_v28, %v4005_v37  ;;  %v398_v0 = vld [vmem:[%s13385_s24 + $0x134] sm:$0x1]  ;;  %v13313_v46 = vld [vmem:[%s13385_s24 + $0x138] sm:$0xf] }
 0x177   : > { %16496 = vst [vmem:[#allocation58_spill] sm:$0xff] %v14785_v40  ;;  %v4029_v50 = vrot.slane %v4027_v58, 4  ;;  %v4042_v23 = vrot.slane %v4040_v53, 4  ;;  %v3977_v30 = vsel %vm13436_vm5, %v3972_v9, %v3976_v6  ;;  %v3996_v21 = vrot.slane %v3995_v19, 4  ;;  %v16500_v19 = vld [vmem:[#allocation62_spill] sm:$0xff] }
 0x178   : > { %11308 = vmatmul.mubr.msk.bf16.gmra.mrb[32].mxu1 %vm586_vm2, %v14726_v57  ;;  %v4030_v57 = vshll.u32 %v13311_v16, 16  ;;  %v3943_v16 = vsel %vm13436_vm5, %v14766_v59, %v14744_v35  ;;  %v4000_v59 = vrot.slane %v3998_v27, 5  ;;  %v4051_v32 = vshrl.u32 %v13313_v46, 16 }
 0x179   : > { %11311 = vmatprep.mubr.msk.bf16.mxu1 %vm586_vm2, %v14753_v5  ;;  %v3985_v5 = vor.u32 %v3984_v29, %v3981_v62  ;;  %v14801_v29 = vrot.slane %v4036_v54, 5  ;;  %v4054_v37 = vshll.u32 %v13313_v46, 16  ;;  %v13314_v54 = vld [vmem:[%s13385_s24 + $0x13c] sm:$0xf]  ;;  %v4010_v28 = vrot.slane %v4009_v36, 4 }
 0x17a   : > { %11254 = vmatmul.mubr.msk.bf16.gmra.mrb[44].mxu0 %vm586_vm2, %v16494_v41  ;;  %v14789_v41 = vrot.slane %v4012_v8, 5  ;;  %v4032_v62 = vrot.slane %v4030_v57, 5  ;;  %v4022_v8 = vshll.u32 %v395_v20, 16  ;;  %v4060_v57 = vshll.u32 %v13314_v54, 16 }
 0x17b   : > { %11257 = vmatprep.mubr.msk.bf16.mxu0 %vm586_vm2, %v16495_v31  ;;  %v3986_v35 = vrot.slane %v3985_v5, 4  ;;  %v4064_v6 = vshrl.u32 %v13314_v54, 16  ;;  %v16497_v5 = vld [vmem:[#allocation59_spill] sm:$0xff]  ;;  %v4043_v60 = vor.u32 %v4042_v23, %v14801_v29  ;;  %v4046_v53 = vshll.u32 %v398_v0, 16 }
 0x17c   : > { %v4019_v56 = vor.u32 %v4018_v4, %v14789_v41  ;;  %v4033_v58 = vor.u32 %v4032_v62, %v4029_v50  ;;  %v14816_v4 = vcombine.low %v3943_v16, %v3953_v2  ;;  %v14818_v9 = vcombine.low %v3967_v25, %v3977_v30  ;;  %v401_v16 = vld [vmem:[%s13385_s24 + $0x140] sm:$0x1]  ;;  %v13315_v30 = vld [vmem:[%s13385_s24 + $0x144] sm:$0xf] }
 0x17d   : > { %v3991_v27 = vsel %vm13436_vm5, %v3986_v35, %v14774_v63  ;;  %v4024_v20 = vrot.slane %v4022_v8, 5  ;;  %v4001_v36 = vsel %vm13436_vm5, %v3996_v21, %v4000_v59  ;;  %v4053_v62 = vrot.slane %v4051_v32, 4  ;;  %v13316_v59 = vld [vmem:[%s13385_s24 + $0x148] sm:$0xf]  ;;  %v13317_v32 = vld [vmem:[%s13385_s24 + $0x150] sm:$0xf] }
 0x17e   : > { %16498 = vst [vmem:[#allocation103_spill] sm:$0xff] %v14816_v4  ;;  %16499 = vst [vmem:[#allocation104_spill] sm:$0xff] %v14818_v9  ;;  %v4020_v50 = vrot.slane %v4019_v56, 4  ;;  %v4056_v23 = vrot.slane %v4054_v37, 5  ;;  %v14828_v2 = vrot.slane %v4060_v57, 5  ;;  %v4066_v25 = vrot.slane %v4064_v6, 4 }
 0x17f   : > { %v4075_v0 = vshrl.u32 %v13315_v30, 16  ;;  %v4078_v63 = vshll.u32 %v13315_v30, 16  ;;  %v4015_v35 = vsel %vm13436_vm5, %v4010_v28, %v14789_v41  ;;  %v4034_v8 = vrot.slane %v4033_v58, 4  ;;  %v13318_v30 = vld [vmem:[%s13385_s24 + $0x154] sm:$0xf] }
 0x180   : > { %11312 = vmatmul.mubr.msk.bf16.gmra.mrb[36].mxu1 %vm586_vm2, %v14755_v44  ;;  %v4044_v46 = vrot.slane %v4043_v60, 4  ;;  %v4048_v54 = vrot.slane %v4046_v53, 5  ;;  %v4084_v21 = vshll.u32 %v13316_v59, 16  ;;  %v4088_v56 = vshrl.u32 %v13316_v59, 16 }
 0x181   : > { %11315 = vmatprep.mubr.msk.bf16.mxu1 %vm586_vm2, %v14785_v40  ;;  %v4099_v37 = vshrl.u32 %v13317_v32, 16  ;;  %v4102_v40 = vshll.u32 %v13317_v32, 16  ;;  %v4025_v57 = vsel %vm13436_vm5, %v4020_v50, %v4024_v20  ;;  %v4070_v6 = vshll.u32 %v401_v16, 16  ;;  %v16502_v32 = vld [vmem:[#allocation63_spill] sm:$0xff] }
 0x182   : > { %11258 = vmatmul.mubr.msk.bf16.gmra.mrb[48].mxu0 %vm586_vm2, %v16497_v5  ;;  %v4108_v44 = vshll.u32 %v13318_v30, 16  ;;  %v4112_v41 = vshrl.u32 %v13318_v30, 16  ;;  %v4057_v28 = vor.u32 %v4056_v23, %v4053_v62  ;;  %v4067_v58 = vor.u32 %v4066_v25, %v14828_v2  ;;  %v404_v16 = vld [vmem:[%s13385_s24 + $0x14c] sm:$0x1]  ;;  %v16503_v30 = vld [vmem:[#allocation65_spill] sm:$0xff] }
 0x183   : > { %11261 = vmatprep.mubr.msk.bf16.mxu0 %vm586_vm2, %v16500_v19  ;;  %v4077_v60 = vrot.slane %v4075_v0, 4  ;;  %v4080_v53 = vrot.slane %v4078_v63, 5  ;;  %v14844_v59 = vcombine.low %v3991_v27, %v4001_v36  ;;  %v4039_v20 = vsel %vm13436_vm5, %v4034_v8, %v14801_v29  ;;  %v407_v63 = vld [vmem:[%s13385_s24 + $0x158] sm:$0x1] }
 0x184   : > { %v4049_v50 = vsel %vm13436_vm5, %v4044_v46, %v4048_v54  ;;  %v14856_v62 = vrot.slane %v4084_v21, 5  ;;  %v4090_v23 = vrot.slane %v4088_v56, 4  ;;  %v4101_v27 = vrot.slane %v4099_v37, 4 }
 0x185   : > { %16501 = vst [vmem:[#allocation105_spill] sm:$0xff] %v14844_v59  ;;  %v4104_v36 = vrot.slane %v4102_v40, 5  ;;  %v14858_v25 = vcombine.low %v4015_v35, %v4025_v57  ;;  %v4072_v0 = vrot.slane %v4070_v6, 5  ;;  %v4114_v29 = vrot.slane %v4112_v41, 4  ;;  %v13319_v40 = vld [vmem:[%s13385_s24 + $0x15c] sm:$0xf] }
 0x186   : > { %v4058_v8 = vrot.slane %v4057_v28, 4  ;;  %v4068_v46 = vrot.slane %v4067_v58, 4  ;;  %v4081_v54 = vor.u32 %v4080_v53, %v4077_v60  ;;  %v4091_v21 = vor.u32 %v4090_v23, %v14856_v62  ;;  %v13320_v6 = vld [vmem:[%s13385_s24 + $0x160] sm:$0xf] }
 0x187   : > { %16504 = vst [vmem:[#allocation106_spill] sm:$0xff] %v14858_v25  ;;  %v4105_v56 = vor.u32 %v4104_v36, %v4101_v27  ;;  %v4118_v37 = vshll.u32 %v407_v63, 16  ;;  %v4123_v35 = vshrl.u32 %v13319_v40, 16  ;;  %v4126_v57 = vshll.u32 %v13319_v40, 16  ;;  %v13322_v27 = vld [vmem:[%s13385_s24 + $0x16c] sm:$0xf] }
 0x188   : > { %11316 = vmatmul.mubr.msk.bf16.gmra.mrb[40].mxu1 %vm586_vm2, %v14816_v4  ;;  %v4094_v4 = vshll.u32 %v404_v16, 16  ;;  %v4132_v41 = vshll.u32 %v13320_v6, 16  ;;  %v4136_v28 = vshrl.u32 %v13320_v6, 16  ;;  %v4063_v58 = vsel %vm13436_vm5, %v4058_v8, %v14828_v2 }
 0x189   : > { %11319 = vmatprep.mubr.msk.bf16.mxu1 %vm586_vm2, %v14818_v9  ;;  %v14861_v9 = vrot.slane %v4108_v44, 5  ;;  %v4073_v60 = vsel %vm13436_vm5, %v4068_v46, %v4072_v0  ;;  %v4082_v53 = vrot.slane %v4081_v54, 4  ;;  %v4156_v36 = vshll.u32 %v13322_v27, 16  ;;  %v410_v54 = vld [vmem:[%s13385_s24 + $0x164] sm:$0x1] }
 0x18a   : > { %11262 = vmatmul.mubr.msk.bf16.gmra.mrb[52].mxu0 %vm586_vm2, %v16502_v32  ;;  %v14863_v32 = vcombine.low %v4039_v20, %v4049_v50  ;;  %v4096_v20 = vrot.slane %v4094_v4, 5  ;;  %v13321_v50 = vld [vmem:[%s13385_s24 + $0x168] sm:$0xf]  ;;  %v4160_v63 = vshrl.u32 %v13322_v27, 16  ;;  %v4106_v2 = vrot.slane %v4105_v56, 4 }
 0x18b   : > { %11265 = vmatprep.mubr.msk.bf16.mxu0 %vm586_vm2, %v16503_v30  ;;  %v4115_v44 = vor.u32 %v4114_v29, %v14861_v9  ;;  %v4147_v16 = vshrl.u32 %v13321_v50, 16  ;;  %v4150_v23 = vshll.u32 %v13321_v50, 16  ;;  %v4092_v29 = vrot.slane %v4091_v21, 4 }
 0x18c   : > { %16505 = vst [vmem:[#allocation107_spill] sm:$0xff] %v14863_v32  ;;  %v4120_v8 = vrot.slane %v4118_v37, 5  ;;  %v4125_v0 = vrot.slane %v4123_v35, 4  ;;  %v4128_v4 = vrot.slane %v4126_v57, 5  ;;  %v4134_v40 = vrot.slane %v4132_v41, 5 }
 0x18d   : > { %v4116_v46 = vrot.slane %v4115_v44, 4  ;;  %v4138_v6 = vrot.slane %v4136_v28, 4  ;;  %v4149_v50 = vrot.slane %v4147_v16, 4  ;;  %v4158_v27 = vrot.slane %v4156_v36, 5  ;;  %v413_v44 = vld [vmem:[%s13385_s24 + $0x170] sm:$0x1] }
 0x18e   : > { %v4162_v21 = vrot.slane %v4160_v63, 4  ;;  %v4087_v56 = vsel %vm13436_vm5, %v4082_v53, %v14856_v62  ;;  %v4097_v37 = vsel %vm13436_vm5, %v4092_v29, %v4096_v20  ;;  %v4142_v35 = vshll.u32 %v410_v54, 16  ;;  %v13323_v62 = vld [vmem:[%s13385_s24 + $0x174] sm:$0xf]  ;;  %v13324_v20 = vld [vmem:[%s13385_s24 + $0x178] sm:$0xf] }
 0x18f   : > { %v4111_v57 = vsel %vm13436_vm5, %v4106_v2, %v14861_v9  ;;  %v4121_v41 = vsel %vm13436_vm5, %v4116_v46, %v4120_v8  ;;  %v4129_v28 = vor.u32 %v4128_v4, %v4125_v0  ;;  %v4174_v53 = vshll.u32 %v13323_v62, 16  ;;  %v16508_v2 = vld [vmem:[#allocation64_spill] sm:$0xff] }
 0x190   : > { %11320 = vmatmul.mubr.msk.bf16.gmra.mrb[44].mxu1 %vm586_vm2, %v14844_v59  ;;  %v4152_v59 = vrot.slane %v4150_v23, 5  ;;  %v4180_v16 = vshll.u32 %v13324_v20, 16  ;;  %v4184_v23 = vshrl.u32 %v13324_v20, 16  ;;  %v4163_v9 = vor.u32 %v4162_v21, %v4158_v27 }
 0x191   : > { %11323 = vmatprep.mubr.msk.bf16.mxu1 %vm586_vm2, %v14858_v25  ;;  %v14885_v25 = vcombine.low %v4063_v58, %v4073_v60  ;;  %v4139_v58 = vor.u32 %v4138_v6, %v4134_v40  ;;  %v4171_v60 = vshrl.u32 %v13323_v62, 16  ;;  %v4166_v63 = vshll.u32 %v413_v44, 16 }
 0x192   : > { %11266 = vmatmul.mubr.msk.bf16.gmra.mrb[56].mxu0 %vm586_vm2, %v14080_v34  ;;  %v4153_v36 = vor.u32 %v4152_v59, %v4149_v50  ;;  %v14906_v29 = vcombine.low %v4087_v56, %v4097_v37  ;;  %v14910_v8 = vcombine.low %v4111_v57, %v4121_v41  ;;  %v4130_v0 = vrot.slane %v4129_v28, 4  ;;  %v416_v50 = vld [vmem:[%s13385_s24 + $0x17c] sm:$0x1] }
 0x193   : > { %11269 = vmatprep.mubr.msk.bf16.mxu0 %vm586_vm2, %v14117_v33  ;;  %16506 = vst [vmem:[#allocation108_spill] sm:$0xff] %v14885_v25  ;;  %v4140_v46 = vrot.slane %v4139_v58, 4  ;;  %v4144_v54 = vrot.slane %v4142_v35, 5  ;;  %v4173_v4 = vrot.slane %v4171_v60, 4  ;;  %v4176_v6 = vrot.slane %v4174_v53, 5 }
 0x194   : > { %16507 = vst [vmem:[#allocation109_spill] sm:$0xff] %v14906_v29  ;;  %16509 = vst [vmem:[#allocation64_spill] sm:$0xff] %v14910_v8  ;;  %v4182_v62 = vrot.slane %v4180_v16, 5  ;;  %v4186_v20 = vrot.slane %v4184_v23, 4  ;;  %v4168_v59 = vrot.slane %v4166_v63, 5  ;;  %v4135_v21 = vsel %vm13436_vm5, %v4130_v0, %v4134_v40  ;;  %v16516_v63 = vld [vmem:[#allocation92_spill] sm:$0xff] }
 0x195   : > { %v4145_v56 = vsel %vm13436_vm5, %v4140_v46, %v4144_v54  ;;  %v4177_v37 = vor.u32 %v4176_v6, %v4173_v4  ;;  %v4190_v44 = vshll.u32 %v416_v50, 16  ;;  %v10016_v16 = vld [vmem:[%s16065_s2 + $0xa] sm:$0x3]  ;;  %v16518_v0 = vld [vmem:[#allocation13_spill] sm:$0xff]  ;;  %v16520_v54 = vld [vmem:[#allocation28_spill] sm:$0xff] }
 0x196   : > { %v4187_v35 = vor.u32 %v4186_v20, %v4182_v62  ;;  %v14930_v40 = vcombine.low %v4135_v21, %v4145_v56  ;;  %v14960_v23 = vand.u32 %v10016_v16, %v13370_v3  ;;  %v16519_v46 = vld [vmem:[#allocation29_spill] sm:$0xff]  ;;  %v16521_v4 = vld [vmem:[#allocation16_spill] sm:$0xff]  ;;  %v16527_v21 = vld [vmem:[#allocation71_spill] sm:$0xff] }
 0x197   : > { %v4178_v58 = vrot.slane %v4177_v37, 4  ;;  %v4192_v53 = vrot.slane %v4190_v44, 5  ;;  %v16522_v6 = vld [vmem:[#allocation17_spill] sm:$0xff]  ;;  %v16524_v20 = vld [vmem:[#allocation32_spill] sm:$0xff] }
 0x198   : > { %11324 = vmatmul.mubr.msk.bf16.gmra.mrb[48].mxu1 %vm586_vm2, %v14863_v32  ;;  %v4164_v32 = vrot.slane %v4163_v9, 4  ;;  %16510 = vst [vmem:[#allocation110_spill] sm:$0xff] %v14930_v40  ;;  %v4188_v60 = vrot.slane %v4187_v35, 4  ;;  %v16515_v9 = vld [vmem:[#allocation91_spill] sm:$0xff]  ;;  %v16526_v50 = vld [vmem:[#allocation21_spill] sm:$0xff]  ;;  %v16528_v56 = vld [vmem:[#allocation72_spill] sm:$0xff] }
 0x199   : > { %11327 = vmatprep.mubr.msk.bf16.mxu1 %vm586_vm2, %v14885_v25  ;;  %v4154_v25 = vrot.slane %v4153_v36, 4  ;;  %v16514_v36 = vld [vmem:[#allocation9_spill] sm:$0xff]  ;;  %v16529_v37 = vld [vmem:[#allocation24_spill] sm:$0xff] }
 0x19a   : > { %11270 = vmatmul.mubr.msk.bf16.gmra.mrb[60].mxu0 %vm586_vm2, %v14134_v49  ;;  %v4169_v41 = vsel %vm13436_vm5, %v4164_v32, %v4168_v59  ;;  %v4183_v32 = vsel %vm13436_vm5, %v4178_v58, %v4182_v62  ;;  %v16523_v62 = vld [vmem:[#allocation34_spill] sm:$0xff]  ;;  %v16525_v59 = vld [vmem:[#allocation20_spill] sm:$0xff]  ;;  %v16530_v35 = vld [vmem:[#allocation25_spill] sm:$0xff] }
 0x19b   : > { %11341 = vmatprep.mubr.msk.bf16.mxu0 %vm586_vm2, %v16508_v2  ;;  %v4159_v57 = vsel %vm13436_vm5, %v4154_v25, %v4158_v27  ;;  %v4193_v25 = vsel %vm13436_vm5, %v4188_v60, %v4192_v53  ;;  %v16517_v2 = vld [vmem:[#allocation12_spill] sm:$0xff]  ;;  %v16531_v44 = vld [vmem:[#allocation73_spill] sm:$0xff]  ;;  %v16534_v58 = vld [vmem:[#allocation31_spill] sm:$0xff] }
 0x19c   : > { %v14932_v28 = vcombine.low %v4159_v57, %v4169_v41  ;;  %v14946_v27 = vcombine.low %v4183_v32, %v4193_v25  ;;  %v16532_v57 = vld [vmem:[#allocation74_spill] sm:$0xff]  ;;  %v16535_v60 = vld [vmem:[#allocation75_spill] sm:$0xff]  ;;  %v16536_v53 = vld [vmem:[#allocation76_spill] sm:$0xff] }
 0x19d   : > { %v16533_v41 = vld [vmem:[#allocation30_spill] sm:$0xff]  ;;  %v16537_v32 = vld [vmem:[#allocation37_spill] sm:$0xff] }
 0x19e   : > { %16511 = vst [vmem:[#allocation111_spill] sm:$0xff] %v14932_v28  ;;  %16512 = vst [vmem:[#allocation112_spill] sm:$0xff] %v14946_v27  ;;  %v16538_v25 = vld [vmem:[#allocation38_spill] sm:$0xff]  ;;  %v16539_v16 = vld [vmem:[#allocation77_spill] sm:$0xff] }
 0x1a0   : > { %11328 = vmatmul.mubr.msk.bf16.gmra.mrb[52].mxu1 %vm586_vm2, %v14906_v29 }
 0x1a1   : > { %11331 = vmatprep.mubr.msk.bf16.mxu1 %vm586_vm2, %v14910_v8 }
 0x1a2   : > { %11342 = vmatmul.mubr.msk.bf16.vlgmr.msra.gmra.mrb[0].mxu0 %vm586_vm2, %v14088_v48 }
 0x1a3   : > { %11345 = vmatprep.mubr.msk.bf16.mxu0 %vm586_vm2, %v14094_v17  ;;  %11472 = vmatpush3.bf16.msra.mxu0 %v14464_v18 }
 0x1a4   : > { %11603 = vmatprep.subr.bf16.mxu0 %v14960_v23 }
 0x1a8   : > { %11332 = vmatmul.mubr.msk.bf16.gmra.mrb[56].mxu1 %vm586_vm2, %v14930_v40 }
 0x1a9   : > { %11335 = vmatprep.mubr.msk.bf16.mxu1 %vm586_vm2, %v14932_v28 }
 0x1aa   : > { %11346 = vmatmul.mubr.msk.bf16.gmra.mrb[4].mxu0 %vm586_vm2, %v14107_v61 }
 0x1ab   : > { %11349 = vmatprep.mubr.msk.bf16.mxu0 %vm586_vm2, %v14132_v39 }
 0x1b0   : > { %11336 = vmatmul.mubr.msk.bf16.gmra.mrb[60].mxu1 %vm586_vm2, %v14946_v27 }
 0x1b1   : > { %11407 = vmatprep.mubr.msk.bf16.mxu1 %vm586_vm2, %v13395_v15 }
 0x1b2   : > { %11350 = vmatmul.mubr.msk.bf16.gmra.mrb[8].mxu0 %vm586_vm2, %v14138_v1 }
 0x1b3   : > { %11353 = vmatprep.mubr.msk.bf16.mxu0 %vm586_vm2, %v14212_v55  ;;  %v15091_v55 = vld [vmem:[%s13385_s24 + $0x184] sm:$0xf] }
 0x1b8   : > { %11408 = vmatmul.mubr.msk.bf16.vlgmr.msra.gmra.mrb[0].mxu1 %vm586_vm2, %v13412_v26 }
 0x1b9   : > { %11538 = vmatpush3.bf16.msra.mxu1 %v14464_v18  ;;  %11411 = vmatprep.mubr.msk.bf16.mxu1 %vm586_vm2, %v13431_v42  ;;  %v16513_v18 = vld [vmem:[#allocation8_spill] sm:$0xff] }
 0x1ba   : > { %11354 = vmatmul.mubr.msk.bf16.gmra.mrb[12].mxu0 %vm586_vm2, %v14220_v24  ;;  %11669 = vmatprep.subr.bf16.mxu1 %v14960_v23  ;;  %v15088_v24 = vld [vmem:[%s13385_s24 + $0x180] sm:$0xf] }
 0x1bb   : > { %11357 = vmatprep.mubr.msk.bf16.mxu0 %vm586_vm2, %v14241_v22  ;;  %v16554_v22 = vld [vmem:[#allocation60_spill] sm:$0xff] }
 0x1c0   : > { %11412 = vmatmul.mubr.msk.bf16.gmra.mrb[4].mxu1 %vm586_vm2, %v13452_v7 }
 0x1c1   : > { %11415 = vmatprep.mubr.msk.bf16.mxu1 %vm586_vm2, %v13455_v13 }
 0x1c2   : > { %11358 = vmatmul.mubr.msk.bf16.gmra.mrb[16].mxu0 %vm586_vm2, %v14245_v11 }
 0x1c3   : > { %11361 = vmatprep.mubr.msk.bf16.mxu0 %vm586_vm2, %v14257_v52 }
 0x1c8   : > { %11416 = vmatmul.mubr.msk.bf16.gmra.mrb[8].mxu1 %vm586_vm2, %v13491_v12 }
 0x1c9   : > { %11419 = vmatprep.mubr.msk.bf16.mxu1 %vm586_vm2, %v13493_v14 }
 0x1ca   : > { %11362 = vmatmul.mubr.msk.bf16.gmra.mrb[20].mxu0 %vm586_vm2, %v14261_v51  ;;  %v16553_v51 = vld [vmem:[#allocation57_spill] sm:$0xff] }
 0x1cb   : > { %11365 = vmatprep.mubr.msk.bf16.mxu0 %vm586_vm2, %v14273_v47 }
 0x1d0   : > { %11420 = vmatmul.mubr.msk.bf16.gmra.mrb[12].mxu1 %vm586_vm2, %v16513_v18 }
 0x1d1   : > { %11423 = vmatprep.mubr.msk.bf16.mxu1 %vm586_vm2, %v16514_v36 }
 0x1d2   : > { %11366 = vmatmul.mubr.msk.bf16.gmra.mrb[24].mxu0 %vm586_vm2, %v16515_v9 }
 0x1d3   : > { %11369 = vmatprep.mubr.msk.bf16.mxu0 %vm586_vm2, %v16516_v63 }
 0x1d8   : > { %11424 = vmatmul.mubr.msk.bf16.gmra.mrb[16].mxu1 %vm586_vm2, %v16517_v2 }
 0x1d9   : > { %11427 = vmatprep.mubr.msk.bf16.mxu1 %vm586_vm2, %v16518_v0 }
 0x1da   : > { %11370 = vmatmul.mubr.msk.bf16.gmra.mrb[28].mxu0 %vm586_vm2, %v16519_v46 }
 0x1db   : > { %11373 = vmatprep.mubr.msk.bf16.mxu0 %vm586_vm2, %v16520_v54  ;;  %v316_v54 = vld [vmem:[%s13401_s27 + $0x184] sm:$0xf] }
 0x1dc   : > { %v5834_v9 = vshll.u32 %v316_v54, 16  ;;  %v5838_v47 = vshrl.u32 %v316_v54, 16 }
 0x1de   : > { %v5836_v52 = vrot.slane %v5834_v9, 5  ;;  %v5840_v11 = vrot.slane %v5838_v47, 4 }
 0x1e0   : > { %11428 = vmatmul.mubr.msk.bf16.gmra.mrb[20].mxu1 %vm586_vm2, %v16521_v4  ;;  %v5841_v1 = vor.u32 %v5840_v11, %v5836_v52 }
 0x1e1   : > { %11431 = vmatprep.mubr.msk.bf16.mxu1 %vm586_vm2, %v16522_v6 }
 0x1e2   : > { %11374 = vmatmul.mubr.msk.bf16.gmra.mrb[32].mxu0 %vm586_vm2, %v16523_v62  ;;  %v315_v62 = vld [vmem:[%s13401_s27 + $0x180] sm:$0xf]  ;;  %v5842_v9 = vrot.slane %v5841_v1, 4  ;;  %v16560_v1 = vld [vmem:[#allocation7_spill] sm:$0xff] }
 0x1e3   : > { %11377 = vmatprep.mubr.msk.bf16.mxu0 %vm586_vm2, %v16524_v20  ;;  %v16546_v20 = vld [vmem:[#allocation49_spill] sm:$0xff]  ;;  %v15063_v46 = vcombine.low %v315_v62, %v316_v54  ;;  %v5828_v63 = vshll.u32 %v315_v62, 16 }
 0x1e4   : > { %v16555_v54 = vld [vmem:[#allocation61_spill] sm:$0xff] }
 0x1e5   : > { %16549 = vst [vmem:[#allocation8_spill] sm:$0xff] %v15063_v46 }
 0x1e8   : > { %11432 = vmatmul.mubr.msk.bf16.gmra.mrb[24].mxu1 %vm586_vm2, %v16525_v59 }
 0x1e9   : > { %11435 = vmatprep.mubr.msk.bf16.mxu1 %vm586_vm2, %v16526_v50 }
 0x1ea   : > { %11378 = vmatmul.mubr.msk.bf16.gmra.mrb[36].mxu0 %vm586_vm2, %v16527_v21  ;;  %v16545_v21 = vld [vmem:[#allocation48_spill] sm:$0xff] }
 0x1eb   : > { %11381 = vmatprep.mubr.msk.bf16.mxu0 %vm586_vm2, %v16528_v56  ;;  %v16542_v56 = vld [vmem:[#allocation45_spill] sm:$0xff] }
 0x1f0   : > { %11436 = vmatmul.mubr.msk.bf16.gmra.mrb[28].mxu1 %vm586_vm2, %v16529_v37 }
 0x1f1   : > { %11439 = vmatprep.mubr.msk.bf16.mxu1 %vm586_vm2, %v16530_v35 }
 0x1f2   : > { %11382 = vmatmul.mubr.msk.bf16.gmra.mrb[40].mxu0 %vm586_vm2, %v16531_v44  ;;  %v16541_v44 = vld [vmem:[#allocation44_spill] sm:$0xff] }
 0x1f3   : > { %11385 = vmatprep.mubr.msk.bf16.mxu0 %vm586_vm2, %v16532_v57  ;;  %v16540_v57 = vld [vmem:[#allocation78_spill] sm:$0xff] }
 0x1f8   : > { %11440 = vmatmul.mubr.msk.bf16.gmra.mrb[32].mxu1 %vm586_vm2, %v16533_v41 }
 0x1f9   : > { %11443 = vmatprep.mubr.msk.bf16.mxu1 %vm586_vm2, %v16534_v58 }
 0x1fa   : > { %11386 = vmatmul.mubr.msk.bf16.gmra.mrb[44].mxu0 %vm586_vm2, %v16535_v60  ;;  %v16543_v60 = vld [vmem:[#allocation79_spill] sm:$0xff] }
 0x1fb   : > { %11389 = vmatprep.mubr.msk.bf16.mxu0 %vm586_vm2, %v16536_v53  ;;  %v16544_v53 = vld [vmem:[#allocation80_spill] sm:$0xff] }
 0x200   : > { %11444 = vmatmul.mubr.msk.bf16.gmra.mrb[36].mxu1 %vm586_vm2, %v16537_v32 }
 0x201   : > { %11447 = vmatprep.mubr.msk.bf16.mxu1 %vm586_vm2, %v16538_v25 }
 0x202   : > { %11390 = vmatmul.mubr.msk.bf16.gmra.mrb[48].mxu0 %vm586_vm2, %v16539_v16  ;;  %v16547_v16 = vld [vmem:[#allocation81_spill] sm:$0xff] }
 0x203   : > { %11393 = vmatprep.mubr.msk.bf16.mxu0 %vm586_vm2, %v16540_v57  ;;  %v16548_v57 = vld [vmem:[#allocation82_spill] sm:$0xff] }
 0x208   : > { %11448 = vmatmul.mubr.msk.bf16.gmra.mrb[40].mxu1 %vm586_vm2, %v16541_v44 }
 0x209   : > { %11451 = vmatprep.mubr.msk.bf16.mxu1 %vm586_vm2, %v16542_v56 }
 0x20a   : > { %11394 = vmatmul.mubr.msk.bf16.gmra.mrb[52].mxu0 %vm586_vm2, %v16543_v60  ;;  %v16550_v60 = vld [vmem:[#allocation52_spill] sm:$0xff] }
 0x20b   : > { %11397 = vmatprep.mubr.msk.bf16.mxu0 %vm586_vm2, %v16544_v53  ;;  %v16551_v53 = vld [vmem:[#allocation53_spill] sm:$0xff] }
 0x210   : > { %11452 = vmatmul.mubr.msk.bf16.gmra.mrb[44].mxu1 %vm586_vm2, %v16545_v21 }
 0x211   : > { %11455 = vmatprep.mubr.msk.bf16.mxu1 %vm586_vm2, %v16546_v20 }
 0x212   : > { %11398 = vmatmul.mubr.msk.bf16.gmra.mrb[56].mxu0 %vm586_vm2, %v16547_v16  ;;  %v16552_v16 = vld [vmem:[#allocation56_spill] sm:$0xff] }
 0x213   : > { %11401 = vmatprep.mubr.msk.bf16.mxu0 %vm586_vm2, %v16548_v57  ;;  %v5825_v57 = vshrl.u32 %v315_v62, 16  ;;  %v317_v62 = vld [vmem:[%s13401_s27 + $0x188] sm:$0x1] }
 0x218   : > { %11456 = vmatmul.mubr.msk.bf16.gmra.mrb[48].mxu1 %vm586_vm2, %v16550_v60 }
 0x219   : > { %11459 = vmatprep.mubr.msk.bf16.mxu1 %vm586_vm2, %v16551_v53 }
 0x21a   : > { %11402 = vmatmul.mubr.msk.bf16.gmra.mrb[60].mxu0 %vm586_vm2, %v15063_v46  ;;  %v5830_v46 = vrot.slane %v5828_v63, 5 }
 0x21b   : > { %11473 = vmatprep.mubr.msk.bf16.mxu0 %vm586_vm2, %v13395_v15  ;;  %v5827_v15 = vrot.slane %v5825_v57, 4  ;;  %v15099_v57 = vcombine.low %v15088_v24, %v15091_v55 }
 0x21d   : > { %16556 = vst [vmem:[#allocation9_spill] sm:$0xff] %v15099_v57 }
 0x220   : > { %11460 = vmatmul.mubr.msk.bf16.gmra.mrb[52].mxu1 %vm586_vm2, %v16552_v16 }
 0x221   : > { %11463 = vmatprep.mubr.msk.bf16.mxu1 %vm586_vm2, %v16553_v51 }
 0x222   : > { %11474 = vmatmul.mubr.msk.bf16.vlgmr.msra.gmra.mrb[0].mxu0 %vm586_vm2, %v13412_v26  ;;  %v5831_v26 = vor.u32 %v5830_v46, %v5827_v15  ;;  %v16558_v15 = vld [vmem:[#allocation5_spill] sm:$0xff] }
 0x223   : > { %11477 = vmatprep.mubr.msk.bf16.mxu0 %vm586_vm2, %v13431_v42  ;;  %11604 = vmatpush3.bf16.msra.mxu0 %v14960_v23  ;;  %v5844_v42 = vshll.u32 %v317_v62, 16  ;;  %v16562_v62 = vld [vmem:[#allocation11_spill] sm:$0xff] }
 0x224   : > { %v5832_v47 = vrot.slane %v5831_v26, 4  ;;  %v10082_v26 = vld [vmem:[%s16065_s2 + $0xc] sm:$0x3] }
 0x225   : > { %v5846_v63 = vrot.slane %v5844_v42, 5  ;;  %v15117_v42 = vand.u32 %v10082_v26, %v13370_v3  ;;  %v16568_v26 = vld [vmem:[#allocation23_spill] sm:$0xff] }
 0x226   : > { %v5837_v39 = vsel %vm13436_vm5, %v5832_v47, %v5836_v52  ;;  %v16561_v52 = vld [vmem:[#allocation10_spill] sm:$0xff]  ;;  %v16564_v47 = vld [vmem:[#allocation15_spill] sm:$0xff] }
 0x227   : > { %v5847_v11 = vsel %vm13436_vm5, %v5842_v9, %v5846_v63  ;;  %11735 = vmatprep.subr.bf16.mxu0 %v15117_v42  ;;  %v16565_v9 = vld [vmem:[#allocation18_spill] sm:$0xff]  ;;  %v16566_v63 = vld [vmem:[#allocation19_spill] sm:$0xff] }
 0x228   : > { %11464 = vmatmul.mubr.msk.bf16.gmra.mrb[56].mxu1 %vm586_vm2, %v16554_v22  ;;  %v15105_v46 = vcombine.low %v5837_v39, %v5847_v11  ;;  %v16559_v39 = vld [vmem:[#allocation6_spill] sm:$0xff] }
 0x229   : > { %11467 = vmatprep.mubr.msk.bf16.mxu1 %vm586_vm2, %v16555_v54  ;;  %v16567_v11 = vld [vmem:[#allocation22_spill] sm:$0xff] }
 0x22a   : > { %11478 = vmatmul.mubr.msk.bf16.gmra.mrb[4].mxu0 %vm586_vm2, %v13452_v7  ;;  %16557 = vst [vmem:[#allocation12_spill] sm:$0xff] %v15105_v46 }
 0x22b   : > { %11481 = vmatprep.mubr.msk.bf16.mxu0 %vm586_vm2, %v13455_v13 }
 0x230   : > { %11468 = vmatmul.mubr.msk.bf16.gmra.mrb[60].mxu1 %vm586_vm2, %v15099_v57 }
 0x231   : > { %11539 = vmatprep.mubr.msk.bf16.mxu1 %vm586_vm2, %v16558_v15 }
 0x232   : > { %11482 = vmatmul.mubr.msk.bf16.gmra.mrb[8].mxu0 %vm586_vm2, %v13491_v12 }
 0x233   : > { %11485 = vmatprep.mubr.msk.bf16.mxu0 %vm586_vm2, %v13493_v14 }
 0x238   : > { %11540 = vmatmul.mubr.msk.bf16.vlgmr.msra.gmra.mrb[0].mxu1 %vm586_vm2, %v16559_v39 }
 0x239   : > { %11670 = vmatpush3.bf16.msra.mxu1 %v14960_v23  ;;  %11543 = vmatprep.mubr.msk.bf16.mxu1 %vm586_vm2, %v16560_v1  ;;  %v16563_v23 = vld [vmem:[#allocation14_spill] sm:$0xff] }
 0x23a   : > { %11486 = vmatmul.mubr.msk.bf16.gmra.mrb[12].mxu0 %vm586_vm2, %v16513_v18  ;;  %11801 = vmatprep.subr.bf16.mxu1 %v15117_v42 }
 0x23b   : > { %11489 = vmatprep.mubr.msk.bf16.mxu0 %vm586_vm2, %v16514_v36 }
 0x240   : > { %11544 = vmatmul.mubr.msk.bf16.gmra.mrb[4].mxu1 %vm586_vm2, %v16561_v52 }
 0x241   : > { %11547 = vmatprep.mubr.msk.bf16.mxu1 %vm586_vm2, %v16562_v62 }
 0x242   : > { %11490 = vmatmul.mubr.msk.bf16.gmra.mrb[16].mxu0 %vm586_vm2, %v16517_v2 }
 0x243   : > { %11493 = vmatprep.mubr.msk.bf16.mxu0 %vm586_vm2, %v16518_v0 }
 0x248   : > { %11548 = vmatmul.mubr.msk.bf16.gmra.mrb[8].mxu1 %vm586_vm2, %v16563_v23 }
 0x249   : > { %11551 = vmatprep.mubr.msk.bf16.mxu1 %vm586_vm2, %v16564_v47 }
 0x24a   : > { %11494 = vmatmul.mubr.msk.bf16.gmra.mrb[20].mxu0 %vm586_vm2, %v16521_v4 }
 0x24b   : > { %11497 = vmatprep.mubr.msk.bf16.mxu0 %vm586_vm2, %v16522_v6  ;;  %v16569_v6 = vld [vmem:[#allocation26_spill] sm:$0xff] }
 0x250   : > { %11552 = vmatmul.mubr.msk.bf16.gmra.mrb[12].mxu1 %vm586_vm2, %v16565_v9 }
 0x251   : > { %11555 = vmatprep.mubr.msk.bf16.mxu1 %vm586_vm2, %v16566_v63 }
 0x252   : > { %11498 = vmatmul.mubr.msk.bf16.gmra.mrb[24].mxu0 %vm586_vm2, %v16525_v59 }
 0x253   : > { %11501 = vmatprep.mubr.msk.bf16.mxu0 %vm586_vm2, %v16526_v50 }
 0x258   : > { %11556 = vmatmul.mubr.msk.bf16.gmra.mrb[16].mxu1 %vm586_vm2, %v16567_v11 }
 0x259   : > { %11559 = vmatprep.mubr.msk.bf16.mxu1 %vm586_vm2, %v16568_v26 }
 0x25a   : > { %11502 = vmatmul.mubr.msk.bf16.gmra.mrb[28].mxu0 %vm586_vm2, %v16529_v37  ;;  %v16571_v37 = vld [vmem:[#allocation43_spill] sm:$0xff] }
 0x25b   : > { %11505 = vmatprep.mubr.msk.bf16.mxu0 %vm586_vm2, %v16530_v35  ;;  %v16570_v35 = vld [vmem:[#allocation41_spill] sm:$0xff] }
 0x260   : > { %11560 = vmatmul.mubr.msk.bf16.gmra.mrb[20].mxu1 %vm586_vm2, %v16569_v6 }
 0x261   : > { %11563 = vmatprep.mubr.msk.bf16.mxu1 %vm586_vm2, %v16475_v10 }
 0x262   : > { %11506 = vmatmul.mubr.msk.bf16.gmra.mrb[32].mxu0 %vm586_vm2, %v16533_v41  ;;  %v16573_v41 = vld [vmem:[#allocation47_spill] sm:$0xff] }
 0x263   : > { %11509 = vmatprep.mubr.msk.bf16.mxu0 %vm586_vm2, %v16534_v58  ;;  %v16572_v58 = vld [vmem:[#allocation46_spill] sm:$0xff] }
 0x268   : > { %11564 = vmatmul.mubr.msk.bf16.gmra.mrb[24].mxu1 %vm586_vm2, %v16476_v38 }
 0x269   : > { %11567 = vmatprep.mubr.msk.bf16.mxu1 %vm586_vm2, %v16477_v43 }
 0x26a   : > { %11510 = vmatmul.mubr.msk.bf16.gmra.mrb[36].mxu0 %vm586_vm2, %v16537_v32  ;;  %v16575_v32 = vld [vmem:[#allocation51_spill] sm:$0xff] }
 0x26b   : > { %11513 = vmatprep.mubr.msk.bf16.mxu0 %vm586_vm2, %v16538_v25  ;;  %v16574_v25 = vld [vmem:[#allocation50_spill] sm:$0xff] }
 0x270   : > { %11568 = vmatmul.mubr.msk.bf16.gmra.mrb[28].mxu1 %vm586_vm2, %v16570_v35 }
 0x271   : > { %11571 = vmatprep.mubr.msk.bf16.mxu1 %vm586_vm2, %v16571_v37 }
 0x272   : > { %11514 = vmatmul.mubr.msk.bf16.gmra.mrb[40].mxu0 %vm586_vm2, %v16541_v44  ;;  %v16577_v44 = vld [vmem:[#allocation55_spill] sm:$0xff] }
 0x273   : > { %11517 = vmatprep.mubr.msk.bf16.mxu0 %vm586_vm2, %v16542_v56  ;;  %v16576_v56 = vld [vmem:[#allocation54_spill] sm:$0xff] }
 0x278   : > { %11572 = vmatmul.mubr.msk.bf16.gmra.mrb[32].mxu1 %vm586_vm2, %v16572_v58 }
 0x279   : > { %11575 = vmatprep.mubr.msk.bf16.mxu1 %vm586_vm2, %v16573_v41 }
 0x27a   : > { %11518 = vmatmul.mubr.msk.bf16.gmra.mrb[44].mxu0 %vm586_vm2, %v16545_v21 }
 0x27b   : > { %11521 = vmatprep.mubr.msk.bf16.mxu0 %vm586_vm2, %v16546_v20 }
 0x280   : > { %11576 = vmatmul.mubr.msk.bf16.gmra.mrb[36].mxu1 %vm586_vm2, %v16574_v25 }
 0x281   : > { %11579 = vmatprep.mubr.msk.bf16.mxu1 %vm586_vm2, %v16575_v32 }
 0x282   : > { %11522 = vmatmul.mubr.msk.bf16.gmra.mrb[48].mxu0 %vm586_vm2, %v16550_v60 }
 0x283   : > { %11525 = vmatprep.mubr.msk.bf16.mxu0 %vm586_vm2, %v16551_v53  ;;  %v16578_v53 = vld [vmem:[#allocation63_spill] sm:$0xff] }
 0x288   : > { %11580 = vmatmul.mubr.msk.bf16.gmra.mrb[40].mxu1 %vm586_vm2, %v16576_v56 }
 0x289   : > { %11583 = vmatprep.mubr.msk.bf16.mxu1 %vm586_vm2, %v16577_v44 }
 0x28a   : > { %11526 = vmatmul.mubr.msk.bf16.gmra.mrb[52].mxu0 %vm586_vm2, %v16552_v16  ;;  %v6579_v16 = vshrl.u32 %v15091_v55, 16 }
 0x28b   : > { %11529 = vmatprep.mubr.msk.bf16.mxu0 %vm586_vm2, %v16553_v51  ;;  %v6575_v51 = vshll.u32 %v15091_v55, 16 }
 0x28c   : > { %v6581_v20 = vrot.slane %v6579_v16, 4 }
 0x28d   : > { %v6577_v60 = vrot.slane %v6575_v51, 5 }
 0x28f   : > { %v6582_v21 = vor.u32 %v6581_v20, %v6577_v60  ;;  %v16580_v20 = vld [vmem:[#allocation85_spill] sm:$0xff] }
 0x290   : > { %11584 = vmatmul.mubr.msk.bf16.gmra.mrb[44].mxu1 %vm586_vm2, %v16495_v31 }
 0x291   : > { %11587 = vmatprep.mubr.msk.bf16.mxu1 %vm586_vm2, %v16497_v5 }
 0x292   : > { %11530 = vmatmul.mubr.msk.bf16.gmra.mrb[56].mxu0 %vm586_vm2, %v16554_v22  ;;  %v6566_v22 = vshrl.u32 %v15088_v24, 16 }
 0x293   : > { %11533 = vmatprep.mubr.msk.bf16.mxu0 %vm586_vm2, %v16555_v54  ;;  %v6569_v54 = vshll.u32 %v15088_v24, 16  ;;  %v419_v24 = vld [vmem:[%s13385_s24 + $0x188] sm:$0x1] }
 0x294   : > { %v6585_v50 = vshll.u32 %v419_v24, 16  ;;  %v16586_v24 = vld [vmem:[#allocation93_spill] sm:$0xff] }
 0x296   : > { %v6587_v51 = vrot.slane %v6585_v50, 5 }
 0x298   : > { %11588 = vmatmul.mubr.msk.bf16.gmra.mrb[48].mxu1 %vm586_vm2, %v16500_v19 }
 0x299   : > { %11591 = vmatprep.mubr.msk.bf16.mxu1 %vm586_vm2, %v16578_v53 }
 0x29a   : > { %11534 = vmatmul.mubr.msk.bf16.gmra.mrb[60].mxu0 %vm586_vm2, %v15099_v57  ;;  %v6571_v57 = vrot.slane %v6569_v54, 5  ;;  %v6583_v54 = vrot.slane %v6582_v21, 4  ;;  %v16581_v21 = vld [vmem:[#allocation39_spill] sm:$0xff] }
 0x29b   : > { %11605 = vmatprep.mubr.msk.bf16.mxu0 %vm586_vm2, %v16558_v15  ;;  %v6568_v15 = vrot.slane %v6566_v22, 4 }
 0x29d   : > { %v6572_v55 = vor.u32 %v6571_v57, %v6568_v15  ;;  %v10149_v57 = vld [vmem:[%s16065_s2 + $0xe] sm:$0x3]  ;;  %v16584_v15 = vld [vmem:[#allocation40_spill] sm:$0xff] }
 0x29e   : > { %v15266_v50 = vand.u32 %v10149_v57, %v13370_v3  ;;  %v16593_v57 = vld [vmem:[#allocation97_spill] sm:$0xff] }
 0x29f   : > { %v6573_v22 = vrot.slane %v6572_v55, 4  ;;  %v16587_v55 = vld [vmem:[#allocation94_spill] sm:$0xff] }
 0x2a0   : > { %11592 = vmatmul.mubr.msk.bf16.gmra.mrb[52].mxu1 %vm586_vm2, %v16503_v30 }
 0x2a1   : > { %11595 = vmatprep.mubr.msk.bf16.mxu1 %vm586_vm2, %v14080_v34  ;;  %v6578_v16 = vsel %vm13436_vm5, %v6573_v22, %v6577_v60  ;;  %v16582_v60 = vld [vmem:[#allocation36_spill] sm:$0xff]  ;;  %v16588_v22 = vld [vmem:[#allocation95_spill] sm:$0xff] }
 0x2a2   : > { %11606 = vmatmul.mubr.msk.bf16.vlgmr.msra.gmra.mrb[0].mxu0 %vm586_vm2, %v16559_v39 }
 0x2a3   : > { %11609 = vmatprep.mubr.msk.bf16.mxu0 %vm586_vm2, %v16560_v1  ;;  %11736 = vmatpush3.bf16.msra.mxu0 %v15117_v42  ;;  %v6588_v1 = vsel %vm13436_vm5, %v6583_v54, %v6587_v51  ;;  %v16589_v54 = vld [vmem:[#allocation96_spill] sm:$0xff]  ;;  %v16590_v51 = vld [vmem:[#allocation27_spill] sm:$0xff] }
 0x2a4   : > { %v15254_v39 = vcombine.low %v6578_v16, %v6588_v1  ;;  %11867 = vmatprep.subr.bf16.mxu0 %v15266_v50  ;;  %v16583_v1 = vld [vmem:[#allocation42_spill] sm:$0xff]  ;;  %v16591_v16 = vld [vmem:[#allocation33_spill] sm:$0xff] }
 0x2a6   : > { %16579 = vst [vmem:[#allocation13_spill] sm:$0xff] %v15254_v39 }
 0x2a8   : > { %11596 = vmatmul.mubr.msk.bf16.gmra.mrb[56].mxu1 %vm586_vm2, %v14117_v33 }
 0x2a9   : > { %11599 = vmatprep.mubr.msk.bf16.mxu1 %vm586_vm2, %v14134_v49 }
 0x2aa   : > { %11610 = vmatmul.mubr.msk.bf16.gmra.mrb[4].mxu0 %vm586_vm2, %v16561_v52 }
 0x2ab   : > { %11613 = vmatprep.mubr.msk.bf16.mxu0 %vm586_vm2, %v16562_v62 }
 0x2b0   : > { %11600 = vmatmul.mubr.msk.bf16.gmra.mrb[60].mxu1 %vm586_vm2, %v15105_v46 }
 0x2b1   : > { %11671 = vmatprep.mubr.msk.bf16.mxu1 %vm586_vm2, %v16580_v20  ;;  %v16592_v20 = vld [vmem:[#allocation35_spill] sm:$0xff] }
 0x2b2   : > { %11614 = vmatmul.mubr.msk.bf16.gmra.mrb[8].mxu0 %vm586_vm2, %v16563_v23 }
 0x2b3   : > { %11617 = vmatprep.mubr.msk.bf16.mxu0 %vm586_vm2, %v16564_v47 }
 0x2b8   : > { %11672 = vmatmul.mubr.msk.bf16.vlgmr.msra.gmra.mrb[0].mxu1 %vm586_vm2, %v16581_v21  ;;  %v16649_v21 = vld [vmem:[#allocation53_spill] sm:$0xff] }
 0x2b9   : > { %11802 = vmatpush3.bf16.msra.mxu1 %v15117_v42  ;;  %11675 = vmatprep.mubr.msk.bf16.mxu1 %vm586_vm2, %v16582_v60  ;;  %v16585_v42 = vld [vmem:[#allocation4_spill] sm:$0xff] }
 0x2ba   : > { %11618 = vmatmul.mubr.msk.bf16.gmra.mrb[12].mxu0 %vm586_vm2, %v16565_v9  ;;  %11933 = vmatprep.subr.bf16.mxu1 %v15266_v50 }
 0x2bb   : > { %11621 = vmatprep.mubr.msk.bf16.mxu0 %vm586_vm2, %v16566_v63 }
 0x2c0   : > { %11676 = vmatmul.mubr.msk.bf16.gmra.mrb[4].mxu1 %vm586_vm2, %v16583_v1  ;;  %v319_v1 = vld [vmem:[%s13401_s27 + $0x190] sm:$0xf] }
 0x2c1   : > { %11679 = vmatprep.mubr.msk.bf16.mxu1 %vm586_vm2, %v16584_v15  ;;  %v318_v15 = vld [vmem:[%s13401_s27 + $0x18c] sm:$0xf] }
 0x2c2   : > { %11622 = vmatmul.mubr.msk.bf16.gmra.mrb[16].mxu0 %vm586_vm2, %v16567_v11  ;;  %v10083_v60 = vcombine.low %v318_v15, %v319_v1 }
 0x2c3   : > { %11625 = vmatprep.mubr.msk.bf16.mxu0 %vm586_vm2, %v16568_v26 }
 0x2c8   : > { %11680 = vmatmul.mubr.msk.bf16.gmra.mrb[8].mxu1 %vm586_vm2, %v16585_v42  ;;  %v16646_v42 = vld [vmem:[#allocation52_spill] sm:$0xff] }
 0x2c9   : > { %11683 = vmatprep.mubr.msk.bf16.mxu1 %vm586_vm2, %v16586_v24  ;;  %v16645_v24 = vld [vmem:[#allocation49_spill] sm:$0xff] }
 0x2ca   : > { %11626 = vmatmul.mubr.msk.bf16.gmra.mrb[20].mxu0 %vm586_vm2, %v16569_v6 }
 0x2cb   : > { %11629 = vmatprep.mubr.msk.bf16.mxu0 %vm586_vm2, %v16475_v10 }
 0x2d0   : > { %11684 = vmatmul.mubr.msk.bf16.gmra.mrb[12].mxu1 %vm586_vm2, %v16587_v55  ;;  %v16642_v55 = vld [vmem:[#allocation48_spill] sm:$0xff] }
 0x2d1   : > { %11687 = vmatprep.mubr.msk.bf16.mxu1 %vm586_vm2, %v16588_v22  ;;  %v16641_v22 = vld [vmem:[#allocation45_spill] sm:$0xff] }
 0x2d2   : > { %11630 = vmatmul.mubr.msk.bf16.gmra.mrb[24].mxu0 %vm586_vm2, %v16476_v38 }
 0x2d3   : > { %11633 = vmatprep.mubr.msk.bf16.mxu0 %vm586_vm2, %v16477_v43 }
 0x2d8   : > { %11688 = vmatmul.mubr.msk.bf16.gmra.mrb[16].mxu1 %vm586_vm2, %v16589_v54  ;;  %v16640_v54 = vld [vmem:[#allocation79_spill] sm:$0xff] }
 0x2d9   : > { %11691 = vmatprep.mubr.msk.bf16.mxu1 %vm586_vm2, %v16590_v51  ;;  %v16594_v51 = vld [vmem:[#allocation98_spill] sm:$0xff] }
 0x2da   : > { %11634 = vmatmul.mubr.msk.bf16.gmra.mrb[28].mxu0 %vm586_vm2, %v16570_v35 }
 0x2db   : > { %11637 = vmatprep.mubr.msk.bf16.mxu0 %vm586_vm2, %v16571_v37 }
 0x2e0   : > { %11692 = vmatmul.mubr.msk.bf16.gmra.mrb[20].mxu1 %vm586_vm2, %v16591_v16  ;;  %v16595_v16 = vld [vmem:[#allocation99_spill] sm:$0xff] }
 0x2e1   : > { %11695 = vmatprep.mubr.msk.bf16.mxu1 %vm586_vm2, %v16592_v20  ;;  %v16596_v20 = vld [vmem:[#allocation100_spill] sm:$0xff] }
 0x2e2   : > { %11638 = vmatmul.mubr.msk.bf16.gmra.mrb[32].mxu0 %vm586_vm2, %v16572_v58 }
 0x2e3   : > { %11641 = vmatprep.mubr.msk.bf16.mxu0 %vm586_vm2, %v16573_v41 }
 0x2e8   : > { %11696 = vmatmul.mubr.msk.bf16.gmra.mrb[24].mxu1 %vm586_vm2, %v16593_v57  ;;  %v16597_v57 = vld [vmem:[#allocation101_spill] sm:$0xff] }
 0x2e9   : > { %11699 = vmatprep.mubr.msk.bf16.mxu1 %vm586_vm2, %v16594_v51  ;;  %v16598_v51 = vld [vmem:[#allocation102_spill] sm:$0xff] }
 0x2ea   : > { %11642 = vmatmul.mubr.msk.bf16.gmra.mrb[36].mxu0 %vm586_vm2, %v16574_v25 }
 0x2eb   : > { %11645 = vmatprep.mubr.msk.bf16.mxu0 %vm586_vm2, %v16575_v32 }
 0x2f0   : > { %11700 = vmatmul.mubr.msk.bf16.gmra.mrb[28].mxu1 %vm586_vm2, %v16595_v16  ;;  %v16599_v16 = vld [vmem:[#allocation58_spill] sm:$0xff] }
 0x2f1   : > { %11703 = vmatprep.mubr.msk.bf16.mxu1 %vm586_vm2, %v16596_v20  ;;  %v16600_v20 = vld [vmem:[#allocation103_spill] sm:$0xff] }
 0x2f2   : > { %11646 = vmatmul.mubr.msk.bf16.gmra.mrb[40].mxu0 %vm586_vm2, %v16576_v56 }
 0x2f3   : > { %11649 = vmatprep.mubr.msk.bf16.mxu0 %vm586_vm2, %v16577_v44 }
 0x2f8   : > { %11704 = vmatmul.mubr.msk.bf16.gmra.mrb[32].mxu1 %vm586_vm2, %v16597_v57  ;;  %v16601_v57 = vld [vmem:[#allocation104_spill] sm:$0xff] }
 0x2f9   : > { %11707 = vmatprep.mubr.msk.bf16.mxu1 %vm586_vm2, %v16598_v51  ;;  %v16602_v51 = vld [vmem:[#allocation105_spill] sm:$0xff] }
 0x2fa   : > { %11650 = vmatmul.mubr.msk.bf16.gmra.mrb[44].mxu0 %vm586_vm2, %v16495_v31 }
 0x2fb   : > { %11653 = vmatprep.mubr.msk.bf16.mxu0 %vm586_vm2, %v16497_v5  ;;  %v15534_v5 = vld [vmem:[%s13385_s24 + $0x190] sm:$0xf] }
 0x300   : > { %11708 = vmatmul.mubr.msk.bf16.gmra.mrb[36].mxu1 %vm586_vm2, %v16599_v16  ;;  %v16603_v16 = vld [vmem:[#allocation106_spill] sm:$0xff] }
 0x301   : > { %11711 = vmatprep.mubr.msk.bf16.mxu1 %vm586_vm2, %v16600_v20  ;;  %v16604_v20 = vld [vmem:[#allocation107_spill] sm:$0xff] }
 0x302   : > { %11654 = vmatmul.mubr.msk.bf16.gmra.mrb[48].mxu0 %vm586_vm2, %v16500_v19  ;;  %v15531_v19 = vld [vmem:[%s13385_s24 + $0x18c] sm:$0xf] }
 0x303   : > { %11657 = vmatprep.mubr.msk.bf16.mxu0 %vm586_vm2, %v16578_v53  ;;  %v16653_v53 = vld [vmem:[#allocation61_spill] sm:$0xff] }
 0x308   : > { %11712 = vmatmul.mubr.msk.bf16.gmra.mrb[40].mxu1 %vm586_vm2, %v16601_v57  ;;  %v16605_v57 = vld [vmem:[#allocation108_spill] sm:$0xff] }
 0x309   : > { %11715 = vmatprep.mubr.msk.bf16.mxu1 %vm586_vm2, %v16602_v51  ;;  %v16637_v51 = vld [vmem:[#allocation38_spill] sm:$0xff] }
 0x30a   : > { %11658 = vmatmul.mubr.msk.bf16.gmra.mrb[52].mxu0 %vm586_vm2, %v16503_v30 }
 0x30b   : > { %11661 = vmatprep.mubr.msk.bf16.mxu0 %vm586_vm2, %v14080_v34 }
 0x310   : > { %11716 = vmatmul.mubr.msk.bf16.gmra.mrb[44].mxu1 %vm586_vm2, %v16603_v16  ;;  %v16634_v16 = vld [vmem:[#allocation37_spill] sm:$0xff] }
 0x311   : > { %11719 = vmatprep.mubr.msk.bf16.mxu1 %vm586_vm2, %v16604_v20  ;;  %v16633_v20 = vld [vmem:[#allocation31_spill] sm:$0xff] }
 0x312   : > { %11662 = vmatmul.mubr.msk.bf16.gmra.mrb[56].mxu0 %vm586_vm2, %v14117_v33  ;;  %v16652_v33 = vld [vmem:[#allocation60_spill] sm:$0xff] }
 0x313   : > { %11665 = vmatprep.mubr.msk.bf16.mxu0 %vm586_vm2, %v14134_v49  ;;  %v8047_v49 = vshrl.u32 %v319_v1, 16 }
 0x315   : > { %v8049_v30 = vrot.slane %v8047_v49, 4 }
 0x318   : > { %11720 = vmatmul.mubr.msk.bf16.gmra.mrb[48].mxu1 %vm586_vm2, %v16605_v57  ;;  %v16630_v57 = vld [vmem:[#allocation30_spill] sm:$0xff] }
 0x319   : > { %11723 = vmatprep.mubr.msk.bf16.mxu1 %vm586_vm2, %v14906_v29  ;;  %v16629_v29 = vld [vmem:[#allocation25_spill] sm:$0xff] }
 0x31a   : > { %11666 = vmatmul.mubr.msk.bf16.gmra.mrb[60].mxu0 %vm586_vm2, %v15105_v46  ;;  %v8043_v46 = vshll.u32 %v319_v1, 16  ;;  %v16654_v1 = vld [vmem:[#allocation9_spill] sm:$0xff] }
 0x31b   : > { %11737 = vmatprep.mubr.msk.bf16.mxu0 %vm586_vm2, %v14088_v48  ;;  %v16606_v48 = vld [vmem:[#allocation68_spill] sm:$0xff] }
 0x31c   : > { %v8045_v34 = vrot.slane %v8043_v46, 5 }
 0x320   : > { %11724 = vmatmul.mubr.msk.bf16.gmra.mrb[52].mxu1 %vm586_vm2, %v14910_v8  ;;  %v16607_v8 = vld [vmem:[#allocation70_spill] sm:$0xff] }
 0x321   : > { %11727 = vmatprep.mubr.msk.bf16.mxu1 %vm586_vm2, %v14930_v40  ;;  %v16626_v40 = vld [vmem:[#allocation24_spill] sm:$0xff] }
 0x322   : > { %11738 = vmatmul.mubr.msk.bf16.vlgmr.msra.gmra.mrb[0].mxu0 %vm586_vm2, %v14094_v17  ;;  %v16608_v17 = vld [vmem:[#allocation2_spill] sm:$0xff] }
 0x323   : > { %11741 = vmatprep.mubr.msk.bf16.mxu0 %vm586_vm2, %v14107_v61  ;;  %11868 = vmatpush3.bf16.msra.mxu0 %v15266_v50  ;;  %v10215_v61 = vld [vmem:[%s16065_s2 + $0x10] sm:$0x3] }
 0x328   : > { %11728 = vmatmul.mubr.msk.bf16.gmra.mrb[56].mxu1 %vm586_vm2, %v14932_v28  ;;  %v16609_v28 = vld [vmem:[#allocation83_spill] sm:$0xff] }
 0x329   : > { %11731 = vmatprep.mubr.msk.bf16.mxu1 %vm586_vm2, %v14946_v27  ;;  %v16610_v27 = vld [vmem:[#allocation84_spill] sm:$0xff] }
 0x32a   : > { %11742 = vmatmul.mubr.msk.bf16.gmra.mrb[4].mxu0 %vm586_vm2, %v16606_v48  ;;  %v15406_v48 = vand.u32 %v10215_v61, %v13370_v3  ;;  %v16614_v3 = vld [vmem:[#allocation88_spill] sm:$0xff] }
 0x32b   : > { %11745 = vmatprep.mubr.msk.bf16.mxu0 %vm586_vm2, %v16607_v8  ;;  %v16611_v8 = vld [vmem:[#allocation3_spill] sm:$0xff]  ;;  %v16618_v61 = vld [vmem:[#allocation92_spill] sm:$0xff] }
 0x32c   : > { %11999 = vmatprep.subr.bf16.mxu0 %v15406_v48 }
 0x330   : > { %11732 = vmatmul.mubr.msk.bf16.gmra.mrb[60].mxu1 %vm586_vm2, %v15254_v39  ;;  %v16612_v39 = vld [vmem:[#allocation86_spill] sm:$0xff] }
 0x331   : > { %11803 = vmatprep.mubr.msk.bf16.mxu1 %vm586_vm2, %v16608_v17 }
 0x332   : > { %11746 = vmatmul.mubr.msk.bf16.gmra.mrb[8].mxu0 %vm586_vm2, %v16609_v28  ;;  %v16613_v28 = vld [vmem:[#allocation87_spill] sm:$0xff] }
 0x333   : > { %11749 = vmatprep.mubr.msk.bf16.mxu0 %vm586_vm2, %v16610_v27  ;;  %v16615_v27 = vld [vmem:[#allocation89_spill] sm:$0xff] }
 0x338   : > { %11804 = vmatmul.mubr.msk.bf16.vlgmr.msra.gmra.mrb[0].mxu1 %vm586_vm2, %v16611_v8 }
 0x339   : > { %11934 = vmatpush3.bf16.msra.mxu1 %v15266_v50  ;;  %11807 = vmatprep.mubr.msk.bf16.mxu1 %vm586_vm2, %v13452_v7  ;;  %v16617_v50 = vld [vmem:[#allocation91_spill] sm:$0xff] }
 0x33a   : > { %11750 = vmatmul.mubr.msk.bf16.gmra.mrb[12].mxu0 %vm586_vm2, %v16612_v39  ;;  %12065 = vmatprep.subr.bf16.mxu1 %v15406_v48  ;;  %v16616_v39 = vld [vmem:[#allocation90_spill] sm:$0xff] }
 0x33b   : > { %11753 = vmatprep.mubr.msk.bf16.mxu0 %vm586_vm2, %v16613_v28  ;;  %v16619_v28 = vld [vmem:[#allocation29_spill] sm:$0xff] }
 0x340   : > { %11808 = vmatmul.mubr.msk.bf16.gmra.mrb[4].mxu1 %vm586_vm2, %v13455_v13 }
 0x341   : > { %11811 = vmatprep.mubr.msk.bf16.mxu1 %vm586_vm2, %v13491_v12 }
 0x342   : > { %11754 = vmatmul.mubr.msk.bf16.gmra.mrb[16].mxu0 %vm586_vm2, %v16614_v3  ;;  %v16620_v3 = vld [vmem:[#allocation28_spill] sm:$0xff] }
 0x343   : > { %11757 = vmatprep.mubr.msk.bf16.mxu0 %vm586_vm2, %v16615_v27  ;;  %v16621_v27 = vld [vmem:[#allocation34_spill] sm:$0xff] }
 0x348   : > { %11812 = vmatmul.mubr.msk.bf16.gmra.mrb[8].mxu1 %vm586_vm2, %v13493_v14 }
 0x349   : > { %11815 = vmatprep.mubr.msk.bf16.mxu1 %vm586_vm2, %v16513_v18 }
 0x34a   : > { %11758 = vmatmul.mubr.msk.bf16.gmra.mrb[20].mxu0 %vm586_vm2, %v16616_v39  ;;  %v16622_v39 = vld [vmem:[#allocation17_spill] sm:$0xff] }
 0x34b   : > { %11761 = vmatprep.mubr.msk.bf16.mxu0 %vm586_vm2, %v16617_v50  ;;  %v16623_v50 = vld [vmem:[#allocation32_spill] sm:$0xff] }
 0x350   : > { %11816 = vmatmul.mubr.msk.bf16.gmra.mrb[12].mxu1 %vm586_vm2, %v16514_v36 }
 0x351   : > { %11819 = vmatprep.mubr.msk.bf16.mxu1 %vm586_vm2, %v16517_v2 }
 0x352   : > { %11762 = vmatmul.mubr.msk.bf16.gmra.mrb[24].mxu0 %vm586_vm2, %v16618_v61  ;;  %v16624_v61 = vld [vmem:[#allocation71_spill] sm:$0xff] }
 0x353   : > { %11765 = vmatprep.mubr.msk.bf16.mxu0 %vm586_vm2, %v16619_v28  ;;  %v16625_v28 = vld [vmem:[#allocation21_spill] sm:$0xff] }
 0x358   : > { %11820 = vmatmul.mubr.msk.bf16.gmra.mrb[16].mxu1 %vm586_vm2, %v16518_v0 }
 0x359   : > { %11823 = vmatprep.mubr.msk.bf16.mxu1 %vm586_vm2, %v16521_v4 }
 0x35a   : > { %11766 = vmatmul.mubr.msk.bf16.gmra.mrb[28].mxu0 %vm586_vm2, %v16620_v3  ;;  %v16627_v3 = vld [vmem:[#allocation72_spill] sm:$0xff] }
 0x35b   : > { %11769 = vmatprep.mubr.msk.bf16.mxu0 %vm586_vm2, %v16621_v27  ;;  %v16628_v27 = vld [vmem:[#allocation73_spill] sm:$0xff] }
 0x360   : > { %11824 = vmatmul.mubr.msk.bf16.gmra.mrb[20].mxu1 %vm586_vm2, %v16622_v39 }
 0x361   : > { %11827 = vmatprep.mubr.msk.bf16.mxu1 %vm586_vm2, %v16525_v59 }
 0x362   : > { %11770 = vmatmul.mubr.msk.bf16.gmra.mrb[32].mxu0 %vm586_vm2, %v16623_v50  ;;  %v16631_v50 = vld [vmem:[#allocation74_spill] sm:$0xff] }
 0x363   : > { %11773 = vmatprep.mubr.msk.bf16.mxu0 %vm586_vm2, %v16624_v61  ;;  %v16632_v61 = vld [vmem:[#allocation75_spill] sm:$0xff] }
 0x368   : > { %11828 = vmatmul.mubr.msk.bf16.gmra.mrb[24].mxu1 %vm586_vm2, %v16625_v28 }
 0x369   : > { %11831 = vmatprep.mubr.msk.bf16.mxu1 %vm586_vm2, %v16626_v40 }
 0x36a   : > { %11774 = vmatmul.mubr.msk.bf16.gmra.mrb[36].mxu0 %vm586_vm2, %v16627_v3  ;;  %v16635_v3 = vld [vmem:[#allocation76_spill] sm:$0xff] }
 0x36b   : > { %11777 = vmatprep.mubr.msk.bf16.mxu0 %vm586_vm2, %v16628_v27  ;;  %v16636_v27 = vld [vmem:[#allocation77_spill] sm:$0xff] }
 0x370   : > { %11832 = vmatmul.mubr.msk.bf16.gmra.mrb[28].mxu1 %vm586_vm2, %v16629_v29 }
 0x371   : > { %11835 = vmatprep.mubr.msk.bf16.mxu1 %vm586_vm2, %v16630_v57 }
 0x372   : > { %11778 = vmatmul.mubr.msk.bf16.gmra.mrb[40].mxu0 %vm586_vm2, %v16631_v50  ;;  %v16638_v50 = vld [vmem:[#allocation44_spill] sm:$0xff] }
 0x373   : > { %11781 = vmatprep.mubr.msk.bf16.mxu0 %vm586_vm2, %v16632_v61  ;;  %v16639_v61 = vld [vmem:[#allocation78_spill] sm:$0xff] }
 0x378   : > { %11836 = vmatmul.mubr.msk.bf16.gmra.mrb[32].mxu1 %vm586_vm2, %v16633_v20 }
 0x379   : > { %11839 = vmatprep.mubr.msk.bf16.mxu1 %vm586_vm2, %v16634_v16 }
 0x37a   : > { %11782 = vmatmul.mubr.msk.bf16.gmra.mrb[44].mxu0 %vm586_vm2, %v16635_v3  ;;  %v16643_v3 = vld [vmem:[#allocation80_spill] sm:$0xff] }
 0x37b   : > { %11785 = vmatprep.mubr.msk.bf16.mxu0 %vm586_vm2, %v16636_v27  ;;  %v16644_v27 = vld [vmem:[#allocation81_spill] sm:$0xff] }
 0x380   : > { %11840 = vmatmul.mubr.msk.bf16.gmra.mrb[36].mxu1 %vm586_vm2, %v16637_v51 }
 0x381   : > { %11843 = vmatprep.mubr.msk.bf16.mxu1 %vm586_vm2, %v16638_v50 }
 0x382   : > { %11786 = vmatmul.mubr.msk.bf16.gmra.mrb[48].mxu0 %vm586_vm2, %v16639_v61  ;;  %v16647_v61 = vld [vmem:[#allocation82_spill] sm:$0xff] }
 0x383   : > { %11789 = vmatprep.mubr.msk.bf16.mxu0 %vm586_vm2, %v16640_v54  ;;  %v16648_v54 = vld [vmem:[#allocation8_spill] sm:$0xff] }
 0x388   : > { %11844 = vmatmul.mubr.msk.bf16.gmra.mrb[40].mxu1 %vm586_vm2, %v16641_v22 }
 0x389   : > { %11847 = vmatprep.mubr.msk.bf16.mxu1 %vm586_vm2, %v16642_v55 }
 0x38a   : > { %11790 = vmatmul.mubr.msk.bf16.gmra.mrb[52].mxu0 %vm586_vm2, %v16643_v3  ;;  %v16650_v3 = vld [vmem:[#allocation56_spill] sm:$0xff] }
 0x38b   : > { %11793 = vmatprep.mubr.msk.bf16.mxu0 %vm586_vm2, %v16644_v27  ;;  %v16651_v27 = vld [vmem:[#allocation57_spill] sm:$0xff] }
 0x390   : > { %11848 = vmatmul.mubr.msk.bf16.gmra.mrb[44].mxu1 %vm586_vm2, %v16645_v24 }
 0x391   : > { %11851 = vmatprep.mubr.msk.bf16.mxu1 %vm586_vm2, %v16646_v42 }
 0x392   : > { %11794 = vmatmul.mubr.msk.bf16.gmra.mrb[56].mxu0 %vm586_vm2, %v16647_v61  ;;  %v8034_v61 = vshrl.u32 %v318_v15, 16 }
 0x393   : > { %11797 = vmatprep.mubr.msk.bf16.mxu0 %vm586_vm2, %v16648_v54  ;;  %v8037_v54 = vshll.u32 %v318_v15, 16  ;;  %v320_v15 = vld [vmem:[%s13401_s27 + $0x194] sm:$0x1] }
 0x398   : > { %11852 = vmatmul.mubr.msk.bf16.gmra.mrb[48].mxu1 %vm586_vm2, %v16649_v21 }
 0x399   : > { %11855 = vmatprep.mubr.msk.bf16.mxu1 %vm586_vm2, %v16650_v3 }
 0x39a   : > { %11798 = vmatmul.mubr.msk.bf16.gmra.mrb[60].mxu0 %vm586_vm2, %v10083_v60  ;;  %v8036_v60 = vrot.slane %v8034_v61, 4 }
 0x39b   : > { %11869 = vmatprep.mubr.msk.bf16.mxu0 %vm586_vm2, %v16608_v17  ;;  %v8039_v17 = vrot.slane %v8037_v54, 5  ;;  %v10116_v54 = vcombine.low %v15531_v19, %v15534_v5 }
 0x3a0   : > { %11856 = vmatmul.mubr.msk.bf16.gmra.mrb[52].mxu1 %vm586_vm2, %v16651_v27 }
 0x3a1   : > { %11859 = vmatprep.mubr.msk.bf16.mxu1 %vm586_vm2, %v16652_v33  ;;  %v8050_v33 = vor.u32 %v8049_v30, %v8045_v34 }
 0x3a2   : > { %11870 = vmatmul.mubr.msk.bf16.vlgmr.msra.gmra.mrb[0].mxu0 %vm586_vm2, %v16611_v8  ;;  %v8040_v8 = vor.u32 %v8039_v17, %v8036_v60  ;;  %v16690_v17 = vld [vmem:[#allocation107_spill] sm:$0xff] }
 0x3a3   : > { %11873 = vmatprep.mubr.msk.bf16.mxu0 %vm586_vm2, %v13452_v7  ;;  %12000 = vmatpush3.bf16.msra.mxu0 %v15406_v48  ;;  %v8053_v7 = vshll.u32 %v320_v15, 16  ;;  %v8051_v46 = vrot.slane %v8050_v33, 4  ;;  %v16659_v33 = vld [vmem:[#allocation62_spill] sm:$0xff]  ;;  %v16691_v15 = vld [vmem:[#allocation108_spill] sm:$0xff] }
 0x3a4   : > { %v8041_v49 = vrot.slane %v8040_v8, 4  ;;  %v16693_v8 = vld [vmem:[#allocation64_spill] sm:$0xff] }
 0x3a5   : > { %v8055_v61 = vrot.slane %v8053_v7, 5  ;;  %v16694_v7 = vld [vmem:[#allocation110_spill] sm:$0xff] }
 0x3a7   : > { %v8056_v60 = vsel %vm13436_vm5, %v8051_v46, %v8055_v61  ;;  %v16696_v46 = vld [vmem:[#allocation112_spill] sm:$0xff]  ;;  %v16697_v61 = vld [vmem:[#allocation13_spill] sm:$0xff] }
 0x3a8   : > { %11860 = vmatmul.mubr.msk.bf16.gmra.mrb[56].mxu1 %vm586_vm2, %v16653_v53 }
 0x3a9   : > { %11863 = vmatprep.mubr.msk.bf16.mxu1 %vm586_vm2, %v16654_v1  ;;  %v8046_v1 = vsel %vm13436_vm5, %v8041_v49, %v8045_v34  ;;  %v16658_v34 = vld [vmem:[#allocation59_spill] sm:$0xff] }
 0x3aa   : > { %11874 = vmatmul.mubr.msk.bf16.gmra.mrb[4].mxu0 %vm586_vm2, %v13455_v13  ;;  %v15546_v30 = vcombine.low %v8046_v1, %v8056_v60  ;;  %v16655_v13 = vld [vmem:[#allocation6_spill] sm:$0xff]  ;;  %v16692_v1 = vld [vmem:[#allocation109_spill] sm:$0xff]  ;;  %v16695_v49 = vld [vmem:[#allocation111_spill] sm:$0xff] }
 0x3ab   : > { %11877 = vmatprep.mubr.msk.bf16.mxu0 %vm586_vm2, %v13491_v12  ;;  %v16656_v12 = vld [vmem:[#allocation7_spill] sm:$0xff] }
 0x3b0   : > { %11864 = vmatmul.mubr.msk.bf16.gmra.mrb[60].mxu1 %vm586_vm2, %v10116_v54 }
 0x3b1   : > { %11935 = vmatprep.mubr.msk.bf16.mxu1 %vm586_vm2, %v16655_v13 }
 0x3b2   : > { %11878 = vmatmul.mubr.msk.bf16.gmra.mrb[8].mxu0 %vm586_vm2, %v13493_v14  ;;  %v16657_v14 = vld [vmem:[#allocation60_spill] sm:$0xff] }
 0x3b3   : > { %11881 = vmatprep.mubr.msk.bf16.mxu0 %vm586_vm2, %v16513_v18  ;;  %v16662_v18 = vld [vmem:[#allocation65_spill] sm:$0xff] }
 0x3b8   : > { %11936 = vmatmul.mubr.msk.bf16.vlgmr.msra.gmra.mrb[0].mxu1 %vm586_vm2, %v16656_v12 }
 0x3b9   : > { %12066 = vmatpush3.bf16.msra.mxu1 %v15406_v48  ;;  %11939 = vmatprep.mubr.msk.bf16.mxu1 %vm586_vm2, %v16561_v52 }
 0x3ba   : > { %11882 = vmatmul.mubr.msk.bf16.gmra.mrb[12].mxu0 %vm586_vm2, %v16514_v36  ;;  %v16663_v36 = vld [vmem:[#allocation66_spill] sm:$0xff] }
 0x3bb   : > { %11885 = vmatprep.mubr.msk.bf16.mxu0 %vm586_vm2, %v16517_v2  ;;  %v8775_v2 = vshrl.u32 %v15531_v19, 16 }
 0x3c0   : > { %11940 = vmatmul.mubr.msk.bf16.gmra.mrb[4].mxu1 %vm586_vm2, %v16562_v62 }
 0x3c1   : > { %11943 = vmatprep.mubr.msk.bf16.mxu1 %vm586_vm2, %v16563_v23 }
 0x3c2   : > { %11886 = vmatmul.mubr.msk.bf16.gmra.mrb[16].mxu0 %vm586_vm2, %v16518_v0  ;;  %v8778_v0 = vshll.u32 %v15531_v19, 16  ;;  %v422_v19 = vld [vmem:[%s13385_s24 + $0x194] sm:$0x1] }
 0x3c3   : > { %11889 = vmatprep.mubr.msk.bf16.mxu0 %vm586_vm2, %v16521_v4  ;;  %v8784_v4 = vshll.u32 %v15534_v5, 16 }
 0x3c8   : > { %11944 = vmatmul.mubr.msk.bf16.gmra.mrb[8].mxu1 %vm586_vm2, %v16564_v47 }
 0x3c9   : > { %11947 = vmatprep.mubr.msk.bf16.mxu1 %vm586_vm2, %v16565_v9 }
 0x3ca   : > { %11890 = vmatmul.mubr.msk.bf16.gmra.mrb[20].mxu0 %vm586_vm2, %v16622_v39 }
 0x3cb   : > { %11893 = vmatprep.mubr.msk.bf16.mxu0 %vm586_vm2, %v16525_v59  ;;  %v8788_v59 = vshrl.u32 %v15534_v5, 16 }
 0x3d0   : > { %11948 = vmatmul.mubr.msk.bf16.gmra.mrb[12].mxu1 %vm586_vm2, %v16566_v63 }
 0x3d1   : > { %11951 = vmatprep.mubr.msk.bf16.mxu1 %vm586_vm2, %v16567_v11 }
 0x3d2   : > { %11894 = vmatmul.mubr.msk.bf16.gmra.mrb[24].mxu0 %vm586_vm2, %v16625_v28 }
 0x3d3   : > { %11897 = vmatprep.mubr.msk.bf16.mxu0 %vm586_vm2, %v16626_v40  ;;  %v16661_v40 = vld [vmem:[#allocation63_spill] sm:$0xff] }
 0x3d8   : > { %11952 = vmatmul.mubr.msk.bf16.gmra.mrb[16].mxu1 %vm586_vm2, %v16568_v26 }
 0x3d9   : > { %11955 = vmatprep.mubr.msk.bf16.mxu1 %vm586_vm2, %v16569_v6 }
 0x3da   : > { %11898 = vmatmul.mubr.msk.bf16.gmra.mrb[28].mxu0 %vm586_vm2, %v16629_v29  ;;  %v16660_v29 = vld [vmem:[#allocation9_spill] sm:$0xff] }
 0x3db   : > { %11901 = vmatprep.mubr.msk.bf16.mxu0 %vm586_vm2, %v16630_v57 }
 0x3e0   : > { %11956 = vmatmul.mubr.msk.bf16.gmra.mrb[20].mxu1 %vm586_vm2, %v16475_v10 }
 0x3e1   : > { %11959 = vmatprep.mubr.msk.bf16.mxu1 %vm586_vm2, %v16476_v38 }
 0x3e2   : > { %11902 = vmatmul.mubr.msk.bf16.gmra.mrb[32].mxu0 %vm586_vm2, %v16633_v20  ;;  %v8794_v20 = vshll.u32 %v422_v19, 16 }
 0x3e3   : > { %11905 = vmatprep.mubr.msk.bf16.mxu0 %vm586_vm2, %v16634_v16 }
 0x3e4   : > { %v8796_v48 = vrot.slane %v8794_v20, 5 }
 0x3e8   : > { %11960 = vmatmul.mubr.msk.bf16.gmra.mrb[24].mxu1 %vm586_vm2, %v16477_v43 }
 0x3e9   : > { %11963 = vmatprep.mubr.msk.bf16.mxu1 %vm586_vm2, %v16570_v35 }
 0x3ea   : > { %11906 = vmatmul.mubr.msk.bf16.gmra.mrb[36].mxu0 %vm586_vm2, %v16637_v51  ;;  %v16666_v51 = vld [vmem:[#allocation12_spill] sm:$0xff] }
 0x3eb   : > { %11909 = vmatprep.mubr.msk.bf16.mxu0 %vm586_vm2, %v16638_v50 }
 0x3f0   : > { %11964 = vmatmul.mubr.msk.bf16.gmra.mrb[28].mxu1 %vm586_vm2, %v16571_v37 }
 0x3f1   : > { %11967 = vmatprep.mubr.msk.bf16.mxu1 %vm586_vm2, %v16572_v58 }
 0x3f2   : > { %11910 = vmatmul.mubr.msk.bf16.gmra.mrb[40].mxu0 %vm586_vm2, %v16641_v22  ;;  %v16665_v22 = vld [vmem:[#allocation69_spill] sm:$0xff] }
 0x3f3   : > { %11913 = vmatprep.mubr.msk.bf16.mxu0 %vm586_vm2, %v16642_v55  ;;  %v8790_v55 = vrot.slane %v8788_v59, 4 }
 0x3f8   : > { %11968 = vmatmul.mubr.msk.bf16.gmra.mrb[32].mxu1 %vm586_vm2, %v16573_v41 }
 0x3f9   : > { %11971 = vmatprep.mubr.msk.bf16.mxu1 %vm586_vm2, %v16574_v25 }
 0x3fa   : > { %11914 = vmatmul.mubr.msk.bf16.gmra.mrb[44].mxu0 %vm586_vm2, %v16645_v24  ;;  %v8786_v24 = vrot.slane %v8784_v4, 5 }
 0x3fb   : > { %11917 = vmatprep.mubr.msk.bf16.mxu0 %vm586_vm2, %v16646_v42  ;;  %v8780_v42 = vrot.slane %v8778_v0, 5 }
 0x3fc   : > { %v8791_v16 = vor.u32 %v8790_v55, %v8786_v24 }
 0x3fe   : > { %v8792_v57 = vrot.slane %v8791_v16, 4 }
 0x400   : > { %11972 = vmatmul.mubr.msk.bf16.gmra.mrb[36].mxu1 %vm586_vm2, %v16575_v32  ;;  %v8797_v28 = vsel %vm13436_vm5, %v8792_v57, %v8796_v48 }
 0x401   : > { %11975 = vmatprep.mubr.msk.bf16.mxu1 %vm586_vm2, %v16576_v56 }
 0x402   : > { %11918 = vmatmul.mubr.msk.bf16.gmra.mrb[48].mxu0 %vm586_vm2, %v16649_v21  ;;  %v8777_v21 = vrot.slane %v8775_v2, 4 }
 0x403   : > { %11921 = vmatprep.mubr.msk.bf16.mxu0 %vm586_vm2, %v16650_v3  ;;  %v16667_v3 = vld [vmem:[#allocation39_spill] sm:$0xff] }
 0x404   : > { %v8781_v5 = vor.u32 %v8780_v42, %v8777_v21  ;;  %v15812_v42 = vld [vmem:[%s16066_s3] ss:$0 sm:$0xff] }
 0x408   : > { %11976 = vmatmul.mubr.msk.bf16.gmra.mrb[40].mxu1 %vm586_vm2, %v16577_v44 }
 0x409   : > { %11979 = vmatprep.mubr.msk.bf16.mxu1 %vm586_vm2, %v16495_v31 }
 0x40a   : > { %11922 = vmatmul.mubr.msk.bf16.gmra.mrb[52].mxu0 %vm586_vm2, %v16651_v27  ;;  %v16671_v27 = vld [vmem:[#allocation4_spill] sm:$0xff] }
 0x40b   : > { %11925 = vmatprep.mubr.msk.bf16.mxu0 %vm586_vm2, %v16657_v14 }
 0x410   : > { %11980 = vmatmul.mubr.msk.bf16.gmra.mrb[44].mxu1 %vm586_vm2, %v16658_v34 }
 0x411   : > { %11983 = vmatprep.mubr.msk.bf16.mxu1 %vm586_vm2, %v16659_v33 }
 0x412   : > { %11926 = vmatmul.mubr.msk.bf16.gmra.mrb[56].mxu0 %vm586_vm2, %v16653_v53  ;;  %v16664_v53 = vld [vmem:[#allocation67_spill] sm:$0xff] }
 0x413   : > { %11929 = vmatprep.mubr.msk.bf16.mxu0 %vm586_vm2, %v16660_v29 }
 0x418   : > { %11984 = vmatmul.mubr.msk.bf16.gmra.mrb[48].mxu1 %vm586_vm2, %v16661_v40 }
 0x419   : > { %11987 = vmatprep.mubr.msk.bf16.mxu1 %vm586_vm2, %v16662_v18 }
 0x41a   : > { %11930 = vmatmul.mubr.msk.bf16.gmra.mrb[60].mxu0 %vm586_vm2, %v10116_v54 }
 0x41b   : > { %12001 = vmatprep.mubr.msk.bf16.mxu0 %vm586_vm2, %v16655_v13 }
 0x420   : > { %11988 = vmatmul.mubr.msk.bf16.gmra.mrb[52].mxu1 %vm586_vm2, %v16663_v36 }
 0x421   : > { %11991 = vmatprep.mubr.msk.bf16.mxu1 %vm586_vm2, %v16664_v53 }
 0x422   : > { %12002 = vmatmul.mubr.msk.bf16.vlgmr.msra.gmra.mrb[0].mxu0 %vm586_vm2, %v16656_v12 }
 0x423   : > { %12005 = vmatprep.mubr.msk.bf16.mxu0 %vm586_vm2, %v16561_v52  ;;  %v8782_v52 = vrot.slane %v8781_v5, 4 }
 0x425   : > { %v8787_v39 = vsel %vm13436_vm5, %v8782_v52, %v8786_v24 }
 0x426   : > { %v10248_v50 = vcombine.low %v8787_v39, %v8797_v28 }
 0x428   : > { %11992 = vmatmul.mubr.msk.bf16.gmra.mrb[56].mxu1 %vm586_vm2, %v16665_v22 }
 0x429   : > { %11995 = vmatprep.mubr.msk.bf16.mxu1 %vm586_vm2, %v16666_v51 }
 0x42a   : > { %12006 = vmatmul.mubr.msk.bf16.gmra.mrb[4].mxu0 %vm586_vm2, %v16562_v62  ;;  %v16668_v62 = vld [vmem:[#allocation36_spill] sm:$0xff] }
 0x42b   : > { %12009 = vmatprep.mubr.msk.bf16.mxu0 %vm586_vm2, %v16563_v23  ;;  %v16669_v23 = vld [vmem:[#allocation42_spill] sm:$0xff] }
 0x430   : > { %11996 = vmatmul.mubr.msk.bf16.gmra.mrb[60].mxu1 %vm586_vm2, %v15546_v30 }
 0x431   : > { %12067 = vmatprep.mubr.msk.bf16.mxu1 %vm586_vm2, %v16667_v3 }
 0x432   : > { %12010 = vmatmul.mubr.msk.bf16.gmra.mrb[8].mxu0 %vm586_vm2, %v16564_v47  ;;  %v16672_v47 = vld [vmem:[#allocation93_spill] sm:$0xff] }
 0x433   : > { %12013 = vmatprep.mubr.msk.bf16.mxu0 %vm586_vm2, %v16565_v9  ;;  %v16673_v9 = vld [vmem:[#allocation94_spill] sm:$0xff] }
 0x438   : > { %12068 = vmatmul.mubr.msk.bf16.vlgmr.msra.gmra.mrb[0].mxu1 %vm586_vm2, %v16668_v62 }
 0x439   : > { %12071 = vmatprep.mubr.msk.bf16.mxu1 %vm586_vm2, %v16669_v23 }
 0x43a   : > { %12014 = vmatmul.mubr.msk.bf16.gmra.mrb[12].mxu0 %vm586_vm2, %v16566_v63  ;;  %v16674_v63 = vld [vmem:[#allocation95_spill] sm:$0xff] }
 0x43b   : > { %12017 = vmatprep.mubr.msk.bf16.mxu0 %vm586_vm2, %v16567_v11  ;;  %v16675_v11 = vld [vmem:[#allocation96_spill] sm:$0xff] }
 0x440   : > { %12072 = vmatmul.mubr.msk.bf16.gmra.mrb[4].mxu1 %vm586_vm2, %v16670_v45 }
 0x441   : > { %12075 = vmatprep.mubr.msk.bf16.mxu1 %vm586_vm2, %v16671_v27 }
 0x442   : > { %12018 = vmatmul.mubr.msk.bf16.gmra.mrb[16].mxu0 %vm586_vm2, %v16568_v26  ;;  %v16677_v26 = vld [vmem:[#allocation33_spill] sm:$0xff] }
 0x443   : > { %12021 = vmatprep.mubr.msk.bf16.mxu0 %vm586_vm2, %v16569_v6  ;;  %v16676_v6 = vld [vmem:[#allocation27_spill] sm:$0xff] }
 0x448   : > { %12076 = vmatmul.mubr.msk.bf16.gmra.mrb[8].mxu1 %vm586_vm2, %v16672_v47 }
 0x449   : > { %12079 = vmatprep.mubr.msk.bf16.mxu1 %vm586_vm2, %v16673_v9 }
 0x44a   : > { %12022 = vmatmul.mubr.msk.bf16.gmra.mrb[20].mxu0 %vm586_vm2, %v16475_v10  ;;  %v16678_v10 = vld [vmem:[#allocation35_spill] sm:$0xff] }
 0x44b   : > { %12025 = vmatprep.mubr.msk.bf16.mxu0 %vm586_vm2, %v16476_v38  ;;  %v16679_v38 = vld [vmem:[#allocation97_spill] sm:$0xff] }
 0x450   : > { %12080 = vmatmul.mubr.msk.bf16.gmra.mrb[12].mxu1 %vm586_vm2, %v16674_v63 }
 0x451   : > { %12083 = vmatprep.mubr.msk.bf16.mxu1 %vm586_vm2, %v16675_v11 }
 0x452   : > { %12026 = vmatmul.mubr.msk.bf16.gmra.mrb[24].mxu0 %vm586_vm2, %v16477_v43  ;;  %v16680_v43 = vld [vmem:[#allocation98_spill] sm:$0xff] }
 0x453   : > { %12029 = vmatprep.mubr.msk.bf16.mxu0 %vm586_vm2, %v16570_v35  ;;  %v16681_v35 = vld [vmem:[#allocation99_spill] sm:$0xff] }
 0x458   : > { %12084 = vmatmul.mubr.msk.bf16.gmra.mrb[16].mxu1 %vm586_vm2, %v16676_v6 }
 0x459   : > { %12087 = vmatprep.mubr.msk.bf16.mxu1 %vm586_vm2, %v16677_v26 }
 0x45a   : > { %12030 = vmatmul.mubr.msk.bf16.gmra.mrb[28].mxu0 %vm586_vm2, %v16571_v37  ;;  %v16682_v37 = vld [vmem:[#allocation100_spill] sm:$0xff] }
 0x45b   : > { %12033 = vmatprep.mubr.msk.bf16.mxu0 %vm586_vm2, %v16572_v58  ;;  %v16683_v58 = vld [vmem:[#allocation101_spill] sm:$0xff] }
 0x460   : > { %12088 = vmatmul.mubr.msk.bf16.gmra.mrb[20].mxu1 %vm586_vm2, %v16678_v10 }
 0x461   : > { %12091 = vmatprep.mubr.msk.bf16.mxu1 %vm586_vm2, %v16679_v38 }
 0x462   : > { %12034 = vmatmul.mubr.msk.bf16.gmra.mrb[32].mxu0 %vm586_vm2, %v16573_v41  ;;  %v16684_v41 = vld [vmem:[#allocation102_spill] sm:$0xff] }
 0x463   : > { %12037 = vmatprep.mubr.msk.bf16.mxu0 %vm586_vm2, %v16574_v25  ;;  %v16685_v25 = vld [vmem:[#allocation58_spill] sm:$0xff] }
 0x468   : > { %12092 = vmatmul.mubr.msk.bf16.gmra.mrb[24].mxu1 %vm586_vm2, %v16680_v43 }
 0x469   : > { %12095 = vmatprep.mubr.msk.bf16.mxu1 %vm586_vm2, %v16681_v35 }
 0x46a   : > { %12038 = vmatmul.mubr.msk.bf16.gmra.mrb[36].mxu0 %vm586_vm2, %v16575_v32  ;;  %v16687_v32 = vld [vmem:[#allocation104_spill] sm:$0xff] }
 0x46b   : > { %12041 = vmatprep.mubr.msk.bf16.mxu0 %vm586_vm2, %v16576_v56  ;;  %v16686_v56 = vld [vmem:[#allocation103_spill] sm:$0xff] }
 0x470   : > { %12096 = vmatmul.mubr.msk.bf16.gmra.mrb[28].mxu1 %vm586_vm2, %v16682_v37 }
 0x471   : > { %12099 = vmatprep.mubr.msk.bf16.mxu1 %vm586_vm2, %v16683_v58 }
 0x472   : > { %12042 = vmatmul.mubr.msk.bf16.gmra.mrb[40].mxu0 %vm586_vm2, %v16577_v44  ;;  %v16689_v44 = vld [vmem:[#allocation106_spill] sm:$0xff] }
 0x473   : > { %12045 = vmatprep.mubr.msk.bf16.mxu0 %vm586_vm2, %v16495_v31  ;;  %v16688_v31 = vld [vmem:[#allocation105_spill] sm:$0xff] }
 0x478   : > { %12100 = vmatmul.mubr.msk.bf16.gmra.mrb[32].mxu1 %vm586_vm2, %v16684_v41 }
 0x479   : > { %12103 = vmatprep.mubr.msk.bf16.mxu1 %vm586_vm2, %v16685_v25 }
 0x47a   : > { %12046 = vmatmul.mubr.msk.bf16.gmra.mrb[44].mxu0 %vm586_vm2, %v16658_v34 }
 0x47b   : > { %12049 = vmatprep.mubr.msk.bf16.mxu0 %vm586_vm2, %v16659_v33 }
 0x480   : > { %12104 = vmatmul.mubr.msk.bf16.gmra.mrb[36].mxu1 %vm586_vm2, %v16686_v56 }
 0x481   : > { %12107 = vmatprep.mubr.msk.bf16.mxu1 %vm586_vm2, %v16687_v32 }
 0x482   : > { %12050 = vmatmul.mubr.msk.bf16.gmra.mrb[48].mxu0 %vm586_vm2, %v16661_v40 }
 0x483   : > { %12053 = vmatprep.mubr.msk.bf16.mxu0 %vm586_vm2, %v16662_v18 }
 0x488   : > { %12108 = vmatmul.mubr.msk.bf16.gmra.mrb[40].mxu1 %vm586_vm2, %v16688_v31 }
 0x489   : > { %12111 = vmatprep.mubr.msk.bf16.mxu1 %vm586_vm2, %v16689_v44 }
 0x48a   : > { %12054 = vmatmul.mubr.msk.bf16.gmra.mrb[52].mxu0 %vm586_vm2, %v16663_v36 }
 0x48b   : > { %12057 = vmatprep.mubr.msk.bf16.mxu0 %vm586_vm2, %v16664_v53 }
 0x490   : > { %12112 = vmatmul.mubr.msk.bf16.gmra.mrb[44].mxu1 %vm586_vm2, %v16690_v17 }
 0x491   : > { %12115 = vmatprep.mubr.msk.bf16.mxu1 %vm586_vm2, %v16691_v15 }
 0x492   : > { %12058 = vmatmul.mubr.msk.bf16.gmra.mrb[56].mxu0 %vm586_vm2, %v16665_v22 }
 0x493   : > { %12061 = vmatprep.mubr.msk.bf16.mxu0 %vm586_vm2, %v16666_v51 }
 0x498   : > { %12116 = vmatmul.mubr.msk.bf16.gmra.mrb[48].mxu1 %vm586_vm2, %v16692_v1 }
 0x499   : > { %12119 = vmatprep.mubr.msk.bf16.mxu1 %vm586_vm2, %v16693_v8 }
 0x49a   : > { %12062 = vmatmul.mubr.msk.bf16.gmra.mrb[60].mxu0 %vm586_vm2, %v15546_v30 }
 0x4a0   : > { %12120 = vmatmul.mubr.msk.bf16.gmra.mrb[52].mxu1 %vm586_vm2, %v16694_v7 }
 0x4a1   : > { %12123 = vmatprep.mubr.msk.bf16.mxu1 %vm586_vm2, %v16695_v49 }
 0x4a8   : > { %12124 = vmatmul.mubr.msk.bf16.gmra.mrb[56].mxu1 %vm586_vm2, %v16696_v46 }
 0x4a9   : > { %12127 = vmatprep.mubr.msk.bf16.mxu1 %vm586_vm2, %v16697_v61 }
 0x4b0   : > { %12128 = vmatmul.mubr.msk.bf16.gmra.mrb[60].mxu1 %vm586_vm2, %v10248_v50 }
 0x4f5   : > { %v12003_v54 = vpop.f32.mrb[0].mxu0 }
 0x4f6   : > { %v8455_v60 = vpop.f32.mrb[1].mxu0 }
 0x4f7   : > { %v12004_v13 = vpop.f32.mrb[2].mxu0 }
 0x4f8   : > { %v8458_v12 = vpop.f32.mrb[3].mxu0 }
 0x4fd   : > { %v12007_v14 = vpop.f32.mrb[4].mxu0 }
 0x4fe   : > { %v8471_v30 = vpop.f32.mrb[5].mxu0 }
 0x4ff   : > { %v12008_v34 = vpop.f32.mrb[6].mxu0 }
 0x500   : > { %v8474_v33 = vpop.f32.mrb[7].mxu0 }
 0x505   : > { %v12011_v29 = vpop.f32.mrb[8].mxu0 }
 0x506   : > { %v8487_v40 = vpop.f32.mrb[9].mxu0 }
 0x507   : > { %v15803_v18 = vpop.f32.mrb[10].mxu0 }
 0x508   : > { %v15805_v36 = vpop.f32.mrb[11].mxu0 }
 0x50b   : > { %v12069_v2 = vpop.f32.mrb[0].mxu1 }
 0x50c   : > { %v9159_v0 = vmax.f32 %v12003_v54, %v12069_v2  ;;  %v8838_v4 = vpop.f32.mrb[1].mxu1 }
 0x50d   : > { %v9157_v59 = vmax.f32 %v8455_v60, %v8838_v4  ;;  %v12070_v53 = vpop.f32.mrb[2].mxu1  ;;  %v15807_v21 = vpop.f32.mrb[12].mxu0 }
 0x50e   : > { %v9160_v24 = vmax.f32 %v12004_v13, %v12070_v53  ;;  %v8841_v55 = vpop.f32.mrb[3].mxu1  ;;  %v15814_v22 = vpop.f32.mrb[13].mxu0 }
 0x50f   : > { %v9221_v19 = vmax.f32 %v9157_v59, %v9159_v0  ;;  %v9158_v51 = vmax.f32 %v8458_v12, %v8841_v55  ;;  %v15816_v5 = vpop.f32.mrb[14].mxu0 }
 0x510   : > { %v15818_v16 = vpop.f32.mrb[15].mxu0 }
 0x511   : > { %v9260_v20 = vadd.f32 %v15812_v42, %v9221_v19  ;;  %v9222_v52 = vmax.f32 %v9158_v51, %v9160_v24 }
 0x513   : > { %v9292_v57 = vmax.f32 %v9260_v20, 0.0  ;;  %v9261_v48 = vadd.f32 %v15812_v42, %v9222_v52  ;;  %v12073_v39 = vpop.f32.mrb[4].mxu1 }
 0x514   : > { %v9163_v28 = vmax.f32 %v12007_v14, %v12073_v39  ;;  %v8854_v50 = vpop.f32.mrb[5].mxu1 }
 0x515   : > { %v10317_v3 = vpack.c.bf16 %v9292_v57, %v9292_v57  ;;  %v9293_v62 = vmax.f32 %v9261_v48, 0.0  ;;  %v9161_v23 = vmax.f32 %v8471_v30, %v8854_v50  ;;  %v12074_v45 = vpop.f32.mrb[6].mxu1  ;;  %v15828_v27 = vpop.f32.mrb[16].mxu0 }
 0x516   : > { %v9164_v47 = vmax.f32 %v12008_v34, %v12074_v45  ;;  %v8857_v9 = vpop.f32.mrb[7].mxu1  ;;  %v15830_v63 = vpop.f32.mrb[17].mxu0 }
 0x517   : > { %9453 = vst.msk [vmem:[%s15826_s23] sm:$0xf] %vm9452_vm6, %v10317_v3  ;;  %v10318_v11 = vpack.c.bf16 %v9293_v62, %v9293_v62  ;;  %v9223_v6 = vmax.f32 %v9161_v23, %v9163_v28  ;;  %v9162_v26 = vmax.f32 %v8474_v33, %v8857_v9  ;;  %v15834_v10 = vpop.f32.mrb[18].mxu0 }
 0x518   : > { %v15836_v38 = vpop.f32.mrb[19].mxu0 }
 0x519   : > { %9454 = vst.msk [vmem:[%s15826_s23 + $0x4] sm:$0xf] %vm9452_vm6, %v10318_v11  ;;  %v9262_v43 = vadd.f32 %v15812_v42, %v9223_v6  ;;  %v9224_v35 = vmax.f32 %v9162_v26, %v9164_v47 }
 0x51b   : > { %v9294_v37 = vmax.f32 %v9262_v43, 0.0  ;;  %v9263_v58 = vadd.f32 %v15812_v42, %v9224_v35  ;;  %v12077_v41 = vpop.f32.mrb[8].mxu1 }
 0x51c   : > { %v9167_v25 = vmax.f32 %v12011_v29, %v12077_v41  ;;  %v8870_v56 = vpop.f32.mrb[9].mxu1 }
 0x51d   : > { %v10319_v32 = vpack.c.bf16 %v9294_v37, %v9294_v37  ;;  %v9295_v31 = vmax.f32 %v9263_v58, 0.0  ;;  %v9165_v44 = vmax.f32 %v8487_v40, %v8870_v56  ;;  %v12078_v17 = vpop.f32.mrb[10].mxu1  ;;  %v15842_v15 = vpop.f32.mrb[20].mxu0 }
 0x51e   : > { %v9168_v1 = vmax.f32 %v15803_v18, %v12078_v17  ;;  %v8873_v8 = vpop.f32.mrb[11].mxu1  ;;  %v15845_v7 = vpop.f32.mrb[21].mxu0 }
 0x51f   : > { %9455 = vst.msk [vmem:[%s15826_s23 + $0x8] sm:$0xf] %vm9452_vm6, %v10319_v32  ;;  %v10320_v49 = vpack.c.bf16 %v9295_v31, %v9295_v31  ;;  %v9225_v46 = vmax.f32 %v9165_v44, %v9167_v25  ;;  %v9166_v61 = vmax.f32 %v15805_v36, %v8873_v8  ;;  %v15850_v54 = vpop.f32.mrb[22].mxu0 }
 0x520   : > { %v15852_v60 = vpop.f32.mrb[23].mxu0 }
 0x521   : > { %9456 = vst.msk [vmem:[%s15826_s23 + $0xc] sm:$0xf] %vm9452_vm6, %v10320_v49  ;;  %v9264_v13 = vadd.f32 %v15812_v42, %v9225_v46  ;;  %v9226_v12 = vmax.f32 %v9166_v61, %v9168_v1 }
 0x523   : > { %v9296_v14 = vmax.f32 %v9264_v13, 0.0  ;;  %v9265_v30 = vadd.f32 %v15812_v42, %v9226_v12  ;;  %v12081_v34 = vpop.f32.mrb[12].mxu1 }
 0x524   : > { %v9171_v33 = vmax.f32 %v15807_v21, %v12081_v34  ;;  %v8886_v29 = vpop.f32.mrb[13].mxu1 }
 0x525   : > { %v10321_v40 = vpack.c.bf16 %v9296_v14, %v9296_v14  ;;  %v9297_v18 = vmax.f32 %v9265_v30, 0.0  ;;  %v9169_v36 = vmax.f32 %v15814_v22, %v8886_v29  ;;  %v12082_v2 = vpop.f32.mrb[14].mxu1  ;;  %v15860_v0 = vpop.f32.mrb[24].mxu0 }
 0x526   : > { %v9172_v4 = vmax.f32 %v15816_v5, %v12082_v2  ;;  %v8889_v59 = vpop.f32.mrb[15].mxu1  ;;  %v15863_v53 = vpop.f32.mrb[25].mxu0 }
 0x527   : > { %9457 = vst.msk [vmem:[%s15826_s23 + $0x10] sm:$0xf] %vm9452_vm6, %v10321_v40  ;;  %v10322_v24 = vpack.c.bf16 %v9297_v18, %v9297_v18  ;;  %v9227_v55 = vmax.f32 %v9169_v36, %v9171_v33  ;;  %v9170_v21 = vmax.f32 %v15818_v16, %v8889_v59  ;;  %v15868_v19 = vpop.f32.mrb[26].mxu0 }
 0x528   : > { %v15870_v51 = vpop.f32.mrb[27].mxu0 }
 0x529   : > { %9458 = vst.msk [vmem:[%s15826_s23 + $0x14] sm:$0xf] %vm9452_vm6, %v10322_v24  ;;  %v9266_v22 = vadd.f32 %v15812_v42, %v9227_v55  ;;  %v9228_v20 = vmax.f32 %v9170_v21, %v9172_v4 }
 0x52b   : > { %v9298_v5 = vmax.f32 %v9266_v22, 0.0  ;;  %v9267_v52 = vadd.f32 %v15812_v42, %v9228_v20  ;;  %v12085_v57 = vpop.f32.mrb[16].mxu1 }
 0x52c   : > { %v9175_v48 = vmax.f32 %v15828_v27, %v12085_v57  ;;  %v8902_v39 = vpop.f32.mrb[17].mxu1 }
 0x52d   : > { %v10323_v28 = vpack.c.bf16 %v9298_v5, %v9298_v5  ;;  %v9299_v16 = vmax.f32 %v9267_v52, 0.0  ;;  %v9173_v50 = vmax.f32 %v15830_v63, %v8902_v39  ;;  %v12086_v3 = vpop.f32.mrb[18].mxu1  ;;  %v15878_v62 = vpop.f32.mrb[28].mxu0 }
 0x52e   : > { %v9176_v23 = vmax.f32 %v15834_v10, %v12086_v3  ;;  %v8905_v45 = vpop.f32.mrb[19].mxu1  ;;  %v15881_v47 = vpop.f32.mrb[29].mxu0 }
 0x52f   : > { %9459 = vst.msk [vmem:[%s15826_s23 + $0x18] sm:$0xf] %vm9452_vm6, %v10323_v28  ;;  %v10324_v9 = vpack.c.bf16 %v9299_v16, %v9299_v16  ;;  %v9229_v11 = vmax.f32 %v9173_v50, %v9175_v48  ;;  %v9174_v27 = vmax.f32 %v15836_v38, %v8905_v45  ;;  %v15886_v6 = vpop.f32.mrb[30].mxu0 }
 0x530   : > { %v15888_v26 = vpop.f32.mrb[31].mxu0 }
 0x531   : > { %9460 = vst.msk [vmem:[%s15826_s23 + $0x1c] sm:$0xf] %vm9452_vm6, %v10324_v9  ;;  %v9268_v63 = vadd.f32 %v15812_v42, %v9229_v11  ;;  %v9230_v43 = vmax.f32 %v9174_v27, %v9176_v23 }
 0x533   : > { %v9300_v10 = vmax.f32 %v9268_v63, 0.0  ;;  %v9269_v35 = vadd.f32 %v15812_v42, %v9230_v43  ;;  %v12089_v37 = vpop.f32.mrb[20].mxu1 }
 0x534   : > { %v9179_v58 = vmax.f32 %v15842_v15, %v12089_v37  ;;  %v8918_v41 = vpop.f32.mrb[21].mxu1 }
 0x535   : > { %v10325_v25 = vpack.c.bf16 %v9300_v10, %v9300_v10  ;;  %v9301_v38 = vmax.f32 %v9269_v35, 0.0  ;;  %v9177_v56 = vmax.f32 %v15845_v7, %v8918_v41  ;;  %v12090_v32 = vpop.f32.mrb[22].mxu1  ;;  %v15896_v31 = vpop.f32.mrb[32].mxu0 }
 0x536   : > { %v9180_v44 = vmax.f32 %v15850_v54, %v12090_v32  ;;  %v8921_v17 = vpop.f32.mrb[23].mxu1  ;;  %v15899_v1 = vpop.f32.mrb[33].mxu0 }
 0x537   : > { %9461 = vst.msk [vmem:[%s15826_s23 + $0x20] sm:$0xf] %vm9452_vm6, %v10325_v25  ;;  %v10326_v8 = vpack.c.bf16 %v9301_v38, %v9301_v38  ;;  %v9231_v49 = vmax.f32 %v9177_v56, %v9179_v58  ;;  %v9178_v15 = vmax.f32 %v15852_v60, %v8921_v17  ;;  %v15904_v46 = vpop.f32.mrb[34].mxu0 }
 0x538   : > { %v15906_v61 = vpop.f32.mrb[35].mxu0 }
 0x539   : > { %9462 = vst.msk [vmem:[%s15826_s23 + $0x24] sm:$0xf] %vm9452_vm6, %v10326_v8  ;;  %v9270_v7 = vadd.f32 %v15812_v42, %v9231_v49  ;;  %v9232_v13 = vmax.f32 %v9178_v15, %v9180_v44 }
 0x53b   : > { %v9302_v54 = vmax.f32 %v9270_v7, 0.0  ;;  %v9271_v12 = vadd.f32 %v15812_v42, %v9232_v13  ;;  %v12093_v14 = vpop.f32.mrb[24].mxu1 }
 0x53c   : > { %v9183_v30 = vmax.f32 %v15860_v0, %v12093_v14  ;;  %v8934_v34 = vpop.f32.mrb[25].mxu1 }
 0x53d   : > { %v10327_v33 = vpack.c.bf16 %v9302_v54, %v9302_v54  ;;  %v9303_v60 = vmax.f32 %v9271_v12, 0.0  ;;  %v9181_v29 = vmax.f32 %v15863_v53, %v8934_v34  ;;  %v12094_v40 = vpop.f32.mrb[26].mxu1  ;;  %v15914_v18 = vpop.f32.mrb[36].mxu0 }
 0x53e   : > { %v9184_v36 = vmax.f32 %v15868_v19, %v12094_v40  ;;  %v8937_v2 = vpop.f32.mrb[27].mxu1  ;;  %v15917_v4 = vpop.f32.mrb[37].mxu0 }
 0x53f   : > { %9463 = vst.msk [vmem:[%s15826_s23 + $0x28] sm:$0xf] %vm9452_vm6, %v10327_v33  ;;  %v10328_v59 = vpack.c.bf16 %v9303_v60, %v9303_v60  ;;  %v9233_v24 = vmax.f32 %v9181_v29, %v9183_v30  ;;  %v9182_v0 = vmax.f32 %v15870_v51, %v8937_v2  ;;  %v15922_v55 = vpop.f32.mrb[38].mxu0 }
 0x540   : > { %v15924_v21 = vpop.f32.mrb[39].mxu0 }
 0x541   : > { %9464 = vst.msk [vmem:[%s15826_s23 + $0x2c] sm:$0xf] %vm9452_vm6, %v10328_v59  ;;  %v9272_v53 = vadd.f32 %v15812_v42, %v9233_v24  ;;  %v9234_v22 = vmax.f32 %v9182_v0, %v9184_v36 }
 0x543   : > { %v9304_v19 = vmax.f32 %v9272_v53, 0.0  ;;  %v9273_v20 = vadd.f32 %v15812_v42, %v9234_v22  ;;  %v12097_v5 = vpop.f32.mrb[28].mxu1 }
 0x544   : > { %v9187_v52 = vmax.f32 %v15878_v62, %v12097_v5  ;;  %v8950_v57 = vpop.f32.mrb[29].mxu1 }
 0x545   : > { %v10329_v48 = vpack.c.bf16 %v9304_v19, %v9304_v19  ;;  %v9305_v51 = vmax.f32 %v9273_v20, 0.0  ;;  %v9185_v39 = vmax.f32 %v15881_v47, %v8950_v57  ;;  %v12098_v28 = vpop.f32.mrb[30].mxu1  ;;  %v15932_v16 = vpop.f32.mrb[40].mxu0 }
 0x546   : > { %v9188_v50 = vmax.f32 %v15886_v6, %v12098_v28  ;;  %v8953_v3 = vpop.f32.mrb[31].mxu1  ;;  %v15935_v23 = vpop.f32.mrb[41].mxu0 }
 0x547   : > { %9465 = vst.msk [vmem:[%s15826_s23 + $0x30] sm:$0xf] %vm9452_vm6, %v10329_v48  ;;  %v10330_v45 = vpack.c.bf16 %v9305_v51, %v9305_v51  ;;  %v9235_v9 = vmax.f32 %v9185_v39, %v9187_v52  ;;  %v9186_v62 = vmax.f32 %v15888_v26, %v8953_v3  ;;  %v15940_v11 = vpop.f32.mrb[42].mxu0 }
 0x548   : > { %v15942_v27 = vpop.f32.mrb[43].mxu0 }
 0x549   : > { %9466 = vst.msk [vmem:[%s15826_s23 + $0x34] sm:$0xf] %vm9452_vm6, %v10330_v45  ;;  %v9274_v47 = vadd.f32 %v15812_v42, %v9235_v9  ;;  %v9236_v63 = vmax.f32 %v9186_v62, %v9188_v50 }
 0x54b   : > { %v9306_v6 = vmax.f32 %v9274_v47, 0.0  ;;  %v9275_v43 = vadd.f32 %v15812_v42, %v9236_v63  ;;  %v12101_v10 = vpop.f32.mrb[32].mxu1 }
 0x54c   : > { %v9191_v35 = vmax.f32 %v15896_v31, %v12101_v10  ;;  %v8966_v37 = vpop.f32.mrb[33].mxu1 }
 0x54d   : > { %v10331_v58 = vpack.c.bf16 %v9306_v6, %v9306_v6  ;;  %v9307_v26 = vmax.f32 %v9275_v43, 0.0  ;;  %v9189_v41 = vmax.f32 %v15899_v1, %v8966_v37  ;;  %v12102_v25 = vpop.f32.mrb[34].mxu1  ;;  %v15950_v38 = vpop.f32.mrb[44].mxu0 }
 0x54e   : > { %v9192_v56 = vmax.f32 %v15904_v46, %v12102_v25  ;;  %v8969_v32 = vpop.f32.mrb[35].mxu1  ;;  %v15953_v44 = vpop.f32.mrb[45].mxu0 }
 0x54f   : > { %9467 = vst.msk [vmem:[%s15826_s23 + $0x38] sm:$0xf] %vm9452_vm6, %v10331_v58  ;;  %v10332_v17 = vpack.c.bf16 %v9307_v26, %v9307_v26  ;;  %v9237_v8 = vmax.f32 %v9189_v41, %v9191_v35  ;;  %v9190_v31 = vmax.f32 %v15906_v61, %v8969_v32  ;;  %v15958_v49 = vpop.f32.mrb[46].mxu0 }
 0x550   : > { %v15960_v15 = vpop.f32.mrb[47].mxu0 }
 0x551   : > { %9468 = vst.msk [vmem:[%s15826_s23 + $0x3c] sm:$0xf] %vm9452_vm6, %v10332_v17  ;;  %v9276_v1 = vadd.f32 %v15812_v42, %v9237_v8  ;;  %v9238_v7 = vmax.f32 %v9190_v31, %v9192_v56 }
 0x553   : > { %v9308_v46 = vmax.f32 %v9276_v1, 0.0  ;;  %v9277_v13 = vadd.f32 %v15812_v42, %v9238_v7  ;;  %v12105_v54 = vpop.f32.mrb[36].mxu1 }
 0x554   : > { %v9195_v12 = vmax.f32 %v15914_v18, %v12105_v54  ;;  %v8982_v14 = vpop.f32.mrb[37].mxu1 }
 0x555   : > { %v10333_v30 = vpack.c.bf16 %v9308_v46, %v9308_v46  ;;  %v9309_v61 = vmax.f32 %v9277_v13, 0.0  ;;  %v9193_v34 = vmax.f32 %v15917_v4, %v8982_v14  ;;  %v12106_v33 = vpop.f32.mrb[38].mxu1  ;;  %v15968_v60 = vpop.f32.mrb[48].mxu0 }
 0x556   : > { %v9196_v29 = vmax.f32 %v15922_v55, %v12106_v33  ;;  %v8985_v40 = vpop.f32.mrb[39].mxu1  ;;  %v15971_v36 = vpop.f32.mrb[49].mxu0 }
 0x557   : > { %9469 = vst.msk [vmem:[%s15826_s23 + $0x40] sm:$0xf] %vm9452_vm6, %v10333_v30  ;;  %v10334_v2 = vpack.c.bf16 %v9309_v61, %v9309_v61  ;;  %v9239_v59 = vmax.f32 %v9193_v34, %v9195_v12  ;;  %v9194_v18 = vmax.f32 %v15924_v21, %v8985_v40  ;;  %v15976_v24 = vpop.f32.mrb[50].mxu0 }
 0x558   : > { %v15978_v0 = vpop.f32.mrb[51].mxu0 }
 0x559   : > { %9470 = vst.msk [vmem:[%s15826_s23 + $0x44] sm:$0xf] %vm9452_vm6, %v10334_v2  ;;  %v9278_v4 = vadd.f32 %v15812_v42, %v9239_v59  ;;  %v9240_v53 = vmax.f32 %v9194_v18, %v9196_v29 }
 0x55b   : > { %v9310_v55 = vmax.f32 %v9278_v4, 0.0  ;;  %v9279_v22 = vadd.f32 %v15812_v42, %v9240_v53  ;;  %v12109_v19 = vpop.f32.mrb[40].mxu1 }
 0x55c   : > { %v9199_v20 = vmax.f32 %v15932_v16, %v12109_v19  ;;  %v8998_v5 = vpop.f32.mrb[41].mxu1 }
 0x55d   : > { %v10335_v52 = vpack.c.bf16 %v9310_v55, %v9310_v55  ;;  %v9311_v21 = vmax.f32 %v9279_v22, 0.0  ;;  %v9197_v57 = vmax.f32 %v15935_v23, %v8998_v5  ;;  %v12110_v48 = vpop.f32.mrb[42].mxu1  ;;  %v15986_v51 = vpop.f32.mrb[52].mxu0 }
 0x55e   : > { %v9200_v39 = vmax.f32 %v15940_v11, %v12110_v48  ;;  %v9001_v28 = vpop.f32.mrb[43].mxu1  ;;  %v15989_v50 = vpop.f32.mrb[53].mxu0 }
 0x55f   : > { %9471 = vst.msk [vmem:[%s15826_s23 + $0x48] sm:$0xf] %vm9452_vm6, %v10335_v52  ;;  %v10336_v3 = vpack.c.bf16 %v9311_v21, %v9311_v21  ;;  %v9241_v45 = vmax.f32 %v9197_v57, %v9199_v20  ;;  %v9198_v16 = vmax.f32 %v15942_v27, %v9001_v28  ;;  %v15994_v9 = vpop.f32.mrb[54].mxu0 }
 0x560   : > { %v15996_v62 = vpop.f32.mrb[55].mxu0 }
 0x561   : > { %9472 = vst.msk [vmem:[%s15826_s23 + $0x4c] sm:$0xf] %vm9452_vm6, %v10336_v3  ;;  %v9280_v23 = vadd.f32 %v15812_v42, %v9241_v45  ;;  %v9242_v47 = vmax.f32 %v9198_v16, %v9200_v39 }
 0x563   : > { %v9312_v11 = vmax.f32 %v9280_v23, 0.0  ;;  %v9281_v63 = vadd.f32 %v15812_v42, %v9242_v47  ;;  %v12113_v6 = vpop.f32.mrb[44].mxu1 }
 0x564   : > { %v9203_v43 = vmax.f32 %v15950_v38, %v12113_v6  ;;  %v9014_v10 = vpop.f32.mrb[45].mxu1 }
 0x565   : > { %v10337_v35 = vpack.c.bf16 %v9312_v11, %v9312_v11  ;;  %v9313_v27 = vmax.f32 %v9281_v63, 0.0  ;;  %v9201_v37 = vmax.f32 %v15953_v44, %v9014_v10  ;;  %v12114_v58 = vpop.f32.mrb[46].mxu1  ;;  %v16004_v26 = vpop.f32.mrb[56].mxu0 }
 0x566   : > { %v9204_v41 = vmax.f32 %v15958_v49, %v12114_v58  ;;  %v9017_v25 = vpop.f32.mrb[47].mxu1  ;;  %v16007_v56 = vpop.f32.mrb[57].mxu0 }
 0x567   : > { %9473 = vst.msk [vmem:[%s15826_s23 + $0x50] sm:$0xf] %vm9452_vm6, %v10337_v35  ;;  %v10338_v32 = vpack.c.bf16 %v9313_v27, %v9313_v27  ;;  %v9243_v17 = vmax.f32 %v9201_v37, %v9203_v43  ;;  %v9202_v38 = vmax.f32 %v15960_v15, %v9017_v25  ;;  %v16012_v8 = vpop.f32.mrb[58].mxu0 }
 0x568   : > { %v8682_v31 = vpop.f32.mrb[59].mxu0 }
 0x569   : > { %9474 = vst.msk [vmem:[%s15826_s23 + $0x54] sm:$0xf] %vm9452_vm6, %v10338_v32  ;;  %v9282_v44 = vadd.f32 %v15812_v42, %v9243_v17  ;;  %v9244_v1 = vmax.f32 %v9202_v38, %v9204_v41 }
 0x56b   : > { %v9314_v7 = vmax.f32 %v9282_v44, 0.0  ;;  %v9283_v49 = vadd.f32 %v15812_v42, %v9244_v1  ;;  %v12117_v46 = vpop.f32.mrb[48].mxu1 }
 0x56c   : > { %v9207_v13 = vmax.f32 %v15968_v60, %v12117_v46  ;;  %v9030_v54 = vpop.f32.mrb[49].mxu1 }
 0x56d   : > { %v10339_v12 = vpack.c.bf16 %v9314_v7, %v9314_v7  ;;  %v9315_v14 = vmax.f32 %v9283_v49, 0.0  ;;  %v9205_v15 = vmax.f32 %v15971_v36, %v9030_v54  ;;  %v12118_v30 = vpop.f32.mrb[50].mxu1  ;;  %v16020_v61 = vpop.f32.mrb[60].mxu0 }
 0x56e   : > { %v9208_v34 = vmax.f32 %v15976_v24, %v12118_v30  ;;  %v9033_v33 = vpop.f32.mrb[51].mxu1  ;;  %v8695_v29 = vpop.f32.mrb[61].mxu0 }
 0x56f   : > { %9475 = vst.msk [vmem:[%s15826_s23 + $0x58] sm:$0xf] %vm9452_vm6, %v10339_v12  ;;  %v10340_v40 = vpack.c.bf16 %v9315_v14, %v9315_v14  ;;  %v9245_v2 = vmax.f32 %v9205_v15, %v9207_v13  ;;  %v9206_v59 = vmax.f32 %v15978_v0, %v9033_v33  ;;  %v12064_v60 = vpop.f32.mrb[62].mxu0 }
 0x570   : > { %v8698_v18 = vpop.f32.mrb[63].mxu0 }
 0x571   : > { %9476 = vst.msk [vmem:[%s15826_s23 + $0x5c] sm:$0xf] %vm9452_vm6, %v10340_v40  ;;  %v9284_v36 = vadd.f32 %v15812_v42, %v9245_v2  ;;  %v9246_v4 = vmax.f32 %v9206_v59, %v9208_v34 }
 0x573   : > { %v9316_v53 = vmax.f32 %v9284_v36, 0.0  ;;  %v9285_v24 = vadd.f32 %v15812_v42, %v9246_v4  ;;  %v12121_v55 = vpop.f32.mrb[52].mxu1 }
 0x574   : > { %v9211_v22 = vmax.f32 %v15986_v51, %v12121_v55  ;;  %v9046_v19 = vpop.f32.mrb[53].mxu1 }
 0x575   : > { %v10341_v20 = vpack.c.bf16 %v9316_v53, %v9316_v53  ;;  %v9317_v5 = vmax.f32 %v9285_v24, 0.0  ;;  %v9209_v0 = vmax.f32 %v15989_v50, %v9046_v19  ;;  %v12122_v52 = vpop.f32.mrb[54].mxu1 }
 0x576   : > { %v9212_v21 = vmax.f32 %v15994_v9, %v12122_v52  ;;  %v9049_v57 = vpop.f32.mrb[55].mxu1 }
 0x577   : > { %9477 = vst.msk [vmem:[%s15826_s23 + $0x60] sm:$0xf] %vm9452_vm6, %v10341_v20  ;;  %v10342_v48 = vpack.c.bf16 %v9317_v5, %v9317_v5  ;;  %v9247_v39 = vmax.f32 %v9209_v0, %v9211_v22  ;;  %v9210_v28 = vmax.f32 %v15996_v62, %v9049_v57 }
 0x579   : > { %9478 = vst.msk [vmem:[%s15826_s23 + $0x64] sm:$0xf] %vm9452_vm6, %v10342_v48  ;;  %v9286_v51 = vadd.f32 %v15812_v42, %v9247_v39  ;;  %v9248_v3 = vmax.f32 %v9210_v28, %v9212_v21 }
 0x57b   : > { %v9318_v45 = vmax.f32 %v9286_v51, 0.0  ;;  %v9287_v50 = vadd.f32 %v15812_v42, %v9248_v3  ;;  %v12125_v16 = vpop.f32.mrb[56].mxu1 }
 0x57c   : > { %v9215_v9 = vmax.f32 %v16004_v26, %v12125_v16  ;;  %v9062_v23 = vpop.f32.mrb[57].mxu1 }
 0x57d   : > { %v10343_v47 = vpack.c.bf16 %v9318_v45, %v9318_v45  ;;  %v9319_v11 = vmax.f32 %v9287_v50, 0.0  ;;  %v9213_v63 = vmax.f32 %v16007_v56, %v9062_v23  ;;  %v12126_v6 = vpop.f32.mrb[58].mxu1 }
 0x57e   : > { %v9216_v62 = vmax.f32 %v16012_v8, %v12126_v6  ;;  %v9065_v43 = vpop.f32.mrb[59].mxu1 }
 0x57f   : > { %9479 = vst.msk [vmem:[%s15826_s23 + $0x68] sm:$0xf] %vm9452_vm6, %v10343_v47  ;;  %v10344_v10 = vpack.c.bf16 %v9319_v11, %v9319_v11  ;;  %v9249_v35 = vmax.f32 %v9213_v63, %v9215_v9  ;;  %v9214_v27 = vmax.f32 %v8682_v31, %v9065_v43 }
 0x581   : > { %9480 = vst.msk [vmem:[%s15826_s23 + $0x6c] sm:$0xf] %vm9452_vm6, %v10344_v10  ;;  %v9288_v37 = vadd.f32 %v15812_v42, %v9249_v35  ;;  %v9250_v58 = vmax.f32 %v9214_v27, %v9216_v62 }
 0x583   : > { %v9320_v26 = vmax.f32 %v9288_v37, 0.0  ;;  %v9289_v41 = vadd.f32 %v15812_v42, %v9250_v58  ;;  %v12129_v25 = vpop.f32.mrb[60].mxu1 }
 0x584   : > { %v9219_v56 = vmax.f32 %v16020_v61, %v12129_v25  ;;  %v9078_v32 = vpop.f32.mrb[61].mxu1 }
 0x585   : > { %v10345_v17 = vpack.c.bf16 %v9320_v26, %v9320_v26  ;;  %v9321_v38 = vmax.f32 %v9289_v41, 0.0  ;;  %v9217_v8 = vmax.f32 %v8695_v29, %v9078_v32  ;;  %v12130_v44 = vpop.f32.mrb[62].mxu1 }
 0x586   : > { %v9220_v31 = vmax.f32 %v12064_v60, %v12130_v44  ;;  %v9081_v1 = vpop.f32.mrb[63].mxu1 }
 0x587   : > { %9481 = vst.msk [vmem:[%s15826_s23 + $0x70] sm:$0xf] %vm9452_vm6, %v10345_v17  ;;  %v10346_v7 = vpack.c.bf16 %v9321_v38, %v9321_v38  ;;  %v9251_v49 = vmax.f32 %v9217_v8, %v9219_v56  ;;  %v9218_v46 = vmax.f32 %v8698_v18, %v9081_v1 }
 0x589   : > { %9482 = vst.msk [vmem:[%s15826_s23 + $0x74] sm:$0xf] %vm9452_vm6, %v10346_v7  ;;  %v9290_v13 = vadd.f32 %v15812_v42, %v9251_v49  ;;  %v9252_v54 = vmax.f32 %v9218_v46, %v9220_v31 }
 0x58b   : > { %v9322_v12 = vmax.f32 %v9290_v13, 0.0  ;;  %v9291_v14 = vadd.f32 %v15812_v42, %v9252_v54 }
 0x58d   : > { %v10347_v15 = vpack.c.bf16 %v9322_v12, %v9322_v12  ;;  %v9323_v30 = vmax.f32 %v9291_v14, 0.0 }
 0x58f   : > { %9483 = vst.msk [vmem:[%s15826_s23 + $0x78] sm:$0xf] %vm9452_vm6, %v10347_v15  ;;  %v10348_v61 = vpack.c.bf16 %v9323_v30, %v9323_v30 }
 0x591   : > { %9484 = vst.msk [vmem:[%s15826_s23 + $0x7c] sm:$0xf] %vm9452_vm6, %v10348_v61 }
 0x592 PF: > { %s14_s15 = sadd.s32 1, %s13331_s15  }
 0x593   : > { %p11_p4 = scmp.ge.s32.totalorder %s14_s15, 4  }
 0x595   :  { %13 = sbr.rel (!%p11_p4) target bundleno = 1 (0x1), region = 77 }

</bundles_post_ra>
